<compile_context>
chip_gen: v5e
topology: v5e:2x2
jax: 0.10.0
libtpu: 0.0.40
codegen_flags: <defaults>
</compile_context>

<pallas_src>
import functools
import numpy as np
import jax
import jax.numpy as jnp
from jax.experimental import pallas as pl
from jax.experimental.pallas import tpu as pltpu


# TODO(synk): PyTorch nn.GELU default is the exact erf-based GELU; we use the
# tanh approximation for robust Mosaic lowering (difference is ~1e-3).
def _gelu_tanh(x):
    c = np.float32(np.sqrt(2.0 / np.pi))
    return 0.5 * x * (1.0 + jnp.tanh(c * (x + 0.044715 * x * x * x)))


def _layernorm(x, g, b, eps):
    mu = jnp.mean(x, axis=-1, keepdims=True)
    var = jnp.mean((x - mu) ** 2, axis=-1, keepdims=True)
    return (x - mu) * jax.lax.rsqrt(var + eps) * g + b


def block_kernel(x_ref, mask_ref, wqkv_ref, wproj_ref, bproj_ref,
                 g1_ref, b1_ref, wfc1_ref, bfc1_ref, wfc2_ref, bfc2_ref,
                 g2_ref, b2_ref, out_ref, o_slab,
                 *, num_heads, bt, seq, eps):
    bf16 = jnp.bfloat16
    x_bf = x_ref[...]                                   # (Bt*S, D) bf16 stream
    M, D = x_bf.shape
    hd = D // num_heads

    # ---------------- Attention ----------------
    # ONE fused lane-dense QKV matmul (Bt*S, D) @ (D, 3D), bf16 in / f32 acc.
    # The 1/sqrt(hd) softmax scale is pre-folded into the Q columns of wqkv.
    qkv = jnp.dot(x_bf, wqkv_ref[...],
                  preferred_element_type=jnp.float32)   # (M, 3D) f32
    qkv = qkv.astype(bf16)

    mask = mask_ref[...].astype(jnp.float32)[None]      # (1, S, S), 0 / -1e30

    # Per-head attention: only one head's (Bt, S, S) f32 logits are live at a
    # time; each head's output is written directly into the o_slab scratch (no
    # head stack / concat copies).  Per-head GEMMs are MXU-starved by design --
    # the D-contraction matmuls carry the MXU load.
    for h in range(num_heads):
        q = qkv[:, h * hd:(h + 1) * hd].reshape(bt, seq, hd)            # scaled
        k = qkv[:, D + h * hd:D + (h + 1) * hd].reshape(bt, seq, hd)
        v = qkv[:, 2 * D + h * hd:2 * D + (h + 1) * hd].reshape(bt, seq, hd)

        logits = jnp.einsum('bqd,bkd->bqk', q, k,
                            preferred_element_type=jnp.float32)          # (Bt,S,S)
        logits = logits + mask
        logits = logits - jnp.max(logits, axis=-1, keepdims=True)
        p = jnp.exp(logits)
        # Note: a fully masked row gives uniform weights here (exp(0)=1), never
        # a 0 denominator, because of the max-subtraction above.
        p = p * pl.reciprocal(jnp.sum(p, axis=-1, keepdims=True), approx=True)

        o = jnp.einsum('bqk,bkd->bqd', p.astype(bf16), v,
                       preferred_element_type=jnp.float32)               # (Bt,S,hd)
        o_slab[:, h * hd:(h + 1) * hd] = o.reshape(bt * seq, hd).astype(bf16)

    # ONE full-width output projection straight from the head slab.
    attn_out = jnp.dot(o_slab[...], wproj_ref[...],
                       preferred_element_type=jnp.float32) + bproj_ref[...]

    # ---------------- residual + LayerNorm1 (f32 elementwise) ----------------
    x_f32 = x_bf.astype(jnp.float32)
    ln1 = _layernorm(x_f32 + attn_out, g1_ref[...], b1_ref[...], eps)

    # ---------------- MLP (fc1 -> GELU -> fc2), bf16 matmuls ----------------
    h1 = jnp.dot(ln1.astype(bf16), wfc1_ref[...],
                 preferred_element_type=jnp.float32) + bfc1_ref[...]
    h1 = _gelu_tanh(h1)
    h2 = jnp.dot(h1.astype(bf16), wfc2_ref[...],
                 preferred_element_type=jnp.float32) + bfc2_ref[...]

    # ---------------- residual + LayerNorm2 ----------------
    out_ref[...] = _layernorm(ln1 + h2, g2_ref[...], b2_ref[...], eps
                              ).astype(out_ref.dtype)


def block_forward(x, params, mask, *, num_heads, eps=1e-6, batch_tile=None):
    B, S, D = x.shape
    hd = D // num_heads
    Hm = params["wfc1"].shape[1]
    bt = batch_tile or B
    assert B % bt == 0, "batch must be divisible by batch_tile"
    assert D % num_heads == 0
    scale = np.float32(float(hd) ** -0.5)

    # Parameter prep (pure layout plumbing, no compute inside the kernel):
    #  * fold the softmax scale into the Q columns of the fused QKV weight
    #  * keep weights lane-dense and cast matmul weights + mask to bf16
    col_scale = jnp.concatenate(
        [jnp.full((D,), scale, jnp.float32), jnp.ones((2 * D,), jnp.float32)])
    wqkv_b = (params["wqkv"] * col_scale[None, :]).astype(jnp.bfloat16)   # (D, 3D)
    wproj_b = params["wproj"].astype(jnp.bfloat16)                         # (D, D)
    wfc1_b = params["wfc1"].astype(jnp.bfloat16)                           # (D, Hm)
    wfc2_b = params["wfc2"].astype(jnp.bfloat16)                           # (Hm, D)
    mask_b = mask.astype(jnp.bfloat16)                                     # (S, S)

    # Stream activations as bf16, flattened to (B*S, D) so each grid step is a
    # lane-dense (Bt*S, D) slab (Bt complete batch rows per step).
    x2 = x.reshape(B * S, D).astype(jnp.bfloat16)

    kernel = functools.partial(block_kernel, num_heads=num_heads, bt=bt,
                               seq=S, eps=eps)

    def invariant(r, c):
        return pl.BlockSpec((r, c), lambda b: (0, 0))   # grid-invariant input

    # VMEM budget per generation: ~3/4 of physical VMEM, capped at 96 MiB
    # (v5e/v6e: 96 MiB of 128 MiB; v7x: 48 MiB of 64 MiB).
    try:
        cap = int(pltpu.get_tpu_info().vmem_capacity_bytes)
        vmem_limit = int(min(96 * 1024 * 1024, (cap * 3) // 4))
    except Exception:
        vmem_limit = 48 * 1024 * 1024

    grid_spec = pltpu.PrefetchScalarGridSpec(
        num_scalar_prefetch=0,
        grid=(B // bt,),
        in_specs=[
            pl.BlockSpec((bt * S, D), lambda b: (b, 0)),   # x slab (bf16)
            invariant(S, S),                               # attn mask (bf16)
            invariant(D, 3 * D),                           # fused qkv weight (bf16)
            invariant(D, D),                               # proj weight (bf16)
            invariant(1, D),                               # proj bias (f32)
            invariant(1, D), invariant(1, D),              # norm1 gamma/beta
            invariant(D, Hm), invariant(1, Hm),            # fc1 weight (bf16) / bias
            invariant(Hm, D), invariant(1, D),             # fc2 weight (bf16) / bias
            invariant(1, D), invariant(1, D),              # norm2 gamma/beta
        ],
        out_specs=pl.BlockSpec((bt * S, D), lambda b: (b, 0)),
        scratch_shapes=[pltpu.VMEM((bt * S, D), jnp.bfloat16)],   # head-output slab
    )
    out2 = pl.pallas_call(
        kernel,
        out_shape=jax.ShapeDtypeStruct((B * S, D), jnp.bfloat16),
        grid_spec=grid_spec,
        compiler_params=pltpu.CompilerParams(
            dimension_semantics=("parallel",),     # batch-tile axis -> megacore
            vmem_limit_bytes=vmem_limit),
    )(x2, mask_b, wqkv_b, wproj_b, params["bproj"],
      params["g1"], params["b1"],
      wfc1_b, params["bfc1"], wfc2_b, params["bfc2"],
      params["g2"], params["b2"])
    return out2.reshape(B, S, D)


# ---------------- pure-JAX reference (mirrors the PyTorch forward) ----------------
def block_reference(x, params, mask, *, num_heads, eps=1e-6):
    B, S, D = x.shape
    hd = D // num_heads
    scale = float(hd) ** -0.5

    def attention(x):
        qkv = x @ params["wqkv"]                                  # (B,S,3D)
        qkv = qkv.reshape(B, S, 3, num_heads, hd).transpose(2, 0, 3, 1, 4)
        q, k, v = qkv[0] * scale, qkv[1], qkv[2]                  # (B,nh,S,hd)
        attn = q @ jnp.swapaxes(k, -2, -1) + mask[None, None]
        attn = jax.nn.softmax(attn, axis=-1)
        o = (attn @ v).transpose(0, 2, 1, 3).reshape(B, S, D)
        return o @ params["wproj"] + params["bproj"]

    def mlp(x):
        h = _gelu_tanh(x @ params["wfc1"] + params["bfc1"])
        return h @ params["wfc2"] + params["bfc2"]

    x = _layernorm(x + attention(x), params["g1"], params["b1"], eps)
    x = _layernorm(x + mlp(x), params["g2"], params["b2"], eps)
    return x


def make_local_mask(hw, local_k):
    # identical to the PyTorch Attention.__init__ mask construction,
    # with -inf replaced by -1e30 (same softmax result).
    h, w = hw
    hk, wk = local_k
    mask = np.ones((h * w, h + hk - 1, w + wk - 1), np.float32)
    for i in range(h):
        for j in range(w):
            mask[w * i + j, i:i + hk, j:j + wk] = 0
    mask_p = mask[:, hk // 2:h + hk // 2, wk // 2:w + wk // 2].reshape(h * w, -1)
    return jnp.asarray(np.where(mask_p == 1, np.float32(-1e30), mask_p))


def make_params(key, dim, num_heads, hidden):
    ks = jax.random.split(key, 6)
    s = 0.05
    return {
        "wqkv": s * jax.random.normal(ks[0], (dim, 3 * dim), jnp.float32),
        "wproj": s * jax.random.normal(ks[1], (dim, dim), jnp.float32),
        "bproj": s * jax.random.normal(ks[2], (1, dim), jnp.float32),
        "g1": jnp.ones((1, dim), jnp.float32),
        "b1": jnp.zeros((1, dim), jnp.float32),
        "wfc1": s * jax.random.normal(ks[3], (dim, hidden), jnp.float32),
        "bfc1": s * jax.random.normal(ks[4], (1, hidden), jnp.float32),
        "wfc2": s * jax.random.normal(ks[5], (hidden, dim), jnp.float32),
        "bfc2": jnp.zeros((1, dim), jnp.float32),
        "g2": jnp.ones((1, dim), jnp.float32),
        "b2": jnp.zeros((1, dim), jnp.float32),
    }


if __name__ == "__main__":
    # Small but lane-dense SVTR-like shapes: D=128 (a real SVTR stage dim) keeps
    # the x/out last dim a multiple of 128; Bt=4 batch rows per grid step gives
    # M = Bt*S = 128 matmul rows (production should pick Bt so Bt*S >= 256).
    B = 8
    dim = 128
    num_heads = 4
    hw = (4, 8)            # S = 32 tokens
    local_k = (3, 5)
    mlp_ratio = 4.0
    hidden = int(dim * mlp_ratio)
    S = hw[0] * hw[1]

    key = jax.random.PRNGKey(0)
    kx, kp = jax.random.split(key)
    x = jax.random.normal(kx, (B, S, dim), jnp.float32)
    params = make_params(kp, dim, num_heads, hidden)
    mask = make_local_mask(hw, local_k)   # 'local' mixer; zeros(S,S) -> 'global'

    out = block_forward(x, params, mask, num_heads=num_heads, batch_tile=4)
    out = jax.block_until_ready(out)

    ref = block_reference(x, params, mask, num_heads=num_heads)
    np.testing.assert_allclose(np.asarray(out.astype(jnp.float32)),
                               np.asarray(ref), rtol=3e-2, atol=3e-2)
    print("KERNEL_OK")
</pallas_src>

<mosaic_0001>
module attributes {stable_mosaic.version = 11 : i64} {
  func.func @block_kernel(%arg0: i32, %arg1: memref<128x128xbf16, #tpu.memory_space<vmem>>, %arg2: memref<32x32xbf16, #tpu.memory_space<vmem>>, %arg3: memref<128x384xbf16, #tpu.memory_space<vmem>>, %arg4: memref<128x128xbf16, #tpu.memory_space<vmem>>, %arg5: memref<1x128xf32, #tpu.memory_space<vmem>>, %arg6: memref<1x128xf32, #tpu.memory_space<vmem>>, %arg7: memref<1x128xf32, #tpu.memory_space<vmem>>, %arg8: memref<128x512xbf16, #tpu.memory_space<vmem>>, %arg9: memref<1x512xf32, #tpu.memory_space<vmem>>, %arg10: memref<512x128xbf16, #tpu.memory_space<vmem>>, %arg11: memref<1x128xf32, #tpu.memory_space<vmem>>, %arg12: memref<1x128xf32, #tpu.memory_space<vmem>>, %arg13: memref<1x128xf32, #tpu.memory_space<vmem>>, %arg14: memref<128x128xbf16, #tpu.memory_space<vmem>>, %arg15: memref<128x128xbf16, #tpu.memory_space<vmem>>) attributes {dimension_semantics = [#tpu.dimension_semantics<parallel>], iteration_bounds = array<i64: 2>, scalar_prefetch = 0 : i64, scratch_operands = 1 : i64, tpu.core_type = #tpu.core_type<tc>, window_params = [{transform_indices = @transform_0, window_bounds = array<i64: 128, 128>}, {pipeline_mode = #tpu.pipeline_mode<synchronous>, transform_indices = @transform_1, window_bounds = array<i64: 32, 32>}, {pipeline_mode = #tpu.pipeline_mode<synchronous>, transform_indices = @transform_2, window_bounds = array<i64: 128, 384>}, {pipeline_mode = #tpu.pipeline_mode<synchronous>, transform_indices = @transform_3, window_bounds = array<i64: 128, 128>}, {pipeline_mode = #tpu.pipeline_mode<synchronous>, transform_indices = @transform_4, window_bounds = array<i64: 1, 128>}, {pipeline_mode = #tpu.pipeline_mode<synchronous>, transform_indices = @transform_5, window_bounds = array<i64: 1, 128>}, {pipeline_mode = #tpu.pipeline_mode<synchronous>, transform_indices = @transform_6, window_bounds = array<i64: 1, 128>}, {pipeline_mode = #tpu.pipeline_mode<synchronous>, transform_indices = @transform_7, window_bounds = array<i64: 128, 512>}, {pipeline_mode = #tpu.pipeline_mode<synchronous>, transform_indices = @transform_8, window_bounds = array<i64: 1, 512>}, {pipeline_mode = #tpu.pipeline_mode<synchronous>, transform_indices = @transform_9, window_bounds = array<i64: 512, 128>}, {pipeline_mode = #tpu.pipeline_mode<synchronous>, transform_indices = @transform_10, window_bounds = array<i64: 1, 128>}, {pipeline_mode = #tpu.pipeline_mode<synchronous>, transform_indices = @transform_11, window_bounds = array<i64: 1, 128>}, {pipeline_mode = #tpu.pipeline_mode<synchronous>, transform_indices = @transform_12, window_bounds = array<i64: 1, 128>}, {transform_indices = @transform_13, window_bounds = array<i64: 128, 128>}]} {
    %c0 = arith.constant 0 : index
    %c0_0 = arith.constant 0 : index
    %0 = vector.load %arg1[%c0, %c0_0] : memref<128x128xbf16, #tpu.memory_space<vmem>>, vector<128x128xbf16>
    %c0_1 = arith.constant 0 : index
    %c0_2 = arith.constant 0 : index
    %1 = vector.load %arg3[%c0_1, %c0_2] : memref<128x384xbf16, #tpu.memory_space<vmem>>, vector<128x384xbf16>
    %cst = arith.constant dense<0.000000e+00> : vector<128x384xf32>
    %2 = tpu.matmul %0, %1, %cst {dimension_numbers = #tpu.dot_dimension_numbers<[1], [0], [0], [1], [0, 0, 1, 1], [], []>} : vector<128x128xbf16>, vector<128x384xbf16>, vector<128x384xf32> -> vector<128x384xf32>
    %3 = arith.truncf %2 : vector<128x384xf32> to vector<128x384xbf16>
    %c0_3 = arith.constant 0 : index
    %c0_4 = arith.constant 0 : index
    %4 = vector.load %arg2[%c0_3, %c0_4] : memref<32x32xbf16, #tpu.memory_space<vmem>>, vector<32x32xbf16>
    %5 = arith.extf %4 : vector<32x32xbf16> to vector<32x32xf32>
    %6 = vector.shape_cast %5 : vector<32x32xf32> to vector<1x32x32xf32>
    %7 = vector.extract_strided_slice %3 {offsets = [0, 0], sizes = [128, 32], strides = [1, 1]} : vector<128x384xbf16> to vector<128x32xbf16>
    %8 = vector.shape_cast %7 : vector<128x32xbf16> to vector<4x32x32xbf16>
    %9 = vector.extract_strided_slice %3 {offsets = [0, 128], sizes = [128, 32], strides = [1, 1]} : vector<128x384xbf16> to vector<128x32xbf16>
    %10 = vector.shape_cast %9 : vector<128x32xbf16> to vector<4x32x32xbf16>
    %11 = vector.extract_strided_slice %3 {offsets = [0, 256], sizes = [128, 32], strides = [1, 1]} : vector<128x384xbf16> to vector<128x32xbf16>
    %12 = vector.shape_cast %11 : vector<128x32xbf16> to vector<4x32x32xbf16>
    "tpu.trace_start"() <{level = 10 : i32, message = "bqd,bkd->bqk"}> : () -> ()
    %cst_5 = arith.constant dense<0.000000e+00> : vector<4x32x32xf32>
    %13 = tpu.matmul %8, %10, %cst_5 {dimension_numbers = #tpu.dot_dimension_numbers<[2], [2], [1], [1], [0, 0, 0, 1, 1, 1], [0], [0]>} : vector<4x32x32xbf16>, vector<4x32x32xbf16>, vector<4x32x32xf32> -> vector<4x32x32xf32>
    "tpu.trace_stop"() : () -> ()
    %14 = vector.broadcast %6 : vector<1x32x32xf32> to vector<4x32x32xf32>
    %15 = arith.addf %13, %14 : vector<4x32x32xf32>
    %cst_6 = arith.constant dense<0xFF800000> : vector<4x32xf32>
    %16 = vector.multi_reduction <maximumf>, %15, %cst_6 [2] : vector<4x32x32xf32> to vector<4x32xf32>
    %17 = vector.shape_cast %16 : vector<4x32xf32> to vector<4x32x1xf32>
    %18 = vector.broadcast %17 : vector<4x32x1xf32> to vector<4x32x32xf32>
    %19 = arith.subf %15, %18 : vector<4x32x32xf32>
    %20 = math.exp %19 : vector<4x32x32xf32>
    %cst_7 = arith.constant dense<0.000000e+00> : vector<4x32xf32>
    %21 = vector.multi_reduction <add>, %20, %cst_7 [2] : vector<4x32x32xf32> to vector<4x32xf32>
    %22 = vector.shape_cast %21 : vector<4x32xf32> to vector<4x32x1xf32>
    %23 = tpu.reciprocal %22 {approx = true} : vector<4x32x1xf32> -> vector<4x32x1xf32>
    %24 = vector.broadcast %23 : vector<4x32x1xf32> to vector<4x32x32xf32>
    %25 = arith.mulf %20, %24 : vector<4x32x32xf32>
    %26 = arith.truncf %25 : vector<4x32x32xf32> to vector<4x32x32xbf16>
    "tpu.trace_start"() <{level = 10 : i32, message = "bqk,bkd->bqd"}> : () -> ()
    %cst_8 = arith.constant dense<0.000000e+00> : vector<4x32x32xf32>
    %27 = tpu.matmul %26, %12, %cst_8 {dimension_numbers = #tpu.dot_dimension_numbers<[2], [1], [1], [2], [0, 0, 0, 1, 1, 2], [0], [0]>} : vector<4x32x32xbf16>, vector<4x32x32xbf16>, vector<4x32x32xf32> -> vector<4x32x32xf32>
    "tpu.trace_stop"() : () -> ()
    %28 = vector.shape_cast %27 : vector<4x32x32xf32> to vector<128x32xf32>
    %29 = arith.truncf %28 : vector<128x32xf32> to vector<128x32xbf16>
    %c0_9 = arith.constant 0 : index
    %c0_10 = arith.constant 0 : index
    %30 = vector.load %arg15[%c0_9, %c0_10] : memref<128x128xbf16, #tpu.memory_space<vmem>>, vector<128x32xbf16>
    tpu.vector_store %arg15[%c0_9, %c0_10], %29 {strides = array<i32>} : memref<128x128xbf16, #tpu.memory_space<vmem>>, vector<128x32xbf16>,
    %31 = vector.extract_strided_slice %3 {offsets = [0, 32], sizes = [128, 32], strides = [1, 1]} : vector<128x384xbf16> to vector<128x32xbf16>
    %32 = vector.shape_cast %31 : vector<128x32xbf16> to vector<4x32x32xbf16>
    %33 = vector.extract_strided_slice %3 {offsets = [0, 160], sizes = [128, 32], strides = [1, 1]} : vector<128x384xbf16> to vector<128x32xbf16>
    %34 = vector.shape_cast %33 : vector<128x32xbf16> to vector<4x32x32xbf16>
    %35 = vector.extract_strided_slice %3 {offsets = [0, 288], sizes = [128, 32], strides = [1, 1]} : vector<128x384xbf16> to vector<128x32xbf16>
    %36 = vector.shape_cast %35 : vector<128x32xbf16> to vector<4x32x32xbf16>
    "tpu.trace_start"() <{level = 10 : i32, message = "bqd,bkd->bqk"}> : () -> ()
    %cst_11 = arith.constant dense<0.000000e+00> : vector<4x32x32xf32>
    %37 = tpu.matmul %32, %34, %cst_11 {dimension_numbers = #tpu.dot_dimension_numbers<[2], [2], [1], [1], [0, 0, 0, 1, 1, 1], [0], [0]>} : vector<4x32x32xbf16>, vector<4x32x32xbf16>, vector<4x32x32xf32> -> vector<4x32x32xf32>
    "tpu.trace_stop"() : () -> ()
    %38 = vector.broadcast %6 : vector<1x32x32xf32> to vector<4x32x32xf32>
    %39 = arith.addf %37, %38 : vector<4x32x32xf32>
    %cst_12 = arith.constant dense<0xFF800000> : vector<4x32xf32>
    %40 = vector.multi_reduction <maximumf>, %39, %cst_12 [2] : vector<4x32x32xf32> to vector<4x32xf32>
    %41 = vector.shape_cast %40 : vector<4x32xf32> to vector<4x32x1xf32>
    %42 = vector.broadcast %41 : vector<4x32x1xf32> to vector<4x32x32xf32>
    %43 = arith.subf %39, %42 : vector<4x32x32xf32>
    %44 = math.exp %43 : vector<4x32x32xf32>
    %cst_13 = arith.constant dense<0.000000e+00> : vector<4x32xf32>
    %45 = vector.multi_reduction <add>, %44, %cst_13 [2] : vector<4x32x32xf32> to vector<4x32xf32>
    %46 = vector.shape_cast %45 : vector<4x32xf32> to vector<4x32x1xf32>
    %47 = tpu.reciprocal %46 {approx = true} : vector<4x32x1xf32> -> vector<4x32x1xf32>
    %48 = vector.broadcast %47 : vector<4x32x1xf32> to vector<4x32x32xf32>
    %49 = arith.mulf %44, %48 : vector<4x32x32xf32>
    %50 = arith.truncf %49 : vector<4x32x32xf32> to vector<4x32x32xbf16>
    "tpu.trace_start"() <{level = 10 : i32, message = "bqk,bkd->bqd"}> : () -> ()
    %cst_14 = arith.constant dense<0.000000e+00> : vector<4x32x32xf32>
    %51 = tpu.matmul %50, %36, %cst_14 {dimension_numbers = #tpu.dot_dimension_numbers<[2], [1], [1], [2], [0, 0, 0, 1, 1, 2], [0], [0]>} : vector<4x32x32xbf16>, vector<4x32x32xbf16>, vector<4x32x32xf32> -> vector<4x32x32xf32>
    "tpu.trace_stop"() : () -> ()
    %52 = vector.shape_cast %51 : vector<4x32x32xf32> to vector<128x32xf32>
    %53 = arith.truncf %52 : vector<128x32xf32> to vector<128x32xbf16>
    %c0_15 = arith.constant 0 : index
    %c32 = arith.constant 32 : index
    %54 = vector.load %arg15[%c0_15, %c32] : memref<128x128xbf16, #tpu.memory_space<vmem>>, vector<128x32xbf16>
    tpu.vector_store %arg15[%c0_15, %c32], %53 {strides = array<i32>} : memref<128x128xbf16, #tpu.memory_space<vmem>>, vector<128x32xbf16>,
    %55 = vector.extract_strided_slice %3 {offsets = [0, 64], sizes = [128, 32], strides = [1, 1]} : vector<128x384xbf16> to vector<128x32xbf16>
    %56 = vector.shape_cast %55 : vector<128x32xbf16> to vector<4x32x32xbf16>
    %57 = vector.extract_strided_slice %3 {offsets = [0, 192], sizes = [128, 32], strides = [1, 1]} : vector<128x384xbf16> to vector<128x32xbf16>
    %58 = vector.shape_cast %57 : vector<128x32xbf16> to vector<4x32x32xbf16>
    %59 = vector.extract_strided_slice %3 {offsets = [0, 320], sizes = [128, 32], strides = [1, 1]} : vector<128x384xbf16> to vector<128x32xbf16>
    %60 = vector.shape_cast %59 : vector<128x32xbf16> to vector<4x32x32xbf16>
    "tpu.trace_start"() <{level = 10 : i32, message = "bqd,bkd->bqk"}> : () -> ()
    %cst_16 = arith.constant dense<0.000000e+00> : vector<4x32x32xf32>
    %61 = tpu.matmul %56, %58, %cst_16 {dimension_numbers = #tpu.dot_dimension_numbers<[2], [2], [1], [1], [0, 0, 0, 1, 1, 1], [0], [0]>} : vector<4x32x32xbf16>, vector<4x32x32xbf16>, vector<4x32x32xf32> -> vector<4x32x32xf32>
    "tpu.trace_stop"() : () -> ()
    %62 = vector.broadcast %6 : vector<1x32x32xf32> to vector<4x32x32xf32>
    %63 = arith.addf %61, %62 : vector<4x32x32xf32>
    %cst_17 = arith.constant dense<0xFF800000> : vector<4x32xf32>
    %64 = vector.multi_reduction <maximumf>, %63, %cst_17 [2] : vector<4x32x32xf32> to vector<4x32xf32>
    %65 = vector.shape_cast %64 : vector<4x32xf32> to vector<4x32x1xf32>
    %66 = vector.broadcast %65 : vector<4x32x1xf32> to vector<4x32x32xf32>
    %67 = arith.subf %63, %66 : vector<4x32x32xf32>
    %68 = math.exp %67 : vector<4x32x32xf32>
    %cst_18 = arith.constant dense<0.000000e+00> : vector<4x32xf32>
    %69 = vector.multi_reduction <add>, %68, %cst_18 [2] : vector<4x32x32xf32> to vector<4x32xf32>
    %70 = vector.shape_cast %69 : vector<4x32xf32> to vector<4x32x1xf32>
    %71 = tpu.reciprocal %70 {approx = true} : vector<4x32x1xf32> -> vector<4x32x1xf32>
    %72 = vector.broadcast %71 : vector<4x32x1xf32> to vector<4x32x32xf32>
    %73 = arith.mulf %68, %72 : vector<4x32x32xf32>
    %74 = arith.truncf %73 : vector<4x32x32xf32> to vector<4x32x32xbf16>
    "tpu.trace_start"() <{level = 10 : i32, message = "bqk,bkd->bqd"}> : () -> ()
    %cst_19 = arith.constant dense<0.000000e+00> : vector<4x32x32xf32>
    %75 = tpu.matmul %74, %60, %cst_19 {dimension_numbers = #tpu.dot_dimension_numbers<[2], [1], [1], [2], [0, 0, 0, 1, 1, 2], [0], [0]>} : vector<4x32x32xbf16>, vector<4x32x32xbf16>, vector<4x32x32xf32> -> vector<4x32x32xf32>
    "tpu.trace_stop"() : () -> ()
    %76 = vector.shape_cast %75 : vector<4x32x32xf32> to vector<128x32xf32>
    %77 = arith.truncf %76 : vector<128x32xf32> to vector<128x32xbf16>
    %c0_20 = arith.constant 0 : index
    %c64 = arith.constant 64 : index
    %78 = vector.load %arg15[%c0_20, %c64] : memref<128x128xbf16, #tpu.memory_space<vmem>>, vector<128x32xbf16>
    tpu.vector_store %arg15[%c0_20, %c64], %77 {strides = array<i32>} : memref<128x128xbf16, #tpu.memory_space<vmem>>, vector<128x32xbf16>,
    %79 = vector.extract_strided_slice %3 {offsets = [0, 96], sizes = [128, 32], strides = [1, 1]} : vector<128x384xbf16> to vector<128x32xbf16>
    %80 = vector.shape_cast %79 : vector<128x32xbf16> to vector<4x32x32xbf16>
    %81 = vector.extract_strided_slice %3 {offsets = [0, 224], sizes = [128, 32], strides = [1, 1]} : vector<128x384xbf16> to vector<128x32xbf16>
    %82 = vector.shape_cast %81 : vector<128x32xbf16> to vector<4x32x32xbf16>
    %83 = vector.extract_strided_slice %3 {offsets = [0, 352], sizes = [128, 32], strides = [1, 1]} : vector<128x384xbf16> to vector<128x32xbf16>
    %84 = vector.shape_cast %83 : vector<128x32xbf16> to vector<4x32x32xbf16>
    "tpu.trace_start"() <{level = 10 : i32, message = "bqd,bkd->bqk"}> : () -> ()
    %cst_21 = arith.constant dense<0.000000e+00> : vector<4x32x32xf32>
    %85 = tpu.matmul %80, %82, %cst_21 {dimension_numbers = #tpu.dot_dimension_numbers<[2], [2], [1], [1], [0, 0, 0, 1, 1, 1], [0], [0]>} : vector<4x32x32xbf16>, vector<4x32x32xbf16>, vector<4x32x32xf32> -> vector<4x32x32xf32>
    "tpu.trace_stop"() : () -> ()
    %86 = vector.broadcast %6 : vector<1x32x32xf32> to vector<4x32x32xf32>
    %87 = arith.addf %85, %86 : vector<4x32x32xf32>
    %cst_22 = arith.constant dense<0xFF800000> : vector<4x32xf32>
    %88 = vector.multi_reduction <maximumf>, %87, %cst_22 [2] : vector<4x32x32xf32> to vector<4x32xf32>
    %89 = vector.shape_cast %88 : vector<4x32xf32> to vector<4x32x1xf32>
    %90 = vector.broadcast %89 : vector<4x32x1xf32> to vector<4x32x32xf32>
    %91 = arith.subf %87, %90 : vector<4x32x32xf32>
    %92 = math.exp %91 : vector<4x32x32xf32>
    %cst_23 = arith.constant dense<0.000000e+00> : vector<4x32xf32>
    %93 = vector.multi_reduction <add>, %92, %cst_23 [2] : vector<4x32x32xf32> to vector<4x32xf32>
    %94 = vector.shape_cast %93 : vector<4x32xf32> to vector<4x32x1xf32>
    %95 = tpu.reciprocal %94 {approx = true} : vector<4x32x1xf32> -> vector<4x32x1xf32>
    %96 = vector.broadcast %95 : vector<4x32x1xf32> to vector<4x32x32xf32>
    %97 = arith.mulf %92, %96 : vector<4x32x32xf32>
    %98 = arith.truncf %97 : vector<4x32x32xf32> to vector<4x32x32xbf16>
    "tpu.trace_start"() <{level = 10 : i32, message = "bqk,bkd->bqd"}> : () -> ()
    %cst_24 = arith.constant dense<0.000000e+00> : vector<4x32x32xf32>
    %99 = tpu.matmul %98, %84, %cst_24 {dimension_numbers = #tpu.dot_dimension_numbers<[2], [1], [1], [2], [0, 0, 0, 1, 1, 2], [0], [0]>} : vector<4x32x32xbf16>, vector<4x32x32xbf16>, vector<4x32x32xf32> -> vector<4x32x32xf32>
    "tpu.trace_stop"() : () -> ()
    %100 = vector.shape_cast %99 : vector<4x32x32xf32> to vector<128x32xf32>
    %101 = arith.truncf %100 : vector<128x32xf32> to vector<128x32xbf16>
    %c0_25 = arith.constant 0 : index
    %c96 = arith.constant 96 : index
    %102 = vector.load %arg15[%c0_25, %c96] : memref<128x128xbf16, #tpu.memory_space<vmem>>, vector<128x32xbf16>
    tpu.vector_store %arg15[%c0_25, %c96], %101 {strides = array<i32>} : memref<128x128xbf16, #tpu.memory_space<vmem>>, vector<128x32xbf16>,
    %c0_26 = arith.constant 0 : index
    %c0_27 = arith.constant 0 : index
    %103 = vector.load %arg15[%c0_26, %c0_27] : memref<128x128xbf16, #tpu.memory_space<vmem>>, vector<128x128xbf16>
    %c0_28 = arith.constant 0 : index
    %c0_29 = arith.constant 0 : index
    %104 = vector.load %arg4[%c0_28, %c0_29] : memref<128x128xbf16, #tpu.memory_space<vmem>>, vector<128x128xbf16>
    %cst_30 = arith.constant dense<0.000000e+00> : vector<128x128xf32>
    %105 = tpu.matmul %103, %104, %cst_30 {dimension_numbers = #tpu.dot_dimension_numbers<[1], [0], [0], [1], [0, 0, 1, 1], [], []>} : vector<128x128xbf16>, vector<128x128xbf16>, vector<128x128xf32> -> vector<128x128xf32>
    %c0_31 = arith.constant 0 : index
    %c0_32 = arith.constant 0 : index
    %106 = vector.load %arg5[%c0_31, %c0_32] : memref<1x128xf32, #tpu.memory_space<vmem>>, vector<1x128xf32>
    %107 = vector.broadcast %106 : vector<1x128xf32> to vector<128x128xf32>
    %108 = arith.addf %105, %107 : vector<128x128xf32>
    %109 = arith.extf %0 : vector<128x128xbf16> to vector<128x128xf32>
    %110 = arith.addf %109, %108 : vector<128x128xf32>
    %c0_33 = arith.constant 0 : index
    %c0_34 = arith.constant 0 : index
    %111 = vector.load %arg6[%c0_33, %c0_34] : memref<1x128xf32, #tpu.memory_space<vmem>>, vector<1x128xf32>
    %c0_35 = arith.constant 0 : index
    %c0_36 = arith.constant 0 : index
    %112 = vector.load %arg7[%c0_35, %c0_36] : memref<1x128xf32, #tpu.memory_space<vmem>>, vector<1x128xf32>
    %cst_37 = arith.constant dense<0.000000e+00> : vector<128xf32>
    %113 = vector.multi_reduction <add>, %110, %cst_37 [1] : vector<128x128xf32> to vector<128xf32>
    %114 = vector.shape_cast %113 : vector<128xf32> to vector<128x1xf32>
    %cst_38 = arith.constant 1.280000e+02 : f32
    %115 = vector.broadcast %cst_38 : f32 to vector<128x1xf32>
    %116 = arith.divf %114, %115 : vector<128x1xf32>
    %117 = vector.broadcast %116 : vector<128x1xf32> to vector<128x128xf32>
    %118 = arith.subf %110, %117 : vector<128x128xf32>
    %119 = arith.mulf %118, %118 : vector<128x128xf32>
    %cst_39 = arith.constant dense<0.000000e+00> : vector<128xf32>
    %120 = vector.multi_reduction <add>, %119, %cst_39 [1] : vector<128x128xf32> to vector<128xf32>
    %121 = vector.shape_cast %120 : vector<128xf32> to vector<128x1xf32>
    %cst_40 = arith.constant 1.280000e+02 : f32
    %122 = vector.broadcast %cst_40 : f32 to vector<128x1xf32>
    %123 = arith.divf %121, %122 : vector<128x1xf32>
    %124 = vector.broadcast %116 : vector<128x1xf32> to vector<128x128xf32>
    %125 = arith.subf %110, %124 : vector<128x128xf32>
    %cst_41 = arith.constant 9.99999997E-7 : f32
    %126 = vector.broadcast %cst_41 : f32 to vector<128x1xf32>
    %127 = arith.addf %123, %126 : vector<128x1xf32>
    %128 = math.rsqrt %127 : vector<128x1xf32>
    %129 = vector.broadcast %128 : vector<128x1xf32> to vector<128x128xf32>
    %130 = arith.mulf %125, %129 : vector<128x128xf32>
    %131 = vector.broadcast %111 : vector<1x128xf32> to vector<128x128xf32>
    %132 = arith.mulf %130, %131 : vector<128x128xf32>
    %133 = vector.broadcast %112 : vector<1x128xf32> to vector<128x128xf32>
    %134 = arith.addf %132, %133 : vector<128x128xf32>
    %135 = arith.truncf %134 : vector<128x128xf32> to vector<128x128xbf16>
    %c0_42 = arith.constant 0 : index
    %c0_43 = arith.constant 0 : index
    %136 = vector.load %arg8[%c0_42, %c0_43] : memref<128x512xbf16, #tpu.memory_space<vmem>>, vector<128x512xbf16>
    %cst_44 = arith.constant dense<0.000000e+00> : vector<128x512xf32>
    %137 = tpu.matmul %135, %136, %cst_44 {dimension_numbers = #tpu.dot_dimension_numbers<[1], [0], [0], [1], [0, 0, 1, 1], [], []>} : vector<128x128xbf16>, vector<128x512xbf16>, vector<128x512xf32> -> vector<128x512xf32>
    %c0_45 = arith.constant 0 : index
    %c0_46 = arith.constant 0 : index
    %138 = vector.load %arg9[%c0_45, %c0_46] : memref<1x512xf32, #tpu.memory_space<vmem>>, vector<1x512xf32>
    %139 = vector.broadcast %138 : vector<1x512xf32> to vector<128x512xf32>
    %140 = arith.addf %137, %139 : vector<128x512xf32>
    %cst_47 = arith.constant 5.000000e-01 : f32
    %141 = vector.broadcast %cst_47 : f32 to vector<128x512xf32>
    %142 = arith.mulf %141, %140 : vector<128x512xf32>
    %cst_48 = arith.constant 4.471500e-02 : f32
    %143 = vector.broadcast %cst_48 : f32 to vector<128x512xf32>
    %144 = arith.mulf %143, %140 : vector<128x512xf32>
    %145 = arith.mulf %144, %140 : vector<128x512xf32>
    %146 = arith.mulf %145, %140 : vector<128x512xf32>
    %147 = arith.addf %140, %146 : vector<128x512xf32>
    %cst_49 = arith.constant 0.797884583 : f32
    %148 = vector.broadcast %cst_49 : f32 to vector<128x512xf32>
    %149 = arith.mulf %148, %147 : vector<128x512xf32>
    %150 = math.tanh %149 : vector<128x512xf32>
    %cst_50 = arith.constant 1.000000e+00 : f32
    %151 = vector.broadcast %cst_50 : f32 to vector<128x512xf32>
    %152 = arith.addf %151, %150 : vector<128x512xf32>
    %153 = arith.mulf %142, %152 : vector<128x512xf32>
    %154 = arith.truncf %153 : vector<128x512xf32> to vector<128x512xbf16>
    %c0_51 = arith.constant 0 : index
    %c0_52 = arith.constant 0 : index
    %155 = vector.load %arg10[%c0_51, %c0_52] : memref<512x128xbf16, #tpu.memory_space<vmem>>, vector<512x128xbf16>
    %cst_53 = arith.constant dense<0.000000e+00> : vector<128x128xf32>
    %156 = tpu.matmul %154, %155, %cst_53 {dimension_numbers = #tpu.dot_dimension_numbers<[1], [0], [0], [1], [0, 0, 1, 1], [], []>} : vector<128x512xbf16>, vector<512x128xbf16>, vector<128x128xf32> -> vector<128x128xf32>
    %c0_54 = arith.constant 0 : index
    %c0_55 = arith.constant 0 : index
    %157 = vector.load %arg11[%c0_54, %c0_55] : memref<1x128xf32, #tpu.memory_space<vmem>>, vector<1x128xf32>
    %158 = vector.broadcast %157 : vector<1x128xf32> to vector<128x128xf32>
    %159 = arith.addf %156, %158 : vector<128x128xf32>
    %160 = arith.addf %134, %159 : vector<128x128xf32>
    %c0_56 = arith.constant 0 : index
    %c0_57 = arith.constant 0 : index
    %161 = vector.load %arg12[%c0_56, %c0_57] : memref<1x128xf32, #tpu.memory_space<vmem>>, vector<1x128xf32>
    %c0_58 = arith.constant 0 : index
    %c0_59 = arith.constant 0 : index
    %162 = vector.load %arg13[%c0_58, %c0_59] : memref<1x128xf32, #tpu.memory_space<vmem>>, vector<1x128xf32>
    %cst_60 = arith.constant dense<0.000000e+00> : vector<128xf32>
    %163 = vector.multi_reduction <add>, %160, %cst_60 [1] : vector<128x128xf32> to vector<128xf32>
    %164 = vector.shape_cast %163 : vector<128xf32> to vector<128x1xf32>
    %cst_61 = arith.constant 1.280000e+02 : f32
    %165 = vector.broadcast %cst_61 : f32 to vector<128x1xf32>
    %166 = arith.divf %164, %165 : vector<128x1xf32>
    %167 = vector.broadcast %166 : vector<128x1xf32> to vector<128x128xf32>
    %168 = arith.subf %160, %167 : vector<128x128xf32>
    %169 = arith.mulf %168, %168 : vector<128x128xf32>
    %cst_62 = arith.constant dense<0.000000e+00> : vector<128xf32>
    %170 = vector.multi_reduction <add>, %169, %cst_62 [1] : vector<128x128xf32> to vector<128xf32>
    %171 = vector.shape_cast %170 : vector<128xf32> to vector<128x1xf32>
    %cst_63 = arith.constant 1.280000e+02 : f32
    %172 = vector.broadcast %cst_63 : f32 to vector<128x1xf32>
    %173 = arith.divf %171, %172 : vector<128x1xf32>
    %174 = vector.broadcast %166 : vector<128x1xf32> to vector<128x128xf32>
    %175 = arith.subf %160, %174 : vector<128x128xf32>
    %cst_64 = arith.constant 9.99999997E-7 : f32
    %176 = vector.broadcast %cst_64 : f32 to vector<128x1xf32>
    %177 = arith.addf %173, %176 : vector<128x1xf32>
    %178 = math.rsqrt %177 : vector<128x1xf32>
    %179 = vector.broadcast %178 : vector<128x1xf32> to vector<128x128xf32>
    %180 = arith.mulf %175, %179 : vector<128x128xf32>
    %181 = vector.broadcast %161 : vector<1x128xf32> to vector<128x128xf32>
    %182 = arith.mulf %180, %181 : vector<128x128xf32>
    %183 = vector.broadcast %162 : vector<1x128xf32> to vector<128x128xf32>
    %184 = arith.addf %182, %183 : vector<128x128xf32>
    %185 = arith.truncf %184 : vector<128x128xf32> to vector<128x128xbf16>
    %c0_65 = arith.constant 0 : index
    %c0_66 = arith.constant 0 : index
    %186 = vector.load %arg14[%c0_65, %c0_66] : memref<128x128xbf16, #tpu.memory_space<vmem>>, vector<128x128xbf16>
    tpu.vector_store %arg14[%c0_65, %c0_66], %185 {strides = array<i32>} : memref<128x128xbf16, #tpu.memory_space<vmem>>, vector<128x128xbf16>,
    return
  }
  func.func @transform_0(%arg0: i32) -> (i32, i32) {
    %c0_i32 = arith.constant 0 : i32
    %c0_i32_0 = arith.constant 0 : i32
    return %arg0, %c0_i32 : i32, i32
  }
  func.func @transform_1(%arg0: i32) -> (i32, i32) {
    %c0_i32 = arith.constant 0 : i32
    %c0_i32_0 = arith.constant 0 : i32
    %c0_i32_1 = arith.constant 0 : i32
    return %c0_i32, %c0_i32_0 : i32, i32
  }
  func.func @transform_2(%arg0: i32) -> (i32, i32) {
    %c0_i32 = arith.constant 0 : i32
    %c0_i32_0 = arith.constant 0 : i32
    %c0_i32_1 = arith.constant 0 : i32
    return %c0_i32, %c0_i32_0 : i32, i32
  }
  func.func @transform_3(%arg0: i32) -> (i32, i32) {
    %c0_i32 = arith.constant 0 : i32
    %c0_i32_0 = arith.constant 0 : i32
    %c0_i32_1 = arith.constant 0 : i32
    return %c0_i32, %c0_i32_0 : i32, i32
  }
  func.func @transform_4(%arg0: i32) -> (i32, i32) {
    %c0_i32 = arith.constant 0 : i32
    %c0_i32_0 = arith.constant 0 : i32
    %c0_i32_1 = arith.constant 0 : i32
    return %c0_i32, %c0_i32_0 : i32, i32
  }
  func.func @transform_5(%arg0: i32) -> (i32, i32) {
    %c0_i32 = arith.constant 0 : i32
    %c0_i32_0 = arith.constant 0 : i32
    %c0_i32_1 = arith.constant 0 : i32
    return %c0_i32, %c0_i32_0 : i32, i32
  }
  func.func @transform_6(%arg0: i32) -> (i32, i32) {
    %c0_i32 = arith.constant 0 : i32
    %c0_i32_0 = arith.constant 0 : i32
    %c0_i32_1 = arith.constant 0 : i32
    return %c0_i32, %c0_i32_0 : i32, i32
  }
  func.func @transform_7(%arg0: i32) -> (i32, i32) {
    %c0_i32 = arith.constant 0 : i32
    %c0_i32_0 = arith.constant 0 : i32
    %c0_i32_1 = arith.constant 0 : i32
    return %c0_i32, %c0_i32_0 : i32, i32
  }
  func.func @transform_8(%arg0: i32) -> (i32, i32) {
    %c0_i32 = arith.constant 0 : i32
    %c0_i32_0 = arith.constant 0 : i32
    %c0_i32_1 = arith.constant 0 : i32
    return %c0_i32, %c0_i32_0 : i32, i32
  }
  func.func @transform_9(%arg0: i32) -> (i32, i32) {
    %c0_i32 = arith.constant 0 : i32
    %c0_i32_0 = arith.constant 0 : i32
    %c0_i32_1 = arith.constant 0 : i32
    return %c0_i32, %c0_i32_0 : i32, i32
  }
  func.func @transform_10(%arg0: i32) -> (i32, i32) {
    %c0_i32 = arith.constant 0 : i32
    %c0_i32_0 = arith.constant 0 : i32
    %c0_i32_1 = arith.constant 0 : i32
    return %c0_i32, %c0_i32_0 : i32, i32
  }
  func.func @transform_11(%arg0: i32) -> (i32, i32) {
    %c0_i32 = arith.constant 0 : i32
    %c0_i32_0 = arith.constant 0 : i32
    %c0_i32_1 = arith.constant 0 : i32
    return %c0_i32, %c0_i32_0 : i32, i32
  }
  func.func @transform_12(%arg0: i32) -> (i32, i32) {
    %c0_i32 = arith.constant 0 : i32
    %c0_i32_0 = arith.constant 0 : i32
    %c0_i32_1 = arith.constant 0 : i32
    return %c0_i32, %c0_i32_0 : i32, i32
  }
  func.func @transform_13(%arg0: i32) -> (i32, i32) {
    %c0_i32 = arith.constant 0 : i32
    %c0_i32_0 = arith.constant 0 : i32
    return %arg0, %c0_i32 : i32, i32
  }
}

</mosaic_0001>

<bundles_post_ra>
// kernel: tpu_custom_call.1
= control target key start
LH: loop header
LB: loop body
LE: loop exit
PB: predicated region body
PF: predicated region fallthrough
CT: control target
= control target key end

     0   :  { %s10751_s0 = inlined_call_operand.hbm [shape: bf16[256,128], index: 0, kind: input, shape index: {}]   ;;  %s10752_s1 = inlined_call_operand.hbm [shape: bf16[32,32], index: 1, kind: input, shape index: {}]   ;;  %s10753_s2 = inlined_call_operand.hbm [shape: bf16[128,384], index: 2, kind: input, shape index: {}]   ;;  %s10754_s3 = inlined_call_operand.hbm [shape: bf16[128,128], index: 3, kind: input, shape index: {}]   ;;  %s10755_s4 = inlined_call_operand.vmem [shape: f32[1,128], index: 4, kind: input, shape index: {}]   ;;  %s10756_s5 = inlined_call_operand.vmem [shape: f32[1,128], index: 5, kind: input, shape index: {}]   ;;  %s10757_s6 = inlined_call_operand.vmem [shape: f32[1,128], index: 6, kind: input, shape index: {}]   ;;  %s10758_s7 = inlined_call_operand.hbm [shape: bf16[128,512], index: 7, kind: input, shape index: {}]   ;;  %s10759_s8 = inlined_call_operand.vmem [shape: f32[1,512], index: 8, kind: input, shape index: {}]   ;;  %s10760_s9 = inlined_call_operand.hbm [shape: bf16[512,128], index: 9, kind: input, shape index: {}]   ;;  %s10761_s10 = inlined_call_operand.vmem [shape: f32[1,128], index: 10, kind: input, shape index: {}]   ;;  %s10762_s11 = inlined_call_operand.vmem [shape: f32[1,128], index: 11, kind: input, shape index: {}]   ;;  %s10763_s12 = inlined_call_operand.vmem [shape: f32[1,128], index: 12, kind: input, shape index: {}]   ;;  %s10764_s13 = inlined_call_operand.hbm [shape: bf16[256,128], index: 13, kind: output, shape index: {}]  }
   0x1   :  { %10796 = sst [smem:[#allocation33_spill]] %s10752_s1 }
   0x2   :  { %10797 = sst [smem:[#allocation34_spill]] %s10753_s2 }
   0x3   :  { %10798 = sst [smem:[#allocation35_spill]] %s10754_s3 }
   0x4   :  { %10799 = sst [smem:[#allocation36_spill]] %s10758_s7 }
   0x5   :  { %10800 = sst [smem:[#allocation37_spill]] %s10760_s9 }
   0x6   :  { %10801 = sst [smem:[#allocation38_spill]] %s10764_s13 }
   0x7   :  { %18 = vsyncpa [#allocation4], 0 }
   0x8   :  { %20 = vsyncpa [#allocation4 + $0x1], 0 }
   0x9   :  { %21 = vsyncpa [#allocation7], 0 }
   0xa   :  { %22 = vsyncpa [#allocation10], 0 }
   0xb   :  { %23 = vsyncpa [#allocation13], 0 }
   0xc   :  { %24 = vsyncpa [#allocation5], 0 }
   0xd   :  { %26 = vsyncpa [#allocation5 + $0x1], 0  ;;  %s7784_s25 = smov 0   ;;  %s7786_s26 = smov 0  }
   0xe   :  { %s7788_s27 = smov 0   ;;  %s7790_s28 = smov 0  }
   0xf LB: > { %s10802_s1 = sld [smem:[#allocation33_spill]]  ;;  %s7808_s15 = sadd.s32 4294967295, %s7696_s28   ;;  %s7696_s28 = sphi %s7790_s28, %s10891_s28   ;;  %s7692_s27 = sphi %s7788_s27, %s10890_s27   ;;  %s7688_s26 = sphi %s7786_s26, %s10889_s26   ;;  %s7684_s25 = sphi %s7784_s25, %s10888_s25  }
  0x10   : > { %p6167_p0 = scmp.ge.s32.totalorder %s7696_s28, 1  ;;  %p53_p1 = scmp.eq.s32.totalorder %s7808_s15, 0 }
  0x11   : > { %p341_p2 = scmp.lt.s32.totalorder %s7696_s28, 3  ;;  %s7698_s17 = smov [#allocation6]  }
  0x12   : > { %s354_s18 = sshll.u32 %s7698_s17, 4  ;;  %s10804_s3 = sld [smem:[#allocation35_spill]]  ;;  %s355_s18 = int_to_ptr.vmem [resolvable:$true] %s354_s18 }
  0x13   : > { %p7813_p3 = pnand %p6167_p0, %p341_p2  ;;  %s10806_s2 = sld [smem:[#allocation34_spill]] }
  0x14   : > { %s7699_s30 = smov [#allocation9]   ;;  %s10767_s13 = smov 4  }
  0x15   : > { %s352_s14 = sshll.u32 %s10802_s1, 4  ;;  %p6896_p4 = pneg %p7813_p3  ;;  %s353_s14 = int_to_ptr.hbm [resolvable:$true] %s352_s14 }
  0x16   : > { %s382_s17 = sshll.u32 %s7699_s30, 4  ;;  %s10766_s1 = smov 64   ;;  %s383_s17 = int_to_ptr.vmem [resolvable:$true] %s382_s17 }
  0x17   : > { %p7825_p6 = pnand %p6896_p4, %p53_p1  ;;  %s7702_s19 = smov [#allocation8]  }
  0x18   : > { %s380_s21 = sshll.u32 %s10804_s3, 4  ;;  %s368_s20 = sshll.u32 %s7702_s19, 4  ;;  %s381_s21 = int_to_ptr.hbm [resolvable:$true] %s380_s21  ;;  %s369_s20 = int_to_ptr.vmem [resolvable:$true] %s368_s20 }
  0x19   : > { %s366_s29 = sshll.u32 %s10806_s2, 4  ;;  %s10807_s7 = sld [smem:[#allocation36_spill]]  ;;  %s367_s29 = int_to_ptr.hbm [resolvable:$true] %s366_s29 }
  0x1a   : > { %6899 = dma.hbm_to_vmem [thread:$0]  (!%p7825_p6), %s353_s14, 256, %s355_s18, [#allocation7], %s10766_s1, %s10766_s1, %s10767_s13  }
  0x1b   : > { %6905 = dma.hbm_to_vmem [thread:$0]  (!%p7825_p6), %s381_s21, 1024, %s383_s17, [#allocation10], %s10766_s1, %s10766_s1, %s10767_s13  }
  0x1c   : > { %s7703_s2 = smov 192   ;;  %s7704_s3 = smov 12  }
  0x1d   : > { %6902 = dma.hbm_to_vmem [thread:$0]  (!%p7825_p6), %s367_s29, 3072, %s369_s20, [#allocation7], %s7703_s2, %s7703_s2, %s7704_s3  }
  0x1e   : > { %s7705_s14 = smov [#allocation11]   ;;  %s7706_s21 = smov 256  }
  0x1f   : > { %s403_s30 = sshll.u32 %s10807_s7, 4  ;;  %s405_s18 = sshll.u32 %s7705_s14, 4  ;;  %s404_s30 = int_to_ptr.hbm [resolvable:$true] %s403_s30  ;;  %s406_s18 = int_to_ptr.vmem [resolvable:$true] %s405_s18 }
  0x20   : > { %s7707_s17 = smov 16   ;;  %s10808_s9 = sld [smem:[#allocation37_spill]] }
  0x21   : > { %6908 = dma.hbm_to_vmem [thread:$0]  (!%p7825_p6), %s404_s30, 4096, %s406_s18, [#allocation10], %s7706_s21, %s7706_s21, %s7707_s17  }
  0x22   : > { %s7708_s3 = smov [#allocation12]   ;;  %s6166_s20 = sadd.s32 4294967294, %s7696_s28  }
  0x23   : > { %s422_s29 = sshll.u32 %s7708_s3, 4  ;;  %s7859_s24 = sadd.s32 1, %s7696_s28   ;;  %s423_s29 = int_to_ptr.vmem [resolvable:$true] %s422_s29 }
  0x24   : > { %s39_s30 = sadd.s32 1, %s7692_s27  ;;  %s36_s14 = ssub.s32 %s7696_s28, %s7859_s24 }
  0x25   : > { %p46_p7 = scmp.ne.s32.totalorder %s7692_s27, %s7688_s26  ;;  %p37_p8 = scmp.eq.s32.totalorder %s36_s14, 0 }
  0x26   : > { %s420_s2 = sshll.u32 %s10808_s9, 4  ;;  %p47_p9 = scmp.eq.s32.totalorder %s7696_s28, 0  ;;  %s421_s2 = int_to_ptr.hbm [resolvable:$true] %s420_s2 }
  0x27   : > { %6911 = dma.hbm_to_vmem [thread:$0]  (!%p7825_p6), %s421_s2, 4096, %s423_s29, [#allocation13], %s10766_s1, %s10766_s1, %s10767_s13  }
  0x28   : > { %p52_p10 = scmp.ne.s32.totalorder %s7688_s26, %s7684_s25  ;;  %p328_p11 = scmp.eq.s32.totalorder %s7808_s15, 1 }
  0x29   : > { %s7871_s18 = scalar_select %p37_p8, %s7692_s27, %s39_s30  }
  0x2a   : > { %p7875_p12 = por %p53_p1, %p52_p10  ;;  %p7879_p13 = por %p328_p11, %p46_p7 }
  0x2b   : > { %10809 = sst [smem:[#allocation20_spill]] %s7871_s18  ;;  %p334_p0 = scmp.eq.s32.totalorder %s6166_s20, 1 }
  0x2c   : > { %p48_p2 = por %p47_p9, %p46_p7  ;;  %s445_s17 = sand.u32 1, %s7692_s27  }
  0x2d   : > { %p7884_p4 = por %p334_p0, %p52_p10  ;;  %p6925_p6 = scmp.lt.s32.totalorder %s7696_s28, 2 }
  0x2e   : > { %s6174_s23 = sshll.u32 %s445_s17, 6  ;;  %s6702_s2 = sshll.u32 %s7696_s28, 6 }
  0x2f   : > { %s454_s30 = scalar_lea.hbm %s10751_s0, %s6702_s2  ;;  %s449_s1 = scalar_lea.vmem [#allocation3], %s6174_s23 }
  0x30   : > { %s455_s14 = sshll.u32 %s454_s30, 4  ;;  %s457_s13 = sshll.u32 %s449_s1, 4  ;;  %s456_s14 = int_to_ptr.hbm [resolvable:$true] %s455_s14  ;;  %s458_s13 = int_to_ptr.vmem [resolvable:$true] %s457_s13 }
  0x31   : > { %p7893_p8 = pnand %p6925_p6, %p48_p2  ;;  %s446_s7 = scalar_lea.sflag [#allocation4], %s445_s17 }
  0x32   : > { %s7588_s9 = sshra.s32 %s456_s14, 4  ;;  %s7595_s1 = scalar_lea.hbm %s10751_s0, 128  ;;  %s7589_s9 = int_to_ptr.hbm [resolvable:$true] %s7588_s9 }
  0x33   : > { %s7590_s18 = scalar_lea.hbm %s7589_s9, 64  ;;  %p7592_p9 = pneg %p7893_p8 }
  0x34   : > { %p7591_p7 = scmp.ne.s32.totalorder %s7589_s9, %s7590_s18  ;;  %p7596_p0 = scmp.lt.s32.totalorder %s7589_s9, %s10751_s0 }
  0x35   : > { %p7597_p2 = scmp.lt.s32.totalorder %s7595_s1, %s7590_s18 }
  0x36   : > { %p7593_p10 = pnand %p7592_p9, %p7591_p7 }
  0x37   : > { %p7598_p6 = por %p7597_p2, %p7596_p0 }
  0x38   : > { %p7594_p11 = pneg %p7593_p10 }
  0x3a   : > { %p7599_p5 = pnand %p7598_p6, %p7594_p11 }
  0x3c   : > { %7602 = shalt.err (!%p7599_p5)
}
  0x3d   : > { %s10814_s17 = smov 4   ;;  %s10815_s30 = smov 64  }
  0x3e   : > { %6915 = dma.hbm_to_vmem [thread:$0]  (!%p7893_p8), %s456_s14, 1024, %s458_s13, %s446_s7, %s10815_s30, %s10815_s30, %s10814_s17  }
  0x3f   : > { %469 = sbr.rel (%p7813_p3) target bundleno = 3648 (0xe40), region = 72 }
  0x44   : > { %s7913_s2 = sand.u32 1, %s7688_s26  }
  0x45   : > { %s6178_s9 = sshll.u32 %s7913_s2, 6  ;;  %s472_s18 = scalar_lea.sflag [#allocation4], %s7913_s2 }
  0x46   : > { %s7919_s3 = scalar_lea.vmem [#allocation3], %s6178_s9 }
  0x47   : > { %7663 = dma.done.wait (%p7875_p12), %s472_s18, 1024  }
  0x48   : > { %7665 = vsyncadd (%p7875_p12), %s472_s18, 4294966272 }
  0x49   : > { %7667 = dma.done.wait (%p53_p1), [#allocation7], 3328  }
  0x4a   : > { %7669 = vsyncadd (%p53_p1), [#allocation7], 4294963968 }
  0x4b   : > { %7671 = dma.done.wait (%p53_p1), [#allocation10], 5120  }
  0x4c   : > { %7673 = vsyncadd (%p53_p1), [#allocation10], 4294962176 }
  0x4d   : > { %7675 = dma.done.wait (%p53_p1), [#allocation13], 4096  }
  0x4e   : > { %7677 = vsyncadd (%p53_p1), [#allocation13], 4294963200  ;;  %v6303_v0 = vld [vmem:[#allocation8 + $0xa8] sm:$0xf]  ;;  %v6733_v1 = vld [vmem:[#allocation8 + $0xb0] sm:$0xf0] }
  0x4f   : > { %v6732_v2 = vld [vmem:[#allocation8 + $0xac] sm:$0xf]  ;;  %v6304_v3 = vor.u32 %v6733_v1, %v6303_v0  ;;  %v6305_v4 = vld [vmem:[#allocation8 + $0xb4] sm:$0xf0]  ;;  %v6291_v5 = vld [vmem:[#allocation8 + $0x90] sm:$0xf] }
  0x50   : > { %v6730_v6 = vld [vmem:[#allocation8 + $0x98] sm:$0xf0]  ;;  %v6308_v7 = vor.u32 %v6732_v2, %v6305_v4  ;;  %v6729_v8 = vld [vmem:[#allocation8 + $0x94] sm:$0xf]  ;;  %v6293_v9 = vld [vmem:[#allocation8 + $0x9c] sm:$0xf0] }
  0x51   : > { %771 = vmatpush.bf16.msra.mxu0 %v6304_v3  ;;  %v6292_v10 = vor.u32 %v6730_v6, %v6291_v5  ;;  %v6296_v11 = vor.u32 %v6729_v8, %v6293_v9  ;;  %v6279_v12 = vld [vmem:[#allocation8 + $0x78] sm:$0xf]  ;;  %v6727_v13 = vld [vmem:[#allocation8 + $0x80] sm:$0xf0]  ;;  %v6726_v14 = vld [vmem:[#allocation8 + $0x7c] sm:$0xf] }
  0x52   : > { %820 = vmatpush.bf16.msra.mxu1 %v6308_v7  ;;  %v6281_v15 = vld [vmem:[#allocation8 + $0x84] sm:$0xf0]  ;;  %v6280_v16 = vor.u32 %v6727_v13, %v6279_v12  ;;  %v6267_v18 = vld [vmem:[#allocation8 + $0x60] sm:$0xf]  ;;  %v6724_v19 = vld [vmem:[#allocation8 + $0x68] sm:$0xf0] }
  0x53   : > { %v6284_v17 = vor.u32 %v6726_v14, %v6281_v15  ;;  %v6723_v20 = vld [vmem:[#allocation8 + $0x64] sm:$0xf]  ;;  %v6269_v21 = vld [vmem:[#allocation8 + $0x6c] sm:$0xf0]  ;;  %v6255_v22 = vld [vmem:[#allocation8 + $0x48] sm:$0xf]  ;;  %v6268_v23 = vor.u32 %v6724_v19, %v6267_v18 }
  0x54   : > { %v6721_v24 = vld [vmem:[#allocation8 + $0x50] sm:$0xf0]  ;;  %v6272_v25 = vor.u32 %v6723_v20, %v6269_v21  ;;  %v6720_v26 = vld [vmem:[#allocation8 + $0x4c] sm:$0xf]  ;;  %v6257_v27 = vld [vmem:[#allocation8 + $0x54] sm:$0xf0] }
  0x55   : > { %772 = vmatpush.bf16.msra.mxu0 %v6292_v10  ;;  %v6256_v28 = vor.u32 %v6721_v24, %v6255_v22  ;;  %v6260_v29 = vor.u32 %v6720_v26, %v6257_v27  ;;  %v6243_v30 = vld [vmem:[#allocation8 + $0x30] sm:$0xf]  ;;  %v6718_v31 = vld [vmem:[#allocation8 + $0x38] sm:$0xf0]  ;;  %v6717_v32 = vld [vmem:[#allocation8 + $0x34] sm:$0xf] }
  0x56   : > { %821 = vmatpush.bf16.msra.mxu1 %v6296_v11  ;;  %v6245_v33 = vld [vmem:[#allocation8 + $0x3c] sm:$0xf0]  ;;  %v6244_v34 = vor.u32 %v6718_v31, %v6243_v30  ;;  %v6231_v36 = vld [vmem:[#allocation8 + $0x18] sm:$0xf]  ;;  %v6715_v37 = vld [vmem:[#allocation8 + $0x20] sm:$0xf0] }
  0x57   : > { %v6248_v35 = vor.u32 %v6717_v32, %v6245_v33  ;;  %v6714_v38 = vld [vmem:[#allocation8 + $0x1c] sm:$0xf]  ;;  %v6233_v39 = vld [vmem:[#allocation8 + $0x24] sm:$0xf0]  ;;  %v6232_v40 = vor.u32 %v6715_v37, %v6231_v36  ;;  %v6219_v42 = vld [vmem:[#allocation8] sm:$0xf] }
  0x58   : > { %v6236_v41 = vor.u32 %v6714_v38, %v6233_v39  ;;  %v6712_v43 = vld [vmem:[#allocation8 + $0x8] sm:$0xf0]  ;;  %v6711_v44 = vld [vmem:[#allocation8 + $0x4] sm:$0xf]  ;;  %v6221_v45 = vld [vmem:[#allocation8 + $0xc] sm:$0xf0] }
  0x59   : > { %773 = vmatpush.bf16.msra.mxu0 %v6280_v16  ;;  %v6220_v46 = vor.u32 %v6712_v43, %v6219_v42  ;;  %v6224_v47 = vor.u32 %v6711_v44, %v6221_v45  ;;  %v6703_v48 = vld [vmem:[%s7919_s3] sm:$0xff]  ;;  %v6704_v49 = vld [vmem:[%s7919_s3 + $0x8] sm:$0xff]  ;;  %v6705_v50 = vld [vmem:[%s7919_s3 + $0x10] sm:$0xff]  ;;  %s7709_s7 = smov 96   ;;  %vm1002_vm0 = vcmask 261120   ;;  %s7710_s13 = smov 64  }
  0x5a   : > { %822 = vmatpush.bf16.msra.mxu1 %v6284_v17  ;;  %v6311_v51 = vld [vmem:[#allocation8 + $0xb0] sm:$0xf]  ;;  %v6734_v52 = vld [vmem:[#allocation8 + $0xb8] sm:$0xf0]  ;;  %v6299_v53 = vld [vmem:[#allocation8 + $0x98] sm:$0xf] }
  0x5b   : > { %v6312_v54 = vor.u32 %v6734_v52, %v6311_v51  ;;  %v6731_v55 = vld [vmem:[#allocation8 + $0xa0] sm:$0xf0]  ;;  %v6287_v57 = vld [vmem:[#allocation8 + $0x80] sm:$0xf]  ;;  %v6728_v58 = vld [vmem:[#allocation8 + $0x88] sm:$0xf0] }
  0x5c   : > { %v6300_v56 = vor.u32 %v6731_v55, %v6299_v53  ;;  %v6288_v59 = vor.u32 %v6728_v58, %v6287_v57  ;;  %v6706_v60 = vld [vmem:[%s7919_s3 + $0x18] sm:$0xff]  ;;  %v6725_v62 = vld [vmem:[#allocation8 + $0x70] sm:$0xf0]  ;;  %v6263_v0 = vld [vmem:[#allocation8 + $0x50] sm:$0xf]  ;;  %vm1559_vm1 = vcmask 257024  }
  0x5d   : > { %774 = vmatpush.bf16.msra.mxu0 %v6268_v23  ;;  %869 = vmatpush.bf16.msra.mxu2 %v6312_v54  ;;  %v6275_v61 = vld [vmem:[#allocation8 + $0x68] sm:$0xf]  ;;  %v6722_v1 = vld [vmem:[#allocation8 + $0x58] sm:$0xf0]  ;;  %v6251_v3 = vld [vmem:[#allocation8 + $0x38] sm:$0xf] }
  0x5e   : > { %823 = vmatpush.bf16.msra.mxu1 %v6272_v25  ;;  %v6276_v63 = vor.u32 %v6725_v62, %v6275_v61  ;;  %v6264_v2 = vor.u32 %v6722_v1, %v6263_v0  ;;  %v6719_v4 = vld [vmem:[#allocation8 + $0x40] sm:$0xf0]  ;;  %v6239_v6 = vld [vmem:[#allocation8 + $0x20] sm:$0xf]  ;;  %v6716_v7 = vld [vmem:[#allocation8 + $0x28] sm:$0xf0] }
  0x5f   : > { %v6252_v5 = vor.u32 %v6719_v4, %v6251_v3  ;;  %v6240_v8 = vor.u32 %v6716_v7, %v6239_v6  ;;  %v6707_v9 = vld [vmem:[%s7919_s3 + $0x20] sm:$0xff]  ;;  %v6227_v10 = vld [vmem:[#allocation8 + $0x8] sm:$0xf]  ;;  %v6708_v13 = vld [vmem:[%s7919_s3 + $0x28] sm:$0xff]  ;;  %s7711_s16 = smov 32   ;;  %vm2224_vm2 = vcmask 519424  }
  0x60   : > { %v6713_v11 = vld [vmem:[#allocation8 + $0x10] sm:$0xf0]  ;;  %v6709_v14 = vld [vmem:[%s7919_s3 + $0x30] sm:$0xff]  ;;  %v7945_v15 = vld [vmem:[%s7919_s3 + $0x38] sm:$0xff]  ;;  %vm2889_vm3 = vcmask 781824   ;;  %vm3554_vm4 = vcmask 1044224  }
  0x61   : > { %775 = vmatpush.bf16.msra.mxu0 %v6256_v28  ;;  %870 = vmatpush.bf16.msra.mxu2 %v6300_v56  ;;  %v6228_v12 = vor.u32 %v6713_v11, %v6227_v10  ;;  %s10650_s17 = scalar_lea.vmem [#allocation14], %s6178_s9  ;;  %s6815_s9 = sshll.u32 %s7808_s15, 6 }
  0x62   : > { %824 = vmatpush.bf16.msra.mxu1 %v6260_v29  ;;  %s6030_s15 = scalar_lea.sflag [#allocation5], %s7913_s2 }
  0x65   : > { %776 = vmatpush.bf16.msra.mxu0 %v6244_v34  ;;  %871 = vmatpush.bf16.msra.mxu2 %v6288_v59 }
  0x66   : > { %825 = vmatpush.bf16.msra.mxu1 %v6248_v35 }
  0x69   : > { %777 = vmatpush.bf16.msra.mxu0 %v6232_v40  ;;  %872 = vmatpush.bf16.msra.mxu2 %v6276_v63 }
  0x6a   : > { %826 = vmatpush.bf16.msra.mxu1 %v6236_v41 }
  0x6d   : > { %778 = vmatpush.bf16.msra.mxu0 %v6220_v46  ;;  %873 = vmatpush.bf16.msra.mxu2 %v6264_v2 }
  0x6e   : > { %827 = vmatpush.bf16.msra.mxu1 %v6224_v47 }
  0x70   : > { %779 = vmatmul.bf16.vlgmr.msra.gmra.mxu0 %v6703_v48 }
  0x71   : > { %828 = vmatmul.bf16.vlgmr.msra.gmra.mxu1 %v6703_v48  ;;  %874 = vmatpush.bf16.msra.mxu2 %v6252_v5 }
  0x75   : > { %875 = vmatpush.bf16.msra.mxu2 %v6240_v8 }
  0x79   : > { %876 = vmatpush.bf16.msra.mxu2 %v6228_v12 }
  0x7c   : > { %877 = vmatmul.bf16.vlgmr.msra.gmra.mxu2 %v6703_v48 }
  0x80   : > { %784 = vmatmul.bf16.gmra.mxu0 %v6704_v49 }
  0x81   : > { %833 = vmatmul.bf16.gmra.mxu1 %v6704_v49 }
  0x8c   : > { %882 = vmatmul.bf16.gmra.mxu2 %v6704_v49 }
  0x90   : > { %789 = vmatmul.bf16.gmra.mxu0 %v6705_v50 }
  0x91   : > { %838 = vmatmul.bf16.gmra.mxu1 %v6705_v50 }
  0x9c   : > { %887 = vmatmul.bf16.gmra.mxu2 %v6705_v50 }
  0xa0   : > { %794 = vmatmul.bf16.gmra.mxu0 %v6706_v60 }
  0xa1   : > { %843 = vmatmul.bf16.gmra.mxu1 %v6706_v60 }
  0xac   : > { %892 = vmatmul.bf16.gmra.mxu2 %v6706_v60 }
  0xb0   : > { %799 = vmatmul.bf16.gmra.mxu0 %v6707_v9 }
  0xb1   : > { %848 = vmatmul.bf16.gmra.mxu1 %v6707_v9 }
  0xbc   : > { %897 = vmatmul.bf16.gmra.mxu2 %v6707_v9 }
  0xc0   : > { %804 = vmatmul.bf16.gmra.mxu0 %v6708_v13 }
  0xc1   : > { %853 = vmatmul.bf16.gmra.mxu1 %v6708_v13 }
  0xcc   : > { %902 = vmatmul.bf16.gmra.mxu2 %v6708_v13 }
  0xd0   : > { %809 = vmatmul.bf16.gmra.mxu0 %v6709_v14 }
  0xd1   : > { %858 = vmatmul.bf16.gmra.mxu1 %v6709_v14 }
  0xdc   : > { %907 = vmatmul.bf16.gmra.mxu2 %v6709_v14 }
  0xe0   : > { %814 = vmatmul.bf16.gmra.mxu0 %v7945_v15 }
  0xe1   : > { %863 = vmatmul.bf16.gmra.mxu1 %v7945_v15 }
  0xec   : > { %912 = vmatmul.bf16.gmra.mxu2 %v7945_v15 }
  0xed   : > { %v780_v16 = vpop.f32.mrf.mxu0 }
  0xee   : > { %v829_v17 = vpop.f32.mrf.mxu1 }
  0xef   : > { %v7949_v18 = vpack.c.bf16 %v829_v17, %v780_v16 }
  0xf1   : > { %1576 = vrot.lane.b32.xlu2 %v7949_v18, %s7709_s7  ;;  %v990_v22 = vunpack.c.l.b16 %v7949_v18  ;;  %v974_v40 = vrot.slane %v7949_v18, 4 }
  0xf3   : > { %v996_v46 = vunpack.c.l.b16 %v974_v40 }
  0xf5   : > { %v782_v19 = vpop.f32.mrf.mxu0 }
  0xf6   : > { %v831_v20 = vpop.f32.mrf.mxu1 }
  0xf7   : > { %v7953_v21 = vpack.c.bf16 %v831_v20, %v782_v19 }
  0xf9   : > { %1578 = vrot.lane.b32.xlu0 %v7953_v21, %s7709_s7  ;;  %v991_v23 = vunpack.c.l.b16 %v7953_v21  ;;  %v975_v36 = vrot.slane %v7953_v21, 4 }
  0xfb   : > { %v7959_v24 = vpack.c.b16 %v991_v23, %v990_v22  ;;  %v997_v45 = vunpack.c.l.b16 %v975_v36 }
  0xfd   : > { %1624 = vrot.lane.b32.xlu1 %v7959_v24, %s7709_s7  ;;  %v785_v25 = vpop.f32.mrf.mxu0  ;;  %v1000_v47 = vpack.c.b16 %v997_v45, %v996_v46 }
  0xfe   : > { %v834_v26 = vpop.f32.mrf.mxu1 }
  0xff   : > { %v7963_v27 = vpack.c.bf16 %v834_v26, %v785_v25  ;;  %v1010_v51 = vsel %vm1002_vm0, %v1000_v47, 0  ;;  %v8026_v17 = vpop.f32.mrf.mxu2 }
 0x101   : > { %1580 = vrot.lane.b32.xlu0 %v7963_v27, %s7709_s7  ;;  %v976_v31 = vrot.slane %v7963_v27, 4  ;;  %v992_v39 = vunpack.c.l.b16 %v7963_v27 }
 0x103   : > { %v998_v33 = vunpack.c.l.b16 %v976_v31 }
 0x105   : > { %v787_v28 = vpop.f32.mrf.mxu0 }
 0x106   : > { %v836_v29 = vpop.f32.mrf.mxu1 }
 0x107   : > { %v7967_v30 = vpack.c.bf16 %v836_v29, %v787_v28  ;;  %v8032_v23 = vpop.f32.mrf.mxu2 }
 0x109   : > { %1582 = vrot.lane.b32.xlu1 %v7967_v30, %s7709_s7  ;;  %v977_v32 = vrot.slane %v7967_v30, 4  ;;  %v993_v35 = vunpack.c.l.b16 %v7967_v30 }
 0x10b   : > { %v999_v34 = vunpack.c.l.b16 %v977_v32  ;;  %v7980_v44 = vpack.c.b16 %v993_v35, %v992_v39 }
 0x10d   : > { %v790_v37 = vpop.f32.mrf.mxu0  ;;  %v1001_v38 = vpack.c.b16 %v999_v34, %v998_v33 }
 0x10e   : > { %v839_v41 = vpop.f32.mrf.mxu1 }
 0x10f   : > { %v7977_v42 = vpack.c.bf16 %v839_v41, %v790_v37  ;;  %v1013_v43 = vsel %vm1002_vm0, %v1001_v38, 0  ;;  %v8041_v32 = vpop.f32.mrf.mxu2 }
 0x110   : > { %1021 = vmatpush.bf16.xpose.msrb.mxu0 %v1013_v43 }
 0x111   : > { %1626 = vrot.lane.b32.xlu1 %v7980_v44, %s7709_s7  ;;  %1584 = vrot.lane.b32.xlu2 %v7977_v42, %s7709_s7  ;;  %v1034_v52 = vunpack.c.l.b16 %v7977_v42  ;;  %v978_v7 = vrot.slane %v7977_v42, 4 }
 0x113   : > { %v1040_v12 = vunpack.c.l.b16 %v978_v7 }
 0x115   : > { %v792_v48 = vpop.f32.mrf.mxu0 }
 0x116   : > { %v841_v49 = vpop.f32.mrf.mxu1 }
 0x117   : > { %v7986_v50 = vpack.c.bf16 %v841_v49, %v792_v48  ;;  %v885_v46 = vpop.f32.mrf.mxu2 }
 0x118   : > { %1022 = vmatpush.bf16.xpose.msrb.mxu0 %v1010_v51 }
 0x119   : > { %1586 = vrot.lane.b32.xlu0 %v7986_v50, %s7709_s7  ;;  %v1035_v53 = vunpack.c.l.b16 %v7986_v50  ;;  %v979_v4 = vrot.slane %v7986_v50, 4 }
 0x11b   : > { %v7993_v54 = vpack.c.b16 %v1035_v53, %v1034_v52  ;;  %v1041_v10 = vunpack.c.l.b16 %v979_v4 }
 0x11d   : > { %1665 = vrot.lane.b32.xlu1 %v7993_v54, %s7709_s7  ;;  %v795_v55 = vpop.f32.mrf.mxu0  ;;  %v1044_v13 = vpack.c.b16 %v1041_v10, %v1040_v12 }
 0x11e   : > { %v844_v56 = vpop.f32.mrf.mxu1 }
 0x11f   : > { %6313 = vmatmul.msk.bf16.vlgmr.msrb.gmra.mxu0 %vm1002_vm0, %v7959_v24  ;;  %v7999_v57 = vpack.c.bf16 %v844_v56, %v795_v55  ;;  %v1053_v16 = vsel %vm1002_vm0, %v1044_v13, 0  ;;  %v888_v52 = vpop.f32.mrf.mxu2 }
 0x121   : > { %v980_v61 = vrot.slane %v7999_v57, 4  ;;  %v1036_v62 = vunpack.c.l.b16 %v7999_v57 }
 0x123   : > { %v1042_v2 = vunpack.c.l.b16 %v980_v61 }
 0x125   : > { %1588 = vrot.lane.b32.xlu1 %v7999_v57, %s7709_s7  ;;  %v797_v58 = vpop.f32.mrf.mxu0 }
 0x126   : > { %v846_v59 = vpop.f32.mrf.mxu1 }
 0x127   : > { %v8004_v60 = vpack.c.bf16 %v846_v59, %v797_v58 }
 0x129   : > { %1590 = vrot.lane.b32.xlu0 %v8004_v60, %s7709_s7  ;;  %v1037_v63 = vunpack.c.l.b16 %v8004_v60  ;;  %v981_v0 = vrot.slane %v8004_v60, 4 }
 0x12b   : > { %v8012_v1 = vpack.c.b16 %v1037_v63, %v1036_v62  ;;  %v1043_v3 = vunpack.c.l.b16 %v981_v0  ;;  %v890_v62 = vpop.f32.mrf.mxu2 }
 0x12d   : > { %10816 = vst [vmem:[#allocation21_spill] sm:$0xff] %v8012_v1  ;;  %1667 = vrot.lane.b32.xlu1 %v8012_v1, %s7709_s7  ;;  %v800_v5 = vpop.f32.mrf.mxu0  ;;  %v1045_v6 = vpack.c.b16 %v1043_v3, %v1042_v2 }
 0x12e   : > { %v849_v8 = vpop.f32.mrf.mxu1 }
 0x12f   : > { %6314 = vmatmul.msk.bf16.gmra.mxu0 %vm1002_vm0, %v7980_v44  ;;  %v1056_v9 = vsel %vm1002_vm0, %v1045_v6, 0  ;;  %v8021_v11 = vpack.c.bf16 %v849_v8, %v800_v5 }
 0x130   : > { %1064 = vmatpush.bf16.xpose.msrb.mxu1 %v1056_v9 }
 0x131   : > { %10817 = vst [vmem:[#allocation22_spill] sm:$0xff] %v8021_v11  ;;  %v982_v36 = vrot.slane %v8021_v11, 4  ;;  %v1077_v53 = vunpack.c.l.b16 %v8021_v11 }
 0x133   : > { %v1083_v43 = vunpack.c.l.b16 %v982_v36  ;;  %v893_v6 = vpop.f32.mrf.mxu2 }
 0x135   : > { %v802_v14 = vpop.f32.mrf.mxu0  ;;  %1592 = vrot.lane.b32.xlu1 %v8021_v11, %s7709_s7 }
 0x136   : > { %v851_v15 = vpop.f32.mrf.mxu1 }
 0x137   : > { %v8037_v29 = vpack.c.bf16 %v851_v15, %v802_v14  ;;  %v931_v15 = vpack.c.bf16 %v893_v6, %v893_v6 }
 0x138   : > { %1065 = vmatpush.bf16.xpose.msrb.mxu1 %v1053_v16  ;;  %v923_v16 = vpack.c.bf16 %v8041_v32, %v8041_v32  ;;  %v919_v32 = vpack.c.bf16 %v8026_v17, %v8026_v17 }
 0x139   : > { %10818 = vst [vmem:[#allocation23_spill] sm:$0xff] %v8037_v29  ;;  %v983_v37 = vrot.slane %v8037_v29, 4  ;;  %v1078_v55 = vunpack.c.l.b16 %v8037_v29 }
 0x13b   : > { %v1084_v45 = vunpack.c.l.b16 %v983_v37  ;;  %v8054_v58 = vpack.c.b16 %v1078_v55, %v1077_v53  ;;  %v895_v37 = vpop.f32.mrf.mxu2 }
 0x13d   : > { %v805_v19 = vpop.f32.mrf.mxu0  ;;  %v1087_v47 = vpack.c.b16 %v1084_v45, %v1083_v43 }
 0x13e   : > { %v854_v20 = vpop.f32.mrf.mxu1 }
 0x13f   : > { %v8028_v22 = vpack.c.bf16 %v854_v20, %v805_v19  ;;  %6315 = vmatmul.msk.bf16.vlgmr.msrb.gmra.mxu1 %vm1002_vm0, %v7993_v54  ;;  %v1096_v51 = vsel %vm1002_vm0, %v1087_v47, 0  ;;  %v925_v20 = vpack.c.bf16 %v885_v46, %v885_v46 }
 0x141   : > { %1596 = vrot.lane.b32.xlu0 %v8028_v22, %s7709_s7  ;;  %v984_v26 = vrot.slane %v8028_v22, 4  ;;  %v1079_v7 = vunpack.c.l.b16 %v8028_v22  ;;  %v1372_v43 = vunpack.c.l.b16 %v925_v20 }
 0x143   : > { %v1085_v34 = vunpack.c.l.b16 %v984_v26 }
 0x145   : > { %v807_v25 = vpop.f32.mrf.mxu0 }
 0x146   : > { %v856_v28 = vpop.f32.mrf.mxu1 }
 0x147   : > { %v8039_v31 = vpack.c.bf16 %v856_v28, %v807_v25  ;;  %v927_v28 = vpack.c.bf16 %v888_v52, %v888_v52  ;;  %v1369_v52 = vunpack.c.l.b16 %v919_v32 }
 0x149   : > { %10819 = vst [vmem:[#allocation24_spill] sm:$0xff] %v8039_v31  ;;  %v985_v33 = vrot.slane %v8039_v31, 4  ;;  %1598 = vrot.lane.b32.xlu2 %v8039_v31, %s7709_s7  ;;  %v1080_v8 = vunpack.c.l.b16 %v8039_v31  ;;  %v1416_v45 = vunpack.c.l.b16 %v927_v28 }
 0x14b   : > { %v1086_v35 = vunpack.c.l.b16 %v985_v33  ;;  %v8076_v25 = vpack.c.b16 %v1080_v8, %v1079_v7  ;;  %v929_v33 = vpack.c.bf16 %v890_v62, %v890_v62  ;;  %v1577_v8 = vpop.permute.xlu2 %1576 }
 0x14d   : > { %v810_v38 = vpop.f32.mrf.mxu0  ;;  %v1088_v39 = vpack.c.b16 %v1086_v35, %v1085_v34  ;;  %10823 = vst [vmem:[#allocation28_spill] sm:$0xff] %v8076_v25  ;;  %v1417_v46 = vunpack.c.l.b16 %v929_v33 }
 0x14e   : > { %v859_v40 = vpop.f32.mrf.mxu1 }
 0x14f   : > { %6316 = vmatmul.msk.bf16.gmra.mxu1 %vm1002_vm0, %v8012_v1  ;;  %v1099_v41 = vsel %vm1002_vm0, %v1088_v39, 0  ;;  %v8063_v3 = vpack.c.bf16 %v859_v40, %v810_v38  ;;  %v1418_v38 = vunpack.c.l.b16 %v931_v15  ;;  %v933_v39 = vpack.c.bf16 %v895_v37, %v895_v37 }
 0x150   : > { %1107 = vmatpush.bf16.xpose.msrb.mxu2 %v1099_v41  ;;  %v921_v40 = vpack.c.bf16 %v8032_v23, %v8032_v23  ;;  %v1371_v41 = vunpack.c.l.b16 %v923_v16  ;;  %v1608_v15 = vrot.slane %v1577_v8, 4 }
 0x151   : > { %v986_v13 = vrot.slane %v8063_v3, 4  ;;  %v1419_v47 = vunpack.c.l.b16 %v933_v39 }
 0x152   : > { %v1370_v53 = vunpack.c.l.b16 %v921_v40  ;;  %v8089_v55 = vpack.c.b16 %v1372_v43, %v1371_v41  ;;  %v1628_v28 = vunpack.c.l.b16 %v1608_v15 }
 0x153   : > { %v1126_v35 = vunpack.c.l.b16 %v986_v13 }
 0x154   : > { %v8095_v62 = vpack.c.b16 %v1370_v53, %v1369_v52 }
 0x155   : > { %v812_v48 = vpop.f32.mrf.mxu0 }
 0x156   : > { %v861_v49 = vpop.f32.mrf.mxu1 }
 0x157   : > { %v8065_v4 = vpack.c.bf16 %v861_v49, %v812_v48 }
 0x158   : > { %1108 = vmatpush.bf16.xpose.msrb.mxu2 %v1096_v51  ;;  %v8087_v51 = vpack.c.b16 %v1419_v47, %v1418_v38 }
 0x159   : > { %10821 = vst [vmem:[#allocation26_spill] sm:$0xff] %v8065_v4  ;;  %v987_v14 = vrot.slane %v8065_v4, 4 }
 0x15a   : > { %1436 = vmatpush.bf16.msra.mxu0 %v8087_v51 }
 0x15b   : > { %v1127_v36 = vunpack.c.l.b16 %v987_v14 }
 0x15d   : > { %v815_v56 = vpop.f32.mrf.mxu0  ;;  %v1130_v49 = vpack.c.b16 %v1127_v36, %v1126_v35 }
 0x15e   : > { %v864_v59 = vpop.f32.mrf.mxu1 }
 0x15f   : > { %v8056_v61 = vpack.c.bf16 %v864_v59, %v815_v56  ;;  %6317 = vmatmul.msk.bf16.vlgmr.msrb.gmra.mxu2 %vm1002_vm0, %v8054_v58  ;;  %v8091_v56 = vpack.c.b16 %v1417_v46, %v1416_v45  ;;  %v1139_v23 = vsel %vm1002_vm0, %v1130_v49, 0  ;;  %v898_v59 = vpop.f32.mrf.mxu2 }
 0x160   : > { %v935_v32 = vpack.c.bf16 %v898_v59, %v898_v59 }
 0x161   : > { %10820 = vst [vmem:[#allocation25_spill] sm:$0xff] %v8056_v61  ;;  %1604 = vrot.lane.b32.xlu1 %v8056_v61, %s7709_s7  ;;  %v988_v0 = vrot.slane %v8056_v61, 4  ;;  %1437 = vmatpush.bf16.msra.mxu0 %v8091_v56  ;;  %v1122_v36 = vunpack.c.l.b16 %v8056_v61 }
 0x162   : > { %v1463_v47 = vunpack.c.l.b16 %v935_v32 }
 0x163   : > { %v1128_v10 = vunpack.c.l.b16 %v988_v0  ;;  %v1121_v0 = vunpack.c.l.b16 %v8065_v4 }
 0x165   : > { %v817_v63 = vpop.f32.mrf.mxu0 }
 0x166   : > { %v866_v2 = vpop.f32.mrf.mxu1 }
 0x167   : > { %v8067_v5 = vpack.c.bf16 %v866_v2, %v817_v63  ;;  %v1120_v63 = vunpack.c.l.b16 %v8063_v3  ;;  %v900_v14 = vpop.f32.mrf.mxu2 }
 0x168   : > { %v937_v40 = vpack.c.bf16 %v900_v14, %v900_v14 }
 0x169   : > { %10822 = vst [vmem:[#allocation27_spill] sm:$0xff] %v8067_v5  ;;  %v989_v9 = vrot.slane %v8067_v5, 4 }
 0x16a   : > { %v1464_v49 = vunpack.c.l.b16 %v937_v40 }
 0x16b   : > { %v1129_v12 = vunpack.c.l.b16 %v989_v9  ;;  %v1579_v19 = vpop.permute.xlu0 %1578  ;;  %v8101_v9 = vpack.c.b16 %v1121_v0, %v1120_v63 }
 0x16c   : > { %v8120_v63 = vpack.c.b16 %v1464_v49, %v1463_v47 }
 0x16d   : > { %v1131_v26 = vpack.c.b16 %v1129_v12, %v1128_v10  ;;  %v1609_v10 = vrot.slane %v1579_v19, 4  ;;  %v1123_v19 = vunpack.c.l.b16 %v8067_v5 }
 0x16f   : > { %6318 = vmatmul.msk.bf16.gmra.mxu2 %vm1002_vm0, %v8076_v25  ;;  %v1142_v34 = vsel %vm1002_vm0, %v1131_v26, 0  ;;  %v8085_v48 = vpop.permute.xlu1 %1624  ;;  %v1629_v20 = vunpack.c.l.b16 %v1609_v10  ;;  %v903_v35 = vpop.f32.mrf.mxu2  ;;  %v8112_v39 = vpack.c.b16 %v1123_v19, %v1122_v36 }
 0x170   : > { %1150 = vmatpush.bf16.xpose.msra.mxu3 %v1142_v34  ;;  %v939_v38 = vpack.c.bf16 %v903_v35, %v903_v35 }
 0x171   : > { %v1632_v33 = vpack.c.b16 %v1629_v20, %v1628_v28 }
 0x172   : > { %v1465_v45 = vunpack.c.l.b16 %v939_v38 }
 0x173   : > { %v1581_v17 = vpop.permute.xlu0 %1580  ;;  %v1641_v37 = vsel %vm1002_vm0, %v1632_v33, 0 }
 0x174   : > { %v1610_v2 = vrot.slane %v1581_v17, 4 }
 0x176   : > { %v1630_v12 = vunpack.c.l.b16 %v1610_v2 }
 0x177   : > { %v905_v43 = vpop.f32.mrf.mxu2 }
 0x178   : > { %1151 = vmatpush.bf16.xpose.msra.mxu3 %v1139_v23  ;;  %v941_v46 = vpack.c.bf16 %v905_v43, %v905_v43  ;;  %v6817_v23 = vld [vmem:[#allocation6] sm:$0xff]   ;;  %v6864_v43 = vld [vmem:[#allocation6 + $0x8] sm:$0xff]  }
 0x179   : > { %v8123_v0 = vunpack.c.l.bf16 %v6817_v23  ;;  %v8131_v33 = vunpack.c.h.bf16 %v6817_v23 }
 0x17a   : > { %v1466_v52 = vunpack.c.l.b16 %v941_v46  ;;  %v8139_v46 = vunpack.c.l.bf16 %v6864_v43 }
 0x17b   : > { %v1583_v6 = vpop.permute.xlu1 %1582 }
 0x17c   : > { %v1611_v7 = vrot.slane %v1583_v6, 4  ;;  %v8118_v17 = vpack.c.b16 %v1466_v52, %v1465_v45 }
 0x17e   : > { %v1631_v13 = vunpack.c.l.b16 %v1611_v7  ;;  %1483 = vmatpush.bf16.msra.mxu1 %v8118_v17 }
 0x17f   : > { %6319 = vmatmul.msk.bf16.vlgmr.msra.gmra.mxu3 %vm1002_vm0, %v8101_v9  ;;  %v908_v2 = vpop.f32.mrf.mxu2 }
 0x180   : > { %1389 = vmatpush.bf16.msrb.mxu3 %v8089_v55  ;;  %v1633_v16 = vpack.c.b16 %v1631_v13, %v1630_v12  ;;  %v1585_v12 = vpop.permute.xlu2 %1584 }
 0x182   : > { %v1644_v26 = vsel %vm1002_vm0, %v1633_v16, 0  ;;  %1484 = vmatpush.bf16.msra.mxu1 %v8120_v63 }
 0x183   : > { %v8107_v34 = vpop.permute.xlu1 %1626 }
 0x184   : > { %1390 = vmatpush.bf16.msrb.mxu3 %v8095_v62 }
 0x187   : > { %v910_v35 = vpop.f32.mrf.mxu2 }
 0x188   : > { %1652 = vmatpush.bf16.xpose.msra.mxu3 %v1644_v26  ;;  %v1612_v26 = vrot.slane %v1585_v12, 4 }
 0x18b   : > { %v1587_v53 = vpop.permute.xlu0 %1586 }
 0x18c   : > { %v1613_v14 = vrot.slane %v1587_v53, 4 }
 0x18e   : > { %v1670_v36 = vunpack.c.l.b16 %v1613_v14 }
 0x18f   : > { %v8114_v41 = vpop.permute.xlu1 %1665  ;;  %6320 = vmatmul.msk.bf16.gmra.mxu3 %vm1002_vm0, %v8112_v39  ;;  %v913_v47 = vpop.f32.mrf.mxu2 }
 0x190   : > { %1653 = vmatpush.bf16.xpose.msra.mxu3 %v1641_v37  ;;  %v1669_v37 = vunpack.c.l.b16 %v1612_v26 }
 0x192   : > { %v1673_v40 = vpack.c.b16 %v1670_v36, %v1669_v37 }
 0x194   : > { %v1682_v49 = vsel %vm1002_vm0, %v1673_v40, 0 }
 0x197   : > { %v1589_v59 = vpop.permute.xlu1 %1588  ;;  %v915_v12 = vpop.f32.mrf.mxu2 }
 0x198   : > { %v1614_v6 = vrot.slane %v1589_v59, 4 }
 0x19a   : > { %v1671_v15 = vunpack.c.l.b16 %v1614_v6  ;;  %v943_v6 = vpack.c.bf16 %v908_v2, %v908_v2 }
 0x19b   : > { %v1591_v7 = vpop.permute.xlu0 %1590 }
 0x19c   : > { %v1615_v8 = vrot.slane %v1591_v7, 4  ;;  %v1024_v10 = vpop.f32.mrf.mxu0  ;;  %v945_v7 = vpack.c.bf16 %v910_v35, %v910_v35  ;;  %v1510_v36 = vunpack.c.l.b16 %v943_v6 }
 0x19d   : > { %v8127_v13 = vadd.f32 %v8123_v0, %v1024_v10  ;;  %v8147_v10 = vunpack.c.h.bf16 %v6864_v43 }
 0x19e   : > { %v1672_v16 = vunpack.c.l.b16 %v1615_v8  ;;  %v947_v8 = vpack.c.bf16 %v913_v47, %v913_v47 }
 0x19f   : > { %v1163_v20 = vsel %vm1002_vm0, %v8127_v13, -inf }
 0x1a0   : > { %v1674_v28 = vpack.c.b16 %v1672_v16, %v1671_v15  ;;  %1164 = vmax.xlane.f32.xlu0 %v1163_v20  ;;  %v1512_v15 = vunpack.c.l.b16 %v947_v8  ;;  %v949_v16 = vpack.c.bf16 %v915_v12, %v915_v12 }
 0x1a2   : > { %v1685_v19 = vsel %vm1002_vm0, %v1674_v28, 0  ;;  %v1513_v37 = vunpack.c.l.b16 %v949_v16 }
 0x1a3   : > { %1693 = vmatpush.bf16.xpose.msrb.mxu0 %v1685_v19  ;;  %v1599_v23 = vpop.permute.xlu2 %1598  ;;  %v1511_v19 = vunpack.c.l.b16 %v945_v7 }
 0x1a4   : > { %v1026_v38 = vpop.f32.mrf.mxu0  ;;  %v1619_v14 = vrot.slane %v1599_v23, 4  ;;  %v8152_v2 = vpack.c.b16 %v1513_v37, %v1512_v15 }
 0x1a5   : > { %v8135_v32 = vadd.f32 %v8131_v33, %v1026_v38  ;;  %v8156_v47 = vpack.c.b16 %v1511_v19, %v1510_v36 }
 0x1a6   : > { %v1713_v40 = vunpack.c.l.b16 %v1619_v14  ;;  %1530 = vmatpush.bf16.msra.mxu2 %v8152_v2 }
 0x1a7   : > { %v1166_v45 = vsel %vm1002_vm0, %v8135_v32, -inf }
 0x1a8   : > { %1167 = vmax.xlane.f32.xlu0 %v1166_v45 }
 0x1aa   : > { %1531 = vmatpush.bf16.msra.mxu2 %v8156_v47 }
 0x1ab   : > { %1694 = vmatpush.bf16.xpose.msrb.mxu0 %v1682_v49 }
 0x1ac   : > { %v1029_v52 = vpop.f32.mrf.mxu0 }
 0x1ad   : > { %v8143_v53 = vadd.f32 %v8139_v46, %v1029_v52 }
 0x1af   : > { %v1169_v59 = vsel %vm1002_vm0, %v8143_v53, -inf }
 0x1b0   : > { %1170 = vmax.xlane.f32.xlu1 %v1169_v59 }
 0x1b3   : > { %v1597_v20 = vpop.permute.xlu0 %1596 }
 0x1b4   : > { %v1618_v26 = vrot.slane %v1597_v20, 4  ;;  %v1031_v28 = vpop.f32.mrf.mxu0 }
 0x1b5   : > { %v8150_v38 = vadd.f32 %v8147_v10, %v1031_v28 }
 0x1b6   : > { %v1712_v45 = vunpack.c.l.b16 %v1618_v26 }
 0x1b7   : > { %v1172_v35 = vsel %vm1002_vm0, %v8150_v38, -inf }
 0x1b8   : > { %v1715_v43 = vpack.c.b16 %v1713_v40, %v1712_v45  ;;  %1173 = vmax.xlane.f32.xlu1 %v1172_v35 }
 0x1ba   : > { %v1726_v49 = vsel %vm1002_vm0, %v1715_v43, 0 }
 0x1bb   : > { %1734 = vmatpush.bf16.xpose.msrb.mxu1 %v1726_v49 }
 0x1bc   : > { %v1067_v52 = vpop.f32.mrf.mxu1  ;;  %1594 = vrot.lane.b32.xlu0 %v8037_v29, %s7709_s7 }
 0x1bd   : > { %v8179_v20 = vadd.f32 %v8123_v0, %v1067_v52 }
 0x1bf   : > { %v1175_v19 = vsel %vm1002_vm0, %v8179_v20, -inf }
 0x1c4   : > { %v1069_v23 = vpop.f32.mrf.mxu1 }
 0x1c5   : > { %v8164_v59 = vadd.f32 %v8131_v33, %v1069_v23 }
 0x1c7   : > { %v1178_v6 = vsel %vm1002_vm0, %v8164_v59, -inf }
 0x1c8   : > { %1179 = vmax.xlane.f32.xlu1 %v1178_v6 }
 0x1cc   : > { %v1072_v7 = vpop.f32.mrf.mxu1 }
 0x1cd   : > { %v8169_v8 = vadd.f32 %v8139_v46, %v1072_v7 }
 0x1cf   : > { %v1181_v12 = vsel %vm1002_vm0, %v8169_v8, -inf }
 0x1d0   : > { %1182 = vmax.xlane.f32.xlu1 %v1181_v12 }
 0x1d4   : > { %v1074_v14 = vpop.f32.mrf.mxu1 }
 0x1d5   : > { %v8174_v15 = vadd.f32 %v8147_v10, %v1074_v14 }
 0x1d7   : > { %v1184_v16 = vsel %vm1002_vm0, %v8174_v15, -inf }
 0x1d8   : > { %1185 = vmax.xlane.f32.xlu2 %v1184_v16 }
 0x1e2   : > { %v1110_v26 = vpop.f32.mrf.mxu2 }
 0x1e3   : > { %v8182_v28 = vadd.f32 %v8123_v0, %v1110_v26  ;;  %v8210_v26 = vpop.permute.xlu1 %1667 }
 0x1e5   : > { %v1187_v36 = vsel %vm1002_vm0, %v8182_v28, -inf }
 0x1e6   : > { %1188 = vmax.xlane.f32.xlu2 %v1187_v36  ;;  %1176 = vmax.xlane.f32.xlu0 %v1175_v19 }
 0x1ea   : > { %v1112_v37 = vpop.f32.mrf.mxu2 }
 0x1eb   : > { %v8189_v40 = vadd.f32 %v8131_v33, %v1112_v37 }
 0x1ed   : > { %v1190_v45 = vsel %vm1002_vm0, %v8189_v40, -inf }
 0x1ee   : > { %1191 = vmax.xlane.f32.xlu1 %v1190_v45  ;;  %v1593_v45 = vpop.permute.xlu1 %1592 }
 0x1f2   : > { %v1115_v35 = vpop.f32.mrf.mxu2 }
 0x1f3   : > { %v8194_v43 = vadd.f32 %v8139_v46, %v1115_v35 }
 0x1f5   : > { %v1193_v49 = vsel %vm1002_vm0, %v8194_v43, -inf }
 0x1f6   : > { %1194 = vmax.xlane.f32.xlu0 %v1193_v49 }
 0x1fa   : > { %v1117_v52 = vpop.f32.mrf.mxu2 }
 0x1fb   : > { %v8199_v23 = vadd.f32 %v8147_v10, %v1117_v52 }
 0x1fd   : > { %v1196_v6 = vsel %vm1002_vm0, %v8199_v23, -inf }
 0x1fe   : > { %1197 = vmax.xlane.f32.xlu2 %v1196_v6 }
 0x202   : > { %v1153_v7 = vpop.f32.mrf.mxu3 }
 0x203   : > { %v8204_v12 = vadd.f32 %v8123_v0, %v1153_v7 }
 0x205   : > { %v1199_v14 = vsel %vm1002_vm0, %v8204_v12, -inf }
 0x206   : > { %1200 = vmax.xlane.f32.xlu0 %v1199_v14 }
 0x207   : > { %1602 = vrot.lane.b32.xlu1 %v8065_v4, %s7709_s7  ;;  %v8226_v4 = vpop.permute.xlu1 %1604 }
 0x20a   : > { %v1155_v16 = vpop.f32.mrf.mxu3 }
 0x20b   : > { %v8213_v36 = vadd.f32 %v8131_v33, %v1155_v16 }
 0x20d   : > { %v1202_v19 = vsel %vm1002_vm0, %v8213_v36, -inf }
 0x20e   : > { %1203 = vmax.xlane.f32.xlu2 %v1202_v19 }
 0x212   : > { %v1158_v37 = vpop.f32.mrf.mxu3 }
 0x213   : > { %v8218_v35 = vadd.f32 %v8139_v46, %v1158_v37  ;;  %v1165_v49 = vpop.xlane.xlu0 %1164 }
 0x214   : > { %v1211_v52 = vsub.f32 %v8127_v13, %v1165_v49 }
 0x215   : > { %v1205_v6 = vsel %vm1002_vm0, %v8218_v35, -inf }
 0x216   : > { %1206 = vmax.xlane.f32.xlu0 %v1205_v6  ;;  %v1227_v7 = vmul.f32 1.442695, %v1211_v52 }
 0x218   : > { %6986 = vpow2.f32 %v1227_v7 }
 0x21a   : > { %v1160_v14 = vpop.f32.mrf.mxu3 }
 0x21b   : > { %v8224_v16 = vadd.f32 %v8147_v10, %v1160_v14  ;;  %v1168_v19 = vpop.xlane.xlu0 %1167 }
 0x21c   : > { %v1212_v61 = vsub.f32 %v8135_v32, %v1168_v19  ;;  %v1616_v19 = vrot.slane %v1593_v45, 4 }
 0x21d   : > { %v1208_v37 = vsel %vm1002_vm0, %v8224_v16, -inf }
 0x21e   : > { %1209 = vmax.xlane.f32.xlu2 %v1208_v37  ;;  %v1229_v13 = vmul.f32 1.442695, %v1212_v61  ;;  %v8231_v49 = vpop.eup %6986 }
 0x21f   : > { %v1259_v6 = vsel %vm1002_vm0, %v8231_v49, 0.0 }
 0x220   : > { %6988 = vpow2.f32 %v1229_v13 }
 0x223   : > { %v1171_v29 = vpop.xlane.xlu1 %1170 }
 0x224   : > { %v1213_v52 = vsub.f32 %v8143_v53, %v1171_v29  ;;  %v1710_v29 = vunpack.c.l.b16 %v1616_v19 }
 0x226   : > { %1260 = vadd.xlane.f32.xlu2 %v1259_v6  ;;  %v1231_v14 = vmul.f32 1.442695, %v1213_v52  ;;  %v8236_v31 = vpop.eup %6988 }
 0x227   : > { %v1262_v61 = vsel %vm1002_vm0, %v8236_v31, 0.0 }
 0x228   : > { %6990 = vpow2.f32 %v1231_v14 }
 0x22b   : > { %v1174_v7 = vpop.xlane.xlu1 %1173 }
 0x22c   : > { %v1214_v32 = vsub.f32 %v8150_v38, %v1174_v7 }
 0x22e   : > { %v1233_v37 = vmul.f32 1.442695, %v1214_v32  ;;  %v1595_v11 = vpop.permute.xlu0 %1594  ;;  %1263 = vadd.xlane.f32.xlu2 %v1262_v61  ;;  %v8241_v1 = vpop.eup %6990 }
 0x22f   : > { %v1617_v13 = vrot.slane %v1595_v11, 4  ;;  %v1265_v14 = vsel %vm1002_vm0, %v8241_v1, 0.0 }
 0x230   : > { %6992 = vpow2.f32 %v1233_v37 }
 0x231   : > { %v1711_v53 = vunpack.c.l.b16 %v1617_v13 }
 0x233   : > { %v1714_v52 = vpack.c.b16 %v1711_v53, %v1710_v29 }
 0x235   : > { %v1723_v6 = vsel %vm1002_vm0, %v1714_v52, 0 }
 0x236   : > { %v8246_v38 = vpop.eup %6992  ;;  %1735 = vmatpush.bf16.xpose.msrb.mxu1 %v1723_v6  ;;  %1266 = vadd.xlane.f32.xlu2 %v1265_v14 }
 0x237   : > { %v1268_v45 = vsel %vm1002_vm0, %v8246_v38, 0.0 }
 0x238   : > { %1269 = vadd.xlane.f32.xlu0 %v1268_v45 }
 0x23b   : > { %v1180_v11 = vpop.xlane.xlu1 %1179 }
 0x23c   : > { %v1216_v7 = vsub.f32 %v8164_v59, %v1180_v11 }
 0x23e   : > { %v1237_v32 = vmul.f32 1.442695, %v1216_v7 }
 0x240   : > { %6994 = vpow2.f32 %v1237_v32 }
 0x243   : > { %v1183_v37 = vpop.xlane.xlu1 %1182 }
 0x244   : > { %v1217_v52 = vsub.f32 %v8169_v8, %v1183_v37 }
 0x246   : > { %v8251_v19 = vpop.eup %6994  ;;  %v1239_v59 = vmul.f32 1.442695, %v1217_v52 }
 0x247   : > { %v1274_v61 = vsel %vm1002_vm0, %v8251_v19, 0.0 }
 0x248   : > { %1275 = vadd.xlane.f32.xlu2 %v1274_v61 }
 0x24b   : > { %v1186_v6 = vpop.xlane.xlu2 %1185 }
 0x259   : > { %v1177_v13 = vpop.xlane.xlu0 %1176  ;;  %v1189_v32 = vpop.xlane.xlu2 %1188 }
 0x25a   : > { %v1215_v29 = vsub.f32 %v8179_v20, %v1177_v13 }
 0x25c   : > { %v1235_v53 = vmul.f32 1.442695, %v1215_v29 }
 0x25e   : > { %6996 = vpow2.f32 %v1235_v53 }
 0x25f   : > { %6998 = vpow2.f32 %v1239_v59 }
 0x260   : > { %1600 = vrot.lane.b32.xlu2 %v8063_v3, %s7709_s7 }
 0x261   : > { %v1192_v14 = vpop.xlane.xlu1 %1191 }
 0x262   : > { %v1220_v45 = vsub.f32 %v8189_v40, %v1192_v14 }
 0x264   : > { %v1245_v11 = vmul.f32 1.442695, %v1220_v45  ;;  %v8260_v7 = vpop.eup %6996 }
 0x265   : > { %v1271_v20 = vsel %vm1002_vm0, %v8260_v7, 0.0  ;;  %v8265_v37 = vpop.eup %6998 }
 0x266   : > { %7000 = vpow2.f32 %v1245_v11  ;;  %1272 = vadd.xlane.f32.xlu0 %v1271_v20  ;;  %v1277_v53 = vsel %vm1002_vm0, %v8265_v37, 0.0  ;;  %v1218_v11 = vsub.f32 %v8174_v15, %v1186_v6 }
 0x268   : > { %v1241_v20 = vmul.f32 1.442695, %v1218_v11 }
 0x269   : > { %v1195_v8 = vpop.xlane.xlu0 %1194 }
 0x26a   : > { %v1221_v61 = vsub.f32 %v8194_v43, %v1195_v8 }
 0x26c   : > { %v8267_v13 = vpop.eup %7000  ;;  %v1247_v29 = vmul.f32 1.442695, %v1221_v61 }
 0x26d   : > { %v1286_v40 = vsel %vm1002_vm0, %v8267_v13, 0.0 }
 0x26e   : > { %7002 = vpow2.f32 %v1247_v29  ;;  %1287 = vadd.xlane.f32.xlu1 %v1286_v40  ;;  %1278 = vadd.xlane.f32.xlu0 %v1277_v53 }
 0x271   : > { %v1198_v52 = vpop.xlane.xlu2 %1197 }
 0x272   : > { %v1222_v59 = vsub.f32 %v8199_v23, %v1198_v52  ;;  %v1219_v23 = vsub.f32 %v8182_v28, %v1189_v32 }
 0x274   : > { %v8274_v14 = vpop.eup %7002  ;;  %v1249_v43 = vmul.f32 1.442695, %v1222_v59  ;;  %v1243_v29 = vmul.f32 1.442695, %v1219_v23 }
 0x275   : > { %v1289_v45 = vsel %vm1002_vm0, %v8274_v14, 0.0 }
 0x276   : > { %7004 = vpow2.f32 %v1249_v43  ;;  %1290 = vadd.xlane.f32.xlu1 %v1289_v45 }
 0x277   : > { %7006 = vpow2.f32 %v1241_v20 }
 0x278   : > { %7008 = vpow2.f32 %v1243_v29 }
 0x279   : > { %v1201_v45 = vpop.xlane.xlu0 %1200 }
 0x27a   : > { %v1223_v20 = vsub.f32 %v8204_v12, %v1201_v45 }
 0x27c   : > { %v8279_v8 = vpop.eup %7004 }
 0x27d   : > { %v1292_v61 = vsel %vm1002_vm0, %v8279_v8, 0.0  ;;  %v8286_v53 = vpop.eup %7006 }
 0x27e   : > { %1293 = vadd.xlane.f32.xlu1 %v1292_v61  ;;  %v1280_v6 = vsel %vm1002_vm0, %v8286_v53, 0.0  ;;  %v8291_v59 = vpop.eup %7008  ;;  %v1251_v61 = vmul.f32 1.442695, %v1223_v20 }
 0x27f   : > { %v1283_v28 = vsel %vm1002_vm0, %v8291_v59, 0.0 }
 0x281   : > { %v1204_v40 = vpop.xlane.xlu2 %1203 }
 0x282   : > { %1606 = vrot.lane.b32.xlu0 %v8067_v5, %s7709_s7  ;;  %v1224_v15 = vsub.f32 %v8213_v36, %v1204_v40 }
 0x284   : > { %v1253_v52 = vmul.f32 1.442695, %v1224_v15 }
 0x286   : > { %7010 = vpow2.f32 %v1253_v52 }
 0x289   : > { %1281 = vadd.xlane.f32.xlu2 %v1280_v6  ;;  %v1207_v23 = vpop.xlane.xlu0 %1206 }
 0x28a   : > { %v1225_v15 = vsub.f32 %v8218_v35, %v1207_v23 }
 0x28c   : > { %v8295_v43 = vpop.eup %7010  ;;  %v1255_v52 = vmul.f32 1.442695, %v1225_v15 }
 0x28d   : > { %v1298_v36 = vsel %vm1002_vm0, %v8295_v43, 0.0 }
 0x291   : > { %1284 = vadd.xlane.f32.xlu2 %v1283_v28  ;;  %v1210_v32 = vpop.xlane.xlu2 %1209 }
 0x297   : > { %1708 = vrot.lane.b32.xlu1 %v8076_v25, %s7709_s7 }
 0x299   : > { %1299 = vadd.xlane.f32.xlu2 %v1298_v36  ;;  %v1261_v11 = vpop.xlane.xlu2 %1260 }
 0x29a   : > { %7012 = vrcp.f32 %v1261_v11 }
 0x29f   : > { %2247 = vrot.lane.b32.xlu1 %v7967_v30, %s7710_s13 }
 0x2a0   : > { %v7013_v40 = vpop.eup %7012 }
 0x2a1   : > { %v1264_v29 = vpop.xlane.xlu2 %1263  ;;  %v1323_v6 = vmul.f32 %v7013_v40, %v8231_v49 }
 0x2a2   : > { %7014 = vrcp.f32 %v1264_v29 }
 0x2a3   : > { %7016 = vpow2.f32 %v1251_v61  ;;  %v1339_v45 = vpack.c.bf16 %v1323_v6, %v1323_v6 }
 0x2a4   : > { %7018 = vpow2.f32 %v1255_v52 }
 0x2a5   : > { %v1359_v49 = vunpack.c.l.b16 %v1339_v45 }
 0x2a7   : > { %2289 = vrot.lane.b32.xlu1 %v7959_v24, %s7710_s13 }
 0x2a8   : > { %v7015_v12 = vpop.eup %7014 }
 0x2a9   : > { %v8308_v28 = vpop.eup %7016  ;;  %v1324_v36 = vmul.f32 %v7015_v12, %v8236_v31  ;;  %v1267_v11 = vpop.xlane.xlu2 %1266 }
 0x2aa   : > { %7020 = vrcp.f32 %v1267_v11  ;;  %v1295_v35 = vsel %vm1002_vm0, %v8308_v28, 0.0  ;;  %v8315_v29 = vpop.eup %7018 }
 0x2ab   : > { %v1340_v20 = vpack.c.bf16 %v1324_v36, %v1324_v36  ;;  %v1270_v25 = vpop.xlane.xlu0 %1269  ;;  %v1301_v15 = vsel %vm1002_vm0, %v8315_v29, 0.0 }
 0x2ac   : > { %7022 = vrcp.f32 %v1270_v25  ;;  %1296 = vadd.xlane.f32.xlu0 %v1295_v35 }
 0x2ad   : > { %v1360_v61 = vunpack.c.l.b16 %v1340_v20 }
 0x2af   : > { %2033 = vrot.lane.b32.xlu1 %v8087_v51, %s7709_s7  ;;  %v1363_v23 = vpack.c.b16 %v1360_v61, %v1359_v49 }
 0x2b0   : > { %v7021_v40 = vpop.eup %7020 }
 0x2b1   : > { %1747 = vrot.lane.b32.xlu2 %v8101_v9, %s7709_s7  ;;  %6321 = vmatmul.msk.bf16.vlgmr.msrb.gmra.mxu3 %vm1002_vm0, %v1363_v23  ;;  %v1325_v6 = vmul.f32 %v7021_v40, %v8241_v1  ;;  %v1226_v1 = vsub.f32 %v8224_v16, %v1210_v32 }
 0x2b2   : > { %v7023_v31 = vpop.eup %7022 }
 0x2b3   : > { %v1326_v25 = vmul.f32 %v7023_v31, %v8246_v38  ;;  %v1341_v12 = vpack.c.bf16 %v1325_v6, %v1325_v6  ;;  %v1257_v20 = vmul.f32 1.442695, %v1226_v1 }
 0x2b4   : > { %1302 = vadd.xlane.f32.xlu0 %v1301_v15 }
 0x2b5   : > { %v1342_v52 = vpack.c.bf16 %v1326_v25, %v1326_v25  ;;  %v1361_v36 = vunpack.c.l.b16 %v1341_v12  ;;  %v1603_v25 = vpop.permute.xlu1 %1602 }
 0x2b7   : > { %2031 = vrot.lane.b32.xlu1 %v8091_v56, %s7709_s7  ;;  %v1362_v45 = vunpack.c.l.b16 %v1342_v52 }
 0x2b9   : > { %1990 = vrot.lane.b32.xlu2 %v8095_v62, %s7709_s7  ;;  %v1364_v38 = vpack.c.b16 %v1362_v45, %v1361_v36 }
 0x2bb   : > { %v1276_v11 = vpop.xlane.xlu2 %1275 }
 0x2bc   : > { %7024 = vrcp.f32 %v1276_v11 }
 0x2bd   : > { %7026 = vpow2.f32 %v1257_v20 }
 0x2bf   : > { %2249 = vrot.lane.b32.xlu1 %v7977_v42, %s7710_s13 }
 0x2c1   : > { %6322 = vmatmul.msk.bf16.gmra.mxu3 %vm1002_vm0, %v1364_v38 }
 0x2c2   : > { %v7025_v49 = vpop.eup %7024 }
 0x2c3   : > { %v8344_v61 = vpop.eup %7026  ;;  %v1328_v16 = vmul.f32 %v7025_v49, %v8251_v19  ;;  %v1601_v45 = vpop.permute.xlu2 %1600 }
 0x2c4   : > { %v1620_v11 = vrot.slane %v1601_v45, 4 }
 0x2c5   : > { %v1344_v23 = vpack.c.bf16 %v1328_v16, %v1328_v16 }
 0x2c6   : > { %v1751_v16 = vunpack.c.l.b16 %v1620_v11 }
 0x2c7   : > { %2072 = vrot.lane.b32.xlu1 %v8120_v63, %s7709_s7  ;;  %v1407_v15 = vunpack.c.l.b16 %v1344_v23 }
 0x2c8   : > { %1706 = vrot.lane.b32.xlu0 %v8054_v58, %s7709_s7 }
 0x2cf   : > { %2115 = vrot.lane.b32.xlu1 %v8152_v2, %s7709_s7 }
 0x2d0   : > { %1749 = vrot.lane.b32.xlu0 %v8112_v39, %s7709_s7 }
 0x2d1   : > { %6329 = vmatmul.msk.bf16.vlgmr.msra.gmra.mxu3 %vm1002_vm0, %v8085_v48  ;;  %v1304_v48 = vsel %vm1002_vm0, %v8344_v61, 0.0 }
 0x2d8   : > { %1992 = vrot.lane.b32.xlu0 %v8089_v55, %s7709_s7 }
 0x2d9   : > { %v1273_v35 = vpop.xlane.xlu0 %1272 }
 0x2da   : > { %7028 = vrcp.f32 %v1273_v35  ;;  %v1621_v35 = vrot.slane %v1603_v25, 4 }
 0x2dc   : > { %v1752_v23 = vunpack.c.l.b16 %v1621_v35 }
 0x2e0   : > { %v7029_v32 = vpop.eup %7028  ;;  %2241 = vrot.lane.b32.xlu0 %v7949_v18, %s7710_s13 }
 0x2e1   : > { %6330 = vmatmul.msk.bf16.gmra.mxu3 %vm1002_vm0, %v8107_v34  ;;  %v1327_v40 = vmul.f32 %v7029_v32, %v8260_v7  ;;  %v1288_v19 = vpop.xlane.xlu1 %1287  ;;  %v1279_v12 = vpop.xlane.xlu0 %1278  ;;  %v1622_v34 = vrot.slane %v8226_v4, 4 }
 0x2e2   : > { %1305 = vadd.xlane.f32.xlu2 %v1304_v48  ;;  %7030 = vrcp.f32 %v1279_v12 }
 0x2e3   : > { %v1343_v31 = vpack.c.bf16 %v1327_v40, %v1327_v40  ;;  %v1753_v1 = vunpack.c.l.b16 %v1622_v34  ;;  %v1755_v40 = vpack.c.b16 %v1752_v23, %v1751_v16 }
 0x2e5   : > { %v1406_v6 = vunpack.c.l.b16 %v1343_v31 }
 0x2e7   : > { %v1410_v52 = vpack.c.b16 %v1407_v15, %v1406_v6 }
 0x2e8   : > { %2253 = vrot.lane.b32.xlu0 %v7999_v57, %s7710_s13  ;;  %v7031_v48 = vpop.eup %7030 }
 0x2e9   : > { %6323 = vmatmul.msk.bf16.vlgmr.msra.gmra.mxu0 %vm1002_vm0, %v1410_v52  ;;  %v1291_v38 = vpop.xlane.xlu1 %1290  ;;  %v1329_v31 = vmul.f32 %v7031_v48, %v8265_v37  ;;  %v1764_v52 = vsel %vm1002_vm0, %v1755_v40, 0 }
 0x2eb   : > { %v1345_v34 = vpack.c.bf16 %v1329_v31, %v1329_v31 }
 0x2f0   : > { %2251 = vrot.lane.b32.xlu0 %v7986_v50, %s7710_s13 }
 0x2f1   : > { %v1294_v15 = vpop.xlane.xlu1 %1293 }
 0x2f4   : > { %v1607_v7 = vpop.permute.xlu0 %1606 }
 0x2f5   : > { %v1623_v36 = vrot.slane %v1607_v7, 4 }
 0x2f7   : > { %v1754_v20 = vunpack.c.l.b16 %v1623_v36  ;;  %v1408_v36 = vunpack.c.l.b16 %v1345_v34 }
 0x2f8   : > { %2330 = vrot.lane.b32.xlu0 %v7993_v54, %s7710_s13 }
 0x2f9   : > { %v1756_v49 = vpack.c.b16 %v1754_v20, %v1753_v1 }
 0x2fa   : > { %2245 = vrot.lane.b32.xlu2 %v7963_v27, %s7710_s13 }
 0x2fb   : > { %v1767_v4 = vsel %vm1002_vm0, %v1756_v49, 0 }
 0x2fc   : > { %v1282_v32 = vpop.xlane.xlu2 %1281  ;;  %1775 = vmatpush.bf16.xpose.msrb.mxu2 %v1767_v4 }
 0x2fd   : > { %7032 = vrcp.f32 %v1282_v32 }
 0x2fe   : > { %7034 = vrcp.f32 %v1288_v19 }
 0x302   : > { %2243 = vrot.lane.b32.xlu2 %v7953_v21, %s7710_s13 }
 0x303   : > { %v7033_v25 = vpop.eup %7032 }
 0x304   : > { %v1285_v6 = vpop.xlane.xlu2 %1284  ;;  %v1330_v12 = vmul.f32 %v7033_v25, %v8286_v53  ;;  %v7035_v45 = vpop.eup %7034  ;;  %1776 = vmatpush.bf16.xpose.msrb.mxu2 %v1764_v52 }
 0x305   : > { %7036 = vrcp.f32 %v1285_v6  ;;  %v1332_v19 = vmul.f32 %v7035_v45, %v8267_v13 }
 0x306   : > { %v1346_v7 = vpack.c.bf16 %v1330_v12, %v1330_v12  ;;  %7038 = vrcp.f32 %v1294_v15 }
 0x307   : > { %v1348_v35 = vpack.c.bf16 %v1332_v19, %v1332_v19  ;;  %7040 = vrcp.f32 %v1291_v38 }
 0x308   : > { %v1409_v1 = vunpack.c.l.b16 %v1346_v7 }
 0x309   : > { %v8371_v37 = vpop.permute.xlu1 %1708  ;;  %v1454_v16 = vunpack.c.l.b16 %v1348_v35 }
 0x30a   : > { %2291 = vrot.lane.b32.xlu2 %v7980_v44, %s7710_s13  ;;  %v1411_v11 = vpack.c.b16 %v1409_v1, %v1408_v36 }
 0x30b   : > { %v7037_v20 = vpop.eup %7036 }
 0x30c   : > { %v1331_v49 = vmul.f32 %v7037_v20, %v8291_v59  ;;  %6324 = vmatmul.msk.bf16.gmra.mxu0 %vm1002_vm0, %v1411_v11  ;;  %v7039_v48 = vpop.eup %7038  ;;  %v1300_v59 = vpop.xlane.xlu2 %1299 }
 0x30d   : > { %v7041_v23 = vpop.eup %7040  ;;  %v1334_v40 = vmul.f32 %v7039_v48, %v8279_v8  ;;  %7042 = vrcp.f32 %v1300_v59 }
 0x30e   : > { %v1347_v53 = vpack.c.bf16 %v1331_v49, %v1331_v49  ;;  %v1333_v31 = vmul.f32 %v7041_v23, %v8274_v14 }
 0x30f   : > { %v1350_v38 = vpack.c.bf16 %v1334_v40, %v1334_v40 }
 0x310   : > { %v1453_v32 = vunpack.c.l.b16 %v1347_v53  ;;  %v1349_v25 = vpack.c.bf16 %v1333_v31, %v1333_v31 }
 0x311   : > { %v8377_v13 = vpop.permute.xlu1 %2247  ;;  %v1456_v6 = vunpack.c.l.b16 %v1350_v38 }
 0x312   : > { %v1457_v4 = vpack.c.b16 %v1454_v16, %v1453_v32  ;;  %2255 = vrot.lane.b32.xlu2 %v8004_v60, %s7710_s13  ;;  %v1455_v12 = vunpack.c.l.b16 %v1349_v25 }
 0x313   : > { %v7043_v34 = vpop.eup %7042 }
 0x314   : > { %6325 = vmatmul.msk.bf16.vlgmr.msra.gmra.mxu1 %vm1002_vm0, %v1457_v4  ;;  %v1458_v45 = vpack.c.b16 %v1456_v6, %v1455_v12  ;;  %v1336_v14 = vmul.f32 %v7043_v34, %v8295_v43  ;;  %v8403_v23 = vpop.permute.xlu2 %1747 }
 0x316   : > { %v1352_v19 = vpack.c.bf16 %v1336_v14, %v1336_v14 }
 0x319   : > { %v8384_v15 = vpop.permute.xlu1 %2289 }
 0x31a   : > { %2074 = vrot.lane.b32.xlu2 %v8118_v17, %s7709_s7 }
 0x31c   : > { %6331 = vmatmul.msk.bf16.vlgmr.msrb.gmra.mxu0 %vm1002_vm0, %v8114_v41  ;;  %v1501_v41 = vunpack.c.l.b16 %v1352_v19  ;;  %v1991_v6 = vpop.permute.xlu2 %1990  ;;  %v2276_v19 = vrot.slane %v8377_v13, 4 }
 0x31f   : > { %v1297_v52 = vpop.xlane.xlu0 %1296 }
 0x320   : > { %7044 = vrcp.f32 %v1297_v52 }
 0x321   : > { %v2034_v8 = vpop.permute.xlu1 %2033 }
 0x322   : > { %2049 = vmatpush.bf16.msra.mxu0 %v2034_v8 }
 0x324   : > { %6326 = vmatmul.msk.bf16.gmra.mxu1 %vm1002_vm0, %v1458_v45 }
 0x326   : > { %v7045_v7 = vpop.eup %7044 }
 0x327   : > { %v1335_v36 = vmul.f32 %v7045_v7, %v8308_v28  ;;  %v1303_v43 = vpop.xlane.xlu0 %1302 }
 0x328   : > { %7046 = vrcp.f32 %v1303_v43 }
 0x329   : > { %v2032_v1 = vpop.permute.xlu1 %2031  ;;  %v1351_v11 = vpack.c.bf16 %v1335_v36, %v1335_v36 }
 0x32a   : > { %2050 = vmatpush.bf16.msra.mxu0 %v2032_v1 }
 0x32b   : > { %v1500_v20 = vunpack.c.l.b16 %v1351_v11 }
 0x32c   : > { %6332 = vmatmul.msk.bf16.gmra.mxu0 %vm1002_vm0, %v8210_v26 }
 0x32d   : > { %v1504_v35 = vpack.c.b16 %v1501_v41, %v1500_v20 }
 0x32e   : > { %v7047_v45 = vpop.eup %7046 }
 0x32f   : > { %6327 = vmatmul.msk.bf16.vlgmr.msra.gmra.mxu2 %vm1002_vm0, %v1504_v35 }
 0x331   : > { %v8396_v49 = vpop.permute.xlu1 %2249 }
 0x334   : > { %v1392_v53 = vpop.f32.mrf.mxu3 }
 0x335   : > { %v1543_v16 = vpack.c.bf16 %v1392_v53, %v1392_v53 }
 0x337   : > { %1560 = vst.msk [vmem:[#allocation2] sm:$0xf] %vm1559_vm1, %v1543_v16  ;;  %v2296_v16 = vunpack.c.l.b16 %v2276_v19 }
 0x339   : > { %v8399_v28 = vpop.permute.xlu1 %2072 }
 0x33a   : > { %v1707_v32 = vpop.permute.xlu0 %1706 }
 0x33b   : > { %6333 = vmatmul.msk.bf16.vlgmr.msrb.gmra.mxu1 %vm1002_vm0, %v1707_v32 }
 0x33c   : > { %v1394_v4 = vpop.f32.mrf.mxu3 }
 0x33d   : > { %v1544_v48 = vpack.c.bf16 %v1394_v4, %v1394_v4 }
 0x33f   : > { %1561 = vst.msk [vmem:[#allocation2 + $0x4] sm:$0xf] %vm1559_vm1, %v1544_v48 }
 0x341   : > { %v2116_v26 = vpop.permute.xlu1 %2115 }
 0x342   : > { %2131 = vmatpush.bf16.msra.mxu2 %v2116_v26  ;;  %v8405_v40 = vpop.permute.xlu0 %1749 }
 0x344   : > { %v1397_v59 = vpop.f32.mrf.mxu3 }
 0x345   : > { %v1545_v31 = vpack.c.bf16 %v1397_v59, %v1397_v59 }
 0x347   : > { %1562 = vst.msk [vmem:[#allocation2 + $0x8] sm:$0xf] %vm1559_vm1, %v1545_v31 }
 0x34a   : > { %v1993_v38 = vpop.permute.xlu0 %1992 }
 0x34b   : > { %6334 = vmatmul.msk.bf16.gmra.mxu1 %vm1002_vm0, %v8371_v37  ;;  %2008 = vmatpush.bf16.msrb.mxu3 %v1993_v38  ;;  %v1337_v37 = vmul.f32 %v7047_v45, %v8315_v29 }
 0x34c   : > { %v1399_v25 = vpop.f32.mrf.mxu3 }
 0x34d   : > { %v1546_v52 = vpack.c.bf16 %v1399_v25, %v1399_v25  ;;  %v1353_v20 = vpack.c.bf16 %v1337_v37, %v1337_v37 }
 0x34f   : > { %1563 = vst.msk [vmem:[#allocation2 + $0xc] sm:$0xf] %vm1559_vm1, %v1546_v52  ;;  %2009 = vmatpush.bf16.msrb.mxu3 %v1991_v6  ;;  %v1502_v4 = vunpack.c.l.b16 %v1353_v20 }
 0x352   : > { %v2242_v29 = vpop.permute.xlu0 %2241 }
 0x353   : > { %v2273_v59 = vrot.slane %v2242_v29, 4 }
 0x354   : > { %v1655_v12 = vpop.f32.mrf.mxu3 }
 0x355   : > { %v8412_v34 = vadd.f32 %v8123_v0, %v1655_v12  ;;  %v1306_v8 = vpop.xlane.xlu2 %1305 }
 0x356   : > { %7048 = vrcp.f32 %v1306_v8  ;;  %v2293_v8 = vunpack.c.l.b16 %v2273_v59 }
 0x357   : > { %v1788_v14 = vsel %vm1002_vm0, %v8412_v34, -inf }
 0x358   : > { %1789 = vmax.xlane.f32.xlu2 %v1788_v14 }
 0x35c   : > { %v7049_v7 = vpop.eup %7048  ;;  %v1657_v36 = vpop.f32.mrf.mxu3 }
 0x35d   : > { %v8419_v1 = vadd.f32 %v8131_v33, %v1657_v36  ;;  %v2246_v11 = vpop.permute.xlu2 %2245  ;;  %v1338_v41 = vmul.f32 %v7049_v7, %v8344_v61  ;;  %v2254_v7 = vpop.permute.xlu0 %2253 }
 0x35e   : > { %v2275_v35 = vrot.slane %v2246_v11, 4 }
 0x35f   : > { %v1791_v43 = vsel %vm1002_vm0, %v8419_v1, -inf  ;;  %v1354_v53 = vpack.c.bf16 %v1338_v41, %v1338_v41 }
 0x360   : > { %v2295_v32 = vunpack.c.l.b16 %v2275_v35  ;;  %1792 = vmax.xlane.f32.xlu1 %v1791_v43 }
 0x361   : > { %v1503_v48 = vunpack.c.l.b16 %v1354_v53  ;;  %v2279_v53 = vrot.slane %v2254_v7, 4 }
 0x362   : > { %v2298_v13 = vpack.c.b16 %v2296_v16, %v2295_v32 }
 0x363   : > { %v1505_v26 = vpack.c.b16 %v1503_v48, %v1502_v4  ;;  %v2336_v4 = vunpack.c.l.b16 %v2279_v53 }
 0x364   : > { %v1660_v31 = vpop.f32.mrf.mxu3  ;;  %v2309_v38 = vsel %vm1002_vm0, %v2298_v13, 0 }
 0x365   : > { %v8426_v61 = vadd.f32 %v8139_v46, %v1660_v31  ;;  %v2244_v25 = vpop.permute.xlu2 %2243  ;;  %6328 = vmatmul.msk.bf16.gmra.mxu2 %vm1002_vm0, %v1505_v26  ;;  %2317 = vmatpush.bf16.xpose.msra.mxu3 %v2309_v38  ;;  %v2252_v16 = vpop.permute.xlu0 %2251  ;;  %v2277_v26 = vrot.slane %v8396_v49, 4 }
 0x366   : > { %v2274_v6 = vrot.slane %v2244_v25, 4  ;;  %v1439_v52 = vpop.f32.mrf.mxu0  ;;  %v2278_v48 = vrot.slane %v2252_v16, 4 }
 0x367   : > { %v1794_v12 = vsel %vm1002_vm0, %v8426_v61, -inf  ;;  %v1547_v14 = vpack.c.bf16 %v1439_v52, %v1439_v52 }
 0x368   : > { %v2294_v45 = vunpack.c.l.b16 %v2274_v6  ;;  %1795 = vmax.xlane.f32.xlu0 %v1794_v12  ;;  %v2335_v31 = vunpack.c.l.b16 %v2278_v48  ;;  %v2334_v6 = vunpack.c.l.b16 %v2277_v26 }
 0x369   : > { %1564 = vst.msk [vmem:[#allocation2 + $0x10] sm:$0xf] %vm1559_vm1, %v1547_v14 }
 0x36a   : > { %v2297_v37 = vpack.c.b16 %v2294_v45, %v2293_v8  ;;  %v2338_v52 = vpack.c.b16 %v2335_v31, %v2334_v6 }
 0x36c   : > { %v1662_v19 = vpop.f32.mrf.mxu3  ;;  %v2306_v36 = vsel %vm1002_vm0, %v2297_v37, 0  ;;  %v2347_v12 = vsel %vm1002_vm0, %v2338_v52, 0 }
 0x36d   : > { %v8434_v11 = vadd.f32 %v8147_v10, %v1662_v19  ;;  %v8436_v41 = vpop.permute.xlu2 %2291  ;;  %2318 = vmatpush.bf16.xpose.msra.mxu3 %v2306_v36 }
 0x36e   : > { %v1441_v20 = vpop.f32.mrf.mxu0 }
 0x36f   : > { %v1797_v35 = vsel %vm1002_vm0, %v8434_v11, -inf  ;;  %v1548_v43 = vpack.c.bf16 %v1441_v20, %v1441_v20 }
 0x370   : > { %1798 = vmax.xlane.f32.xlu2 %v1797_v35 }
 0x371   : > { %1565 = vst.msk [vmem:[#allocation2 + $0x14] sm:$0xf] %vm1559_vm1, %v1548_v43 }
 0x375   : > { %v2256_v32 = vpop.permute.xlu2 %2255  ;;  %6335 = vmatmul.msk.bf16.vlgmr.msrb.gmra.mxu2 %vm1002_vm0, %v8403_v23 }
 0x376   : > { %v2280_v29 = vrot.slane %v2256_v32, 4 }
 0x378   : > { %v2337_v13 = vunpack.c.l.b16 %v2280_v29 }
 0x37a   : > { %v2339_v59 = vpack.c.b16 %v2337_v13, %v2336_v4 }
 0x37c   : > { %v2350_v38 = vsel %vm1002_vm0, %v2339_v59, 0 }
 0x37d   : > { %v2075_v25 = vpop.permute.xlu2 %2074  ;;  %2358 = vmatpush.bf16.xpose.msrb.mxu0 %v2350_v38 }
 0x37e   : > { %2090 = vmatpush.bf16.msra.mxu1 %v2075_v25 }
 0x382   : > { %2091 = vmatpush.bf16.msra.mxu1 %v8399_v28 }
 0x385   : > { %6336 = vmatmul.msk.bf16.gmra.mxu2 %vm1002_vm0, %v8405_v40  ;;  %2359 = vmatpush.bf16.xpose.msrb.mxu0 %v2347_v12 }
 0x389   : > { %v1444_v23 = vpop.f32.mrf.mxu0 }
 0x38a   : > { %v1549_v8 = vpack.c.bf16 %v1444_v23, %v1444_v23 }
 0x38c   : > { %1566 = vst.msk [vmem:[#allocation2 + $0x18] sm:$0xf] %vm1559_vm1, %v1549_v8 }
 0x391   : > { %v1446_v49 = vpop.f32.mrf.mxu0  ;;  %v1486_v45 = vpop.f32.mrf.mxu1 }
 0x392   : > { %v1550_v14 = vpack.c.bf16 %v1446_v49, %v1446_v49  ;;  %v1551_v37 = vpack.c.bf16 %v1486_v45, %v1486_v45 }
 0x394   : > { %1567 = vst.msk [vmem:[#allocation2 + $0x1c] sm:$0xf] %vm1559_vm1, %v1550_v14 }
 0x395   : > { %1568 = vst.msk [vmem:[#allocation2 + $0x20] sm:$0xf] %vm1559_vm1, %v1551_v37 }
 0x399   : > { %v1488_v7 = vpop.f32.mrf.mxu1  ;;  %v1696_v28 = vpop.f32.mrf.mxu0 }
 0x39a   : > { %v1552_v19 = vpack.c.bf16 %v1488_v7, %v1488_v7  ;;  %v8453_v36 = vadd.f32 %v8123_v0, %v1696_v28 }
 0x39c   : > { %1569 = vst.msk [vmem:[#allocation2 + $0x24] sm:$0xf] %vm1559_vm1, %v1552_v19  ;;  %v1800_v40 = vsel %vm1002_vm0, %v8453_v36, -inf }
 0x39d   : > { %1801 = vmax.xlane.f32.xlu1 %v1800_v40 }
 0x3a1   : > { %v1491_v20 = vpop.f32.mrf.mxu1  ;;  %v1698_v35 = vpop.f32.mrf.mxu0 }
 0x3a2   : > { %v1553_v43 = vpack.c.bf16 %v1491_v20, %v1491_v20  ;;  %v8459_v53 = vadd.f32 %v8131_v33, %v1698_v35 }
 0x3a4   : > { %1570 = vst.msk [vmem:[#allocation2 + $0x28] sm:$0xf] %vm1559_vm1, %v1553_v43  ;;  %v1803_v16 = vsel %vm1002_vm0, %v8459_v53, -inf }
 0x3a5   : > { %1804 = vmax.xlane.f32.xlu0 %v1803_v16 }
 0x3a9   : > { %v1493_v32 = vpop.f32.mrf.mxu1  ;;  %v1701_v29 = vpop.f32.mrf.mxu0 }
 0x3aa   : > { %v1554_v4 = vpack.c.bf16 %v1493_v32, %v1493_v32  ;;  %v8465_v48 = vadd.f32 %v8139_v46, %v1701_v29 }
 0x3ac   : > { %1571 = vst.msk [vmem:[#allocation2 + $0x2c] sm:$0xf] %vm1559_vm1, %v1554_v4  ;;  %v1806_v13 = vsel %vm1002_vm0, %v8465_v48, -inf }
 0x3ad   : > { %1807 = vmax.xlane.f32.xlu1 %v1806_v13 }
 0x3b1   : > { %v1703_v26 = vpop.f32.mrf.mxu0 }
 0x3b2   : > { %v8471_v59 = vadd.f32 %v8147_v10, %v1703_v26  ;;  %v1533_v31 = vpop.f32.mrf.mxu2 }
 0x3b3   : > { %v1555_v38 = vpack.c.bf16 %v1533_v31, %v1533_v31 }
 0x3b4   : > { %v1809_v25 = vsel %vm1002_vm0, %v8471_v59, -inf }
 0x3b5   : > { %1810 = vmax.xlane.f32.xlu1 %v1809_v25  ;;  %1572 = vst.msk [vmem:[#allocation2 + $0x30] sm:$0xf] %vm1559_vm1, %v1555_v38 }
 0x3b8   : > { %v1737_v6 = vpop.f32.mrf.mxu1 }
 0x3b9   : > { %v8477_v52 = vadd.f32 %v8123_v0, %v1737_v6  ;;  %v8505_v6 = vpop.permute.xlu0 %2330 }
 0x3ba   : > { %v1535_v12 = vpop.f32.mrf.mxu2 }
 0x3bb   : > { %v1556_v23 = vpack.c.bf16 %v1535_v12, %v1535_v12  ;;  %v1812_v8 = vsel %vm1002_vm0, %v8477_v52, -inf }
 0x3bc   : > { %1813 = vmax.xlane.f32.xlu2 %v1812_v8 }
 0x3bd   : > { %1573 = vst.msk [vmem:[#allocation2 + $0x34] sm:$0xf] %vm1559_vm1, %v1556_v23 }
 0x3c0   : > { %v1739_v49 = vpop.f32.mrf.mxu1 }
 0x3c1   : > { %v8483_v45 = vadd.f32 %v8131_v33, %v1739_v49 }
 0x3c3   : > { %v1815_v14 = vsel %vm1002_vm0, %v8483_v45, -inf }
 0x3c4   : > { %1816 = vmax.xlane.f32.xlu1 %v1815_v14 }
 0x3c8   : > { %v1742_v37 = vpop.f32.mrf.mxu1 }
 0x3c9   : > { %v8488_v7 = vadd.f32 %v8139_v46, %v1742_v37 }
 0x3cb   : > { %v1818_v28 = vsel %vm1002_vm0, %v8488_v7, -inf  ;;  %v1790_v29 = vpop.xlane.xlu2 %1789 }
 0x3cc   : > { %1819 = vmax.xlane.f32.xlu2 %v1818_v28  ;;  %v1836_v14 = vsub.f32 %v8412_v34, %v1790_v29 }
 0x3ce   : > { %v1852_v28 = vmul.f32 1.442695, %v1836_v14 }
 0x3d0   : > { %v1744_v19 = vpop.f32.mrf.mxu1 }
 0x3d1   : > { %v8493_v40 = vadd.f32 %v8147_v10, %v1744_v19 }
 0x3d3   : > { %v1821_v20 = vsel %vm1002_vm0, %v8493_v40, -inf  ;;  %v1793_v4 = vpop.xlane.xlu1 %1792 }
 0x3d4   : > { %1822 = vmax.xlane.f32.xlu1 %v1821_v20  ;;  %v1837_v31 = vsub.f32 %v8419_v1, %v1793_v4 }
 0x3d6   : > { %v1854_v25 = vmul.f32 1.442695, %v1837_v31 }
 0x3d8   : > { %7050 = vpow2.f32 %v1854_v25 }
 0x3db   : > { %v1796_v19 = vpop.xlane.xlu0 %1795 }
 0x3de   : > { %v8514_v20 = vpop.eup %7050 }
 0x3df   : > { %v1887_v34 = vsel %vm1002_vm0, %v8514_v20, 0.0 }
 0x3e3   : > { %v1799_v12 = vpop.xlane.xlu2 %1798 }
 0x3e4   : > { %v1839_v49 = vsub.f32 %v8434_v11, %v1799_v12 }
 0x3e6   : > { %v1858_v37 = vmul.f32 1.442695, %v1839_v49 }
 0x3e8   : > { %v1538_v35 = vpop.f32.mrf.mxu2  ;;  %7052 = vpow2.f32 %v1858_v37 }
 0x3e9   : > { %v1557_v43 = vpack.c.bf16 %v1538_v35, %v1538_v35  ;;  %7054 = vpow2.f32 %v1852_v28 }
 0x3eb   : > { %1574 = vst.msk [vmem:[#allocation2 + $0x38] sm:$0xf] %vm1559_vm1, %v1557_v43 }
 0x3ee   : > { %v8524_v29 = vpop.eup %7052 }
 0x3ef   : > { %v8526_v31 = vpop.eup %7054  ;;  %v1893_v25 = vsel %vm1002_vm0, %v8524_v29, 0.0 }
 0x3f0   : > { %v1540_v16 = vpop.f32.mrf.mxu2 }
 0x3f1   : > { %v1558_v32 = vpack.c.bf16 %v1540_v16, %v1540_v16  ;;  %v1838_v16 = vsub.f32 %v8426_v61, %v1796_v19 }
 0x3f3   : > { %1575 = vst.msk [vmem:[#allocation2 + $0x3c] sm:$0xf] %vm1559_vm1, %v1558_v32  ;;  %v1856_v32 = vmul.f32 1.442695, %v1838_v16 }
 0x3f5   : > { %7056 = vpow2.f32 %v1856_v32 }
 0x3f8   : > { %v1778_v13 = vpop.f32.mrf.mxu2 }
 0x3f9   : > { %v8500_v26 = vadd.f32 %v8123_v0, %v1778_v13 }
 0x3fb   : > { %v1824_v38 = vsel %vm1002_vm0, %v8500_v26, -inf  ;;  %v8538_v14 = vpop.eup %7056 }
 0x3fc   : > { %1825 = vmax.xlane.f32.xlu0 %v1824_v38 }
 0x400   : > { %v1780_v23 = vpop.f32.mrf.mxu2 }
 0x401   : > { %v8508_v8 = vadd.f32 %v8131_v33, %v1780_v23  ;;  %v1884_v23 = vsel %vm1002_vm0, %v8526_v31, 0.0 }
 0x403   : > { %v1827_v1 = vsel %vm1002_vm0, %v8508_v8, -inf }
 0x404   : > { %1828 = vmax.xlane.f32.xlu1 %v1827_v1 }
 0x408   : > { %v1783_v35 = vpop.f32.mrf.mxu2 }
 0x409   : > { %v8517_v43 = vadd.f32 %v8139_v46, %v1783_v35 }
 0x40b   : > { %v1830_v11 = vsel %vm1002_vm0, %v8517_v43, -inf }
 0x40c   : > { %1888 = vadd.xlane.f32.xlu1 %v1887_v34  ;;  %1831 = vmax.xlane.f32.xlu2 %v1830_v11  ;;  %v10824_v11 = vld [vmem:[#allocation21_spill] sm:$0xff] }
 0x410   : > { %v1802_v4 = vpop.xlane.xlu1 %1801  ;;  %v1785_v13 = vpop.f32.mrf.mxu2 }
 0x411   : > { %v8529_v38 = vadd.f32 %v8147_v10, %v1785_v13  ;;  %v1840_v61 = vsub.f32 %v8453_v36, %v1802_v4  ;;  %v1890_v36 = vsel %vm1002_vm0, %v8538_v14, 0.0  ;;  %v10825_v4 = vld [vmem:[#allocation22_spill] sm:$0xff]  ;;  %v10826_v13 = vld [vmem:[#allocation24_spill] sm:$0xff] }
 0x413   : > { %v1833_v12 = vsel %vm1002_vm0, %v8529_v38, -inf  ;;  %v1860_v49 = vmul.f32 1.442695, %v1840_v61 }
 0x414   : > { %1894 = vadd.xlane.f32.xlu1 %v1893_v25  ;;  %1834 = vmax.xlane.f32.xlu0 %v1833_v12 }
 0x415   : > { %1885 = vadd.xlane.f32.xlu2 %v1884_v23  ;;  %7058 = vpow2.f32 %v1860_v49  ;;  %v10827_v23 = vld [vmem:[#allocation23_spill] sm:$0xff] }
 0x418   : > { %v1805_v1 = vpop.xlane.xlu0 %1804 }
 0x419   : > { %v1841_v37 = vsub.f32 %v8459_v53, %v1805_v1 }
 0x41b   : > { %v1862_v28 = vmul.f32 1.442695, %v1841_v37  ;;  %v8543_v19 = vpop.eup %7058 }
 0x41c   : > { %1891 = vadd.xlane.f32.xlu0 %v1890_v36  ;;  %v1896_v35 = vsel %vm1002_vm0, %v8543_v19, 0.0  ;;  %v10828_v36 = vld [vmem:[#allocation25_spill] sm:$0xff] }
 0x41d   : > { %7060 = vpow2.f32 %v1862_v28 }
 0x420   : > { %v1808_v53 = vpop.xlane.xlu1 %1807 }
 0x423   : > { %v8547_v16 = vpop.eup %7060 }
 0x424   : > { %1897 = vadd.xlane.f32.xlu0 %v1896_v35  ;;  %v1899_v34 = vsel %vm1002_vm0, %v8547_v16, 0.0 }
 0x428   : > { %v1811_v32 = vpop.xlane.xlu1 %1810 }
 0x42c   : > { %1900 = vadd.xlane.f32.xlu0 %v1899_v34  ;;  %v1842_v34 = vsub.f32 %v8465_v48, %v1808_v53  ;;  %v1843_v48 = vsub.f32 %v8471_v59, %v1811_v32 }
 0x42d   : > { %2261 = vrot.lane.b32.xlu2 %v8028_v22, %s7710_s13  ;;  %2113 = vrot.lane.b32.xlu1 %v8156_v47, %s7709_s7 }
 0x42f   : > { %v1814_v61 = vpop.xlane.xlu2 %1813 }
 0x435   : > { %2332 = vrot.lane.b32.xlu1 %v10824_v11, %s7710_s13 }
 0x437   : > { %v1817_v25 = vpop.xlane.xlu1 %1816 }
 0x438   : > { %v1845_v12 = vsub.f32 %v8483_v45, %v1817_v25 }
 0x43a   : > { %v1870_v49 = vmul.f32 1.442695, %v1845_v12  ;;  %v1864_v12 = vmul.f32 1.442695, %v1842_v34  ;;  %v1866_v34 = vmul.f32 1.442695, %v1843_v48 }
 0x43c   : > { %7062 = vpow2.f32 %v1870_v49  ;;  %v1844_v49 = vsub.f32 %v8477_v52, %v1814_v61  ;;  %v10829_v61 = vld [vmem:[#allocation26_spill] sm:$0xff] }
 0x43d   : > { %2257 = vrot.lane.b32.xlu1 %v10825_v4, %s7710_s13 }
 0x43f   : > { %v1820_v1 = vpop.xlane.xlu2 %1819 }
 0x440   : > { %2263 = vrot.lane.b32.xlu0 %v10826_v13, %s7710_s13  ;;  %v1846_v37 = vsub.f32 %v8488_v7, %v1820_v1  ;;  %v1868_v1 = vmul.f32 1.442695, %v1844_v49 }
 0x442   : > { %v1872_v28 = vmul.f32 1.442695, %v1846_v37  ;;  %v8567_v35 = vpop.eup %7062 }
 0x443   : > { %v1911_v45 = vsel %vm1002_vm0, %v8567_v35, 0.0 }
 0x444   : > { %7064 = vpow2.f32 %v1872_v28 }
 0x445   : > { %2259 = vrot.lane.b32.xlu1 %v10827_v23, %s7710_s13  ;;  %7066 = vpow2.f32 %v1864_v12 }
 0x446   : > { %7068 = vpow2.f32 %v1868_v1 }
 0x447   : > { %7070 = vpow2.f32 %v1866_v34 }
 0x44a   : > { %v8574_v25 = vpop.eup %7064 }
 0x44b   : > { %v1914_v7 = vsel %vm1002_vm0, %v8574_v25, 0.0  ;;  %v8579_v37 = vpop.eup %7066 }
 0x44c   : > { %v1902_v28 = vsel %vm1002_vm0, %v8579_v37, 0.0  ;;  %v8584_v53 = vpop.eup %7068 }
 0x44d   : > { %2269 = vrot.lane.b32.xlu1 %v10828_v36, %s7710_s13  ;;  %v8592_v32 = vpop.eup %7070 }
 0x455   : > { %2271 = vrot.lane.b32.xlu1 %v8067_v5, %s7710_s13 }
 0x456   : > { %1912 = vadd.xlane.f32.xlu2 %v1911_v45  ;;  %v1823_v45 = vpop.xlane.xlu1 %1822 }
 0x457   : > { %v1847_v52 = vsub.f32 %v8493_v40, %v1823_v45  ;;  %v1905_v40 = vsel %vm1002_vm0, %v8592_v32, 0.0 }
 0x459   : > { %v1874_v1 = vmul.f32 1.442695, %v1847_v52 }
 0x45e   : > { %1915 = vadd.xlane.f32.xlu2 %v1914_v7  ;;  %v1908_v7 = vsel %vm1002_vm0, %v8584_v53, 0.0 }
 0x46a   : > { %1903 = vadd.xlane.f32.xlu0 %v1902_v28 }
 0x46f   : > { %v1826_v28 = vpop.xlane.xlu0 %1825 }
 0x470   : > { %v1848_v48 = vsub.f32 %v8500_v26, %v1826_v28 }
 0x472   : > { %1909 = vadd.xlane.f32.xlu0 %v1908_v7  ;;  %v1876_v7 = vmul.f32 1.442695, %v1848_v48 }
 0x476   : > { %2267 = vrot.lane.b32.xlu2 %v10829_v61, %s7710_s13 }
 0x477   : > { %v1829_v12 = vpop.xlane.xlu1 %1828 }
 0x478   : > { %v1849_v49 = vsub.f32 %v8508_v8, %v1829_v12 }
 0x47a   : > { %v1878_v59 = vmul.f32 1.442695, %v1849_v49 }
 0x47c   : > { %7072 = vpow2.f32 %v1878_v59 }
 0x47d   : > { %7074 = vpow2.f32 %v1874_v1 }
 0x47e   : > { %2912 = vrot.lane.b32.xlu2 %v7967_v30, %s7711_s16 }
 0x47f   : > { %1906 = vadd.xlane.f32.xlu1 %v1905_v40  ;;  %v1832_v45 = vpop.xlane.xlu2 %1831  ;;  %v1889_v34 = vpop.xlane.xlu1 %1888 }
 0x480   : > { %v1850_v8 = vsub.f32 %v8517_v43, %v1832_v45  ;;  %7076 = vrcp.f32 %v1889_v34 }
 0x482   : > { %v8600_v52 = vpop.eup %7072  ;;  %v1880_v12 = vmul.f32 1.442695, %v1850_v8 }
 0x483   : > { %v8602_v49 = vpop.eup %7074  ;;  %v1923_v26 = vsel %vm1002_vm0, %v8600_v52, 0.0 }
 0x484   : > { %7078 = vpow2.f32 %v1880_v12  ;;  %1924 = vadd.xlane.f32.xlu0 %v1923_v26  ;;  %v1917_v30 = vsel %vm1002_vm0, %v8602_v49, 0.0 }
 0x485   : > { %7080 = vpow2.f32 %v1876_v7 }
 0x486   : > { %v7077_v43 = vpop.eup %7076 }
 0x487   : > { %1918 = vadd.xlane.f32.xlu1 %v1917_v30  ;;  %v1835_v1 = vpop.xlane.xlu0 %1834  ;;  %v1949_v45 = vmul.f32 %v7077_v43, %v8514_v20  ;;  %v1895_v26 = vpop.xlane.xlu1 %1894 }
 0x488   : > { %v1886_v28 = vpop.xlane.xlu2 %1885  ;;  %v1851_v36 = vsub.f32 %v8529_v38, %v1835_v1 }
 0x489   : > { %7082 = vrcp.f32 %v1886_v28  ;;  %v1965_v12 = vpack.c.bf16 %v1949_v45, %v1949_v45 }
 0x48a   : > { %v8608_v59 = vpop.eup %7078  ;;  %v1882_v4 = vmul.f32 1.442695, %v1851_v36 }
 0x48b   : > { %v8610_v48 = vpop.eup %7080  ;;  %v1926_v40 = vsel %vm1002_vm0, %v8608_v59, 0.0  ;;  %v1985_v61 = vunpack.c.l.b16 %v1965_v12 }
 0x48c   : > { %1927 = vadd.xlane.f32.xlu0 %v1926_v40  ;;  %v1920_v34 = vsel %vm1002_vm0, %v8610_v48, 0.0 }
 0x48f   : > { %v7083_v8 = vpop.eup %7082  ;;  %1921 = vadd.xlane.f32.xlu1 %v1920_v34  ;;  %v1892_v7 = vpop.xlane.xlu0 %1891 }
 0x490   : > { %v1948_v30 = vmul.f32 %v7083_v8, %v8526_v31  ;;  %7084 = vrcp.f32 %v1892_v7 }
 0x491   : > { %7086 = vrcp.f32 %v1895_v26 }
 0x492   : > { %v1964_v28 = vpack.c.bf16 %v1948_v30, %v1948_v30 }
 0x494   : > { %v1984_v5 = vunpack.c.l.b16 %v1964_v28 }
 0x496   : > { %v1988_v23 = vpack.c.b16 %v1985_v61, %v1984_v5  ;;  %v7085_v20 = vpop.eup %7084 }
 0x497   : > { %v1898_v43 = vpop.xlane.xlu0 %1897  ;;  %v7087_v40 = vpop.eup %7086  ;;  %v1950_v45 = vmul.f32 %v7085_v20, %v8538_v14 }
 0x498   : > { %6337 = vmatmul.msk.bf16.vlgmr.msrb.gmra.mxu3 %vm1002_vm0, %v1988_v23  ;;  %7088 = vrcp.f32 %v1898_v43  ;;  %v1951_v34 = vmul.f32 %v7087_v40, %v8524_v29  ;;  %v2262_v40 = vpop.permute.xlu2 %2261 }
 0x499   : > { %7090 = vpow2.f32 %v1882_v4  ;;  %v1966_v31 = vpack.c.bf16 %v1950_v45, %v1950_v45 }
 0x49a   : > { %v1967_v5 = vpack.c.bf16 %v1951_v34, %v1951_v34 }
 0x49b   : > { %v1986_v38 = vunpack.c.l.b16 %v1966_v31 }
 0x49c   : > { %v1987_v61 = vunpack.c.l.b16 %v1967_v5 }
 0x49e   : > { %v7089_v12 = vpop.eup %7088  ;;  %v1989_v4 = vpack.c.b16 %v1987_v61, %v1986_v38  ;;  %v10830_v61 = vld [vmem:[#allocation28_spill] sm:$0xff] }
 0x49f   : > { %v2114_v8 = vpop.permute.xlu1 %2113  ;;  %v1901_v7 = vpop.xlane.xlu0 %1900  ;;  %v1952_v36 = vmul.f32 %v7089_v12, %v8543_v19 }
 0x4a0   : > { %7092 = vrcp.f32 %v1901_v7  ;;  %2132 = vmatpush.bf16.msra.mxu2 %v2114_v8  ;;  %2265 = vrot.lane.b32.xlu0 %v8063_v3, %s7710_s13  ;;  %v8624_v23 = vpop.eup %7090 }
 0x4a1   : > { %v1929_v29 = vsel %vm1002_vm0, %v8624_v23, 0.0  ;;  %v1968_v1 = vpack.c.bf16 %v1952_v36, %v1952_v36 }
 0x4a3   : > { %v2025_v19 = vunpack.c.l.b16 %v1968_v1 }
 0x4a6   : > { %v7093_v14 = vpop.eup %7092 }
 0x4a7   : > { %v1953_v26 = vmul.f32 %v7093_v14, %v8547_v16  ;;  %1930 = vadd.xlane.f32.xlu2 %v1929_v29  ;;  %v8630_v30 = vpop.permute.xlu1 %2332  ;;  %v2283_v16 = vrot.slane %v2262_v40, 4 }
 0x4a8   : > { %6338 = vmatmul.msk.bf16.gmra.mxu3 %vm1002_vm0, %v1989_v4  ;;  %2414 = vrot.lane.b32.xlu0 %v8112_v39, %s7710_s13 }
 0x4a9   : > { %v1969_v28 = vpack.c.bf16 %v1953_v26, %v1953_v26  ;;  %2371 = vrot.lane.b32.xlu1 %v8054_v58, %s7710_s13  ;;  %v2377_v8 = vunpack.c.l.b16 %v2283_v16 }
 0x4ab   : > { %v2026_v20 = vunpack.c.l.b16 %v1969_v28 }
 0x4ad   : > { %v2029_v43 = vpack.c.b16 %v2026_v20, %v2025_v19 }
 0x4af   : > { %v2258_v45 = vpop.permute.xlu1 %2257  ;;  %6339 = vmatmul.msk.bf16.vlgmr.msra.gmra.mxu0 %vm1002_vm0, %v2029_v43 }
 0x4b0   : > { %2655 = vrot.lane.b32.xlu0 %v8095_v62, %s7710_s13  ;;  %v2281_v12 = vrot.slane %v2258_v45, 4 }
 0x4b1   : > { %2412 = vrot.lane.b32.xlu1 %v8101_v9, %s7710_s13 }
 0x4b2   : > { %v2264_v34 = vpop.permute.xlu0 %2263  ;;  %v2375_v4 = vunpack.c.l.b16 %v2281_v12 }
 0x4b3   : > { %v2284_v31 = vrot.slane %v2264_v34, 4 }
 0x4b5   : > { %v2378_v7 = vunpack.c.l.b16 %v2284_v31 }
 0x4b7   : > { %v2380_v5 = vpack.c.b16 %v2378_v7, %v2377_v8  ;;  %v2260_v38 = vpop.permute.xlu1 %2259 }
 0x4b8   : > { %v2282_v36 = vrot.slane %v2260_v38, 4  ;;  %6345 = vmatmul.msk.bf16.vlgmr.msra.gmra.mxu3 %vm1002_vm0, %v8384_v15  ;;  %2696 = vrot.lane.b32.xlu0 %v8091_v56, %s7710_s13 }
 0x4b9   : > { %2373 = vrot.lane.b32.xlu1 %v10830_v61, %s7710_s13  ;;  %v2391_v14 = vsel %vm1002_vm0, %v2380_v5, 0 }
 0x4ba   : > { %v2376_v29 = vunpack.c.l.b16 %v2282_v36  ;;  %2399 = vmatpush.bf16.xpose.msrb.mxu1 %v2391_v14 }
 0x4bc   : > { %v2379_v1 = vpack.c.b16 %v2376_v29, %v2375_v4 }
 0x4be   : > { %v2388_v15 = vsel %vm1002_vm0, %v2379_v1, 0 }
 0x4bf   : > { %2698 = vrot.lane.b32.xlu2 %v8087_v51, %s7710_s13  ;;  %v2270_v26 = vpop.permute.xlu1 %2269 }
 0x4c0   : > { %2920 = vrot.lane.b32.xlu0 %v8004_v60, %s7711_s16  ;;  %v2287_v28 = vrot.slane %v2270_v26, 4 }
 0x4c1   : > { %2657 = vrot.lane.b32.xlu1 %v8089_v55, %s7710_s13 }
 0x4c2   : > { %2400 = vmatpush.bf16.xpose.msrb.mxu1 %v2388_v15  ;;  %v2418_v60 = vunpack.c.l.b16 %v2287_v28 }
 0x4c7   : > { %2918 = vrot.lane.b32.xlu2 %v7999_v57, %s7711_s16  ;;  %v2272_v19 = vpop.permute.xlu1 %2271 }
 0x4c8   : > { %v2288_v20 = vrot.slane %v2272_v19, 4  ;;  %6346 = vmatmul.msk.bf16.gmra.mxu3 %vm1002_vm0, %v8436_v41  ;;  %2914 = vrot.lane.b32.xlu0 %v7977_v42, %s7711_s16 }
 0x4c9   : > { %2910 = vrot.lane.b32.xlu1 %v7963_v27, %s7711_s16  ;;  %v1913_v27 = vpop.xlane.xlu2 %1912 }
 0x4ca   : > { %v2419_v43 = vunpack.c.l.b16 %v2288_v20  ;;  %7094 = vrcp.f32 %v1913_v27 }
 0x4cc   : > { %v2421_v40 = vpack.c.b16 %v2419_v43, %v2418_v60 }
 0x4ce   : > { %v2432_v45 = vsel %vm1002_vm0, %v2421_v40, 0 }
 0x4cf   : > { %2926 = vrot.lane.b32.xlu2 %v8028_v22, %s7711_s16  ;;  %2440 = vmatpush.bf16.xpose.msrb.mxu2 %v2432_v45 }
 0x4d0   : > { %2916 = vrot.lane.b32.xlu0 %v7986_v50, %s7711_s16  ;;  %v7095_v50 = vpop.eup %7094 }
 0x4d1   : > { %2906 = vrot.lane.b32.xlu1 %v7949_v18, %s7711_s16  ;;  %v1957_v18 = vmul.f32 %v7095_v50, %v8567_v35 }
 0x4d3   : > { %v1973_v41 = vpack.c.bf16 %v1957_v18, %v1957_v18 }
 0x4d5   : > { %v2067_v34 = vunpack.c.l.b16 %v1973_v41 }
 0x4d8   : > { %2739 = vrot.lane.b32.xlu0 %v8118_v17, %s7710_s13 }
 0x4d9   : > { %2908 = vrot.lane.b32.xlu1 %v7953_v21, %s7711_s16 }
 0x4dd   : > { %v1904_v42 = vpop.xlane.xlu0 %1903 }
 0x4e0   : > { %2737 = vrot.lane.b32.xlu0 %v8120_v63, %s7710_s13 }
 0x4e1   : > { %2954 = vrot.lane.b32.xlu1 %v7959_v24, %s7711_s16  ;;  %v1916_v24 = vpop.xlane.xlu2 %1915 }
 0x4e5   : > { %v1910_v57 = vpop.xlane.xlu0 %1909 }
 0x4e6   : > { %7096 = vrcp.f32 %v1910_v57 }
 0x4e7   : > { %7098 = vrcp.f32 %v1904_v42 }
 0x4e9   : > { %2956 = vrot.lane.b32.xlu1 %v7980_v44, %s7711_s16  ;;  %v2268_v40 = vpop.permute.xlu2 %2267 }
 0x4ea   : > { %v2286_v41 = vrot.slane %v2268_v40, 4 }
 0x4ec   : > { %v7097_v22 = vpop.eup %7096 }
 0x4ed   : > { %v1956_v21 = vmul.f32 %v7097_v22, %v8584_v53  ;;  %v7099_v7 = vpop.eup %7098 }
 0x4ee   : > { %v1954_v44 = vmul.f32 %v7099_v7, %v8579_v37 }
 0x4ef   : > { %v1972_v16 = vpack.c.bf16 %v1956_v21, %v1956_v21 }
 0x4f0   : > { %v1970_v53 = vpack.c.bf16 %v1954_v44, %v1954_v44 }
 0x4f1   : > { %v2066_v31 = vunpack.c.l.b16 %v1972_v16  ;;  %2995 = vrot.lane.b32.xlu1 %v7993_v54, %s7711_s16  ;;  %v2913_v21 = vpop.permute.xlu2 %2912 }
 0x4f2   : > { %v1907_v8 = vpop.xlane.xlu1 %1906  ;;  %v2027_v4 = vunpack.c.l.b16 %v1970_v53 }
 0x4f3   : > { %v2070_v12 = vpack.c.b16 %v2067_v34, %v2066_v31  ;;  %7100 = vrcp.f32 %v1907_v8  ;;  %v2417_v34 = vunpack.c.l.b16 %v2286_v41 }
 0x4f4   : > { %7102 = vrcp.f32 %v1916_v24 }
 0x4f5   : > { %6341 = vmatmul.msk.bf16.vlgmr.msra.gmra.mxu1 %vm1002_vm0, %v2070_v12 }
 0x4f7   : > { %v1925_v38 = vpop.xlane.xlu0 %1924 }
 0x4f9   : > { %v7101_v35 = vpop.eup %7100  ;;  %2928 = vrot.lane.b32.xlu1 %v10826_v13, %s7711_s16 }
 0x4fa   : > { %v1955_v5 = vmul.f32 %v7101_v35, %v8592_v32  ;;  %v1919_v36 = vpop.xlane.xlu1 %1918  ;;  %v7103_v54 = vpop.eup %7102 }
 0x4fb   : > { %7104 = vrcp.f32 %v1919_v36  ;;  %v1958_v29 = vmul.f32 %v7103_v54, %v8574_v25 }
 0x4fc   : > { %v1971_v14 = vpack.c.bf16 %v1955_v5, %v1955_v5  ;;  %7106 = vrcp.f32 %v1925_v38 }
 0x4fd   : > { %v1974_v37 = vpack.c.bf16 %v1958_v29, %v1958_v29 }
 0x4fe   : > { %v2028_v1 = vunpack.c.l.b16 %v1971_v14 }
 0x4ff   : > { %v2068_v60 = vunpack.c.l.b16 %v1974_v37  ;;  %v1928_v42 = vpop.xlane.xlu0 %1927 }
 0x500   : > { %v2030_v26 = vpack.c.b16 %v2028_v1, %v2027_v4 }
 0x501   : > { %v7105_v15 = vpop.eup %7104 }
 0x502   : > { %v1959_v28 = vmul.f32 %v7105_v15, %v8602_v49  ;;  %v1922_v19 = vpop.xlane.xlu1 %1921  ;;  %6340 = vmatmul.msk.bf16.gmra.mxu0 %vm1002_vm0, %v2030_v26  ;;  %v7107_v13 = vpop.eup %7106 }
 0x503   : > { %7108 = vrcp.f32 %v1922_v19  ;;  %v1961_v20 = vmul.f32 %v7107_v13, %v8600_v52 }
 0x504   : > { %v1975_v32 = vpack.c.bf16 %v1959_v28, %v1959_v28  ;;  %7110 = vrcp.f32 %v1928_v42 }
 0x505   : > { %v1977_v27 = vpack.c.bf16 %v1961_v20, %v1961_v20 }
 0x506   : > { %v2069_v43 = vunpack.c.l.b16 %v1975_v32 }
 0x507   : > { %v2108_v50 = vunpack.c.l.b16 %v1977_v27 }
 0x508   : > { %v2071_v45 = vpack.c.b16 %v2069_v43, %v2068_v60 }
 0x509   : > { %v7109_v25 = vpop.eup %7108 }
 0x50a   : > { %v1960_v57 = vmul.f32 %v7109_v25, %v8610_v48  ;;  %6342 = vmatmul.msk.bf16.gmra.mxu1 %vm1002_vm0, %v2071_v45  ;;  %v7111_v12 = vpop.eup %7110  ;;  %v2941_v25 = vrot.slane %v2913_v21, 4 }
 0x50c   : > { %v1976_v49 = vpack.c.bf16 %v1960_v57, %v1960_v57 }
 0x50e   : > { %v2107_v18 = vunpack.c.l.b16 %v1976_v49 }
 0x510   : > { %v2111_v22 = vpack.c.b16 %v2108_v50, %v2107_v18  ;;  %v2961_v18 = vunpack.c.l.b16 %v2941_v25 }
 0x512   : > { %6343 = vmatmul.msk.bf16.vlgmr.msra.gmra.mxu2 %vm1002_vm0, %v2111_v22  ;;  %6347 = vmatmul.msk.bf16.vlgmr.msrb.gmra.mxu0 %vm1002_vm0, %v8505_v6  ;;  %v2266_v52 = vpop.permute.xlu0 %2265  ;;  %v1962_v6 = vmul.f32 %v7111_v12, %v8608_v59 }
 0x513   : > { %v2285_v16 = vrot.slane %v2266_v52, 4 }
 0x514   : > { %v1978_v5 = vpack.c.bf16 %v1962_v6, %v1962_v6 }
 0x515   : > { %v2416_v31 = vunpack.c.l.b16 %v2285_v16 }
 0x516   : > { %v2109_v1 = vunpack.c.l.b16 %v1978_v5 }
 0x517   : > { %v2420_v24 = vpack.c.b16 %v2417_v34, %v2416_v31 }
 0x519   : > { %v2429_v48 = vsel %vm1002_vm0, %v2420_v24, 0 }
 0x51a   : > { %v1931_v8 = vpop.xlane.xlu2 %1930  ;;  %2441 = vmatpush.bf16.xpose.msrb.mxu2 %v2429_v48  ;;  %v8700_v7 = vpop.permute.xlu0 %2414 }
 0x51b   : > { %7112 = vrcp.f32 %v1931_v8  ;;  %v8702_v44 = vpop.f32.mrf.mxu3  ;;  %v2372_v35 = vpop.permute.xlu1 %2371 }
 0x51c   : > { %6349 = vmatmul.msk.bf16.vlgmr.msrb.gmra.mxu1 %vm1002_vm0, %v2372_v35 }
 0x521   : > { %v7113_v53 = vpop.eup %7112 }
 0x522   : > { %v1963_v38 = vmul.f32 %v7113_v53, %v8624_v23  ;;  %v2699_v36 = vpop.permute.xlu2 %2698  ;;  %6348 = vmatmul.msk.bf16.gmra.mxu0 %vm1002_vm0, %v8630_v30  ;;  %v2656_v54 = vpop.permute.xlu0 %2655 }
 0x523   : > { %v8709_v14 = vpop.f32.mrf.mxu3  ;;  %v2413_v29 = vpop.permute.xlu1 %2412  ;;  %2714 = vmatpush.bf16.msra.mxu0 %v2699_v36 }
 0x524   : > { %v1979_v4 = vpack.c.bf16 %v1963_v38, %v1963_v38 }
 0x526   : > { %v2110_v26 = vunpack.c.l.b16 %v1979_v4 }
 0x528   : > { %v2112_v15 = vpack.c.b16 %v2110_v26, %v2109_v1 }
 0x52a   : > { %6344 = vmatmul.msk.bf16.gmra.mxu2 %vm1002_vm0, %v2112_v15  ;;  %v2697_v59 = vpop.permute.xlu0 %2696  ;;  %v2919_v23 = vpop.permute.xlu2 %2918 }
 0x52b   : > { %v2374_v37 = vpop.permute.xlu1 %2373  ;;  %v8712_v28 = vpop.f32.mrf.mxu3  ;;  %2715 = vmatpush.bf16.msra.mxu0 %v2697_v59  ;;  %v2944_v30 = vrot.slane %v2919_v23, 4 }
 0x52c   : > { %6350 = vmatmul.msk.bf16.gmra.mxu1 %vm1002_vm0, %v2374_v37 }
 0x52d   : > { %v3001_v60 = vunpack.c.l.b16 %v2944_v30 }
 0x532   : > { %v2921_v19 = vpop.permute.xlu0 %2920 }
 0x533   : > { %v2658_v13 = vpop.permute.xlu1 %2657  ;;  %v8715_v32 = vpop.f32.mrf.mxu3  ;;  %v2945_v20 = vrot.slane %v2921_v19, 4 }
 0x534   : > { %2673 = vmatpush.bf16.msrb.mxu3 %v2658_v13 }
 0x535   : > { %v3002_v43 = vunpack.c.l.b16 %v2945_v20 }
 0x537   : > { %v3004_v40 = vpack.c.b16 %v3002_v43, %v3001_v60 }
 0x538   : > { %2674 = vmatpush.bf16.msrb.mxu3 %v2656_v54 }
 0x539   : > { %v3015_v45 = vsel %vm1002_vm0, %v3004_v40, 0  ;;  %v2927_v40 = vpop.permute.xlu2 %2926 }
 0x53a   : > { %6351 = vmatmul.msk.bf16.vlgmr.msrb.gmra.mxu2 %vm1002_vm0, %v2413_v29  ;;  %3023 = vmatpush.bf16.xpose.msrb.mxu0 %v3015_v45  ;;  %v2915_v27 = vpop.permute.xlu0 %2914  ;;  %v2948_v45 = vrot.slane %v2927_v40, 4 }
 0x53b   : > { %v2911_v42 = vpop.permute.xlu1 %2910  ;;  %v2320_v57 = vpop.f32.mrf.mxu3  ;;  %v2942_v16 = vrot.slane %v2915_v27, 4 }
 0x53c   : > { %v2940_v49 = vrot.slane %v2911_v42, 4  ;;  %v8720_v50 = vadd.f32 %v8123_v0, %v2320_v57  ;;  %v8750_v42 = vpop.f32.mrf.mxu0  ;;  %v3042_v57 = vunpack.c.l.b16 %v2948_v45 }
 0x53d   : > { %v2999_v12 = vunpack.c.l.b16 %v2942_v16 }
 0x53e   : > { %v2960_v22 = vunpack.c.l.b16 %v2940_v49  ;;  %v2453_v41 = vsel %vm1002_vm0, %v8720_v50, -inf }
 0x53f   : > { %2454 = vmax.xlane.f32.xlu2 %v2453_v41 }
 0x540   : > { %v2963_v52 = vpack.c.b16 %v2961_v18, %v2960_v22 }
 0x542   : > { %v2974_v21 = vsel %vm1002_vm0, %v2963_v52, 0  ;;  %v2917_v34 = vpop.permute.xlu0 %2916 }
 0x543   : > { %v2907_v31 = vpop.permute.xlu1 %2906  ;;  %v2322_v24 = vpop.f32.mrf.mxu3  ;;  %2982 = vmatpush.bf16.xpose.msra.mxu3 %v2974_v21  ;;  %v2943_v48 = vrot.slane %v2917_v34, 4 }
 0x544   : > { %v8726_v8 = vadd.f32 %v8131_v33, %v2322_v24  ;;  %v2938_v38 = vrot.slane %v2907_v31, 4  ;;  %v8755_v52 = vpop.f32.mrf.mxu0 }
 0x545   : > { %v3000_v35 = vunpack.c.l.b16 %v2943_v48  ;;  %10831 = vst [vmem:[#allocation21_spill] sm:$0xff] %v8755_v52 }
 0x546   : > { %v2456_v6 = vsel %vm1002_vm0, %v8726_v8, -inf  ;;  %v2958_v26 = vunpack.c.l.b16 %v2938_v38 }
 0x547   : > { %2457 = vmax.xlane.f32.xlu1 %v2456_v6  ;;  %v3003_v53 = vpack.c.b16 %v3000_v35, %v2999_v12 }
 0x549   : > { %v3012_v5 = vsel %vm1002_vm0, %v3003_v53, 0 }
 0x54a   : > { %6352 = vmatmul.msk.bf16.gmra.mxu2 %vm1002_vm0, %v8700_v7  ;;  %3024 = vmatpush.bf16.xpose.msrb.mxu0 %v3012_v5  ;;  %v2740_v36 = vpop.permute.xlu0 %2739 }
 0x54b   : > { %v2909_v54 = vpop.permute.xlu1 %2908  ;;  %v2325_v29 = vpop.f32.mrf.mxu3  ;;  %2755 = vmatpush.bf16.msra.mxu1 %v2740_v36 }
 0x54c   : > { %v2939_v4 = vrot.slane %v2909_v54, 4  ;;  %v8734_v1 = vadd.f32 %v8139_v46, %v2325_v29 }
 0x54e   : > { %v2959_v15 = vunpack.c.l.b16 %v2939_v4  ;;  %v2459_v59 = vsel %vm1002_vm0, %v8734_v1, -inf }
 0x54f   : > { %2460 = vmax.xlane.f32.xlu0 %v2459_v59 }
 0x550   : > { %v2962_v37 = vpack.c.b16 %v2959_v15, %v2958_v26 }
 0x552   : > { %v2971_v23 = vsel %vm1002_vm0, %v2962_v37, 0  ;;  %v2738_v30 = vpop.permute.xlu0 %2737 }
 0x553   : > { %v8739_v7 = vpop.permute.xlu1 %2954  ;;  %v2327_v19 = vpop.f32.mrf.mxu3  ;;  %2983 = vmatpush.bf16.xpose.msra.mxu3 %v2971_v23  ;;  %2756 = vmatpush.bf16.msra.mxu1 %v2738_v30 }
 0x554   : > { %v8742_v13 = vadd.f32 %v8147_v10, %v2327_v19 }
 0x556   : > { %v2462_v20 = vsel %vm1002_vm0, %v8742_v13, -inf }
 0x557   : > { %2463 = vmax.xlane.f32.xlu2 %v2462_v20 }
 0x55b   : > { %v8746_v60 = vpop.permute.xlu1 %2956 }
 0x563   : > { %v8748_v43 = vpop.permute.xlu1 %2995 }
 0x56b   : > { %v2929_v25 = vpop.permute.xlu1 %2928 }
 0x56c   : > { %v2949_v27 = vrot.slane %v2929_v25, 4 }
 0x56e   : > { %v3043_v49 = vunpack.c.l.b16 %v2949_v27 }
 0x570   : > { %v3045_v18 = vpack.c.b16 %v3043_v49, %v3042_v57 }
 0x572   : > { %v3056_v22 = vsel %vm1002_vm0, %v3045_v18, 0  ;;  %v8753_v41 = vpop.f32.mrf.mxu1 }
 0x573   : > { %3064 = vmatpush.bf16.xpose.msrb.mxu1 %v3056_v22 }
 0x57a   : > { %v8757_v16 = vpop.f32.mrf.mxu1 }
 0x57b   : > { %10832 = vst [vmem:[#allocation24_spill] sm:$0xff] %v8757_v16 }
 0x57f   : > { %v8759_v21 = vpop.f32.mrf.mxu0 }
 0x587   : > { %v8761_v34 = vpop.f32.mrf.mxu0  ;;  %v8763_v31 = vpop.f32.mrf.mxu1 }
 0x588   : > { %10833 = vst [vmem:[#allocation28_spill] sm:$0xff] %v8761_v34 }
 0x58f   : > { %v8765_v24 = vpop.f32.mrf.mxu1  ;;  %v2361_v48 = vpop.f32.mrf.mxu0 }
 0x590   : > { %10834 = vst [vmem:[#allocation29_spill] sm:$0xff] %v8765_v24  ;;  %v8768_v12 = vadd.f32 %v8123_v0, %v2361_v48 }
 0x592   : > { %v2465_v35 = vsel %vm1002_vm0, %v8768_v12, -inf }
 0x593   : > { %2466 = vmax.xlane.f32.xlu1 %v2465_v35 }
 0x595   : > { %v8777_v36 = vpop.f32.mrf.mxu2 }
 0x597   : > { %v2363_v6 = vpop.f32.mrf.mxu0 }
 0x598   : > { %v8773_v53 = vadd.f32 %v8131_v33, %v2363_v6 }
 0x599   : > { %v2402_v5 = vpop.f32.mrf.mxu1 }
 0x59a   : > { %v2468_v38 = vsel %vm1002_vm0, %v8773_v53, -inf  ;;  %v8804_v27 = vadd.f32 %v8123_v0, %v2402_v5 }
 0x59b   : > { %2469 = vmax.xlane.f32.xlu0 %v2468_v38 }
 0x59c   : > { %v2477_v49 = vsel %vm1002_vm0, %v8804_v27, -inf }
 0x59d   : > { %v8784_v15 = vpop.f32.mrf.mxu2 }
 0x59e   : > { %10835 = vst [vmem:[#allocation30_spill] sm:$0xff] %v8784_v15 }
 0x59f   : > { %v2366_v54 = vpop.f32.mrf.mxu0 }
 0x5a0   : > { %v8780_v29 = vadd.f32 %v8139_v46, %v2366_v54 }
 0x5a1   : > { %v2404_v4 = vpop.f32.mrf.mxu1 }
 0x5a2   : > { %v2471_v26 = vsel %vm1002_vm0, %v8780_v29, -inf  ;;  %v8787_v59 = vadd.f32 %v8131_v33, %v2404_v4 }
 0x5a3   : > { %2472 = vmax.xlane.f32.xlu0 %v2471_v26 }
 0x5a4   : > { %v2480_v40 = vsel %vm1002_vm0, %v8787_v59, -inf }
 0x5a7   : > { %v2368_v37 = vpop.f32.mrf.mxu0 }
 0x5a8   : > { %v8790_v23 = vadd.f32 %v8147_v10, %v2368_v37 }
 0x5a9   : > { %v2407_v30 = vpop.f32.mrf.mxu1 }
 0x5aa   : > { %v8793_v19 = vadd.f32 %v8139_v46, %v2407_v30  ;;  %v2474_v20 = vsel %vm1002_vm0, %v8790_v23, -inf }
 0x5ab   : > { %2475 = vmax.xlane.f32.xlu2 %v2474_v20  ;;  %2481 = vmax.xlane.f32.xlu0 %v2480_v40 }
 0x5ac   : > { %v2483_v45 = vsel %vm1002_vm0, %v8793_v19, -inf }
 0x5ad   : > { %2484 = vmax.xlane.f32.xlu1 %v2483_v45  ;;  %v8801_v25 = vpop.f32.mrf.mxu2 }
 0x5ae   : > { %10836 = vst [vmem:[#allocation31_spill] sm:$0xff] %v8801_v25 }
 0x5b1   : > { %v2409_v18 = vpop.f32.mrf.mxu1 }
 0x5b2   : > { %v2455_v57 = vpop.xlane.xlu2 %2454  ;;  %v8812_v6 = vadd.f32 %v8147_v10, %v2409_v18 }
 0x5b3   : > { %v2501_v22 = vsub.f32 %v8720_v50, %v2455_v57  ;;  %2478 = vmax.xlane.f32.xlu2 %v2477_v49 }
 0x5b4   : > { %v2486_v38 = vsel %vm1002_vm0, %v8812_v6, -inf }
 0x5b5   : > { %v2517_v48 = vmul.f32 1.442695, %v2501_v22  ;;  %v8809_v35 = vpop.f32.mrf.mxu2 }
 0x5b6   : > { %10837 = vst [vmem:[#allocation32_spill] sm:$0xff] %v8809_v35 }
 0x5b7   : > { %7114 = vpow2.f32 %v2517_v48 }
 0x5ba   : > { %v2458_v22 = vpop.xlane.xlu1 %2457 }
 0x5bb   : > { %2487 = vmax.xlane.f32.xlu2 %v2486_v38 }
 0x5bd   : > { %v2443_v5 = vpop.f32.mrf.mxu2  ;;  %v8819_v4 = vpop.eup %7114 }
 0x5be   : > { %v8817_v54 = vadd.f32 %v8123_v0, %v2443_v5  ;;  %v2549_v37 = vsel %vm1002_vm0, %v8819_v4, 0.0 }
 0x5c0   : > { %v2489_v50 = vsel %vm1002_vm0, %v8817_v54, -inf }
 0x5c1   : > { %2490 = vmax.xlane.f32.xlu0 %v2489_v50 }
 0x5c2   : > { %v2461_v26 = vpop.xlane.xlu0 %2460 }
 0x5c3   : > { %v2503_v30 = vsub.f32 %v8734_v1, %v2461_v26  ;;  %2550 = vadd.xlane.f32.xlu2 %v2549_v37  ;;  %v2502_v26 = vsub.f32 %v8726_v8, %v2458_v22 }
 0x5c5   : > { %v2521_v20 = vmul.f32 1.442695, %v2503_v30  ;;  %v2445_v40 = vpop.f32.mrf.mxu2 }
 0x5c6   : > { %v8827_v45 = vadd.f32 %v8131_v33, %v2445_v40 }
 0x5c7   : > { %7116 = vpow2.f32 %v2521_v20 }
 0x5c8   : > { %v2492_v57 = vsel %vm1002_vm0, %v8827_v45, -inf }
 0x5c9   : > { %2493 = vmax.xlane.f32.xlu0 %v2492_v57 }
 0x5ca   : > { %v2464_v49 = vpop.xlane.xlu2 %2463 }
 0x5cb   : > { %v2504_v18 = vsub.f32 %v8742_v13, %v2464_v49  ;;  %v2519_v13 = vmul.f32 1.442695, %v2502_v26 }
 0x5cd   : > { %v8832_v48 = vpop.eup %7116  ;;  %v2523_v38 = vmul.f32 1.442695, %v2504_v18  ;;  %v2448_v5 = vpop.f32.mrf.mxu2 }
 0x5ce   : > { %v8835_v1 = vadd.f32 %v8139_v46, %v2448_v5  ;;  %v2555_v50 = vsel %vm1002_vm0, %v8832_v48, 0.0 }
 0x5cf   : > { %7118 = vpow2.f32 %v2523_v38  ;;  %2556 = vadd.xlane.f32.xlu2 %v2555_v50 }
 0x5d0   : > { %v2495_v37 = vsel %vm1002_vm0, %v8835_v1, -inf  ;;  %7120 = vpow2.f32 %v2519_v13 }
 0x5d1   : > { %2496 = vmax.xlane.f32.xlu0 %v2495_v37 }
 0x5d5   : > { %v8842_v30 = vpop.eup %7118  ;;  %v2450_v20 = vpop.f32.mrf.mxu2 }
 0x5d6   : > { %v8845_v40 = vadd.f32 %v8147_v10, %v2450_v20  ;;  %v2558_v57 = vsel %vm1002_vm0, %v8842_v30, 0.0  ;;  %v8851_v49 = vpop.eup %7120 }
 0x5d7   : > { %2559 = vadd.xlane.f32.xlu2 %v2558_v57  ;;  %v2552_v18 = vsel %vm1002_vm0, %v8851_v49, 0.0 }
 0x5d8   : > { %v2498_v8 = vsel %vm1002_vm0, %v8845_v40, -inf }
 0x5d9   : > { %2499 = vmax.xlane.f32.xlu1 %v2498_v8 }
 0x5e1   : > { %2553 = vadd.xlane.f32.xlu1 %v2552_v18 }
 0x5fa   : > { %2780 = vrot.lane.b32.xlu1 %v8152_v2, %s7710_s13 }
 0x606   : > { %v2467_v22 = vpop.xlane.xlu1 %2466 }
 0x607   : > { %v2505_v38 = vsub.f32 %v8768_v12, %v2467_v22 }
 0x609   : > { %v2525_v5 = vmul.f32 1.442695, %v2505_v38 }
 0x60b   : > { %7122 = vpow2.f32 %v2525_v5 }
 0x60e   : > { %v2470_v50 = vpop.xlane.xlu0 %2469 }
 0x60f   : > { %v2506_v26 = vsub.f32 %v8773_v53, %v2470_v50 }
 0x611   : > { %v8859_v37 = vpop.eup %7122  ;;  %v2527_v13 = vmul.f32 1.442695, %v2506_v26 }
 0x612   : > { %v2561_v20 = vsel %vm1002_vm0, %v8859_v37, 0.0 }
 0x613   : > { %7124 = vpow2.f32 %v2527_v13  ;;  %2562 = vadd.xlane.f32.xlu0 %v2561_v20 }
 0x616   : > { %v2473_v57 = vpop.xlane.xlu0 %2472 }
 0x617   : > { %v2507_v8 = vsub.f32 %v8780_v29, %v2473_v57 }
 0x619   : > { %v8864_v18 = vpop.eup %7124  ;;  %v2529_v35 = vmul.f32 1.442695, %v2507_v8 }
 0x61a   : > { %v2564_v12 = vsel %vm1002_vm0, %v8864_v18, 0.0 }
 0x61b   : > { %7126 = vpow2.f32 %v2529_v35  ;;  %2565 = vadd.xlane.f32.xlu0 %v2564_v12 }
 0x61e   : > { %v2476_v53 = vpop.xlane.xlu2 %2475  ;;  %v2482_v22 = vpop.xlane.xlu0 %2481 }
 0x61f   : > { %v2508_v38 = vsub.f32 %v8790_v23, %v2476_v53  ;;  %v2510_v5 = vsub.f32 %v8787_v59, %v2482_v22 }
 0x620   : > { %v2485_v50 = vpop.xlane.xlu1 %2484 }
 0x621   : > { %v8870_v26 = vpop.eup %7126  ;;  %v2531_v13 = vmul.f32 1.442695, %v2508_v38  ;;  %v2535_v20 = vmul.f32 1.442695, %v2510_v5  ;;  %v2511_v29 = vsub.f32 %v8793_v19, %v2485_v50 }
 0x622   : > { %v2567_v57 = vsel %vm1002_vm0, %v8870_v26, 0.0 }
 0x623   : > { %7128 = vpow2.f32 %v2531_v13  ;;  %2568 = vadd.xlane.f32.xlu2 %v2567_v57  ;;  %v2537_v35 = vmul.f32 1.442695, %v2511_v29  ;;  %v10838_v57 = vld [vmem:[#allocation22_spill] sm:$0xff] }
 0x624   : > { %7130 = vpow2.f32 %v2535_v20 }
 0x625   : > { %7132 = vpow2.f32 %v2537_v35 }
 0x626   : > { %v2479_v8 = vpop.xlane.xlu2 %2478 }
 0x627   : > { %v2509_v12 = vsub.f32 %v8804_v27, %v2479_v8  ;;  %v10839_v8 = vld [vmem:[#allocation23_spill] sm:$0xff] }
 0x629   : > { %v8876_v23 = vpop.eup %7128  ;;  %v2533_v59 = vmul.f32 1.442695, %v2509_v12 }
 0x62a   : > { %v8878_v53 = vpop.eup %7130  ;;  %v2570_v22 = vsel %vm1002_vm0, %v8876_v23, 0.0 }
 0x62b   : > { %7134 = vpow2.f32 %v2533_v59  ;;  %2571 = vadd.xlane.f32.xlu0 %v2570_v22  ;;  %v2576_v19 = vsel %vm1002_vm0, %v8878_v53, 0.0  ;;  %v8884_v38 = vpop.eup %7132 }
 0x62c   : > { %2577 = vadd.xlane.f32.xlu1 %v2576_v19  ;;  %v2579_v27 = vsel %vm1002_vm0, %v8884_v38, 0.0 }
 0x62e   : > { %v2488_v13 = vpop.xlane.xlu2 %2487 }
 0x631   : > { %v8886_v5 = vpop.eup %7134 }
 0x632   : > { %v2573_v50 = vsel %vm1002_vm0, %v8886_v5, 0.0 }
 0x633   : > { %2580 = vadd.xlane.f32.xlu0 %v2579_v27  ;;  %2574 = vadd.xlane.f32.xlu2 %v2573_v50  ;;  %v10840_v27 = vld [vmem:[#allocation25_spill] sm:$0xff] }
 0x634   : > { %v2491_v20 = vpop.xlane.xlu0 %2490 }
 0x636   : > { %v2551_v29 = vpop.xlane.xlu2 %2550 }
 0x637   : > { %7136 = vrcp.f32 %v2551_v29 }
 0x63c   : > { %v2494_v59 = vpop.xlane.xlu0 %2493 }
 0x63d   : > { %v7137_v19 = vpop.eup %7136 }
 0x642   : > { %v2557_v12 = vpop.xlane.xlu2 %2556 }
 0x644   : > { %v2497_v16 = vpop.xlane.xlu0 %2496 }
 0x645   : > { %2778 = vrot.lane.b32.xlu1 %v8156_v47, %s7710_s13  ;;  %v2515_v34 = vsub.f32 %v8835_v1, %v2497_v16  ;;  %v2513_v16 = vsub.f32 %v8817_v54, %v2491_v20  ;;  %v2514_v54 = vsub.f32 %v8827_v45, %v2494_v59 }
 0x647   : > { %2997 = vrot.lane.b32.xlu0 %v10824_v11, %s7711_s16  ;;  %v2613_v11 = vmul.f32 %v7137_v19, %v8819_v4  ;;  %v2545_v19 = vmul.f32 1.442695, %v2515_v34  ;;  %v2541_v34 = vmul.f32 1.442695, %v2513_v16 }
 0x649   : > { %v2629_v24 = vpack.c.bf16 %v2613_v11, %v2613_v11 }
 0x64a   : > { %v2560_v50 = vpop.xlane.xlu2 %2559 }
 0x64b   : > { %2922 = vrot.lane.b32.xlu2 %v10838_v57, %s7711_s16 }
 0x64c   : > { %v2500_v35 = vpop.xlane.xlu1 %2499 }
 0x64d   : > { %2924 = vrot.lane.b32.xlu1 %v10839_v8, %s7711_s16  ;;  %v10841_v8 = vld [vmem:[#allocation27_spill] sm:$0xff] }
 0x654   : > { %v2554_v22 = vpop.xlane.xlu1 %2553 }
 0x655   : > { %7138 = vrcp.f32 %v2554_v22  ;;  %2934 = vrot.lane.b32.xlu1 %v10840_v27, %s7711_s16  ;;  %v2649_v22 = vunpack.c.l.b16 %v2629_v24  ;;  %v2512_v27 = vsub.f32 %v8812_v6, %v2488_v13 }
 0x656   : > { %7140 = vrcp.f32 %v2560_v50  ;;  %v2543_v50 = vmul.f32 1.442695, %v2514_v54 }
 0x657   : > { %7142 = vrcp.f32 %v2557_v12 }
 0x658   : > { %7144 = vpow2.f32 %v2545_v19 }
 0x65b   : > { %v7139_v15 = vpop.eup %7138 }
 0x65c   : > { %v2614_v57 = vmul.f32 %v7139_v15, %v8851_v49  ;;  %v7141_v4 = vpop.eup %7140  ;;  %v2539_v15 = vmul.f32 1.442695, %v2512_v27 }
 0x65d   : > { %2936 = vrot.lane.b32.xlu1 %v10841_v8, %s7711_s16  ;;  %v7143_v11 = vpop.eup %7142  ;;  %v2616_v49 = vmul.f32 %v7141_v4, %v8842_v30  ;;  %v2516_v8 = vsub.f32 %v8845_v40, %v2500_v35 }
 0x65e   : > { %v2630_v29 = vpack.c.bf16 %v2614_v57, %v2614_v57  ;;  %v2615_v12 = vmul.f32 %v7143_v11, %v8832_v48  ;;  %7146 = vpow2.f32 %v2539_v15  ;;  %v8914_v1 = vpop.eup %7144 }
 0x65f   : > { %v2632_v24 = vpack.c.bf16 %v2616_v49, %v2616_v49  ;;  %v2591_v30 = vsel %vm1002_vm0, %v8914_v1, 0.0  ;;  %7148 = vpow2.f32 %v2541_v34  ;;  %v2547_v45 = vmul.f32 1.442695, %v2516_v8 }
 0x660   : > { %v2650_v52 = vunpack.c.l.b16 %v2630_v29  ;;  %7150 = vpow2.f32 %v2543_v50 }
 0x661   : > { %7152 = vpow2.f32 %v2547_v45 }
 0x662   : > { %v2653_v25 = vpack.c.b16 %v2650_v52, %v2649_v22  ;;  %v2631_v52 = vpack.c.bf16 %v2615_v12, %v2615_v12 }
 0x664   : > { %6353 = vmatmul.msk.bf16.vlgmr.msrb.gmra.mxu3 %vm1002_vm0, %v2653_v25  ;;  %v8918_v25 = vpop.eup %7146  ;;  %v2651_v48 = vunpack.c.l.b16 %v2631_v52 }
 0x665   : > { %3036 = vrot.lane.b32.xlu1 %v8054_v58, %s7711_s16  ;;  %v2652_v58 = vunpack.c.l.b16 %v2632_v24  ;;  %v2582_v20 = vsel %vm1002_vm0, %v8918_v25, 0.0  ;;  %v8928_v57 = vpop.eup %7148 }
 0x666   : > { %v2585_v29 = vsel %vm1002_vm0, %v8928_v57, 0.0  ;;  %v8935_v59 = vpop.eup %7150 }
 0x667   : > { %v2654_v13 = vpack.c.b16 %v2652_v58, %v2651_v48  ;;  %v2588_v22 = vsel %vm1002_vm0, %v8935_v59, 0.0  ;;  %v8945_v35 = vpop.eup %7152 }
 0x66c   : > { %v2781_v6 = vpop.permute.xlu1 %2780 }
 0x66d   : > { %2796 = vmatpush.bf16.msra.mxu2 %v2781_v6  ;;  %2930 = vrot.lane.b32.xlu1 %v8063_v3, %s7711_s16  ;;  %v10842_v3 = vld [vmem:[#allocation26_spill] sm:$0xff] }
 0x671   : > { %2592 = vadd.xlane.f32.xlu0 %v2591_v30 }
 0x674   : > { %6354 = vmatmul.msk.bf16.gmra.mxu3 %vm1002_vm0, %v2654_v13  ;;  %2583 = vadd.xlane.f32.xlu2 %v2582_v20 }
 0x675   : > { %2932 = vrot.lane.b32.xlu1 %v10842_v3, %s7711_s16 }
 0x67c   : > { %2586 = vadd.xlane.f32.xlu2 %v2585_v29 }
 0x67d   : > { %3079 = vrot.lane.b32.xlu1 %v8112_v39, %s7711_s16  ;;  %v2594_v39 = vsel %vm1002_vm0, %v8945_v35, 0.0 }
 0x684   : > { %6361 = vmatmul.msk.bf16.vlgmr.msra.gmra.mxu3 %vm1002_vm0, %v8739_v7  ;;  %2589 = vadd.xlane.f32.xlu2 %v2588_v22 }
 0x685   : > { %3322 = vrot.lane.b32.xlu1 %v8089_v55, %s7711_s16  ;;  %3077 = vrot.lane.b32.xlu0 %v8101_v9, %s7711_s16 }
 0x686   : > { %v2563_v40 = vpop.xlane.xlu0 %2562 }
 0x687   : > { %7154 = vrcp.f32 %v2563_v40 }
 0x68c   : > { %2595 = vadd.xlane.f32.xlu2 %v2594_v39 }
 0x68d   : > { %3320 = vrot.lane.b32.xlu0 %v8095_v62, %s7711_s16  ;;  %v7155_v7 = vpop.eup %7154 }
 0x68e   : > { %v2566_v27 = vpop.xlane.xlu0 %2565  ;;  %v2617_v4 = vmul.f32 %v7155_v7, %v8859_v37 }
 0x68f   : > { %7156 = vrcp.f32 %v2566_v27 }
 0x690   : > { %v2633_v9 = vpack.c.bf16 %v2617_v4, %v2617_v4 }
 0x692   : > { %v2690_v49 = vunpack.c.l.b16 %v2633_v9 }
 0x694   : > { %6362 = vmatmul.msk.bf16.gmra.mxu3 %vm1002_vm0, %v8746_v60 }
 0x695   : > { %v7157_v55 = vpop.eup %7156 }
 0x696   : > { %v2618_v19 = vmul.f32 %v7157_v55, %v8864_v18  ;;  %v2569_v11 = vpop.xlane.xlu2 %2568 }
 0x697   : > { %7158 = vrcp.f32 %v2569_v11 }
 0x698   : > { %v2634_v15 = vpack.c.bf16 %v2618_v19, %v2618_v19 }
 0x69a   : > { %v2691_v12 = vunpack.c.l.b16 %v2634_v15 }
 0x69c   : > { %v2694_v16 = vpack.c.b16 %v2691_v12, %v2690_v49 }
 0x69d   : > { %v7159_v24 = vpop.eup %7158 }
 0x69e   : > { %6355 = vmatmul.msk.bf16.vlgmr.msra.gmra.mxu0 %vm1002_vm0, %v2694_v16  ;;  %v2572_v62 = vpop.xlane.xlu0 %2571  ;;  %v2619_v37 = vmul.f32 %v7159_v24, %v8870_v26 }
 0x69f   : > { %v2578_v6 = vpop.xlane.xlu1 %2577  ;;  %7160 = vrcp.f32 %v2572_v62 }
 0x6a0   : > { %7162 = vrcp.f32 %v2578_v6  ;;  %v2635_v18 = vpack.c.bf16 %v2619_v37, %v2619_v37 }
 0x6a2   : > { %v2692_v54 = vunpack.c.l.b16 %v2635_v18 }
 0x6a4   : > { %3038 = vrot.lane.b32.xlu2 %v10830_v61, %s7711_s16 }
 0x6a5   : > { %v7161_v60 = vpop.eup %7160 }
 0x6a6   : > { %v2620_v52 = vmul.f32 %v7161_v60, %v8876_v23  ;;  %v2575_v34 = vpop.xlane.xlu2 %2574  ;;  %v7163_v58 = vpop.eup %7162 }
 0x6a7   : > { %7164 = vrcp.f32 %v2575_v34  ;;  %v2622_v48 = vmul.f32 %v7163_v58, %v8878_v53  ;;  %v2581_v4 = vpop.xlane.xlu0 %2580 }
 0x6a8   : > { %v2636_v30 = vpack.c.bf16 %v2620_v52, %v2620_v52  ;;  %7166 = vrcp.f32 %v2581_v4 }
 0x6a9   : > { %v2638_v50 = vpack.c.bf16 %v2622_v48, %v2622_v48 }
 0x6aa   : > { %v2693_v13 = vunpack.c.l.b16 %v2636_v30 }
 0x6ab   : > { %v2732_v8 = vunpack.c.l.b16 %v2638_v50 }
 0x6ac   : > { %v2695_v20 = vpack.c.b16 %v2693_v13, %v2692_v54 }
 0x6ad   : > { %v7165_v3 = vpop.eup %7164 }
 0x6ae   : > { %v2621_v26 = vmul.f32 %v7165_v3, %v8886_v5  ;;  %6356 = vmatmul.msk.bf16.gmra.mxu0 %vm1002_vm0, %v2695_v20  ;;  %v2923_v22 = vpop.permute.xlu2 %2922  ;;  %v7167_v58 = vpop.eup %7166 }
 0x6af   : > { %v2946_v40 = vrot.slane %v2923_v22, 4  ;;  %v2623_v54 = vmul.f32 %v7167_v58, %v8884_v38 }
 0x6b0   : > { %v2637_v61 = vpack.c.bf16 %v2621_v26, %v2621_v26 }
 0x6b1   : > { %v3040_v27 = vunpack.c.l.b16 %v2946_v40 }
 0x6b2   : > { %v2731_v29 = vunpack.c.l.b16 %v2637_v61  ;;  %v2639_v61 = vpack.c.bf16 %v2623_v54, %v2623_v54 }
 0x6b4   : > { %v2735_v45 = vpack.c.b16 %v2732_v8, %v2731_v29  ;;  %v2733_v22 = vunpack.c.l.b16 %v2639_v61 }
 0x6b6   : > { %6357 = vmatmul.msk.bf16.vlgmr.msra.gmra.mxu1 %vm1002_vm0, %v2735_v45 }
 0x6b7   : > { %v2779_v23 = vpop.permute.xlu1 %2778 }
 0x6b8   : > { %2797 = vmatpush.bf16.msra.mxu2 %v2779_v23 }
 0x6b9   : > { %v2998_v19 = vpop.permute.xlu0 %2997 }
 0x6be   : > { %6363 = vmatmul.msk.bf16.vlgmr.msrb.gmra.mxu0 %vm1002_vm0, %v8748_v43 }
 0x6bf   : > { %v2925_v53 = vpop.permute.xlu1 %2924 }
 0x6c0   : > { %v2947_v39 = vrot.slane %v2925_v53, 4 }
 0x6c2   : > { %v3041_v7 = vunpack.c.l.b16 %v2947_v39 }
 0x6c4   : > { %v3044_v5 = vpack.c.b16 %v3041_v7, %v3040_v27 }
 0x6c6   : > { %v3053_v55 = vsel %vm1002_vm0, %v3044_v5, 0 }
 0x6c7   : > { %3065 = vmatpush.bf16.xpose.msrb.mxu1 %v3053_v55  ;;  %v2935_v9 = vpop.permute.xlu1 %2934 }
 0x6c8   : > { %v2952_v11 = vrot.slane %v2935_v9, 4 }
 0x6ca   : > { %v3083_v12 = vunpack.c.l.b16 %v2952_v11 }
 0x6ce   : > { %6364 = vmatmul.msk.bf16.gmra.mxu0 %vm1002_vm0, %v2998_v19 }
 0x6cf   : > { %v2937_v15 = vpop.permute.xlu1 %2936 }
 0x6d0   : > { %v2953_v49 = vrot.slane %v2937_v15, 4 }
 0x6d2   : > { %v3084_v16 = vunpack.c.l.b16 %v2953_v49 }
 0x6d4   : > { %v3086_v62 = vpack.c.b16 %v3084_v16, %v3083_v12 }
 0x6d6   : > { %v3097_v43 = vsel %vm1002_vm0, %v3086_v62, 0 }
 0x6d7   : > { %3105 = vmatpush.bf16.xpose.msrb.mxu2 %v3097_v43  ;;  %v3037_v24 = vpop.permute.xlu1 %3036 }
 0x6df   : > { %v2931_v6 = vpop.permute.xlu1 %2930 }
 0x6e0   : > { %v2950_v37 = vrot.slane %v2931_v6, 4 }
 0x6e2   : > { %v3081_v30 = vunpack.c.l.b16 %v2950_v37 }
 0x6e4   : > { %v2593_v8 = vpop.xlane.xlu0 %2592 }
 0x6e7   : > { %v8969_v60 = vpop.f32.mrf.mxu3  ;;  %v2933_v18 = vpop.permute.xlu1 %2932 }
 0x6e8   : > { %v2951_v52 = vrot.slane %v2933_v18, 4  ;;  %v2584_v34 = vpop.xlane.xlu2 %2583 }
 0x6e9   : > { %7168 = vrcp.f32 %v2584_v34 }
 0x6ea   : > { %v3082_v48 = vunpack.c.l.b16 %v2951_v52 }
 0x6ec   : > { %v3085_v13 = vpack.c.b16 %v3082_v48, %v3081_v30 }
 0x6ee   : > { %v3094_v20 = vsel %vm1002_vm0, %v3085_v13, 0 }
 0x6ef   : > { %v7169_v3 = vpop.eup %7168  ;;  %v8973_v50 = vpop.f32.mrf.mxu3  ;;  %3106 = vmatpush.bf16.xpose.msrb.mxu2 %v3094_v20 }
 0x6f0   : > { %v8975_v26 = vpop.permute.xlu1 %3079  ;;  %v2624_v29 = vmul.f32 %v7169_v3, %v8918_v25  ;;  %v2587_v45 = vpop.xlane.xlu2 %2586 }
 0x6f1   : > { %7170 = vrcp.f32 %v2587_v45 }
 0x6f2   : > { %v2640_v23 = vpack.c.bf16 %v2624_v29, %v2624_v29 }
 0x6f4   : > { %v2734_v40 = vunpack.c.l.b16 %v2640_v23 }
 0x6f6   : > { %v2736_v53 = vpack.c.b16 %v2734_v40, %v2733_v22 }
 0x6f7   : > { %v8978_v38 = vpop.f32.mrf.mxu3  ;;  %v3078_v7 = vpop.permute.xlu0 %3077 }
 0x6f8   : > { %v3323_v39 = vpop.permute.xlu1 %3322  ;;  %v2590_v27 = vpop.xlane.xlu2 %2589  ;;  %6358 = vmatmul.msk.bf16.gmra.mxu1 %vm1002_vm0, %v2736_v53 }
 0x6f9   : > { %3338 = vmatpush.bf16.msrb.mxu3 %v3323_v39  ;;  %v7171_v5 = vpop.eup %7170  ;;  %7172 = vrcp.f32 %v2590_v27 }
 0x6fa   : > { %v2625_v4 = vmul.f32 %v7171_v5, %v8928_v57 }
 0x6fc   : > { %v2641_v9 = vpack.c.bf16 %v2625_v4, %v2625_v4 }
 0x6fe   : > { %v2772_v12 = vunpack.c.l.b16 %v2641_v9 }
 0x6ff   : > { %v7173_v55 = vpop.eup %7172  ;;  %v8982_v25 = vpop.f32.mrf.mxu3 }
 0x700   : > { %v2626_v19 = vmul.f32 %v7173_v55, %v8935_v59  ;;  %v2596_v11 = vpop.xlane.xlu2 %2595  ;;  %v3321_v15 = vpop.permute.xlu0 %3320 }
 0x701   : > { %7174 = vrcp.f32 %v2596_v11  ;;  %3339 = vmatpush.bf16.msrb.mxu3 %v3321_v15 }
 0x702   : > { %v2642_v49 = vpack.c.bf16 %v2626_v19, %v2626_v19  ;;  %7176 = vrcp.f32 %v2593_v8 }
 0x704   : > { %v2773_v16 = vunpack.c.l.b16 %v2642_v49 }
 0x706   : > { %v2776_v62 = vpack.c.b16 %v2773_v16, %v2772_v12 }
 0x707   : > { %v7175_v43 = vpop.eup %7174  ;;  %v2985_v6 = vpop.f32.mrf.mxu3 }
 0x708   : > { %v8986_v37 = vadd.f32 %v8123_v0, %v2985_v6  ;;  %6359 = vmatmul.msk.bf16.vlgmr.msra.gmra.mxu2 %vm1002_vm0, %v2776_v62  ;;  %6365 = vmatmul.msk.bf16.vlgmr.msrb.gmra.mxu1 %vm1002_vm0, %v3037_v24  ;;  %v7177_v57 = vpop.eup %7176  ;;  %v2628_v59 = vmul.f32 %v7175_v43, %v8945_v35  ;;  %v3039_v3 = vpop.permute.xlu2 %3038 }
 0x709   : > { %v2627_v52 = vmul.f32 %v7177_v57, %v8914_v1 }
 0x70a   : > { %v3118_v18 = vsel %vm1002_vm0, %v8986_v37, -inf  ;;  %v2644_v34 = vpack.c.bf16 %v2628_v59, %v2628_v59 }
 0x70b   : > { %3119 = vmax.xlane.f32.xlu1 %v3118_v18  ;;  %v2643_v30 = vpack.c.bf16 %v2627_v52, %v2627_v52 }
 0x70c   : > { %v2775_v13 = vunpack.c.l.b16 %v2644_v34 }
 0x70d   : > { %v2774_v20 = vunpack.c.l.b16 %v2643_v30 }
 0x70f   : > { %v2987_v58 = vpop.f32.mrf.mxu3  ;;  %v2777_v24 = vpack.c.b16 %v2775_v13, %v2774_v20 }
 0x710   : > { %v2988_v48 = vadd.f32 %v8131_v33, %v2987_v58 }
 0x712   : > { %v3121_v54 = vsel %vm1002_vm0, %v2988_v48, -inf }
 0x713   : > { %3122 = vmax.xlane.f32.xlu0 %v3121_v54 }
 0x717   : > { %v2990_v61 = vpop.f32.mrf.mxu3 }
 0x718   : > { %v8997_v35 = vadd.f32 %v8139_v46, %v2990_v61  ;;  %6360 = vmatmul.msk.bf16.gmra.mxu2 %vm1002_vm0, %v2777_v24  ;;  %6366 = vmatmul.msk.bf16.gmra.mxu1 %vm1002_vm0, %v3039_v3 }
 0x71a   : > { %v3124_v1 = vsel %vm1002_vm0, %v8997_v35, -inf }
 0x71b   : > { %3125 = vmax.xlane.f32.xlu2 %v3124_v1  ;;  %v9003_v8 = vpop.f32.mrf.mxu0 }
 0x71f   : > { %v2992_v39 = vpop.f32.mrf.mxu3 }
 0x720   : > { %v9020_v27 = vadd.f32 %v8147_v10, %v2992_v39 }
 0x723   : > { %v9005_v29 = vpop.f32.mrf.mxu0 }
 0x728   : > { %6367 = vmatmul.msk.bf16.vlgmr.msrb.gmra.mxu2 %vm1002_vm0, %v3078_v7 }
 0x72b   : > { %v9008_v45 = vpop.f32.mrf.mxu0 }
 0x733   : > { %v9010_v23 = vpop.f32.mrf.mxu0  ;;  %v9039_v12 = vpop.f32.mrf.mxu1 }
 0x738   : > { %6368 = vmatmul.msk.bf16.gmra.mxu2 %vm1002_vm0, %v8975_v26  ;;  %v3127_v26 = vsel %vm1002_vm0, %v9020_v27, -inf }
 0x73b   : > { %v3026_v22 = vpop.f32.mrf.mxu0  ;;  %v9041_v16 = vpop.f32.mrf.mxu1 }
 0x73c   : > { %v9015_v40 = vadd.f32 %v8123_v0, %v3026_v22 }
 0x73e   : > { %v3130_v53 = vsel %vm1002_vm0, %v9015_v40, -inf }
 0x73f   : > { %3131 = vmax.xlane.f32.xlu1 %v3130_v53 }
 0x743   : > { %v3028_v7 = vpop.f32.mrf.mxu0 }
 0x744   : > { %v9023_v5 = vadd.f32 %v8131_v33, %v3028_v7 }
 0x746   : > { %v3133_v4 = vsel %vm1002_vm0, %v9023_v5, -inf }
 0x747   : > { %3134 = vmax.xlane.f32.xlu0 %v3133_v4  ;;  %3128 = vmax.xlane.f32.xlu1 %v3127_v26 }
 0x74b   : > { %v3031_v55 = vpop.f32.mrf.mxu0 }
 0x74c   : > { %v9030_v9 = vadd.f32 %v8139_v46, %v3031_v55 }
 0x74e   : > { %v3136_v19 = vsel %vm1002_vm0, %v9030_v9, -inf }
 0x74f   : > { %3137 = vmax.xlane.f32.xlu0 %v3136_v19 }
 0x753   : > { %v3033_v11 = vpop.f32.mrf.mxu0 }
 0x754   : > { %v9035_v15 = vadd.f32 %v8147_v10, %v3033_v11 }
 0x756   : > { %v3139_v49 = vsel %vm1002_vm0, %v9035_v15, -inf }
 0x757   : > { %3140 = vmax.xlane.f32.xlu2 %v3139_v49 }
 0x775   : > { %v9043_v62 = vpop.f32.mrf.mxu1 }
 0x77d   : > { %v9045_v43 = vpop.f32.mrf.mxu1 }
 0x77e   : > { %v3120_v26 = vpop.xlane.xlu1 %3119 }
 0x77f   : > { %v3166_v11 = vsub.f32 %v8986_v37, %v3120_v26 }
 0x785   : > { %v3067_v6 = vpop.f32.mrf.mxu1 }
 0x786   : > { %v3068_v57 = vadd.f32 %v8123_v0, %v3067_v6  ;;  %v3123_v52 = vpop.xlane.xlu0 %3122  ;;  %v3182_v6 = vmul.f32 1.442695, %v3166_v11 }
 0x787   : > { %v3167_v30 = vsub.f32 %v2988_v48, %v3123_v52 }
 0x788   : > { %v3142_v59 = vsel %vm1002_vm0, %v3068_v57, -inf }
 0x789   : > { %3143 = vmax.xlane.f32.xlu2 %v3142_v59  ;;  %v3184_v13 = vmul.f32 1.442695, %v3167_v30 }
 0x78b   : > { %v9049_v18 = vpop.f32.mrf.mxu2  ;;  %7178 = vpow2.f32 %v3184_v13 }
 0x78c   : > { %7180 = vpow2.f32 %v3182_v6 }
 0x78d   : > { %v3069_v34 = vpop.f32.mrf.mxu1 }
 0x78e   : > { %v9052_v58 = vadd.f32 %v8131_v33, %v3069_v34 }
 0x790   : > { %v3145_v54 = vsel %vm1002_vm0, %v9052_v58, -inf }
 0x791   : > { %3146 = vmax.xlane.f32.xlu0 %v3145_v54  ;;  %v9065_v22 = vpop.eup %7178 }
 0x792   : > { %v3217_v7 = vsel %vm1002_vm0, %v9065_v22, 0.0 }
 0x793   : > { %v9056_v20 = vpop.f32.mrf.mxu2 }
 0x795   : > { %v3072_v24 = vpop.f32.mrf.mxu1 }
 0x796   : > { %v9059_v3 = vadd.f32 %v8139_v46, %v3072_v24  ;;  %v3126_v24 = vpop.xlane.xlu2 %3125 }
 0x797   : > { %v3168_v11 = vsub.f32 %v8997_v35, %v3126_v24 }
 0x798   : > { %v3148_v61 = vsel %vm1002_vm0, %v9059_v3, -inf }
 0x799   : > { %3149 = vmax.xlane.f32.xlu1 %v3148_v61 }
 0x79b   : > { %v9063_v1 = vpop.f32.mrf.mxu2 }
 0x79d   : > { %v3074_v48 = vpop.f32.mrf.mxu1 }
 0x79e   : > { %v9068_v53 = vadd.f32 %v8147_v10, %v3074_v48 }
 0x7a0   : > { %v3151_v39 = vsel %vm1002_vm0, %v9068_v53, -inf }
 0x7a1   : > { %3152 = vmax.xlane.f32.xlu2 %v3151_v39  ;;  %3218 = vadd.xlane.f32.xlu1 %v3217_v7 }
 0x7a3   : > { %v9074_v4 = vpop.f32.mrf.mxu2 }
 0x7a5   : > { %3363 = vrot.lane.b32.xlu0 %v8087_v51, %s7711_s16 }
 0x7ab   : > { %v3108_v55 = vpop.f32.mrf.mxu2 }
 0x7ac   : > { %v9079_v19 = vadd.f32 %v8123_v0, %v3108_v55  ;;  %v9091_v0 = vpop.eup %7180 }
 0x7ad   : > { %v3214_v34 = vsel %vm1002_vm0, %v9091_v0, 0.0 }
 0x7ae   : > { %v3154_v49 = vsel %vm1002_vm0, %v9079_v19, -inf }
 0x7af   : > { %3155 = vmax.xlane.f32.xlu2 %v3154_v49  ;;  %v3186_v49 = vmul.f32 1.442695, %v3168_v11 }
 0x7b2   : > { %v3132_v61 = vpop.xlane.xlu1 %3131 }
 0x7b3   : > { %v3110_v59 = vpop.f32.mrf.mxu2 }
 0x7b4   : > { %v9085_v52 = vadd.f32 %v8131_v33, %v3110_v59 }
 0x7b6   : > { %v3157_v51 = vsel %vm1002_vm0, %v9085_v52, -inf }
 0x7b7   : > { %3158 = vmax.xlane.f32.xlu2 %v3157_v51 }
 0x7ba   : > { %3361 = vrot.lane.b32.xlu1 %v8091_v56, %s7711_s16  ;;  %v3135_v26 = vpop.xlane.xlu0 %3134  ;;  %v3129_v59 = vpop.xlane.xlu1 %3128 }
 0x7bb   : > { %v3113_v37 = vpop.f32.mrf.mxu2 }
 0x7bc   : > { %v9101_v13 = vadd.f32 %v8139_v46, %v3113_v37 }
 0x7be   : > { %v3160_v56 = vsel %vm1002_vm0, %v9101_v13, -inf }
 0x7bf   : > { %3215 = vadd.xlane.f32.xlu2 %v3214_v34 }
 0x7c2   : > { %v3138_v37 = vpop.xlane.xlu0 %3137 }
 0x7c3   : > { %v3115_v30 = vpop.f32.mrf.mxu2 }
 0x7c4   : > { %v9096_v54 = vadd.f32 %v8147_v10, %v3115_v30  ;;  %v3170_v10 = vsub.f32 %v9015_v40, %v3132_v61 }
 0x7c6   : > { %v3163_v33 = vsel %vm1002_vm0, %v9096_v54, -inf  ;;  %v3190_v39 = vmul.f32 1.442695, %v3170_v10 }
 0x7c7   : > { %3164 = vmax.xlane.f32.xlu2 %v3163_v33 }
 0x7c8   : > { %7182 = vpow2.f32 %v3190_v39 }
 0x7ca   : > { %v3141_v48 = vpop.xlane.xlu2 %3140 }
 0x7ce   : > { %v9109_v6 = vpop.eup %7182 }
 0x7cf   : > { %3161 = vmax.xlane.f32.xlu0 %v3160_v56  ;;  %v3226_v40 = vsel %vm1002_vm0, %v9109_v6, 0.0  ;;  %v3169_v56 = vsub.f32 %v9020_v27, %v3129_v59 }
 0x7d1   : > { %v3188_v10 = vmul.f32 1.442695, %v3169_v56 }
 0x7df   : > { %3404 = vrot.lane.b32.xlu2 %v8118_v17, %s7711_s16  ;;  %v3171_v17 = vsub.f32 %v9023_v5, %v3135_v26 }
 0x7fc   : > { %v3144_v7 = vpop.xlane.xlu2 %3143 }
 0x7fd   : > { %v3174_v55 = vsub.f32 %v3068_v57, %v3144_v7  ;;  %v3192_v57 = vmul.f32 1.442695, %v3171_v17  ;;  %v3172_v7 = vsub.f32 %v9030_v9, %v3138_v37  ;;  %v3173_v9 = vsub.f32 %v9035_v15, %v3141_v48 }
 0x7ff   : > { %v3198_v46 = vmul.f32 1.442695, %v3174_v55  ;;  %v3194_v11 = vmul.f32 1.442695, %v3172_v7  ;;  %v3196_v17 = vmul.f32 1.442695, %v3173_v9 }
 0x801   : > { %7184 = vpow2.f32 %v3198_v46 }
 0x802   : > { %7186 = vpow2.f32 %v3186_v49 }
 0x803   : > { %7188 = vpow2.f32 %v3192_v57 }
 0x804   : > { %v3147_v5 = vpop.xlane.xlu0 %3146 }
 0x807   : > { %v9112_v51 = vpop.eup %7184 }
 0x808   : > { %3227 = vadd.xlane.f32.xlu2 %v3226_v40  ;;  %v3238_v35 = vsel %vm1002_vm0, %v9112_v51, 0.0  ;;  %v9118_v34 = vpop.eup %7186 }
 0x809   : > { %3239 = vadd.xlane.f32.xlu1 %v3238_v35  ;;  %v3220_v61 = vsel %vm1002_vm0, %v9118_v34, 0.0  ;;  %v9124_v39 = vpop.eup %7188 }
 0x80a   : > { %v3229_v27 = vsel %vm1002_vm0, %v9124_v39, 0.0 }
 0x80c   : > { %v3150_v30 = vpop.xlane.xlu1 %3149 }
 0x80d   : > { %v3176_v33 = vsub.f32 %v9059_v3, %v3150_v30 }
 0x80f   : > { %v3202_v24 = vmul.f32 1.442695, %v3176_v33  ;;  %v3175_v33 = vsub.f32 %v9052_v58, %v3147_v5 }
 0x810   : > { %3221 = vadd.xlane.f32.xlu2 %v3220_v61 }
 0x811   : > { %7190 = vpow2.f32 %v3202_v24  ;;  %v3200_v15 = vmul.f32 1.442695, %v3175_v33 }
 0x812   : > { %7192 = vpow2.f32 %v3188_v10 }
 0x813   : > { %7194 = vpow2.f32 %v3194_v11 }
 0x814   : > { %v9133_v46 = vpop.xlane.xlu2 %3152  ;;  %v3219_v57 = vpop.xlane.xlu1 %3218  ;;  %7196 = vpow2.f32 %v3196_v17 }
 0x817   : > { %v9127_v26 = vpop.eup %7190  ;;  %v3364_v55 = vpop.permute.xlu0 %3363 }
 0x818   : > { %3230 = vadd.xlane.f32.xlu2 %v3229_v27  ;;  %3379 = vmatpush.bf16.msra.mxu0 %v3364_v55  ;;  %v3244_v3 = vsel %vm1002_vm0, %v9127_v26, 0.0  ;;  %v9135_v49 = vpop.eup %7192 }
 0x819   : > { %3245 = vadd.xlane.f32.xlu0 %v3244_v3  ;;  %v3223_v59 = vsel %vm1002_vm0, %v9135_v49, 0.0  ;;  %v9141_v35 = vpop.eup %7194 }
 0x81a   : > { %v3232_v56 = vsel %vm1002_vm0, %v9141_v35, 0.0  ;;  %v9147_v61 = vpop.eup %7196 }
 0x81b   : > { %v3235_v5 = vsel %vm1002_vm0, %v9147_v61, 0.0 }
 0x820   : > { %3224 = vadd.xlane.f32.xlu2 %v3223_v59 }
 0x822   : > { %v3156_v37 = vpop.xlane.xlu2 %3155 }
 0x823   : > { %v3178_v40 = vsub.f32 %v9079_v19, %v3156_v37 }
 0x825   : > { %v3206_v30 = vmul.f32 1.442695, %v3178_v40 }
 0x827   : > { %7198 = vpow2.f32 %v3206_v30 }
 0x828   : > { %3233 = vadd.xlane.f32.xlu2 %v3232_v56  ;;  %7200 = vrcp.f32 %v3219_v57 }
 0x829   : > { %7202 = vpow2.f32 %v3200_v15 }
 0x82a   : > { %v3159_v48 = vpop.xlane.xlu2 %3158 }
 0x82b   : > { %v3179_v24 = vsub.f32 %v9085_v52, %v3159_v48 }
 0x82c   : > { %v3362_v10 = vpop.permute.xlu1 %3361 }
 0x82d   : > { %v9149_v19 = vpop.eup %7198  ;;  %v3208_v7 = vmul.f32 1.442695, %v3179_v24  ;;  %3380 = vmatpush.bf16.msra.mxu0 %v3362_v10 }
 0x82e   : > { %v3250_v58 = vsel %vm1002_vm0, %v9149_v19, 0.0  ;;  %v7201_v52 = vpop.eup %7200 }
 0x82f   : > { %7204 = vpow2.f32 %v3208_v7  ;;  %3251 = vadd.xlane.f32.xlu1 %v3250_v58  ;;  %v9155_v27 = vpop.eup %7202  ;;  %v3279_v11 = vmul.f32 %v7201_v52, %v9065_v22  ;;  %v3177_v7 = vsub.f32 %v9068_v53, %v9133_v46  ;;  %v2809_v52 = vpack.c.bf16 %v8969_v60, %v8969_v60 }
 0x830   : > { %3236 = vadd.xlane.f32.xlu2 %v3235_v5  ;;  %v3241_v59 = vsel %vm1002_vm0, %v9155_v27, 0.0 }
 0x831   : > { %v3295_v37 = vpack.c.bf16 %v3279_v11, %v3279_v11  ;;  %v3204_v5 = vmul.f32 1.442695, %v3177_v7 }
 0x832   : > { %v3216_v55 = vpop.xlane.xlu2 %3215 }
 0x833   : > { %7206 = vrcp.f32 %v3216_v55  ;;  %v3315_v33 = vunpack.c.l.b16 %v3295_v37 }
 0x835   : > { %v9157_v3 = vpop.eup %7204 }
 0x836   : > { %v3253_v9 = vsel %vm1002_vm0, %v9157_v3, 0.0 }
 0x837   : > { %3254 = vadd.xlane.f32.xlu0 %v3253_v9 }
 0x838   : > { %3242 = vadd.xlane.f32.xlu2 %v3241_v59  ;;  %v2144_v59 = vpack.c.bf16 %v8702_v44, %v8702_v44  ;;  %v2145_v44 = vpack.c.bf16 %v8709_v14, %v8709_v14 }
 0x839   : > { %v7207_v17 = vpop.eup %7206 }
 0x83a   : > { %v3278_v40 = vmul.f32 %v7207_v17, %v9091_v0  ;;  %v3165_v57 = vpop.xlane.xlu2 %3164  ;;  %v2147_v17 = vpack.c.bf16 %v8715_v32, %v8715_v32  ;;  %v2812_v32 = vpack.c.bf16 %v8982_v25, %v8982_v25  ;;  %v2148_v25 = vpack.c.bf16 %v8750_v42, %v8750_v42 }
 0x83b   : > { %v3181_v22 = vsub.f32 %v9096_v54, %v3165_v57  ;;  %v2146_v42 = vpack.c.bf16 %v8712_v28, %v8712_v28 }
 0x83c   : > { %v3294_v30 = vpack.c.bf16 %v3278_v40, %v3278_v40 }
 0x83d   : > { %v3212_v10 = vmul.f32 1.442695, %v3181_v22 }
 0x83e   : > { %v3314_v56 = vunpack.c.l.b16 %v3294_v30 }
 0x83f   : > { %7208 = vpow2.f32 %v3212_v10 }
 0x840   : > { %v3318_v15 = vpack.c.b16 %v3315_v33, %v3314_v56 }
 0x842   : > { %v3405_v48 = vpop.permute.xlu2 %3404  ;;  %6369 = vmatmul.msk.bf16.vlgmr.msrb.gmra.mxu3 %vm1002_vm0, %v3318_v15  ;;  %v3162_v0 = vpop.xlane.xlu0 %3161 }
 0x843   : > { %3420 = vmatpush.bf16.msra.mxu1 %v3405_v48  ;;  %v3180_v24 = vsub.f32 %v9101_v13, %v3162_v0 }
 0x845   : > { %v3210_v58 = vmul.f32 1.442695, %v3180_v24 }
 0x847   : > { %7210 = vpow2.f32 %v3210_v58 }
 0x848   : > { %3445 = vrot.lane.b32.xlu1 %v8152_v2, %s7711_s16  ;;  %v9176_v2 = vpop.eup %7208  ;;  %7212 = vpow2.f32 %v3204_v5 }
 0x84b   : > { %3443 = vrot.lane.b32.xlu0 %v8156_v47, %s7711_s16 }
 0x84d   : > { %v9178_v47 = vpop.eup %7210 }
 0x84e   : > { %v3256_v54 = vsel %vm1002_vm0, %v9178_v47, 0.0  ;;  %v9184_v13 = vpop.eup %7212 }
 0x84f   : > { %v3247_v53 = vsel %vm1002_vm0, %v9184_v13, 0.0 }
 0x850   : > { %3402 = vrot.lane.b32.xlu2 %v8120_v63, %s7711_s16  ;;  %v3259_v63 = vsel %vm1002_vm0, %v9176_v2, 0.0 }
 0x872   : > { %3260 = vadd.xlane.f32.xlu1 %v3259_v63 }
 0x875   : > { %3257 = vadd.xlane.f32.xlu0 %v3256_v54 }
 0x879   : > { %3248 = vadd.xlane.f32.xlu2 %v3247_v53 }
 0x87b   : > { %v3228_v46 = vpop.xlane.xlu2 %3227 }
 0x87c   : > { %7214 = vrcp.f32 %v3228_v46  ;;  %v3240_v63 = vpop.xlane.xlu1 %3239 }
 0x882   : > { %v7215_v9 = vpop.eup %7214 }
 0x883   : > { %v3222_v55 = vpop.xlane.xlu2 %3221  ;;  %v3282_v37 = vmul.f32 %v7215_v9, %v9109_v6 }
 0x885   : > { %v3298_v60 = vpack.c.bf16 %v3282_v37, %v3282_v37 }
 0x887   : > { %v3355_v15 = vunpack.c.l.b16 %v3298_v60 }
 0x889   : > { %2841 = vrot.lane.b32.xlu0 %v2809_v52, %s7710_s13 }
 0x88b   : > { %v3231_v11 = vpop.xlane.xlu2 %3230 }
 0x88c   : > { %7216 = vrcp.f32 %v3231_v11 }
 0x88d   : > { %7218 = vrcp.f32 %v3222_v55 }
 0x891   : > { %2176 = vrot.lane.b32.xlu2 %v2144_v59, %s7711_s16  ;;  %2182 = vrot.lane.b32.xlu0 %v2147_v17, %s7711_s16 }
 0x892   : > { %v7217_v40 = vpop.eup %7216 }
 0x893   : > { %v3283_v57 = vmul.f32 %v7217_v40, %v9124_v39  ;;  %v3225_v30 = vpop.xlane.xlu2 %3224  ;;  %v7219_v33 = vpop.eup %7218 }
 0x894   : > { %7220 = vrcp.f32 %v3225_v30  ;;  %v3280_v6 = vmul.f32 %v7219_v33, %v9118_v34  ;;  %v2810_v34 = vpack.c.bf16 %v8973_v50, %v8973_v50  ;;  %v2814_v50 = vpack.c.bf16 %v9005_v29, %v9005_v29 }
 0x895   : > { %v3299_v56 = vpack.c.bf16 %v3283_v57, %v3283_v57  ;;  %v2150_v29 = vpack.c.bf16 %v8759_v21, %v8759_v21 }
 0x896   : > { %v3296_v0 = vpack.c.bf16 %v3280_v6, %v3280_v6  ;;  %v2816_v6 = vpack.c.bf16 %v9010_v23, %v9010_v23 }
 0x897   : > { %v3356_v48 = vunpack.c.l.b16 %v3299_v56 }
 0x898   : > { %v3316_v7 = vunpack.c.l.b16 %v3296_v0 }
 0x899   : > { %v3359_v22 = vpack.c.b16 %v3356_v48, %v3355_v15  ;;  %2178 = vrot.lane.b32.xlu2 %v2145_v44, %s7711_s16  ;;  %2847 = vrot.lane.b32.xlu0 %v2812_v32, %s7710_s13 }
 0x89a   : > { %v7221_v39 = vpop.eup %7220 }
 0x89b   : > { %v3281_v24 = vmul.f32 %v7221_v39, %v9135_v49  ;;  %v3234_v10 = vpop.xlane.xlu2 %3233  ;;  %6371 = vmatmul.msk.bf16.vlgmr.msra.gmra.mxu0 %vm1002_vm0, %v3359_v22  ;;  %v9214_v49 = vpop.xlane.xlu0 %3245 }
 0x89c   : > { %7222 = vrcp.f32 %v3234_v10 }
 0x89d   : > { %v3297_v14 = vpack.c.bf16 %v3281_v24, %v3281_v24 }
 0x89f   : > { %v3317_v58 = vunpack.c.l.b16 %v3297_v14 }
 0x8a1   : > { %2843 = vrot.lane.b32.xlu2 %v2810_v34, %s7710_s13  ;;  %2184 = vrot.lane.b32.xlu0 %v2148_v25, %s7711_s16  ;;  %v3319_v5 = vpack.c.b16 %v3317_v58, %v3316_v7  ;;  %v2818_v7 = vpack.c.bf16 %v9041_v16, %v9041_v16  ;;  %v2156_v16 = vpack.c.bf16 %v8777_v36, %v8777_v36 }
 0x8a2   : > { %v7223_v53 = vpop.eup %7222  ;;  %v3252_v52 = vpop.xlane.xlu1 %3251 }
 0x8a3   : > { %6370 = vmatmul.msk.bf16.gmra.mxu3 %vm1002_vm0, %v3319_v5  ;;  %v3237_v54 = vpop.xlane.xlu2 %3236  ;;  %v3284_v46 = vmul.f32 %v7223_v53, %v9141_v35  ;;  %v2822_v53 = vpack.c.bf16 %v9056_v20, %v9056_v20 }
 0x8a4   : > { %7224 = vrcp.f32 %v3237_v54  ;;  %v2820_v54 = vpack.c.bf16 %v9045_v43, %v9045_v43 }
 0x8a5   : > { %7226 = vrcp.f32 %v3240_v63  ;;  %v3300_v9 = vpack.c.bf16 %v3284_v46, %v3284_v46  ;;  %v2811_v63 = vpack.c.bf16 %v8978_v38, %v8978_v38 }
 0x8a7   : > { %v3357_v40 = vunpack.c.l.b16 %v3300_v9 }
 0x8a9   : > { %2180 = vrot.lane.b32.xlu2 %v2146_v42, %s7711_s16  ;;  %2851 = vrot.lane.b32.xlu0 %v2814_v50, %s7710_s13 }
 0x8aa   : > { %v7225_v55 = vpop.eup %7224  ;;  %v3255_v11 = vpop.xlane.xlu0 %3254 }
 0x8ab   : > { %v3285_v59 = vmul.f32 %v7225_v55, %v9147_v61  ;;  %7228 = vrcp.f32 %v3255_v11  ;;  %v3243_v17 = vpop.xlane.xlu2 %3242  ;;  %v7227_v37 = vpop.eup %7226  ;;  %v10843_v55 = vld [vmem:[#allocation31_spill] sm:$0xff] }
 0x8ac   : > { %7230 = vrcp.f32 %v3243_v17  ;;  %v3286_v35 = vmul.f32 %v7227_v37, %v9112_v51 }
 0x8ad   : > { %7232 = vrcp.f32 %v3252_v52  ;;  %v3301_v28 = vpack.c.bf16 %v3285_v59, %v3285_v59  ;;  %v2158_v52 = vpack.c.bf16 %v10843_v55, %v10843_v55 }
 0x8ae   : > { %v3302_v61 = vpack.c.bf16 %v3286_v35, %v3286_v35 }
 0x8af   : > { %v3358_v60 = vunpack.c.l.b16 %v3301_v28 }
 0x8b0   : > { %v3396_v48 = vunpack.c.l.b16 %v3302_v61  ;;  %v6749_v61 = vld [vmem:[#allocation9 + $0x30] sm:$0xff] }
 0x8b1   : > { %v7229_v57 = vpop.eup %7228  ;;  %2188 = vrot.lane.b32.xlu0 %v2150_v29, %s7711_s16  ;;  %v3360_v30 = vpack.c.b16 %v3358_v60, %v3357_v40 }
 0x8b2   : > { %v7231_v33 = vpop.eup %7230  ;;  %v3291_v15 = vmul.f32 %v7229_v57, %v9157_v3 }
 0x8b3   : > { %v7233_v56 = vpop.eup %7232  ;;  %v3287_v44 = vmul.f32 %v7231_v33, %v9155_v27  ;;  %v3403_v32 = vpop.permute.xlu2 %3402  ;;  %6372 = vmatmul.msk.bf16.gmra.mxu0 %vm1002_vm0, %v3360_v30 }
 0x8b4   : > { %3421 = vmatpush.bf16.msra.mxu1 %v3403_v32  ;;  %v3290_v51 = vmul.f32 %v7233_v56, %v9149_v19  ;;  %v3307_v39 = vpack.c.bf16 %v3291_v15, %v3291_v15  ;;  %v2152_v19 = vpack.c.bf16 %v8753_v41, %v8753_v41  ;;  %v2154_v41 = vpack.c.bf16 %v8763_v31, %v8763_v31  ;;  %v6750_v56 = vld [vmem:[#allocation9 + $0x38] sm:$0xff]  ;;  %v6748_v32 = vld [vmem:[#allocation9 + $0x28] sm:$0xff] }
 0x8b5   : > { %v3303_v21 = vpack.c.bf16 %v3287_v44, %v3287_v44  ;;  %3703 = vmatpush.bf16.msra.mxu3 %v6750_v56  ;;  %v2821_v56 = vpack.c.bf16 %v9049_v18, %v9049_v18 }
 0x8b6   : > { %v3306_v24 = vpack.c.bf16 %v3290_v51, %v3290_v51  ;;  %v3438_v10 = vunpack.c.l.b16 %v3307_v39  ;;  %v6744_v39 = vld [vmem:[#allocation9 + $0x8] sm:$0xff] }
 0x8b7   : > { %v3397_v22 = vunpack.c.l.b16 %v3303_v21  ;;  %v6747_v21 = vld [vmem:[#allocation9 + $0x20] sm:$0xff] }
 0x8b8   : > { %v3437_v14 = vunpack.c.l.b16 %v3306_v24 }
 0x8b9   : > { %v3400_v0 = vpack.c.b16 %v3397_v22, %v3396_v48  ;;  %2855 = vrot.lane.b32.xlu0 %v2816_v6, %s7710_s13  ;;  %3704 = vmatpush.bf16.msra.mxu3 %v6749_v61  ;;  %v6746_v6 = vld [vmem:[#allocation9 + $0x18] sm:$0xff]  ;;  %v6745_v48 = vld [vmem:[#allocation9 + $0x10] sm:$0xff] }
 0x8ba   : > { %v3446_v27 = vpop.permute.xlu1 %3445  ;;  %v3441_v25 = vpack.c.b16 %v3438_v10, %v3437_v14 }
 0x8bb   : > { %6373 = vmatmul.msk.bf16.vlgmr.msra.gmra.mxu1 %vm1002_vm0, %v3400_v0  ;;  %3461 = vmatpush.bf16.msra.mxu2 %v3446_v27  ;;  %v6743_v0 = vld [vmem:[#allocation9] sm:$0xff] }
 0x8bd   : > { %v3444_v3 = vpop.permute.xlu0 %3443  ;;  %3705 = vmatpush.bf16.msra.mxu3 %v6748_v32 }
 0x8bf   : > { %3462 = vmatpush.bf16.msra.mxu2 %v3444_v3 }
 0x8c1   : > { %2192 = vrot.lane.b32.xlu0 %v2152_v19, %s7711_s16  ;;  %3706 = vmatpush.bf16.msra.mxu3 %v6747_v21 }
 0x8c2   : > { %6375 = vmatmul.msk.bf16.vlgmr.msra.gmra.mxu2 %vm1002_vm0, %v3441_v25  ;;  %v10844_v25 = vld [vmem:[#allocation21_spill] sm:$0xff] }
 0x8c5   : > { %v3341_v23 = vpop.f32.mrf.mxu3  ;;  %3707 = vmatpush.bf16.msra.mxu3 %v6746_v6 }
 0x8c6   : > { %v3474_v34 = vpack.c.bf16 %v3341_v23, %v3341_v23  ;;  %v2149_v23 = vpack.c.bf16 %v10844_v25, %v10844_v25 }
 0x8c8   : > { %3506 = vrot.lane.b32.xlu1 %v3474_v34, %s7709_s7 }
 0x8c9   : > { %2859 = vrot.lane.b32.xlu0 %v2818_v7, %s7710_s13  ;;  %3708 = vmatpush.bf16.msra.mxu3 %v6745_v48 }
 0x8cd   : > { %v3343_v58 = vpop.f32.mrf.mxu3  ;;  %3709 = vmatpush.bf16.msra.mxu3 %v6744_v39 }
 0x8ce   : > { %v3475_v5 = vpack.c.bf16 %v3343_v58, %v3343_v58 }
 0x8d0   : > { %3508 = vrot.lane.b32.xlu2 %v3475_v5, %s7709_s7 }
 0x8d1   : > { %2196 = vrot.lane.b32.xlu0 %v2154_v41, %s7711_s16  ;;  %3710 = vmatpush.bf16.msra.mxu3 %v6743_v0  ;;  %v2813_v41 = vpack.c.bf16 %v9003_v8, %v9003_v8 }
 0x8d8   : > { %2845 = vrot.lane.b32.xlu2 %v2811_v63, %s7710_s13 }
 0x8d9   : > { %2863 = vrot.lane.b32.xlu0 %v2820_v54, %s7710_s13 }
 0x8e1   : > { %2200 = vrot.lane.b32.xlu0 %v2156_v16, %s7711_s16 }
 0x8e5   : > { %v3261_v31 = vpop.xlane.xlu1 %3260 }
 0x8e6   : > { %7234 = vrcp.f32 %v3261_v31 }
 0x8e7   : > { %7236 = vrcp.f32 %v9214_v49 }
 0x8e8   : > { %v3258_v38 = vpop.xlane.xlu0 %3257 }
 0x8e9   : > { %7238 = vrcp.f32 %v3258_v38  ;;  %2867 = vrot.lane.b32.xlu0 %v2822_v53, %s7710_s13  ;;  %v10845_v53 = vld [vmem:[#allocation28_spill] sm:$0xff] }
 0x8ea   : > { %v2151_v38 = vpack.c.bf16 %v10845_v53, %v10845_v53 }
 0x8ec   : > { %v7235_v43 = vpop.eup %7234  ;;  %v3249_v42 = vpop.xlane.xlu2 %3248 }
 0x8ed   : > { %v7237_v50 = vpop.eup %7236  ;;  %v3293_v46 = vmul.f32 %v7235_v43, %v9176_v2  ;;  %7240 = vrcp.f32 %v3249_v42 }
 0x8ee   : > { %v3288_v11 = vmul.f32 %v7237_v50, %v9127_v26  ;;  %v2824_v26 = vpack.c.bf16 %v9074_v4, %v9074_v4 }
 0x8ef   : > { %v7239_v36 = vpop.eup %7238  ;;  %v3309_v9 = vpack.c.bf16 %v3293_v46, %v3293_v46  ;;  %v2815_v46 = vpack.c.bf16 %v9008_v45, %v9008_v45  ;;  %v2817_v45 = vpack.c.bf16 %v9039_v12, %v9039_v12  ;;  %v2819_v12 = vpack.c.bf16 %v9043_v62, %v9043_v62 }
 0x8f0   : > { %v3292_v20 = vmul.f32 %v7239_v36, %v9178_v47  ;;  %v3304_v17 = vpack.c.bf16 %v3288_v11, %v3288_v11  ;;  %v10846_v11 = vld [vmem:[#allocation24_spill] sm:$0xff] }
 0x8f1   : > { %2204 = vrot.lane.b32.xlu0 %v2158_v52, %s7711_s16  ;;  %v3440_v37 = vunpack.c.l.b16 %v3309_v9  ;;  %v2153_v9 = vpack.c.bf16 %v10846_v11, %v10846_v11 }
 0x8f2   : > { %v3308_v49 = vpack.c.bf16 %v3292_v20, %v3292_v20  ;;  %v3398_v60 = vunpack.c.l.b16 %v3304_v17 }
 0x8f3   : > { %v7241_v59 = vpop.eup %7240 }
 0x8f4   : > { %v3439_v28 = vunpack.c.l.b16 %v3308_v49  ;;  %v3289_v2 = vmul.f32 %v7241_v59, %v9184_v13  ;;  %v2177_v29 = vpop.permute.xlu2 %2176 }
 0x8f5   : > { %2225 = vst.msk [vmem:[#allocation2] sm:$0xf] %vm2224_vm2, %v2177_v29 }
 0x8f6   : > { %v3305_v35 = vpack.c.bf16 %v3289_v2, %v3289_v2  ;;  %v3442_v40 = vpack.c.b16 %v3440_v37, %v3439_v28  ;;  %v10847_v2 = vld [vmem:[#allocation29_spill] sm:$0xff] }
 0x8f7   : > { %v2155_v29 = vpack.c.bf16 %v10847_v2, %v10847_v2 }
 0x8f8   : > { %v3399_v47 = vunpack.c.l.b16 %v3305_v35  ;;  %6376 = vmatmul.msk.bf16.gmra.mxu2 %vm1002_vm0, %v3442_v40 }
 0x8f9   : > { %2871 = vrot.lane.b32.xlu0 %v2824_v26, %s7710_s13 }
 0x8fa   : > { %v3401_v57 = vpack.c.b16 %v3399_v47, %v3398_v60 }
 0x8fb   : > { %v2842_v30 = vpop.permute.xlu0 %2841 }
 0x8fc   : > { %2890 = vst.msk [vmem:[#allocation2] sm:$0xf] %vm2889_vm3, %v2842_v30  ;;  %v2179_v13 = vpop.permute.xlu2 %2178  ;;  %6374 = vmatmul.msk.bf16.gmra.mxu1 %vm1002_vm0, %v3401_v57  ;;  %v10848_v57 = vld [vmem:[#allocation30_spill] sm:$0xff] }
 0x8fd   : > { %2226 = vst.msk [vmem:[#allocation2 + $0x4] sm:$0xf] %vm2224_vm2, %v2179_v13  ;;  %v2157_v30 = vpack.c.bf16 %v10848_v57, %v10848_v57 }
 0x903   : > { %v2183_v33 = vpop.permute.xlu0 %2182 }
 0x904   : > { %2228 = vst.msk [vmem:[#allocation2 + $0xc] sm:$0xf] %vm2224_vm2, %v2183_v33  ;;  %v2844_v4 = vpop.permute.xlu2 %2843 }
 0x905   : > { %2891 = vst.msk [vmem:[#allocation2 + $0x4] sm:$0xf] %vm2889_vm3, %v2844_v4 }
 0x90b   : > { %v2848_v44 = vpop.permute.xlu0 %2847 }
 0x90c   : > { %2893 = vst.msk [vmem:[#allocation2 + $0xc] sm:$0xf] %vm2889_vm3, %v2848_v44  ;;  %v2181_v15 = vpop.permute.xlu2 %2180  ;;  %v10849_v44 = vld [vmem:[#allocation32_spill] sm:$0xff] }
 0x90d   : > { %2227 = vst.msk [vmem:[#allocation2 + $0x8] sm:$0xf] %vm2224_vm2, %v2181_v15  ;;  %v2159_v32 = vpack.c.bf16 %v10849_v44, %v10849_v44  ;;  %v551_v44 = vld [vmem:[%s7919_s3 + $0x10] sm:$0xff]  }
 0x913   : > { %v2185_v51 = vpop.permute.xlu0 %2184 }
 0x914   : > { %2229 = vst.msk [vmem:[#allocation2 + $0x10] sm:$0xf] %vm2224_vm2, %v2185_v51  ;;  %v2823_v51 = vpack.c.bf16 %v9063_v1, %v9063_v1 }
 0x918   : > { %v3382_v7 = vpop.f32.mrf.mxu0 }
 0x919   : > { %v3478_v63 = vpack.c.bf16 %v3382_v7, %v3382_v7 }
 0x91b   : > { %v9282_v22 = vpop.permute.xlu0 %2851 }
 0x920   : > { %v3384_v54 = vpop.f32.mrf.mxu0 }
 0x921   : > { %v3479_v43 = vpack.c.bf16 %v3384_v54, %v3384_v54  ;;  %v9370_v54 = vld [vmem:[%s10755_s4] ss:$0 sm:$0xff] }
 0x923   : > { %v2189_v24 = vpop.permute.xlu0 %2188 }
 0x924   : > { %2231 = vst.msk [vmem:[#allocation2 + $0x18] sm:$0xf] %vm2224_vm2, %v2189_v24 }
 0x926   : > { %v3346_v27 = vpop.f32.mrf.mxu3 }
 0x927   : > { %v3476_v10 = vpack.c.bf16 %v3346_v27, %v3346_v27 }
 0x929   : > { %3510 = vrot.lane.b32.xlu1 %v3476_v10, %s7709_s7 }
 0x92a   : > { %v3509_v3 = vpop.permute.xlu2 %3508 }
 0x92b   : > { %3556 = vst.msk [vmem:[#allocation2 + $0x4] sm:$0xf] %vm3554_vm4, %v3509_v3  ;;  %v9287_v14 = vpop.permute.xlu0 %2855 }
 0x92e   : > { %v3348_v19 = vpop.f32.mrf.mxu3 }
 0x92f   : > { %v3477_v34 = vpack.c.bf16 %v3348_v19, %v3348_v19 }
 0x930   : > { %v3387_v8 = vpop.f32.mrf.mxu0 }
 0x931   : > { %2186 = vrot.lane.b32.xlu1 %v2149_v23, %s7711_s16  ;;  %3512 = vrot.lane.b32.xlu2 %v3477_v34, %s7709_s7  ;;  %v3480_v36 = vpack.c.bf16 %v3387_v8, %v3387_v8 }
 0x932   : > { %v2846_v58 = vpop.permute.xlu2 %2845 }
 0x933   : > { %2892 = vst.msk [vmem:[#allocation2 + $0x8] sm:$0xf] %vm2889_vm3, %v2846_v58  ;;  %v2193_v5 = vpop.permute.xlu0 %2192 }
 0x934   : > { %2233 = vst.msk [vmem:[#allocation2 + $0x20] sm:$0xf] %vm2224_vm2, %v2193_v5 }
 0x938   : > { %v3389_v52 = vpop.f32.mrf.mxu0  ;;  %v3423_v49 = vpop.f32.mrf.mxu1 }
 0x939   : > { %2849 = vrot.lane.b32.xlu2 %v2813_v41, %s7710_s13  ;;  %3514 = vrot.lane.b32.xlu1 %v3478_v63, %s7709_s7  ;;  %v3481_v20 = vpack.c.bf16 %v3389_v52, %v3389_v52  ;;  %v3482_v17 = vpack.c.bf16 %v3423_v49, %v3423_v49  ;;  %v547_v41 = vld [vmem:[%s7919_s3] sm:$0xff]  }
 0x93a   : > { %v3507_v16 = vpop.permute.xlu1 %3506  ;;  %v3753_v8 = vunpack.c.h.bf16 %v547_v41 }
 0x93b   : > { %3555 = vst.msk [vmem:[#allocation2] sm:$0xf] %vm3554_vm4, %v3507_v16  ;;  %v9300_v31 = vpop.permute.xlu0 %2859 }
 0x940   : > { %v3425_v28 = vpop.f32.mrf.mxu1 }
 0x941   : > { %2190 = vrot.lane.b32.xlu1 %v2151_v38, %s7711_s16  ;;  %3516 = vrot.lane.b32.xlu2 %v3479_v43, %s7709_s7  ;;  %v3483_v35 = vpack.c.bf16 %v3425_v28, %v3425_v28 }
 0x942   : > { %v6735_v42 = vld [vmem:[#allocation2] sm:$0xff] }
 0x943   : > { %v2197_v50 = vpop.permute.xlu0 %2196  ;;  %3711 = vmatmul.bf16.vlgmr.msra.gmra.mxu3 %v6735_v42 }
 0x944   : > { %2235 = vst.msk [vmem:[#allocation2 + $0x28] sm:$0xf] %vm2224_vm2, %v2197_v50 }
 0x945   : > { %v3464_v33 = vpop.f32.mrf.mxu2 }
 0x946   : > { %v3486_v62 = vpack.c.bf16 %v3464_v33, %v3464_v33 }
 0x949   : > { %2853 = vrot.lane.b32.xlu2 %v2815_v46, %s7710_s13  ;;  %3518 = vrot.lane.b32.xlu1 %v3480_v36, %s7709_s7 }
 0x94b   : > { %v9311_v55 = vpop.permute.xlu0 %2863 }
 0x94d   : > { %v3466_v61 = vpop.f32.mrf.mxu2 }
 0x94e   : > { %v3487_v15 = vpack.c.bf16 %v3466_v61, %v3466_v61 }
 0x951   : > { %2194 = vrot.lane.b32.xlu1 %v2153_v9, %s7711_s16  ;;  %3520 = vrot.lane.b32.xlu2 %v3481_v20, %s7709_s7 }
 0x953   : > { %v2201_v59 = vpop.permute.xlu0 %2200 }
 0x954   : > { %2237 = vst.msk [vmem:[#allocation2 + $0x30] sm:$0xf] %vm2224_vm2, %v2201_v59 }
 0x959   : > { %3522 = vrot.lane.b32.xlu1 %v3482_v17, %s7709_s7  ;;  %2857 = vrot.lane.b32.xlu2 %v2817_v45, %s7710_s13 }
 0x95b   : > { %v9322_v37 = vpop.permute.xlu0 %2867 }
 0x961   : > { %2198 = vrot.lane.b32.xlu1 %v2155_v29, %s7711_s16  ;;  %3524 = vrot.lane.b32.xlu2 %v3483_v35, %s7709_s7 }
 0x963   : > { %v2205_v40 = vpop.permute.xlu0 %2204 }
 0x964   : > { %2239 = vst.msk [vmem:[#allocation2 + $0x38] sm:$0xf] %vm2224_vm2, %v2205_v40  ;;  %v549_v40 = vld [vmem:[%s7919_s3 + $0x8] sm:$0xff]  }
 0x965   : > { %v3755_v33 = vunpack.c.h.bf16 %v549_v40 }
 0x969   : > { %2861 = vrot.lane.b32.xlu2 %v2819_v12, %s7710_s13  ;;  %v7712_v12 = vmov 128.0  }
 0x96a   : > { %7242 = vrcp.f32 %v7712_v12 }
 0x96b   : > { %v2872_v2 = vpop.permute.xlu0 %2871 }
 0x970   : > { %v7243_v57 = vpop.eup %7242 }
 0x971   : > { %vm3823_vm5 = vweird.f32 %v7243_v57 }
 0x979   : > { %v3428_v26 = vpop.f32.mrf.mxu1 }
 0x97a   : > { %v3484_v60 = vpack.c.bf16 %v3428_v26, %v3428_v26  ;;  %v3754_v26 = vunpack.c.l.bf16 %v549_v40 }
 0x97b   : > { %v3469_v18 = vpop.f32.mrf.mxu2 }
 0x97c   : > { %3526 = vrot.lane.b32.xlu1 %v3484_v60, %s7709_s7  ;;  %v3488_v6 = vpack.c.bf16 %v3469_v18, %v3469_v18 }
 0x981   : > { %v3430_v47 = vpop.f32.mrf.mxu1 }
 0x982   : > { %v3485_v13 = vpack.c.bf16 %v3430_v47, %v3430_v47 }
 0x983   : > { %v3471_v0 = vpop.f32.mrf.mxu2 }
 0x984   : > { %2202 = vrot.lane.b32.xlu1 %v2157_v30, %s7711_s16  ;;  %3528 = vrot.lane.b32.xlu2 %v3485_v13, %s7709_s7  ;;  %v3489_v24 = vpack.c.bf16 %v3471_v0, %v3471_v0  ;;  %v3819_v13 = vmul.f32 128.0, %v7243_v57  ;;  %v3757_v0 = vunpack.c.h.bf16 %v551_v44 }
 0x98b   : > { %v3513_v4 = vpop.permute.xlu2 %3512 }
 0x98c   : > { %3558 = vst.msk [vmem:[#allocation2 + $0xc] sm:$0xf] %vm3554_vm4, %v3513_v4  ;;  %2865 = vrot.lane.b32.xlu2 %v2821_v56, %s7710_s13  ;;  %3530 = vrot.lane.b32.xlu1 %v3486_v62, %s7709_s7  ;;  %v3820_v4 = vsub.f32 1.0, %v3819_v13  ;;  %v6547_v13 = vld [vmem:[#allocation11 + $0xc8] sm:$0xf] }
 0x993   : > { %v2850_v21 = vpop.permute.xlu2 %2849 }
 0x994   : > { %2894 = vst.msk [vmem:[#allocation2 + $0x10] sm:$0xf] %vm2889_vm3, %v2850_v21  ;;  %2206 = vrot.lane.b32.xlu1 %v2159_v32, %s7711_s16  ;;  %3532 = vrot.lane.b32.xlu2 %v3487_v15, %s7709_s7  ;;  %v3821_v32 = vmul.f32 %v7243_v57, %v3820_v4  ;;  %v3756_v15 = vunpack.c.l.bf16 %v551_v44  ;;  %v6776_v4 = vld [vmem:[#allocation11 + $0xcc] sm:$0xf]  ;;  %v6549_v44 = vld [vmem:[#allocation11 + $0xd8] sm:$0xf0] }
 0x995   : > { %s6042_s16 = sshll.u32 %s10650_s17, 4  ;;  %s6043_s16 = int_to_ptr.vmem [resolvable:$true] %s6042_s16 }
 0x99b   : > { %v3511_v48 = vpop.permute.xlu1 %3510  ;;  %v3517_v39 = vpop.permute.xlu2 %3516 }
 0x99c   : > { %3557 = vst.msk [vmem:[#allocation2 + $0x8] sm:$0xf] %vm3554_vm4, %v3511_v48  ;;  %2869 = vrot.lane.b32.xlu2 %v2823_v51, %s7710_s13  ;;  %3534 = vrot.lane.b32.xlu1 %v3488_v6, %s7709_s7  ;;  %v3822_v51 = vadd.f32 %v7243_v57, %v3821_v32 }
 0x99e   : > { %v9412_v48 = vsel %vm3823_vm5, %v7243_v57, %v3822_v51 }
 0x99f   : > { %10850 = vst [vmem:[#allocation22_spill] sm:$0xff] %v9412_v48 }
 0x9a3   : > { %v2187_v27 = vpop.permute.xlu1 %2186  ;;  %v2854_v10 = vpop.permute.xlu2 %2853  ;;  %v6736_v3 = vld [vmem:[#allocation2 + $0x8] sm:$0xff] }
 0x9a4   : > { %2230 = vst.msk [vmem:[#allocation2 + $0x14] sm:$0xf] %vm2224_vm2, %v2187_v27  ;;  %3536 = vrot.lane.b32.xlu2 %v3489_v24, %s7709_s7  ;;  %3716 = vmatmul.bf16.gmra.mxu3 %v6736_v3 }
 0x9a5   : > { %2895 = vst.msk [vmem:[#allocation2 + $0x14] sm:$0xf] %vm2889_vm3, %v9282_v22 }
 0x9a6   : > { %3560 = vst.msk [vmem:[#allocation2 + $0x14] sm:$0xf] %vm3554_vm4, %v3517_v39 }
 0x9a7   : > { %2896 = vst.msk [vmem:[#allocation2 + $0x18] sm:$0xf] %vm2889_vm3, %v2854_v10 }
 0x9ab   : > { %v3515_v1 = vpop.permute.xlu1 %3514  ;;  %v3521_v19 = vpop.permute.xlu2 %3520 }
 0x9ac   : > { %3559 = vst.msk [vmem:[#allocation2 + $0x10] sm:$0xf] %vm3554_vm4, %v3515_v1 }
 0x9b3   : > { %v2191_v25 = vpop.permute.xlu1 %2190  ;;  %v2858_v23 = vpop.permute.xlu2 %2857  ;;  %v6737_v34 = vld [vmem:[#allocation2 + $0x10] sm:$0xff] }
 0x9b4   : > { %2232 = vst.msk [vmem:[#allocation2 + $0x1c] sm:$0xf] %vm2224_vm2, %v2191_v25  ;;  %3721 = vmatmul.bf16.gmra.mxu3 %v6737_v34  ;;  %v553_v25 = vld [vmem:[%s7919_s3 + $0x18] sm:$0xff]  }
 0x9b5   : > { %2897 = vst.msk [vmem:[#allocation2 + $0x1c] sm:$0xf] %vm2889_vm3, %v9287_v14  ;;  %v3752_v14 = vunpack.c.l.bf16 %v547_v41  ;;  %v3758_v34 = vunpack.c.l.bf16 %v553_v25 }
 0x9b6   : > { %3562 = vst.msk [vmem:[#allocation2 + $0x1c] sm:$0xf] %vm3554_vm4, %v3521_v19 }
 0x9b7   : > { %2898 = vst.msk [vmem:[#allocation2 + $0x20] sm:$0xf] %vm2889_vm3, %v2858_v23 }
 0x9bb   : > { %v3519_v22 = vpop.permute.xlu1 %3518  ;;  %v3525_v7 = vpop.permute.xlu2 %3524 }
 0x9bc   : > { %3561 = vst.msk [vmem:[#allocation2 + $0x18] sm:$0xf] %vm3554_vm4, %v3519_v22 }
 0x9c3   : > { %v2195_v58 = vpop.permute.xlu1 %2194  ;;  %v6738_v5 = vld [vmem:[#allocation2 + $0x18] sm:$0xff]  ;;  %v2862_v63 = vpop.permute.xlu2 %2861 }
 0x9c4   : > { %2234 = vst.msk [vmem:[#allocation2 + $0x24] sm:$0xf] %vm2224_vm2, %v2195_v58  ;;  %3726 = vmatmul.bf16.gmra.mxu3 %v6738_v5 }
 0x9c5   : > { %2899 = vst.msk [vmem:[#allocation2 + $0x24] sm:$0xf] %vm2889_vm3, %v9300_v31 }
 0x9c6   : > { %3564 = vst.msk [vmem:[#allocation2 + $0x24] sm:$0xf] %vm3554_vm4, %v3525_v7  ;;  %v3712_v16 = vpop.f32.mrf.mxu3 }
 0x9c7   : > { %2900 = vst.msk [vmem:[#allocation2 + $0x28] sm:$0xf] %vm2889_vm3, %v2862_v63  ;;  %v3713_v53 = vadd.f32 %v9370_v54, %v3712_v16 }
 0x9c9   : > { %v9377_v38 = vadd.f32 %v3752_v14, %v3713_v53  ;;  %v3759_v14 = vunpack.c.h.bf16 %v553_v25  ;;  %v6774_v25 = vld [vmem:[#allocation11 + $0xb4] sm:$0xf0] }
 0x9cb   : > { %v3523_v43 = vpop.permute.xlu1 %3522  ;;  %3786 = vadd.xlane.f32.xlu0 %v9377_v38 }
 0x9cc   : > { %3563 = vst.msk [vmem:[#allocation2 + $0x20] sm:$0xf] %vm3554_vm4, %v3523_v43  ;;  %v9439_v43 = vld [vmem:[%s7919_s3 + $0x20] sm:$0xff]  }
 0x9ce   : > { %v3714_v42 = vpop.f32.mrf.mxu3 }
 0x9cf   : > { %v3715_v31 = vadd.f32 %v9370_v54, %v3714_v42 }
 0x9d1   : > { %v9382_v50 = vadd.f32 %v3753_v8, %v3715_v31  ;;  %v3760_v8 = vunpack.c.l.bf16 %v9439_v43 }
 0x9d3   : > { %v2199_v46 = vpop.permute.xlu1 %2198  ;;  %v6739_v36 = vld [vmem:[#allocation2 + $0x20] sm:$0xff]  ;;  %3788 = vadd.xlane.f32.xlu1 %v9382_v50 }
 0x9d4   : > { %2236 = vst.msk [vmem:[#allocation2 + $0x2c] sm:$0xf] %vm2224_vm2, %v2199_v46  ;;  %3731 = vmatmul.bf16.gmra.mxu3 %v6739_v36 }
 0x9d5   : > { %2901 = vst.msk [vmem:[#allocation2 + $0x2c] sm:$0xf] %vm2889_vm3, %v9311_v55 }
 0x9de   : > { %v3529_v52 = vpop.permute.xlu2 %3528 }
 0x9df   : > { %3566 = vst.msk [vmem:[#allocation2 + $0x2c] sm:$0xf] %vm3554_vm4, %v3529_v52 }
 0x9e6   : > { %v2866_v11 = vpop.permute.xlu2 %2865 }
 0x9e7   : > { %2902 = vst.msk [vmem:[#allocation2 + $0x30] sm:$0xf] %vm2889_vm3, %v2866_v11  ;;  %v6555_v11 = vld [vmem:[#allocation11 + $0xe0] sm:$0xf] }
 0x9ee   : > { %v3527_v9 = vpop.permute.xlu1 %3526  ;;  %v3533_v20 = vpop.permute.xlu2 %3532 }
 0x9ef   : > { %3565 = vst.msk [vmem:[#allocation2 + $0x28] sm:$0xf] %vm3554_vm4, %v3527_v9  ;;  %v6781_v9 = vld [vmem:[#allocation11 + $0xec] sm:$0xf0] }
 0x9f6   : > { %v2203_v49 = vpop.permute.xlu1 %2202  ;;  %v6740_v59 = vld [vmem:[#allocation2 + $0x28] sm:$0xff]  ;;  %v2870_v45 = vpop.permute.xlu2 %2869 }
 0x9f7   : > { %2238 = vst.msk [vmem:[#allocation2 + $0x34] sm:$0xf] %vm2224_vm2, %v2203_v49  ;;  %3736 = vmatmul.bf16.gmra.mxu3 %v6740_v59  ;;  %v6556_v49 = vor.u32 %v6781_v9, %v6555_v11  ;;  %v6557_v59 = vld [vmem:[#allocation11 + $0xf0] sm:$0xf0] }
 0x9f8   : > { %2903 = vst.msk [vmem:[#allocation2 + $0x34] sm:$0xf] %vm2889_vm3, %v9322_v37 }
 0x9f9   : > { %3568 = vst.msk [vmem:[#allocation2 + $0x34] sm:$0xf] %vm3554_vm4, %v3533_v20  ;;  %v6779_v20 = vld [vmem:[#allocation11 + $0xe4] sm:$0xf]  ;;  %4361 = vmatpush.bf16.msrb.mxu0 %v6556_v49  ;;  %v6517_v49 = vld [vmem:[#allocation11 + $0x98] sm:$0xf0] }
 0x9fa   : > { %2904 = vst.msk [vmem:[#allocation2 + $0x38] sm:$0xf] %vm2889_vm3, %v2870_v45  ;;  %v6563_v45 = vld [vmem:[#allocation11 + $0xe8] sm:$0xf] }
 0x9fe   : > { %v3531_v55 = vpop.permute.xlu1 %3530  ;;  %v3537_v29 = vpop.permute.xlu2 %3536 }
 0x9ff   : > { %3567 = vst.msk [vmem:[#allocation2 + $0x30] sm:$0xf] %vm3554_vm4, %v3531_v55  ;;  %v6782_v55 = vld [vmem:[#allocation11 + $0xf4] sm:$0xf0] }
 0xa06   : > { %v2207_v17 = vpop.permute.xlu1 %2206  ;;  %v6741_v28 = vld [vmem:[#allocation2 + $0x30] sm:$0xff] }
 0xa07   : > { %2240 = vst.msk [vmem:[#allocation2 + $0x3c] sm:$0xf] %vm2224_vm2, %v2207_v17  ;;  %3741 = vmatmul.bf16.gmra.mxu3 %v6741_v28  ;;  %v6560_v28 = vor.u32 %v6779_v20, %v6557_v59  ;;  %v6768_v20 = vld [vmem:[#allocation11 + $0x8c] sm:$0xf] }
 0xa08   : > { %2905 = vst.msk [vmem:[#allocation2 + $0x3c] sm:$0xf] %vm2889_vm3, %v2872_v2  ;;  %v6564_v2 = vor.u32 %v6782_v55, %v6563_v45  ;;  %v6520_v45 = vor.u32 %v6768_v20, %v6517_v49  ;;  %v559_v20 = vld [vmem:[%s7919_s3 + $0x30] sm:$0xff]  }
 0xa09   : > { %3570 = vst.msk [vmem:[#allocation2 + $0x3c] sm:$0xf] %vm3554_vm4, %v3537_v29  ;;  %v6780_v29 = vld [vmem:[#allocation11 + $0xec] sm:$0xf]  ;;  %4410 = vmatpush.bf16.msrb.mxu1 %v6560_v28 }
 0xa0a   : > { %4459 = vmatpush.bf16.msrb.mxu2 %v6564_v2 }
 0xa0e   : > { %v3535_v37 = vpop.permute.xlu1 %3534 }
 0xa0f   : > { %3569 = vst.msk [vmem:[#allocation2 + $0x38] sm:$0xf] %vm3554_vm4, %v3535_v37  ;;  %v6565_v37 = vld [vmem:[#allocation11 + $0xf8] sm:$0xf0] }
 0xa10   : > { %v6568_v40 = vor.u32 %v6780_v29, %v6565_v37  ;;  %v6491_v29 = vld [vmem:[#allocation11 + $0x60] sm:$0xf]  ;;  %v6765_v37 = vld [vmem:[#allocation11 + $0x6c] sm:$0xf0] }
 0xa12   : > { %4508 = vmatpush.bf16.msrb.mxu3 %v6568_v40  ;;  %v6763_v40 = vld [vmem:[#allocation11 + $0x64] sm:$0xf] }
 0xa16   : > { %v6742_v35 = vld [vmem:[#allocation2 + $0x38] sm:$0xff] }
 0xa17   : > { %3746 = vmatmul.bf16.gmra.mxu3 %v6742_v35 }
 0xa27   : > { %v3717_v60 = vpop.f32.mrf.mxu3 }
 0xa28   : > { %v3718_v47 = vadd.f32 %v9370_v54, %v3717_v60  ;;  %v6777_v60 = vld [vmem:[#allocation11 + $0xcc] sm:$0xf0] }
 0xa2a   : > { %v3770_v30 = vadd.f32 %v3754_v26, %v3718_v47  ;;  %v6539_v26 = vld [vmem:[#allocation11 + $0xc0] sm:$0xf]  ;;  %v6775_v47 = vld [vmem:[#allocation11 + $0xc4] sm:$0xf] }
 0xa2b   : > { %v6540_v57 = vor.u32 %v6777_v60, %v6539_v26  ;;  %v6493_v26 = vld [vmem:[#allocation11 + $0x70] sm:$0xf0]  ;;  %v6499_v60 = vld [vmem:[#allocation11 + $0x68] sm:$0xf] }
 0xa2c   : > { %3790 = vadd.xlane.f32.xlu2 %v3770_v30 }
 0xa2d   : > { %4362 = vmatpush.bf16.msrb.mxu0 %v6540_v57 }
 0xa2f   : > { %v3719_v56 = vpop.f32.mrf.mxu3 }
 0xa30   : > { %v3720_v62 = vadd.f32 %v9370_v54, %v3719_v56 }
 0xa32   : > { %v9404_v61 = vadd.f32 %v3755_v33, %v3720_v62  ;;  %v6778_v33 = vld [vmem:[#allocation11 + $0xd4] sm:$0xf0] }
 0xa33   : > { %v6548_v62 = vor.u32 %v6778_v33, %v6547_v13  ;;  %v6501_v33 = vld [vmem:[#allocation11 + $0x78] sm:$0xf0] }
 0xa34   : > { %3792 = vadd.xlane.f32.xlu0 %v9404_v61 }
 0xa35   : > { %4460 = vmatpush.bf16.msrb.mxu2 %v6548_v62 }
 0xa37   : > { %v3722_v21 = vpop.f32.mrf.mxu3 }
 0xa38   : > { %v3723_v18 = vadd.f32 %v9370_v54, %v3722_v21 }
 0xa3a   : > { %v9409_v6 = vadd.f32 %v3756_v15, %v3723_v18  ;;  %v6552_v15 = vor.u32 %v6776_v4, %v6549_v44  ;;  %v3761_v18 = vunpack.c.h.bf16 %v9439_v43  ;;  %v6507_v43 = vld [vmem:[#allocation11 + $0x80] sm:$0xf] }
 0xa3b   : > { %v6475_v44 = vld [vmem:[#allocation11 + $0x40] sm:$0xf] }
 0xa3c   : > { %3794 = vadd.xlane.f32.xlu1 %v9409_v6  ;;  %4509 = vmatpush.bf16.msrb.mxu3 %v6552_v15  ;;  %v6759_v15 = vld [vmem:[#allocation11 + $0x44] sm:$0xf] }
 0xa3e   : > { %v3787_v39 = vpop.xlane.xlu0 %3786 }
 0xa3f   : > { %v3825_v24 = vmul.f32 %v9412_v48, %v3787_v39  ;;  %v3724_v27 = vpop.f32.mrf.mxu3  ;;  %v6523_v39 = vld [vmem:[#allocation11 + $0xa0] sm:$0xf] }
 0xa40   : > { %v3725_v10 = vadd.f32 %v9370_v54, %v3724_v27 }
 0xa41   : > { %v9417_v3 = vsub.f32 %v9377_v38, %v3825_v24  ;;  %v6771_v24 = vld [vmem:[#allocation11 + $0xa4] sm:$0xf] }
 0xa42   : > { %v9419_v1 = vadd.f32 %v3757_v0, %v3725_v10  ;;  %v6773_v0 = vld [vmem:[#allocation11 + $0xac] sm:$0xf0]  ;;  %v6525_v10 = vld [vmem:[#allocation11 + $0xb0] sm:$0xf0] }
 0xa43   : > { %v3857_v19 = vmul.f32 %v9417_v3, %v9417_v3  ;;  %v6524_v27 = vor.u32 %v6773_v0, %v6523_v39 }
 0xa44   : > { %3796 = vadd.xlane.f32.xlu2 %v9419_v1 }
 0xa45   : > { %3873 = vadd.xlane.f32.xlu0 %v3857_v19  ;;  %v6531_v19 = vld [vmem:[#allocation11 + $0xa8] sm:$0xf]  ;;  %4363 = vmatpush.bf16.msrb.mxu0 %v6524_v27  ;;  %v6485_v27 = vld [vmem:[#allocation11 + $0x58] sm:$0xf0] }
 0xa46   : > { %v3789_v23 = vpop.xlane.xlu1 %3788 }
 0xa47   : > { %v3826_v22 = vmul.f32 %v9412_v48, %v3789_v23  ;;  %v3727_v7 = vpop.f32.mrf.mxu3 }
 0xa48   : > { %v3728_v58 = vadd.f32 %v9370_v54, %v3727_v7  ;;  %v6772_v7 = vld [vmem:[#allocation11 + $0xac] sm:$0xf] }
 0xa49   : > { %v9428_v5 = vsub.f32 %v9382_v50, %v3826_v22  ;;  %v6532_v22 = vor.u32 %v6774_v25, %v6531_v19 }
 0xa4a   : > { %v9430_v41 = vadd.f32 %v3758_v34, %v3728_v58  ;;  %v6528_v34 = vor.u32 %v6771_v24, %v6525_v10  ;;  %v6533_v58 = vld [vmem:[#allocation11 + $0xb8] sm:$0xf0]  ;;  %v6760_v24 = vld [vmem:[#allocation11 + $0x4c] sm:$0xf] }
 0xa4b   : > { %v3858_v63 = vmul.f32 %v9428_v5, %v9428_v5  ;;  %4461 = vmatpush.bf16.msrb.mxu2 %v6532_v22  ;;  %v6488_v25 = vor.u32 %v6760_v24, %v6485_v27 }
 0xa4c   : > { %3798 = vadd.xlane.f32.xlu2 %v9430_v41 }
 0xa4d   : > { %3875 = vadd.xlane.f32.xlu1 %v3858_v63  ;;  %v9461_v63 = vld [vmem:[%s7919_s3 + $0x28] sm:$0xff]  }
 0xa4e   : > { %v3762_v28 = vunpack.c.l.bf16 %v9461_v63  ;;  %v3763_v22 = vunpack.c.h.bf16 %v9461_v63 }
 0xa4f   : > { %v3729_v16 = vpop.f32.mrf.mxu3 }
 0xa50   : > { %v3730_v53 = vadd.f32 %v9370_v54, %v3729_v16 }
 0xa52   : > { %v9436_v38 = vadd.f32 %v3759_v14, %v3730_v53  ;;  %v6536_v14 = vor.u32 %v6772_v7, %v6533_v58 }
 0xa54   : > { %3800 = vadd.xlane.f32.xlu0 %v9436_v38  ;;  %4510 = vmatpush.bf16.msrb.mxu3 %v6536_v14  ;;  %v6459_v14 = vld [vmem:[#allocation11 + $0x20] sm:$0xf] }
 0xa57   : > { %v3732_v42 = vpop.f32.mrf.mxu3 }
 0xa58   : > { %v3733_v31 = vadd.f32 %v9370_v54, %v3732_v42  ;;  %v6767_v42 = vld [vmem:[#allocation11 + $0x84] sm:$0xf]  ;;  %4511 = vmatpush.bf16.msrb.mxu3 %v6520_v45  ;;  %v6443_v45 = vld [vmem:[#allocation11] sm:$0xf] }
 0xa5a   : > { %v9444_v50 = vadd.f32 %v3760_v8, %v3733_v31  ;;  %v6769_v8 = vld [vmem:[#allocation11 + $0x8c] sm:$0xf0] }
 0xa5b   : > { %v6508_v31 = vor.u32 %v6769_v8, %v6507_v43  ;;  %v6755_v43 = vld [vmem:[#allocation11 + $0x24] sm:$0xf] }
 0xa5c   : > { %3802 = vadd.xlane.f32.xlu0 %v9444_v50 }
 0xa5d   : > { %4364 = vmatpush.bf16.msrb.mxu0 %v6508_v31  ;;  %v6461_v31 = vld [vmem:[#allocation11 + $0x30] sm:$0xf0] }
 0xa5e   : > { %v6464_v63 = vor.u32 %v6755_v43, %v6461_v31 }
 0xa5f   : > { %v3734_v46 = vpop.f32.mrf.mxu3 }
 0xa60   : > { %v3735_v21 = vadd.f32 %v9370_v54, %v3734_v46  ;;  %v6509_v46 = vld [vmem:[#allocation11 + $0x90] sm:$0xf0] }
 0xa61   : > { %v6512_v11 = vor.u32 %v6767_v42, %v6509_v46  ;;  %v6467_v46 = vld [vmem:[#allocation11 + $0x28] sm:$0xf] }
 0xa62   : > { %v9463_v16 = vadd.f32 %v3761_v18, %v3735_v21  ;;  %v6483_v18 = vld [vmem:[#allocation11 + $0x48] sm:$0xf] }
 0xa7a   : > { %v9450_v35 = vpop.f32.mrf.mxu3 }
 0xa7b   : > { %v3738_v55 = vadd.f32 %v9370_v54, %v9450_v35  ;;  %v6764_v35 = vld [vmem:[#allocation11 + $0x6c] sm:$0xf] }
 0xa7d   : > { %v9475_v62 = vadd.f32 %v3762_v28, %v3738_v55  ;;  %v6753_v55 = vld [vmem:[#allocation11 + $0xc] sm:$0xf0] }
 0xa9f   : > { %v3791_v36 = vpop.xlane.xlu2 %3790 }
 0xaa0   : > { %v3827_v52 = vmul.f32 %v9412_v48, %v3791_v36  ;;  %v6515_v36 = vld [vmem:[#allocation11 + $0x88] sm:$0xf] }
 0xaa2   : > { %v9448_v17 = vsub.f32 %v3770_v30, %v3827_v52  ;;  %v6541_v30 = vld [vmem:[#allocation11 + $0xd0] sm:$0xf0]  ;;  %v6770_v52 = vld [vmem:[#allocation11 + $0x94] sm:$0xf0] }
 0xaa3   : > { %v6544_v56 = vor.u32 %v6775_v47, %v6541_v30  ;;  %v6516_v9 = vor.u32 %v6770_v52, %v6515_v36  ;;  %v6766_v47 = vld [vmem:[#allocation11 + $0x74] sm:$0xf0]  ;;  %v6496_v30 = vor.u32 %v6763_v40, %v6493_v26  ;;  %v6451_v40 = vld [vmem:[#allocation11 + $0x8] sm:$0xf] }
 0xaa4   : > { %v3859_v12 = vmul.f32 %v9448_v17, %v9448_v17  ;;  %v6500_v13 = vor.u32 %v6766_v47, %v6499_v60  ;;  %v6758_v36 = vld [vmem:[#allocation11 + $0x34] sm:$0xf0]  ;;  %v6752_v60 = vld [vmem:[#allocation11 + $0xc] sm:$0xf]  ;;  %v6453_v47 = vld [vmem:[#allocation11 + $0x18] sm:$0xf0] }
 0xaa5   : > { %4411 = vmatpush.bf16.msrb.mxu1 %v6544_v56  ;;  %4462 = vmatpush.bf16.msrb.mxu2 %v6516_v9  ;;  %v6504_v56 = vor.u32 %v6764_v35, %v6501_v33  ;;  %v6468_v52 = vor.u32 %v6758_v36, %v6467_v46  ;;  %v6469_v9 = vld [vmem:[#allocation11 + $0x38] sm:$0xf0]  ;;  %v6754_v26 = vld [vmem:[#allocation11 + $0x14] sm:$0xf0] }
 0xaa6   : > { %3877 = vadd.xlane.f32.xlu1 %v3859_v12  ;;  %v6492_v12 = vor.u32 %v6765_v37, %v6491_v29  ;;  %v6751_v29 = vld [vmem:[#allocation11 + $0x4] sm:$0xf]  ;;  %v6445_v37 = vld [vmem:[#allocation11 + $0x10] sm:$0xf0] }
 0xaa7   : > { %v3793_v32 = vpop.xlane.xlu0 %3792  ;;  %4512 = vmatpush.bf16.msrb.mxu3 %v6504_v56  ;;  %v3764_v56 = vunpack.c.l.bf16 %v559_v20 }
 0xaa8   : > { %v3828_v51 = vmul.f32 %v9412_v48, %v3793_v32  ;;  %4365 = vmatpush.bf16.msrb.mxu0 %v6492_v12  ;;  %v6761_v32 = vld [vmem:[#allocation11 + $0x4c] sm:$0xf0]  ;;  %v6448_v12 = vor.u32 %v6751_v29, %v6445_v37 }
 0xaa9   : > { %4412 = vmatpush.bf16.msrb.mxu1 %v6528_v34  ;;  %4463 = vmatpush.bf16.msrb.mxu2 %v6500_v13  ;;  %v6476_v21 = vor.u32 %v6761_v32, %v6475_v44  ;;  %v6456_v13 = vor.u32 %v6752_v60, %v6453_v47 }
 0xaaa   : > { %v9458_v23 = vsub.f32 %v9404_v61, %v3828_v51  ;;  %v3739_v61 = vpop.f32.mrf.mxu3  ;;  %v6762_v51 = vld [vmem:[#allocation11 + $0x54] sm:$0xf0] }
 0xaab   : > { %v6484_v0 = vor.u32 %v6762_v51, %v6483_v18  ;;  %v3740_v34 = vadd.f32 %v9370_v54, %v3739_v61  ;;  %4513 = vmatpush.bf16.msrb.mxu3 %v6488_v25 }
 0xaac   : > { %v3860_v53 = vmul.f32 %v9458_v23, %v9458_v23  ;;  %4366 = vmatpush.bf16.msrb.mxu0 %v6476_v21 }
 0xaad   : > { %4413 = vmatpush.bf16.msrb.mxu1 %v6512_v11  ;;  %4464 = vmatpush.bf16.msrb.mxu2 %v6484_v0  ;;  %v6756_v11 = vld [vmem:[#allocation11 + $0x2c] sm:$0xf]  ;;  %v9490_v28 = vadd.f32 %v3763_v22, %v3740_v34 }
 0xaae   : > { %3804 = vadd.xlane.f32.xlu1 %v9463_v16  ;;  %3879 = vadd.xlane.f32.xlu2 %v3860_v53  ;;  %v6757_v53 = vld [vmem:[#allocation11 + $0x2c] sm:$0xf0] }
 0xaaf   : > { %v3795_v59 = vpop.xlane.xlu1 %3794  ;;  %v6460_v42 = vor.u32 %v6757_v53, %v6459_v14  ;;  %v561_v53 = vld [vmem:[%s7919_s3 + $0x38] sm:$0xff]   ;;  %s10885_s3 = sld [smem:[#allocation38_spill]] }
 0xab0   : > { %v3829_v2 = vmul.f32 %v9412_v48, %v3795_v59  ;;  %v6472_v59 = vor.u32 %v6756_v11, %v6469_v9  ;;  %v3766_v46 = vunpack.c.l.bf16 %v561_v53 }
 0xab1   : > { %4414 = vmatpush.bf16.msrb.mxu1 %v6496_v30  ;;  %4367 = vmatpush.bf16.msrb.mxu0 %v6460_v42  ;;  %v6452_v30 = vor.u32 %v6754_v26, %v6451_v40 }
 0xab2   : > { %v9473_v57 = vsub.f32 %v9409_v6, %v3829_v2  ;;  %v6477_v6 = vld [vmem:[#allocation11 + $0x50] sm:$0xf0]  ;;  %v3742_v10 = vpop.f32.mrf.mxu3  ;;  %4465 = vmatpush.bf16.msrb.mxu2 %v6468_v52  ;;  %4514 = vmatpush.bf16.msrb.mxu3 %v6472_v59 }
 0xab3   : > { %v6480_v39 = vor.u32 %v6759_v15, %v6477_v6  ;;  %v3743_v33 = vadd.f32 %v9370_v54, %v3742_v10  ;;  %v3765_v10 = vunpack.c.h.bf16 %v559_v20 }
 0xab4   : > { %v3861_v4 = vmul.f32 %v9473_v57, %v9473_v57 }
 0xab5   : > { %4415 = vmatpush.bf16.msrb.mxu1 %v6480_v39  ;;  %v9502_v51 = vadd.f32 %v3764_v56, %v3743_v33  ;;  %s6041_s7 = scalar_lea.hbm %s10885_s3, %s6815_s9  ;;  %s7638_s29 = scalar_lea.hbm %s10885_s3, 128 }
 0xab6   : > { %3806 = vadd.xlane.f32.xlu1 %v9475_v62  ;;  %3881 = vadd.xlane.f32.xlu2 %v3861_v4  ;;  %s6044_s22 = sshll.u32 %s6041_s7, 4  ;;  %s6045_s22 = int_to_ptr.hbm [resolvable:$true] %s6044_s22 }
 0xab7   : > { %v3797_v19 = vpop.xlane.xlu2 %3796  ;;  %4466 = vmatpush.bf16.msrb.mxu2 %v6452_v30  ;;  %4515 = vmatpush.bf16.msrb.mxu3 %v6456_v13  ;;  %s7632_s14 = sshra.s32 %s6045_s22, 4  ;;  %s7633_s14 = int_to_ptr.hbm [resolvable:$true] %s7632_s14 }
 0xab8   : > { %v3830_v7 = vmul.f32 %v9412_v48, %v3797_v19  ;;  %v3874_v58 = vpop.xlane.xlu0 %3873  ;;  %s7634_s20 = scalar_lea.hbm %s7633_s14, 64  ;;  %p7639_p12 = scmp.lt.s32.totalorder %s7633_s14, %s10885_s3 }
 0xab9   : > { %v3905_v8 = vmul.f32 %v3874_v58, %v9412_v48  ;;  %4416 = vmatpush.bf16.msrb.mxu1 %v6464_v63  ;;  %p7635_p1 = scmp.ne.s32.totalorder %s7633_s14, %s7634_s20  ;;  %p7640_p8 = scmp.lt.s32.totalorder %s7638_s29, %s7634_s20 }
 0xaba   : > { %v9485_v61 = vsub.f32 %v9419_v1, %v3830_v7  ;;  %v6444_v1 = vor.u32 %v6753_v55, %v6443_v45  ;;  %v3744_v32 = vpop.f32.mrf.mxu3 }
 0xabb   : > { %v9488_v49 = vadd.f32 1e-06, %v3905_v8  ;;  %v3745_v27 = vadd.f32 %v9370_v54, %v3744_v32  ;;  %p7636_p3 = pnand %p7635_p1, %p7879_p13  ;;  %p7641_p7 = por %p7640_p8, %p7639_p12 }
 0xabc   : > { %v3862_v2 = vmul.f32 %v9485_v61, %v9485_v61  ;;  %4368 = vmatpush.bf16.msrb.mxu0 %v6444_v1 }
 0xabd   : > { %7244 = vrsqrt.f32 %v9488_v49  ;;  %4417 = vmatpush.bf16.msrb.mxu1 %v6448_v12  ;;  %v9513_v58 = vadd.f32 %v3765_v10, %v3745_v27  ;;  %vm3943_vm7 = vweird.f32 %v9488_v49  ;;  %v3767_v12 = vunpack.c.h.bf16 %v561_v53  ;;  %p7637_p5 = pneg %p7636_p3 }
 0xabe   : > { %3883 = vadd.xlane.f32.xlu0 %v3862_v2  ;;  %3808 = vadd.xlane.f32.xlu2 %v9490_v28 }
 0xabf   : > { %v3799_v35 = vpop.xlane.xlu2 %3798  ;;  %p7642_p9 = pnand %p7641_p7, %p7637_p5 }
 0xac0   : > { %v3831_v4 = vmul.f32 %v9412_v48, %v3799_v35  ;;  %v3876_v44 = vpop.xlane.xlu1 %3875 }
 0xac1   : > { %v3906_v15 = vmul.f32 %v3876_v44, %v9412_v48 }
 0xac2   : > { %v9500_v21 = vsub.f32 %v9430_v41, %v3831_v4  ;;  %v3747_v14 = vpop.f32.mrf.mxu3 }
 0xac3   : > { %v7245_v6 = vpop.eup %7244  ;;  %v3922_v18 = vadd.f32 1e-06, %v3906_v15  ;;  %v3748_v36 = vadd.f32 %v9370_v54, %v3747_v14 }
 0xac4   : > { %v3938_v39 = vmul.f32 %v7245_v6, %v9488_v49  ;;  %v3863_v0 = vmul.f32 %v9500_v21, %v9500_v21  ;;  %vm3944_vm6 = vweird.f32 %v7245_v6  ;;  %v9528_v49 = vld [vmem:[%s10756_s5] ss:$0 sm:$0xff] }
 0xac5   : > { %7246 = vrsqrt.f32 %v3922_v18  ;;  %vm3945_vm8 = vmor %vm3943_vm7, %vm3944_vm6  ;;  %v9531_v45 = vadd.f32 %v3766_v46, %v3748_v36  ;;  %vm3953_vm10 = vweird.f32 %v3922_v18 }
 0xac6   : > { %v3939_v24 = vmul.f32 %v7245_v6, %v3938_v39  ;;  %3885 = vadd.xlane.f32.xlu0 %v3863_v0  ;;  %3810 = vadd.xlane.f32.xlu2 %v9502_v51 }
 0xac7   : > { %v3801_v41 = vpop.xlane.xlu0 %3800 }
 0xac8   : > { %v3940_v19 = vmul.f32 0.5, %v3939_v24  ;;  %v3832_v25 = vmul.f32 %v9412_v48, %v3801_v41 }
 0xaca   : > { %v3941_v34 = vsub.f32 1.5, %v3940_v19  ;;  %v9511_v22 = vsub.f32 %v9436_v38, %v3832_v25  ;;  %v3749_v1 = vpop.f32.mrf.mxu3 }
 0xacb   : > { %v7247_v7 = vpop.eup %7246  ;;  %v3750_v40 = vadd.f32 %v9370_v54, %v3749_v1 }
 0xacc   : > { %v3942_v43 = vmul.f32 %v7245_v6, %v3941_v34  ;;  %v3948_v8 = vmul.f32 %v7247_v7, %v3922_v18  ;;  %v3864_v42 = vmul.f32 %v9511_v22, %v9511_v22  ;;  %vm3954_vm9 = vweird.f32 %v7247_v7 }
 0xacd   : > { %vm3955_vm11 = vmor %vm3953_vm10, %vm3954_vm9  ;;  %v9551_v30 = vadd.f32 %v3767_v12, %v3750_v40 }
 0xace   : > { %v3949_v31 = vmul.f32 %v7247_v7, %v3948_v8  ;;  %3812 = vadd.xlane.f32.xlu0 %v9513_v58  ;;  %3887 = vadd.xlane.f32.xlu1 %v3864_v42  ;;  %v3946_v63 = vsel %vm3945_vm8, %v7245_v6, %v3942_v43 }
 0xacf   : > { %v3803_v38 = vpop.xlane.xlu0 %3802  ;;  %v4097_v59 = vmul.f32 %v3946_v63, %v9417_v3 }
 0xad0   : > { %v3950_v52 = vmul.f32 0.5, %v3949_v31  ;;  %v3833_v11 = vmul.f32 %v9412_v48, %v3803_v38 }
 0xad1   : > { %v4116_v3 = vmul.f32 %v9528_v49, %v4097_v59 }
 0xad2   : > { %v3951_v9 = vsub.f32 1.5, %v3950_v52  ;;  %v9523_v20 = vsub.f32 %v9444_v50, %v3833_v11  ;;  %v9539_v50 = vld [vmem:[%s10757_s6] ss:$0 sm:$0xff] }
 0xad3   : > { %v9546_v60 = vadd.f32 %v9539_v50, %v4116_v3 }
 0xad4   : > { %v3952_v55 = vmul.f32 %v7247_v7, %v3951_v9  ;;  %v3865_v2 = vmul.f32 %v9523_v20, %v9523_v20 }
 0xad6   : > { %v3956_v29 = vsel %vm3955_vm11, %v7247_v7, %v3952_v55  ;;  %3814 = vadd.xlane.f32.xlu0 %v9531_v45  ;;  %3889 = vadd.xlane.f32.xlu1 %v3865_v2 }
 0xad7   : > { %v4098_v37 = vmul.f32 %v3956_v29, %v9428_v5 }
 0xad9   : > { %v4117_v26 = vmul.f32 %v9528_v49, %v4098_v37 }
 0xadb   : > { %v9549_v47 = vadd.f32 %v9539_v50, %v4117_v26 }
 0xadd   : > { %v4151_v13 = vpack.c.bf16 %v9549_v47, %v9546_v60 }
 0xade   : > { %3816 = vadd.xlane.f32.xlu1 %v9551_v30 }
 0xadf   : > { %4369 = vmatmul.bf16.vlgmr.msrb.gmra.mxu0 %v4151_v13  ;;  %4418 = vmatmul.bf16.vlgmr.msrb.gmra.mxu1 %v4151_v13 }
 0xae0   : > { %4467 = vmatmul.bf16.vlgmr.msrb.gmra.mxu2 %v4151_v13  ;;  %4516 = vmatmul.bf16.vlgmr.msrb.gmra.mxu3 %v4151_v13 }
 0xb19   : > { %v3878_v54 = vpop.xlane.xlu1 %3877 }
 0xb1a   : > { %v3907_v5 = vmul.f32 %v3878_v54, %v9412_v48 }
 0xb1c   : > { %v3923_v35 = vadd.f32 1e-06, %v3907_v5 }
 0xb1e   : > { %7248 = vrsqrt.f32 %v3923_v35  ;;  %vm3963_vm13 = vweird.f32 %v3923_v35 }
 0xb21   : > { %v3805_v33 = vpop.xlane.xlu1 %3804  ;;  %v3880_v56 = vpop.xlane.xlu2 %3879 }
 0xb22   : > { %v3834_v4 = vmul.f32 %v9412_v48, %v3805_v33  ;;  %v3908_v44 = vmul.f32 %v3880_v56, %v9412_v48 }
 0xb24   : > { %v7249_v32 = vpop.eup %7248  ;;  %v9560_v15 = vsub.f32 %v9463_v16, %v3834_v4  ;;  %v3924_v6 = vadd.f32 1e-06, %v3908_v44 }
 0xb25   : > { %v3958_v18 = vmul.f32 %v7249_v32, %v3923_v35  ;;  %vm3964_vm12 = vweird.f32 %v7249_v32 }
 0xb26   : > { %7250 = vrsqrt.f32 %v3924_v6  ;;  %v3866_v39 = vmul.f32 %v9560_v15, %v9560_v15  ;;  %vm3965_vm14 = vmor %vm3963_vm13, %vm3964_vm12  ;;  %vm3973_vm0 = vweird.f32 %v3924_v6 }
 0xb27   : > { %v3959_v0 = vmul.f32 %v7249_v32, %v3958_v18 }
 0xb28   : > { %3891 = vadd.xlane.f32.xlu2 %v3866_v39 }
 0xb29   : > { %v3960_v24 = vmul.f32 0.5, %v3959_v0  ;;  %v3807_v27 = vpop.xlane.xlu1 %3806  ;;  %v3882_v10 = vpop.xlane.xlu2 %3881 }
 0xb2a   : > { %v3835_v41 = vmul.f32 %v9412_v48, %v3807_v27  ;;  %v3909_v19 = vmul.f32 %v3882_v10, %v9412_v48 }
 0xb2b   : > { %v3961_v25 = vsub.f32 1.5, %v3960_v24 }
 0xb2c   : > { %v7251_v34 = vpop.eup %7250  ;;  %v9567_v16 = vsub.f32 %v9475_v62, %v3835_v41  ;;  %v3925_v7 = vadd.f32 1e-06, %v3909_v19 }
 0xb2d   : > { %v3962_v14 = vmul.f32 %v7249_v32, %v3961_v25  ;;  %v3968_v53 = vmul.f32 %v7251_v34, %v3924_v6  ;;  %vm3974_vm15 = vweird.f32 %v7251_v34 }
 0xb2e   : > { %7252 = vrsqrt.f32 %v3925_v7  ;;  %v3867_v43 = vmul.f32 %v9567_v16, %v9567_v16  ;;  %vm3975_vm1 = vmor %vm3973_vm0, %vm3974_vm15  ;;  %vm3983_vm3 = vweird.f32 %v3925_v7 }
 0xb2f   : > { %v3969_v8 = vmul.f32 %v7251_v34, %v3968_v53  ;;  %v3966_v42 = vsel %vm3965_vm14, %v7249_v32, %v3962_v14 }
 0xb30   : > { %3893 = vadd.xlane.f32.xlu2 %v3867_v43  ;;  %v4099_v11 = vmul.f32 %v3966_v42, %v9448_v17 }
 0xb31   : > { %v3970_v31 = vmul.f32 0.5, %v3969_v8  ;;  %v3809_v46 = vpop.xlane.xlu2 %3808  ;;  %v3884_v38 = vpop.xlane.xlu0 %3883 }
 0xb32   : > { %v3836_v36 = vmul.f32 %v9412_v48, %v3809_v46  ;;  %v3910_v62 = vmul.f32 %v3884_v38, %v9412_v48  ;;  %v4118_v40 = vmul.f32 %v9528_v49, %v4099_v11 }
 0xb33   : > { %v3971_v63 = vsub.f32 1.5, %v3970_v31 }
 0xb34   : > { %v7253_v52 = vpop.eup %7252  ;;  %v9575_v9 = vsub.f32 %v9490_v28, %v3836_v36  ;;  %v3926_v59 = vadd.f32 1e-06, %v3910_v62 }
 0xb35   : > { %v3972_v55 = vmul.f32 %v7251_v34, %v3971_v63  ;;  %v3978_v2 = vmul.f32 %v7253_v52, %v3925_v7  ;;  %vm3984_vm2 = vweird.f32 %v7253_v52 }
 0xb36   : > { %7254 = vrsqrt.f32 %v3926_v59  ;;  %v3868_v1 = vmul.f32 %v9575_v9, %v9575_v9  ;;  %vm3985_vm4 = vmor %vm3983_vm3, %vm3984_vm2  ;;  %vm3993_vm6 = vweird.f32 %v3926_v59 }
 0xb37   : > { %v3976_v29 = vsel %vm3975_vm1, %v7251_v34, %v3972_v55  ;;  %v3979_v3 = vmul.f32 %v7253_v52, %v3978_v2 }
 0xb38   : > { %v4100_v37 = vmul.f32 %v3976_v29, %v9458_v23  ;;  %3895 = vadd.xlane.f32.xlu0 %v3868_v1  ;;  %v9588_v23 = vadd.f32 %v9539_v50, %v4118_v40 }
 0xb39   : > { %v3980_v17 = vmul.f32 0.5, %v3979_v3  ;;  %v3811_v12 = vpop.xlane.xlu2 %3810  ;;  %v3886_v28 = vpop.xlane.xlu0 %3885 }
 0xb3a   : > { %v3837_v26 = vmul.f32 %v9412_v48, %v3811_v12  ;;  %v3911_v13 = vmul.f32 %v3886_v28, %v9412_v48  ;;  %v4119_v54 = vmul.f32 %v9528_v49, %v4100_v37 }
 0xb3b   : > { %v3981_v5 = vsub.f32 1.5, %v3980_v17 }
 0xb3c   : > { %v7255_v35 = vpop.eup %7254  ;;  %v9585_v33 = vsub.f32 %v9502_v51, %v3837_v26  ;;  %v3927_v56 = vadd.f32 1e-06, %v3911_v13  ;;  %v9591_v4 = vadd.f32 %v9539_v50, %v4119_v54 }
 0xb3d   : > { %v3982_v44 = vmul.f32 %v7253_v52, %v3981_v5  ;;  %v3988_v32 = vmul.f32 %v7255_v35, %v3926_v59  ;;  %vm3994_vm5 = vweird.f32 %v7255_v35 }
 0xb3e   : > { %7256 = vrsqrt.f32 %v3927_v56  ;;  %v4152_v6 = vpack.c.bf16 %v9591_v4, %v9588_v23  ;;  %v3869_v18 = vmul.f32 %v9585_v33, %v9585_v33  ;;  %vm3995_vm7 = vmor %vm3993_vm6, %vm3994_vm5  ;;  %vm4003_vm9 = vweird.f32 %v3927_v56 }
 0xb3f   : > { %v3989_v51 = vmul.f32 %v7255_v35, %v3988_v32  ;;  %v3986_v39 = vsel %vm3985_vm4, %v7253_v52, %v3982_v44 }
 0xb40   : > { %4374 = vmatmul.bf16.gmra.mxu0 %v4152_v6  ;;  %4423 = vmatmul.bf16.gmra.mxu1 %v4152_v6  ;;  %v4101_v34 = vmul.f32 %v3986_v39, %v9473_v57 }
 0xb41   : > { %v3990_v0 = vmul.f32 0.5, %v3989_v51  ;;  %4472 = vmatmul.bf16.gmra.mxu2 %v4152_v6  ;;  %4521 = vmatmul.bf16.gmra.mxu3 %v4152_v6  ;;  %v3888_v24 = vpop.xlane.xlu1 %3887  ;;  %v3813_v27 = vpop.xlane.xlu0 %3812 }
 0xb42   : > { %3897 = vadd.xlane.f32.xlu1 %v3869_v18  ;;  %v3912_v10 = vmul.f32 %v3888_v24, %v9412_v48  ;;  %v3838_v41 = vmul.f32 %v9412_v48, %v3813_v27  ;;  %v4120_v38 = vmul.f32 %v9528_v49, %v4101_v34  ;;  %v4191_v34 = vld [vmem:[%s10759_s8] sm:$0xf] }
 0xb43   : > { %v3991_v19 = vsub.f32 1.5, %v3990_v0 }
 0xb44   : > { %v7257_v25 = vpop.eup %7256  ;;  %v3928_v7 = vadd.f32 1e-06, %v3912_v10  ;;  %v9601_v14 = vsub.f32 %v9513_v58, %v3838_v41  ;;  %v9613_v55 = vadd.f32 %v9539_v50, %v4120_v38 }
 0xb45   : > { %v3992_v53 = vmul.f32 %v7255_v35, %v3991_v19  ;;  %v3998_v43 = vmul.f32 %v7257_v25, %v3927_v56  ;;  %vm4004_vm8 = vweird.f32 %v7257_v25 }
 0xb46   : > { %7258 = vrsqrt.f32 %v3928_v7  ;;  %v3870_v8 = vmul.f32 %v9601_v14, %v9601_v14  ;;  %vm4005_vm10 = vmor %vm4003_vm9, %vm4004_vm8  ;;  %vm4013_vm12 = vweird.f32 %v3928_v7 }
 0xb47   : > { %v3996_v42 = vsel %vm3995_vm7, %v7255_v35, %v3992_v53  ;;  %v3999_v31 = vmul.f32 %v7257_v25, %v3998_v43 }
 0xb48   : > { %v4102_v46 = vmul.f32 %v3996_v42, %v9485_v61  ;;  %3899 = vadd.xlane.f32.xlu2 %v3870_v8  ;;  %v9648_v42 = vperm.slane %v4191_v34, 0 }
 0xb49   : > { %v4000_v57 = vmul.f32 0.5, %v3999_v31  ;;  %v3890_v36 = vpop.xlane.xlu1 %3889  ;;  %v3815_v62 = vpop.xlane.xlu0 %3814 }
 0xb4a   : > { %v3839_v58 = vmul.f32 %v9412_v48, %v3815_v62  ;;  %v4121_v63 = vmul.f32 %v9528_v49, %v4102_v46 }
 0xb4b   : > { %v4001_v52 = vsub.f32 1.5, %v4000_v57 }
 0xb4c   : > { %v7259_v11 = vpop.eup %7258  ;;  %v9610_v59 = vsub.f32 %v9531_v45, %v3839_v58  ;;  %v9616_v61 = vadd.f32 %v9539_v50, %v4121_v63 }
 0xb4d   : > { %v4002_v2 = vmul.f32 %v7257_v25, %v4001_v52  ;;  %v4008_v1 = vmul.f32 %v7259_v11, %v3928_v7  ;;  %vm4014_vm11 = vweird.f32 %v7259_v11  ;;  %v9655_v52 = vperm.slane %v4191_v34, 1 }
 0xb4e   : > { %10851 = vst [vmem:[#allocation23_spill] sm:$0xff] %v9616_v61  ;;  %v4153_v29 = vpack.c.bf16 %v9616_v61, %v9613_v55  ;;  %v3871_v3 = vmul.f32 %v9610_v59, %v9610_v59  ;;  %vm4015_vm13 = vmor %vm4013_vm12, %vm4014_vm11 }
 0xb4f   : > { %v4009_v37 = vmul.f32 %v7259_v11, %v4008_v1  ;;  %v4006_v45 = vsel %vm4005_vm10, %v7257_v25, %v4002_v2 }
 0xb50   : > { %4379 = vmatmul.bf16.gmra.mxu0 %v4153_v29  ;;  %4428 = vmatmul.bf16.gmra.mxu1 %v4153_v29  ;;  %v4103_v26 = vmul.f32 %v4006_v45, %v9500_v21 }
 0xb51   : > { %v4010_v40 = vmul.f32 0.5, %v4009_v37  ;;  %4477 = vmatmul.bf16.gmra.mxu2 %v4153_v29  ;;  %4526 = vmatmul.bf16.gmra.mxu3 %v4153_v29  ;;  %v3817_v17 = vpop.xlane.xlu1 %3816 }
 0xb52   : > { %3901 = vadd.xlane.f32.xlu0 %v3871_v3  ;;  %v3840_v12 = vmul.f32 %v9412_v48, %v3817_v17  ;;  %v4122_v44 = vmul.f32 %v9528_v49, %v4103_v26 }
 0xb53   : > { %v4011_v28 = vsub.f32 1.5, %v4010_v40 }
 0xb54   : > { %v9625_v13 = vsub.f32 %v9551_v30, %v3840_v12  ;;  %v9633_v6 = vadd.f32 %v9539_v50, %v4122_v44 }
 0xb55   : > { %v4012_v54 = vmul.f32 %v7259_v11, %v4011_v28 }
 0xb56   : > { %v3872_v5 = vmul.f32 %v9625_v13, %v9625_v13  ;;  %10852 = vst [vmem:[#allocation25_spill] sm:$0xff] %v9633_v6 }
 0xb57   : > { %v4016_v35 = vsel %vm4015_vm13, %v7259_v11, %v4012_v54 }
 0xb58   : > { %v4104_v56 = vmul.f32 %v4016_v35, %v9511_v22  ;;  %3903 = vadd.xlane.f32.xlu1 %v3872_v5  ;;  %v3913_v22 = vmul.f32 %v3890_v36, %v9412_v48 }
 0xb5a   : > { %v4123_v32 = vmul.f32 %v9528_v49, %v4104_v56  ;;  %v3929_v18 = vadd.f32 1e-06, %v3913_v22 }
 0xb5c   : > { %v9636_v21 = vadd.f32 %v9539_v50, %v4123_v32  ;;  %7260 = vrsqrt.f32 %v3929_v18  ;;  %v4370_v46 = vpop.f32.mrf.mxu0  ;;  %vm4023_vm15 = vweird.f32 %v3929_v18  ;;  %v4419_v29 = vpop.f32.mrf.mxu1 }
 0xb5d   : > { %v9652_v36 = vadd.f32 %v4370_v46, %v9648_v42  ;;  %v9667_v17 = vadd.f32 %v4419_v29, %v9655_v52 }
 0xb5e   : > { %10853 = vst [vmem:[#allocation27_spill] sm:$0xff] %v9636_v21  ;;  %v4154_v30 = vpack.c.bf16 %v9636_v21, %v9633_v6 }
 0xb5f   : > { %v4621_v37 = vmul.f32 0.044715, %v9652_v36  ;;  %v4622_v32 = vmul.f32 0.044715, %v9667_v17 }
 0xb60   : > { %4384 = vmatmul.bf16.gmra.mxu0 %v4154_v30  ;;  %4433 = vmatmul.bf16.gmra.mxu1 %v4154_v30 }
 0xb61   : > { %4482 = vmatmul.bf16.gmra.mxu2 %v4154_v30  ;;  %4531 = vmatmul.bf16.gmra.mxu3 %v4154_v30  ;;  %v4685_v5 = vmul.f32 %v4621_v37, %v9652_v36 }
 0xb62   : > { %v7261_v51 = vpop.eup %7260 }
 0xb63   : > { %v4018_v39 = vmul.f32 %v7261_v51, %v3929_v18  ;;  %vm4024_vm14 = vweird.f32 %v7261_v51  ;;  %v4468_v12 = vpop.f32.mrf.mxu2  ;;  %v4517_v35 = vpop.f32.mrf.mxu3 }
 0xb64   : > { %vm4025_vm0 = vmor %vm4023_vm15, %vm4024_vm14 }
 0xb65   : > { %v4019_v0 = vmul.f32 %v7261_v51, %v4018_v39 }
 0xb67   : > { %v4020_v41 = vmul.f32 0.5, %v4019_v0 }
 0xb69   : > { %v4021_v19 = vsub.f32 1.5, %v4020_v41 }
 0xb6b   : > { %v4022_v8 = vmul.f32 %v7261_v51, %v4021_v19 }
 0xb6d   : > { %v4026_v57 = vsel %vm4025_vm0, %v7261_v51, %v4022_v8  ;;  %v9677_v51 = vperm.slane %v4191_v34, 2  ;;  %v4421_v8 = vpop.f32.mrf.mxu1 }
 0xb6e   : > { %v4105_v1 = vmul.f32 %v4026_v57, %v9523_v20  ;;  %v4470_v57 = vpop.f32.mrf.mxu2 }
 0xb6f   : > { %v9700_v46 = vadd.f32 %v4468_v12, %v9677_v51  ;;  %v6790_v12 = vld [vmem:[#allocation12 + $0x38] sm:$0xff] }
 0xb70   : > { %v4124_v54 = vmul.f32 %v9528_v49, %v4105_v1  ;;  %5425 = vmatpush.bf16.msra.mxu0 %v6790_v12  ;;  %v6788_v12 = vld [vmem:[#allocation12 + $0x28] sm:$0xff] }
 0xb9b   : > { %v3892_v24 = vpop.xlane.xlu2 %3891 }
 0xb9c   : > { %v3914_v27 = vmul.f32 %v3892_v24, %v9412_v48  ;;  %v4749_v24 = vmul.f32 %v4685_v5, %v9652_v36  ;;  %v6814_v5 = vld [vmem:[#allocation12 + $0xf8] sm:$0xff] }
 0xb9d   : > { %5572 = vmatpush.bf16.msra.mxu3 %v6814_v5 }
 0xb9e   : > { %v3930_v10 = vadd.f32 1e-06, %v3914_v27 }
 0xba0   : > { %7262 = vrsqrt.f32 %v3930_v10  ;;  %vm4033_vm2 = vweird.f32 %v3930_v10 }
 0xba3   : > { %v3894_v25 = vpop.xlane.xlu2 %3893 }
 0xba4   : > { %v3915_v7 = vmul.f32 %v3894_v25, %v9412_v48  ;;  %v4686_v25 = vmul.f32 %v4622_v32, %v9667_v17 }
 0xba6   : > { %v7263_v53 = vpop.eup %7262  ;;  %v9646_v43 = vadd.f32 1e-06, %v3915_v7  ;;  %v9696_v7 = vperm.slane %v4191_v34, 3  ;;  %v4750_v29 = vmul.f32 %v4686_v25, %v9667_v17  ;;  %v6797_v25 = vld [vmem:[#allocation12 + $0x70] sm:$0xff] }
 0xba7   : > { %v4028_v31 = vmul.f32 %v7263_v53, %v3930_v10  ;;  %vm4034_vm1 = vweird.f32 %v7263_v53 }
 0xba8   : > { %7264 = vrsqrt.f32 %v9646_v43  ;;  %vm4035_vm3 = vmor %vm4033_vm2, %vm4034_vm1  ;;  %vm4043_vm5 = vweird.f32 %v9646_v43  ;;  %v9723_v37 = vadd.f32 %v4517_v35, %v9696_v7 }
 0xba9   : > { %v4029_v38 = vmul.f32 %v7263_v53, %v4028_v31 }
 0xbab   : > { %v4030_v62 = vmul.f32 0.5, %v4029_v38  ;;  %v3896_v58 = vpop.xlane.xlu0 %3895  ;;  %v4813_v38 = vadd.f32 %v4749_v24, %v9652_v36 }
 0xbac   : > { %v3916_v63 = vmul.f32 %v3896_v58, %v9412_v48 }
 0xbad   : > { %v4031_v11 = vsub.f32 1.5, %v4030_v62 }
 0xbae   : > { %v9657_v2 = vpop.eup %7264  ;;  %v9660_v3 = vadd.f32 1e-06, %v3916_v63 }
 0xbaf   : > { %v4032_v45 = vmul.f32 %v7263_v53, %v4031_v11  ;;  %v4038_v40 = vmul.f32 %v9657_v2, %v9646_v43  ;;  %vm4044_vm4 = vweird.f32 %v9657_v2  ;;  %v9715_v43 = vadd.f32 %v4421_v8, %v9655_v52 }
 0xbb0   : > { %7266 = vrsqrt.f32 %v9660_v3  ;;  %vm9707_vm6 = vmor %vm4043_vm5, %vm4044_vm4  ;;  %vm4053_vm8 = vweird.f32 %v9660_v3 }
 0xbb1   : > { %v4036_v28 = vsel %vm4035_vm3, %v7263_v53, %v4032_v45  ;;  %v4039_v20 = vmul.f32 %v9657_v2, %v4038_v40  ;;  %v4372_v53 = vpop.f32.mrf.mxu0  ;;  %v4519_v45 = vpop.f32.mrf.mxu3 }
 0xbb2   : > { %v4106_v26 = vmul.f32 %v4036_v28, %v9560_v15  ;;  %v9681_v15 = vadd.f32 %v9539_v50, %v4124_v54  ;;  %v9712_v63 = vadd.f32 %v4372_v53, %v9648_v42  ;;  %v6798_v28 = vld [vmem:[#allocation12 + $0x78] sm:$0xff]  ;;  %v9728_v54 = vadd.f32 %v4470_v57, %v9677_v51  ;;  %v6805_v53 = vld [vmem:[#allocation12 + $0xb0] sm:$0xff] }
 0xbb3   : > { %v4040_v56 = vmul.f32 0.5, %v4039_v20  ;;  %v6806_v20 = vld [vmem:[#allocation12 + $0xb8] sm:$0xff]  ;;  %5474 = vmatpush.bf16.msra.mxu1 %v6798_v28  ;;  %v6813_v57 = vld [vmem:[#allocation12 + $0xf0] sm:$0xff]  ;;  %v6796_v28 = vld [vmem:[#allocation12 + $0x68] sm:$0xff] }
 0xbb4   : > { %v4125_v44 = vmul.f32 %v9528_v49, %v4106_v26  ;;  %10854 = vst [vmem:[#allocation26_spill] sm:$0xff] %v9681_v15  ;;  %v4623_v26 = vmul.f32 0.044715, %v9700_v46  ;;  %5523 = vmatpush.bf16.msra.mxu2 %v6806_v20  ;;  %5573 = vmatpush.bf16.msra.mxu3 %v6813_v57  ;;  %v6804_v20 = vld [vmem:[#allocation12 + $0xa8] sm:$0xff]  ;;  %v6787_v57 = vld [vmem:[#allocation12 + $0x20] sm:$0xff] }
 0xbb5   : > { %v4041_v30 = vsub.f32 1.5, %v4040_v56  ;;  %v3898_v22 = vpop.xlane.xlu1 %3897  ;;  %v4877_v56 = vmul.f32 0.7978846, %v4813_v38 }
 0xbb6   : > { %v9675_v18 = vpop.eup %7266  ;;  %v3917_v39 = vmul.f32 %v3898_v22, %v9412_v48  ;;  %v9684_v0 = vadd.f32 %v9539_v50, %v4125_v44  ;;  %v4626_v22 = vmul.f32 0.044715, %v9715_v43  ;;  %v4687_v8 = vmul.f32 %v4623_v26, %v9700_v46 }
 0xbb7   : > { %v4048_v27 = vmul.f32 %v9675_v18, %v9660_v3  ;;  %v4042_v10 = vmul.f32 %v9657_v2, %v4041_v30  ;;  %vm4054_vm7 = vweird.f32 %v9675_v18  ;;  %v4625_v30 = vmul.f32 0.044715, %v9712_v63  ;;  %5475 = vmatpush.bf16.msra.mxu1 %v6797_v25 }
 0xbb8   : > { %10855 = vst [vmem:[#allocation31_spill] sm:$0xff] %v9684_v0  ;;  %v9691_v41 = vadd.f32 1e-06, %v3917_v39  ;;  %v4155_v19 = vpack.c.bf16 %v9684_v0, %v9681_v15  ;;  %v9740_v39 = vadd.f32 %v4519_v45, %v9696_v7  ;;  %vm4055_vm9 = vmor %vm4053_vm8, %vm4054_vm7  ;;  %v4624_v3 = vmul.f32 0.044715, %v9723_v37  ;;  %5524 = vmatpush.bf16.msra.mxu2 %v6805_v53 }
 0xbb9   : > { %v4049_v31 = vmul.f32 %v9675_v18, %v4048_v27  ;;  %v4046_v11 = vsel %vm9707_vm6, %v9657_v2, %v4042_v10  ;;  %v4751_v5 = vmul.f32 %v4687_v8, %v9700_v46 }
 0xbba   : > { %7268 = vrsqrt.f32 %v9691_v41  ;;  %4389 = vmatmul.bf16.gmra.mxu0 %v4155_v19  ;;  %4438 = vmatmul.bf16.gmra.mxu1 %v4155_v19  ;;  %v4107_v44 = vmul.f32 %v4046_v11, %v9567_v16  ;;  %v4814_v16 = vadd.f32 %v4750_v29, %v9667_v17  ;;  %v4628_v11 = vmul.f32 0.044715, %v9740_v39 }
 0xbbb   : > { %v4050_v62 = vmul.f32 0.5, %v4049_v31  ;;  %4487 = vmatmul.bf16.gmra.mxu2 %v4155_v19  ;;  %4536 = vmatmul.bf16.gmra.mxu3 %v4155_v19  ;;  %v3900_v58 = vpop.xlane.xlu2 %3899  ;;  %v6789_v19 = vld [vmem:[#allocation12 + $0x30] sm:$0xff]  ;;  %v4627_v31 = vmul.f32 0.044715, %v9728_v54  ;;  %vm4063_vm11 = vweird.f32 %v9691_v41 }
 0xbbc   : > { %v3918_v1 = vmul.f32 %v3900_v58, %v9412_v48  ;;  %5426 = vmatpush.bf16.msra.mxu0 %v6789_v19  ;;  %v4690_v58 = vmul.f32 %v4626_v22, %v9715_v43  ;;  %v4878_v29 = vmul.f32 0.7978846, %v4814_v16  ;;  %5476 = vmatpush.bf16.msra.mxu1 %v6796_v28  ;;  %v4692_v19 = vmul.f32 %v4628_v11, %v9740_v39  ;;  %v6811_v11 = vld [vmem:[#allocation12 + $0xe0] sm:$0xff] }
 0xbbd   : > { %v4051_v40 = vsub.f32 1.5, %v4050_v62  ;;  %v9750_v10 = vpop.f32.mrf.mxu0  ;;  %v4126_v62 = vmul.f32 %v9528_v49, %v4107_v44  ;;  %v4691_v44 = vmul.f32 %v4627_v31, %v9728_v54  ;;  %v9779_v25 = vpop.f32.mrf.mxu1  ;;  %5525 = vmatpush.bf16.msra.mxu2 %v6804_v20 }
 0xbbe   : > { %v9730_v2 = vadd.f32 1e-06, %v3918_v1 }
 0xbbf   : > { %v4052_v35 = vmul.f32 %v9675_v18, %v4051_v40 }
 0xbc0   : > { %v9735_v32 = vpop.eup %7268  ;;  %7270 = vrsqrt.f32 %v9730_v2  ;;  %5427 = vmatpush.bf16.msra.mxu0 %v6788_v12  ;;  %vm4073_vm14 = vweird.f32 %v9730_v2 }
 0xbc1   : > { %v4056_v24 = vsel %vm4055_vm9, %v9675_v18, %v4052_v35  ;;  %v4058_v27 = vmul.f32 %v9735_v32, %v9691_v41  ;;  %v4689_v18 = vmul.f32 %v4625_v30, %v9712_v63  ;;  %7272 = vtanh.f32 %v4877_v56  ;;  %v6812_v56 = vld [vmem:[#allocation12 + $0xe8] sm:$0xff]  ;;  %v6803_v41 = vld [vmem:[#allocation12 + $0xa0] sm:$0xff] }
 0xbc2   : > { %v4108_v38 = vmul.f32 %v4056_v24, %v9575_v9  ;;  %v4688_v9 = vmul.f32 %v4624_v3, %v9723_v37  ;;  %vm4064_vm10 = vweird.f32 %v9735_v32  ;;  %v9774_v3 = vadd.f32 %v9539_v50, %v4126_v62  ;;  %5574 = vmatpush.bf16.msra.mxu3 %v6812_v56  ;;  %5526 = vmatpush.bf16.msra.mxu2 %v6803_v41 }
 0xbc3   : > { %v4059_v34 = vmul.f32 %v9735_v32, %v4058_v27  ;;  %v4753_v24 = vmul.f32 %v4689_v18, %v9712_v63  ;;  %v4754_v27 = vmul.f32 %v4690_v58, %v9715_v43  ;;  %v4755_v62 = vmul.f32 %v4691_v44, %v9728_v54  ;;  %vm9791_vm12 = vmor %vm4063_vm11, %vm4064_vm10 }
 0xbc4   : > { %v4127_v1 = vmul.f32 %v9528_v49, %v4108_v38  ;;  %10859 = vst [vmem:[#allocation28_spill] sm:$0xff] %v9774_v3  ;;  %v9795_v58 = vpop.f32.mrf.mxu2  ;;  %v4756_v56 = vmul.f32 %v4692_v19, %v9740_v39  ;;  %5428 = vmatpush.bf16.msra.mxu0 %v6787_v57  ;;  %v9829_v41 = vadd.f32 %v9750_v10, %v9648_v42 }
 0xbc5   : > { %v4060_v45 = vmul.f32 0.5, %v4059_v34  ;;  %v3902_v40 = vpop.xlane.xlu0 %3901  ;;  %v6795_v34 = vld [vmem:[#allocation12 + $0x60] sm:$0xff]  ;;  %v4377_v20 = vpop.f32.mrf.mxu0 }
 0xbc6   : > { %v9762_v26 = vpop.eup %7270  ;;  %v3919_v35 = vmul.f32 %v3902_v40, %v9412_v48  ;;  %v9768_v30 = vadd.f32 %v9539_v50, %v4127_v1  ;;  %v4752_v40 = vmul.f32 %v4688_v9, %v9723_v37  ;;  %5477 = vmatpush.bf16.msra.mxu1 %v6795_v34  ;;  %v9815_v19 = vadd.f32 %v4377_v20, %v9648_v42  ;;  %v6793_v20 = vld [vmem:[#allocation12 + $0x50] sm:$0xff] }
 0xbc7   : > { %v4061_v22 = vsub.f32 1.5, %v4060_v45  ;;  %v4068_v16 = vmul.f32 %v9762_v26, %v9730_v2  ;;  %v9798_v1 = vpop.eup %7272  ;;  %v4815_v45 = vadd.f32 %v4751_v5, %v9700_v46  ;;  %v4818_v5 = vadd.f32 %v4754_v27, %v9715_v43  ;;  %5575 = vmatpush.bf16.msra.mxu3 %v6811_v11  ;;  %v6810_v27 = vld [vmem:[#allocation12 + $0xd8] sm:$0xff] }
 0xbc8   : > { %10858 = vst [vmem:[#allocation21_spill] sm:$0xff] %v9768_v30  ;;  %v9781_v53 = vadd.f32 1e-06, %v3919_v35  ;;  %v4156_v38 = vpack.c.bf16 %v9768_v30, %v9774_v3  ;;  %v4817_v35 = vadd.f32 %v4753_v24, %v9712_v63  ;;  %vm4074_vm13 = vweird.f32 %v9762_v26 }
 0xbc9   : > { %v4062_v8 = vmul.f32 %v9735_v32, %v4061_v22  ;;  %v4069_v31 = vmul.f32 %v9762_v26, %v4068_v16  ;;  %v9807_v22 = vpop.f32.mrf.mxu3  ;;  %v4879_v18 = vmul.f32 0.7978846, %v4815_v45  ;;  %vm4075_vm15 = vmor %vm4073_vm14, %vm4074_vm13  ;;  %v9833_v11 = vmul.f32 0.5, %v9652_v36 }
 0xbca   : > { %7274 = vrsqrt.f32 %v9781_v53  ;;  %4394 = vmatmul.bf16.gmra.mxu0 %v4156_v38  ;;  %4443 = vmatmul.bf16.gmra.mxu1 %v4156_v38  ;;  %v4882_v45 = vmul.f32 0.7978846, %v4818_v5  ;;  %v6801_v5 = vld [vmem:[#allocation12 + $0x90] sm:$0xff]  ;;  %vm4083_vm1 = vweird.f32 %v9781_v53 }
 0xbcb   : > { %v4066_v12 = vsel %vm9791_vm12, %v9735_v32, %v4062_v8  ;;  %v4070_v28 = vmul.f32 0.5, %v4069_v31  ;;  %v3904_v44 = vpop.xlane.xlu1 %3903  ;;  %7276 = vtanh.f32 %v4878_v29  ;;  %4492 = vmatmul.bf16.gmra.mxu2 %v4156_v38  ;;  %4541 = vmatmul.bf16.gmra.mxu3 %v4156_v38  ;;  %v6786_v32 = vld [vmem:[#allocation12 + $0x18] sm:$0xff]  ;;  %v4819_v29 = vadd.f32 %v4755_v62, %v9728_v54 }
 0xbcc   : > { %v3920_v9 = vmul.f32 %v3904_v44, %v9412_v48  ;;  %v6794_v8 = vld [vmem:[#allocation12 + $0x58] sm:$0xff]  ;;  %v4109_v24 = vmul.f32 %v4066_v12, %v9585_v33  ;;  %v4881_v62 = vmul.f32 0.7978846, %v4817_v35  ;;  %v4820_v33 = vadd.f32 %v4756_v56, %v9740_v39  ;;  %5429 = vmatpush.bf16.msra.mxu0 %v6786_v32  ;;  %v6785_v12 = vld [vmem:[#allocation12 + $0x10] sm:$0xff]  ;;  %5576 = vmatpush.bf16.msra.mxu3 %v6810_v27  ;;  %v9850_v27 = vpop.f32.mrf.mxu2 }
 0xbcd   : > { %v4071_v16 = vsub.f32 1.5, %v4070_v28  ;;  %v6802_v38 = vld [vmem:[#allocation12 + $0x98] sm:$0xff]  ;;  %v4816_v28 = vadd.f32 %v4752_v40, %v9723_v37  ;;  %5478 = vmatpush.bf16.msra.mxu1 %v6794_v8  ;;  %v4883_v35 = vmul.f32 0.7978846, %v4819_v29  ;;  %v4633_v56 = vmul.f32 0.044715, %v9815_v19 }
 0xbce   : > { %v9817_v31 = vadd.f32 1e-06, %v3920_v9  ;;  %v4426_v9 = vpop.f32.mrf.mxu1  ;;  %v4128_v36 = vmul.f32 %v9528_v49, %v4109_v24  ;;  %5527 = vmatpush.bf16.msra.mxu2 %v6802_v38  ;;  %v4884_v29 = vmul.f32 0.7978846, %v4820_v33 }
 0xbcf   : > { %v4072_v57 = vmul.f32 %v9762_v26, %v4071_v16  ;;  %v9842_v16 = vmul.f32 0.5, %v9667_v17  ;;  %v4880_v32 = vmul.f32 0.7978846, %v4816_v28  ;;  %v6784_v17 = vld [vmem:[#allocation12 + $0x8] sm:$0xff] }
 0xbd0   : > { %v9822_v34 = vpop.eup %7274  ;;  %7278 = vrsqrt.f32 %v9817_v31  ;;  %5430 = vmatpush.bf16.msra.mxu0 %v6785_v12  ;;  %vm4093_vm4 = vweird.f32 %v9817_v31 }
 0xbd1   : > { %v4076_v2 = vsel %vm4075_vm15, %v9762_v26, %v4072_v57  ;;  %v4078_v40 = vmul.f32 %v9822_v34, %v9781_v53  ;;  %v7277_v44 = vpop.eup %7276  ;;  %v6809_v26 = vld [vmem:[#allocation12 + $0xd0] sm:$0xff]  ;;  %7280 = vtanh.f32 %v4879_v18  ;;  %5479 = vmatpush.bf16.msra.mxu1 %v6793_v20  ;;  %v6792_v18 = vld [vmem:[#allocation12 + $0x48] sm:$0xff]  ;;  %v9855_v33 = vpop.f32.mrf.mxu3  ;;  %vm4084_vm0 = vweird.f32 %v9822_v34 }
 0xbd2   : > { %v4110_v10 = vmul.f32 %v4076_v2, %v9601_v14  ;;  %7282 = vtanh.f32 %v4881_v62  ;;  %v4629_v14 = vmul.f32 0.044715, %v9829_v41  ;;  %v5005_v2 = vadd.f32 1.0, %v9798_v1  ;;  %5528 = vmatpush.bf16.msra.mxu2 %v6801_v5  ;;  %5577 = vmatpush.bf16.msra.mxu3 %v6809_v26  ;;  %v6783_v26 = vld [vmem:[#allocation12] sm:$0xff]  ;;  %vm9888_vm2 = vmor %vm4083_vm1, %vm4084_vm0  ;;  %v9892_v53 = vpop.f32.mrf.mxu0 }
 0xbd3   : > { %v4079_v8 = vmul.f32 %v9822_v34, %v4078_v40  ;;  %v9848_v24 = vadd.f32 1.0, %v7277_v44  ;;  %7284 = vtanh.f32 %v4882_v45  ;;  %v4697_v62 = vmul.f32 %v4633_v56, %v9815_v19  ;;  %v6800_v45 = vld [vmem:[#allocation12 + $0x88] sm:$0xff] }
 0xbd4   : > { %v4129_v57 = vmul.f32 %v9528_v49, %v4110_v10  ;;  %7286 = vtanh.f32 %v4883_v35  ;;  %v9858_v49 = vadd.f32 %v9539_v50, %v4128_v36  ;;  %v6808_v40 = vld [vmem:[#allocation12 + $0xc8] sm:$0xff]  ;;  %v4693_v44 = vmul.f32 %v4629_v14, %v9829_v41  ;;  %5431 = vmatpush.bf16.msra.mxu0 %v6784_v17 }
 0xbd5   : > { %v4080_v38 = vmul.f32 0.5, %v4079_v8  ;;  %7288 = vtanh.f32 %v4880_v32  ;;  %v9868_v35 = vadd.f32 %v4426_v9, %v9655_v52  ;;  %v9874_v56 = vadd.f32 %v9779_v25, %v9655_v52  ;;  %5480 = vmatpush.bf16.msra.mxu1 %v6792_v18  ;;  %v6791_v32 = vld [vmem:[#allocation12 + $0x40] sm:$0xff] }
 0xbd6   : > { %v9852_v28 = vpop.eup %7278  ;;  %10862 = vst [vmem:[#allocation24_spill] sm:$0xff] %v9858_v49  ;;  %v9861_v1 = vadd.f32 %v9539_v50, %v4129_v57  ;;  %7290 = vtanh.f32 %v4884_v29  ;;  %v9880_v8 = vmul.f32 0.5, %v9700_v46  ;;  %v9883_v29 = vmul.f32 0.5, %v9723_v37  ;;  %5529 = vmatpush.bf16.msra.mxu2 %v6800_v45  ;;  %5578 = vmatpush.bf16.msra.mxu3 %v6808_v40  ;;  %v6799_v57 = vld [vmem:[#allocation12 + $0x80] sm:$0xff] }
 0xbd7   : > { %v4081_v12 = vsub.f32 1.5, %v4080_v38  ;;  %v4088_v20 = vmul.f32 %v9852_v28, %v9817_v31  ;;  %v7281_v10 = vpop.eup %7280  ;;  %v4561_v25 = vmul.f32 0.5, %v9712_v63  ;;  %v6807_v38 = vld [vmem:[#allocation12 + $0xc0] sm:$0xff]  ;;  %v4761_v46 = vmul.f32 %v4697_v62, %v9815_v19 }
 0xbd8   : > { %10863 = vst [vmem:[#allocation29_spill] sm:$0xff] %v9861_v1  ;;  %v4157_v50 = vpack.c.bf16 %v9861_v1, %v9858_v49  ;;  %v7283_v9 = vpop.eup %7282  ;;  %v4562_v37 = vmul.f32 0.5, %v9715_v43  ;;  %v4563_v18 = vmul.f32 0.5, %v9728_v54  ;;  %v4564_v45 = vmul.f32 0.5, %v9740_v39  ;;  %v9902_v1 = vpop.f32.mrf.mxu1  ;;  %5432 = vmatpush.bf16.msra.mxu0 %v6783_v26 }
 0xbd9   : > { %v4082_v36 = vmul.f32 %v9822_v34, %v4081_v12  ;;  %v4089_v5 = vmul.f32 %v9852_v28, %v4088_v20  ;;  %v7285_v17 = vpop.eup %7284  ;;  %v4634_v40 = vmul.f32 0.044715, %v9868_v35  ;;  %v9905_v43 = vmul.f32 %v5005_v2, %v9833_v11  ;;  %5481 = vmatpush.bf16.msra.mxu1 %v6791_v32 }
 0xbda   : > { %4399 = vmatmul.bf16.gmra.mxu0 %v4157_v50  ;;  %4448 = vmatmul.bf16.gmra.mxu1 %v4157_v50  ;;  %v7287_v20 = vpop.eup %7286  ;;  %v4757_v54 = vmul.f32 %v4693_v44, %v9829_v41  ;;  %vm4094_vm3 = vweird.f32 %v9852_v28  ;;  %v9912_v39 = vmul.f32 %v9848_v24, %v9842_v16  ;;  %v5007_v14 = vadd.f32 1.0, %v7281_v10 }
 0xbdb   : > { %v4086_v63 = vsel %vm9888_vm2, %v9822_v34, %v4082_v36  ;;  %v4090_v12 = vmul.f32 0.5, %v4089_v5  ;;  %4497 = vmatmul.bf16.gmra.mxu2 %v4157_v50  ;;  %4546 = vmatmul.bf16.gmra.mxu3 %v4157_v50  ;;  %v7289_v62 = vpop.eup %7288  ;;  %v4630_v34 = vmul.f32 0.044715, %v9874_v56  ;;  %v5009_v11 = vadd.f32 1.0, %v7283_v9  ;;  %vm4095_vm5 = vmor %vm4093_vm4, %vm4094_vm3 }
 0xbdc   : > { %v7291_v5 = vpop.eup %7290  ;;  %v4111_v50 = vmul.f32 %v4086_v63, %v9610_v59  ;;  %5530 = vmatpush.bf16.msra.mxu2 %v6799_v57  ;;  %5579 = vmatpush.bf16.msra.mxu3 %v6807_v38  ;;  %v4825_v2 = vadd.f32 %v4761_v46, %v9815_v19  ;;  %v5010_v26 = vadd.f32 1.0, %v7285_v17  ;;  %v5011_v32 = vadd.f32 1.0, %v7287_v20  ;;  %v9925_v59 = vpop.f32.mrf.mxu3  ;;  %v7436_v17 = vld [vmem:[%s10756_s5] ss:$0 sm:$0xff] }
 0xbdd   : > { %v4091_v36 = vsub.f32 1.5, %v4090_v12  ;;  %v4478_v12 = vpop.f32.mrf.mxu2  ;;  %v5008_v48 = vadd.f32 1.0, %v7289_v62  ;;  %v4698_v16 = vmul.f32 %v4634_v40, %v9868_v35  ;;  %v9921_v24 = vadd.f32 %v9850_v27, %v9677_v51  ;;  %v4382_v62 = vpop.f32.mrf.mxu0 }
 0xbde   : > { %v4821_v10 = vadd.f32 %v4757_v54, %v9829_v41  ;;  %v4694_v9 = vmul.f32 %v4630_v34, %v9874_v56  ;;  %v9931_v31 = vadd.f32 %v9855_v33, %v9696_v7  ;;  %v5012_v38 = vadd.f32 1.0, %v7291_v5 }
 0xbdf   : > { %v4092_v44 = vmul.f32 %v9852_v28, %v4091_v36  ;;  %v9936_v27 = vadd.f32 %v9795_v58, %v9677_v51  ;;  %v4130_v63 = vmul.f32 %v7436_v17, %v4111_v50  ;;  %v4889_v20 = vmul.f32 0.7978846, %v4825_v2 }
 0xbe0   : > { %v9944_v40 = vadd.f32 %v9807_v22, %v9696_v7  ;;  %v9946_v33 = vmul.f32 %v5009_v11, %v4561_v25  ;;  %v9950_v54 = vmul.f32 %v5011_v32, %v4563_v18  ;;  %v4635_v58 = vmul.f32 0.044715, %v9921_v24  ;;  %v4431_v18 = vpop.f32.mrf.mxu1  ;;  %v7437_v11 = vld [vmem:[%s10757_s6] ss:$0 sm:$0xff] }
 0xbe1   : > { %v4096_v57 = vsel %vm4095_vm5, %v9852_v28, %v4092_v44  ;;  %v9948_v28 = vmul.f32 %v5010_v26, %v4562_v37  ;;  %v4885_v34 = vmul.f32 0.7978846, %v4821_v10  ;;  %v4762_v36 = vmul.f32 %v4698_v16, %v9868_v35 }
 0xbe2   : > { %v4112_v46 = vmul.f32 %v4096_v57, %v9625_v13  ;;  %v4636_v5 = vmul.f32 0.044715, %v9931_v31  ;;  %v9957_v50 = vadd.f32 %v9892_v53, %v9648_v42  ;;  %v9959_v22 = vmul.f32 %v5012_v38, %v4564_v45 }
 0xbe3   : > { %v4758_v25 = vmul.f32 %v4694_v9, %v9874_v56  ;;  %v4631_v37 = vmul.f32 0.044715, %v9936_v27  ;;  %v9966_v2 = vadd.f32 %v7437_v11, %v4130_v63  ;;  %7292 = vtanh.f32 %v4889_v20 }
 0xbe4   : > { %v4131_v13 = vmul.f32 %v7436_v17, %v4112_v46  ;;  %v4632_v26 = vmul.f32 0.044715, %v9944_v40  ;;  %v9974_v45 = vmul.f32 %v5007_v14, %v9880_v8  ;;  %v9977_v32 = vmul.f32 %v5008_v48, %v9883_v29  ;;  %v4529_v17 = vpop.f32.mrf.mxu3 }
 0xbe5   : > { %10866 = vst [vmem:[#allocation30_spill] sm:$0xff] %v9966_v2  ;;  %v4699_v16 = vmul.f32 %v4635_v58, %v9921_v24  ;;  %7294 = vtanh.f32 %v4885_v34  ;;  %v4826_v9 = vadd.f32 %v4762_v36, %v9868_v35  ;;  %v4700_v57 = vmul.f32 %v4636_v5, %v9931_v31  ;;  %v4480_v46 = vpop.f32.mrf.mxu2 }
 0xbe6   : > { %v9968_v44 = vadd.f32 %v7437_v11, %v4131_v13  ;;  %v4637_v38 = vmul.f32 0.044715, %v9957_v50  ;;  %v4822_v14 = vadd.f32 %v4758_v25, %v9874_v56  ;;  %v4695_v48 = vmul.f32 %v4631_v37, %v9936_v27 }
 0xbe7   : > { %v9991_v29 = vadd.f32 %v9902_v1, %v9655_v52  ;;  %v4696_v58 = vmul.f32 %v4632_v26, %v9944_v40  ;;  %v9999_v13 = vadd.f32 %v4478_v12, %v9677_v51  ;;  %v10002_v34 = vadd.f32 %v4382_v62, %v9648_v42 }
 0xbe8   : > { %10867 = vst [vmem:[#allocation32_spill] sm:$0xff] %v9968_v44  ;;  %v4158_v10 = vpack.c.bf16 %v9968_v44, %v9966_v2  ;;  %v4565_v1 = vmul.f32 0.5, %v9829_v41  ;;  %v10006_v5 = vmul.f32 0.5, %v9874_v56  ;;  %v4890_v25 = vmul.f32 0.7978846, %v4826_v9  ;;  %v4385_v56 = vpop.f32.mrf.mxu0 }
 0xbe9   : > { %v7293_v36 = vpop.eup %7292  ;;  %v4763_v37 = vmul.f32 %v4699_v16, %v9921_v24  ;;  %v4701_v11 = vmul.f32 %v4637_v38, %v9957_v50  ;;  %v4569_v12 = vmul.f32 0.5, %v9815_v19  ;;  %v4886_v26 = vmul.f32 0.7978846, %v4822_v14 }
 0xbea   : > { %4404 = vmatmul.bf16.gmra.mxu0 %v4158_v10  ;;  %4453 = vmatmul.bf16.gmra.mxu1 %v4158_v10  ;;  %v4764_v62 = vmul.f32 %v4700_v57, %v9931_v31  ;;  %v4638_v63 = vmul.f32 0.044715, %v9991_v29  ;;  %v10018_v41 = vadd.f32 %v4431_v18, %v9655_v52  ;;  %v4759_v16 = vmul.f32 %v4695_v48, %v9936_v27 }
 0xbeb   : > { %4502 = vmatmul.bf16.gmra.mxu2 %v4158_v10  ;;  %4551 = vmatmul.bf16.gmra.mxu3 %v4158_v10  ;;  %v7295_v20 = vpop.eup %7294  ;;  %v10015_v10 = vadd.f32 %v9925_v59, %v9696_v7  ;;  %v4639_v9 = vmul.f32 0.044715, %v9999_v13  ;;  %v4641_v19 = vmul.f32 0.044715, %v10002_v34  ;;  %v5017_v38 = vadd.f32 1.0, %v7293_v36  ;;  %v4434_v59 = vpop.f32.mrf.mxu1 }
 0xbec   : > { %v4760_v57 = vmul.f32 %v4696_v58, %v9944_v40  ;;  %v10025_v14 = vadd.f32 %v4480_v46, %v9677_v51  ;;  %v10028_v8 = vadd.f32 %v4529_v17, %v9696_v7  ;;  %7296 = vtanh.f32 %v4890_v25  ;;  %v4532_v30 = vpop.f32.mrf.mxu3 }
 0xbed   : > { %v4827_v18 = vadd.f32 %v4763_v37, %v9921_v24  ;;  %v10032_v53 = vadd.f32 %v4385_v56, %v9648_v42  ;;  %v5013_v48 = vadd.f32 1.0, %v7295_v20  ;;  %7298 = vtanh.f32 %v4886_v26  ;;  %v4483_v37 = vpop.f32.mrf.mxu2 }
 0xbee   : > { %v4828_v44 = vadd.f32 %v4764_v62, %v9931_v31  ;;  %v4640_v36 = vmul.f32 0.044715, %v10015_v10  ;;  %v4642_v58 = vmul.f32 0.044715, %v10018_v41  ;;  %v4570_v46 = vmul.f32 0.5, %v9868_v35 }
 0xbef   : > { %v4823_v17 = vadd.f32 %v4759_v16, %v9936_v27  ;;  %v4702_v2 = vmul.f32 %v4638_v63, %v9991_v29  ;;  %v10041_v25 = vadd.f32 %v4434_v59, %v9655_v52  ;;  %v10043_v56 = vmul.f32 %v5017_v38, %v4569_v12 }
 0xbf0   : > { %v4824_v20 = vadd.f32 %v4760_v57, %v9944_v40  ;;  %v4703_v26 = vmul.f32 %v4639_v9, %v9999_v13  ;;  %v4643_v62 = vmul.f32 0.044715, %v10025_v14  ;;  %v4644_v49 = vmul.f32 0.044715, %v10028_v8 }
 0xbf1   : > { %v4891_v35 = vmul.f32 0.7978846, %v4827_v18  ;;  %v4705_v16 = vmul.f32 %v4641_v19, %v10002_v34  ;;  %v4645_v63 = vmul.f32 0.044715, %v10032_v53  ;;  %v10051_v3 = vmul.f32 %v5013_v48, %v4565_v1 }
 0xbf2   : > { %v4892_v59 = vmul.f32 0.7978846, %v4828_v44  ;;  %v7297_v0 = vpop.eup %7296  ;;  %v4704_v12 = vmul.f32 %v4640_v36, %v10015_v10  ;;  %v4706_v38 = vmul.f32 %v4642_v58, %v10018_v41  ;;  %v10056_v9 = vmul.f32 0.5, %v9936_v27  ;;  %v4387_v58 = vpop.f32.mrf.mxu0 }
 0xbf3   : > { %v4887_v57 = vmul.f32 0.7978846, %v4823_v17  ;;  %v7299_v15 = vpop.eup %7298  ;;  %v4646_v21 = vmul.f32 0.044715, %v10041_v25  ;;  %v10062_v18 = vmul.f32 0.5, %v9921_v24  ;;  %v4707_v44 = vmul.f32 %v4643_v62, %v10025_v14 }
 0xbf4   : > { %v4888_v1 = vmul.f32 0.7978846, %v4824_v20  ;;  %v4708_v48 = vmul.f32 %v4644_v49, %v10028_v8  ;;  %7300 = vtanh.f32 %v4891_v35  ;;  %v4765_v36 = vmul.f32 %v4701_v11, %v9957_v50 }
 0xbf5   : > { %v10068_v27 = vmul.f32 %v4645_v63, %v10032_v53  ;;  %v5018_v17 = vadd.f32 1.0, %v7297_v0  ;;  %7302 = vtanh.f32 %v4892_v59  ;;  %v4769_v6 = vmul.f32 %v4705_v16, %v10002_v34 }
 0xbf6   : > { %v10072_v19 = vadd.f32 %v4483_v37, %v9677_v51  ;;  %v5014_v24 = vadd.f32 1.0, %v7299_v15  ;;  %7304 = vtanh.f32 %v4887_v57  ;;  %v4766_v20 = vmul.f32 %v4702_v2, %v9991_v29  ;;  %v4436_v2 = vpop.f32.mrf.mxu1 }
 0xbf7   : > { %v10076_v49 = vmul.f32 %v4646_v21, %v10041_v25  ;;  %v10079_v11 = vadd.f32 %v4532_v30, %v9696_v7  ;;  %v10868_v62 = vpack.c.bf16 %v9946_v33, %v9905_v43  ;;  %v10869_v0 = vpack.c.bf16 %v9948_v28, %v9912_v39  ;;  %v4485_v28 = vpop.f32.mrf.mxu2 }
 0xbf8   : > { %7306 = vtanh.f32 %v4888_v1  ;;  %v4770_v15 = vmul.f32 %v4706_v38, %v10018_v41  ;;  %v10089_v37 = vadd.f32 %v4387_v58, %v9648_v42  ;;  %v10870_v21 = vpack.c.bf16 %v9950_v54, %v9974_v45 }
 0xbf9   : > { %v10871_v30 = vpack.c.bf16 %v9959_v22, %v9977_v32  ;;  %v4568_v43 = vmul.f32 0.5, %v9944_v40  ;;  %v4829_v39 = vadd.f32 %v4765_v36, %v9957_v50  ;;  %v4771_v33 = vmul.f32 %v4707_v44, %v10025_v14  ;;  %v4534_v22 = vpop.f32.mrf.mxu3 }
 0xbfa   : > { %5433 = vmatmul.bf16.vlgmr.msra.gmra.mxu0 %v10868_v62  ;;  %5482 = vmatmul.bf16.vlgmr.msra.gmra.mxu1 %v10869_v0  ;;  %v10100_v35 = vmul.f32 %v5018_v17, %v4570_v46  ;;  %v4572_v16 = vmul.f32 0.5, %v9931_v31  ;;  %v4833_v63 = vadd.f32 %v4769_v6, %v10002_v34  ;;  %v4772_v54 = vmul.f32 %v4708_v48, %v10028_v8  ;;  %v7301_v45 = vpop.eup %7300 }
 0xbfb   : > { %5531 = vmatmul.bf16.vlgmr.msra.gmra.mxu2 %v10870_v21  ;;  %5580 = vmatmul.bf16.vlgmr.msra.gmra.mxu3 %v10871_v30  ;;  %v4647_v59 = vmul.f32 0.044715, %v10072_v19  ;;  %v5078_v32 = vmul.f32 %v5014_v24, %v10006_v5  ;;  %v4830_v40 = vadd.f32 %v4766_v20, %v9991_v29  ;;  %v4767_v38 = vmul.f32 %v4703_v26, %v9999_v13  ;;  %v7303_v57 = vpop.eup %7302 }
 0xbfc   : > { %v4648_v46 = vmul.f32 0.044715, %v10079_v11  ;;  %v10111_v1 = vadd.f32 %v4436_v2, %v9655_v52  ;;  %v4834_v6 = vadd.f32 %v4770_v15, %v10018_v41  ;;  %v4768_v31 = vmul.f32 %v4704_v12, %v10015_v10  ;;  %v7305_v44 = vpop.eup %7304 }
 0xbfd   : > { %v4649_v48 = vmul.f32 0.044715, %v10089_v37  ;;  %v10117_v36 = vadd.f32 %v4485_v28, %v9677_v51  ;;  %v4893_v5 = vmul.f32 0.7978846, %v4829_v39  ;;  %v4835_v58 = vadd.f32 %v4771_v33, %v10025_v14 }
 0xbfe   : > { %v7307_v26 = vpop.eup %7306  ;;  %v10121_v17 = vadd.f32 %v4534_v22, %v9696_v7  ;;  %v5138_v24 = vpack.c.bf16 %v10100_v35, %v5078_v32  ;;  %v4897_v20 = vmul.f32 0.7978846, %v4833_v63  ;;  %v4836_v62 = vadd.f32 %v4772_v54, %v10028_v8 }
 0xbff   : > { %v5019_v0 = vadd.f32 1.0, %v7301_v45  ;;  %v5020_v12 = vadd.f32 1.0, %v7303_v57  ;;  %v4894_v15 = vmul.f32 0.7978846, %v4830_v40  ;;  %v4831_v2 = vadd.f32 %v4767_v38, %v9999_v13 }
 0xc00   : > { %v4650_v21 = vmul.f32 0.044715, %v10111_v1  ;;  %v5015_v30 = vadd.f32 1.0, %v7305_v44  ;;  %v4898_v39 = vmul.f32 0.7978846, %v4834_v6  ;;  %v4832_v33 = vadd.f32 %v4768_v31, %v10015_v10 }
 0xc01   : > { %v4651_v28 = vmul.f32 0.044715, %v10117_v36  ;;  %v5016_v22 = vadd.f32 1.0, %v7307_v26  ;;  %7308 = vtanh.f32 %v4893_v5  ;;  %v4899_v61 = vmul.f32 0.7978846, %v4835_v58 }
 0xc02   : > { %v4713_v35 = vmul.f32 %v4649_v48, %v10089_v37  ;;  %v4652_v63 = vmul.f32 0.044715, %v10121_v17  ;;  %7310 = vtanh.f32 %v4897_v20  ;;  %v4900_v54 = vmul.f32 0.7978846, %v4836_v62 }
 0xc03   : > { %v5083_v45 = vmul.f32 %v5019_v0, %v10062_v18  ;;  %v5084_v32 = vmul.f32 %v5020_v12, %v4572_v16  ;;  %7312 = vtanh.f32 %v4894_v15  ;;  %v4895_v40 = vmul.f32 0.7978846, %v4831_v2 }
 0xc04   : > { %v4714_v38 = vmul.f32 %v4650_v21, %v10111_v1  ;;  %v5079_v57 = vmul.f32 %v5015_v30, %v10056_v9  ;;  %7314 = vtanh.f32 %v4898_v39  ;;  %v4896_v6 = vmul.f32 0.7978846, %v4832_v33 }
 0xc05   : > { %v4715_v31 = vmul.f32 %v4651_v28, %v10117_v36  ;;  %v5080_v44 = vmul.f32 %v5016_v22, %v4568_v43  ;;  %7316 = vtanh.f32 %v4899_v61  ;;  %v4773_v48 = vmul.f32 %v10068_v27, %v10032_v53 }
 0xc06   : > { %v4711_v5 = vmul.f32 %v4647_v59, %v10072_v19  ;;  %v4716_v18 = vmul.f32 %v4652_v63, %v10121_v17  ;;  %7318 = vtanh.f32 %v4900_v54  ;;  %v4777_v16 = vmul.f32 %v4713_v35, %v10089_v37 }
 0xc07   : > { %v7309_v58 = vpop.eup %7308  ;;  %v5139_v26 = vpack.c.bf16 %v5083_v45, %v5079_v57  ;;  %v5140_v20 = vpack.c.bf16 %v5084_v32, %v5080_v44  ;;  %7320 = vtanh.f32 %v4895_v40  ;;  %v4774_v9 = vmul.f32 %v10076_v49, %v10041_v25 }
 0xc08   : > { %v7311_v62 = vpop.eup %7310  ;;  %v4712_v61 = vmul.f32 %v4648_v46, %v10079_v11  ;;  %v10872_v27 = vpack.c.bf16 %v10043_v56, %v10051_v3  ;;  %7322 = vtanh.f32 %v4896_v6  ;;  %v4778_v43 = vmul.f32 %v4714_v38, %v10111_v1 }
 0xc09   : > { %v7313_v59 = vpop.eup %7312  ;;  %v4837_v0 = vadd.f32 %v4773_v48, %v10032_v53  ;;  %v4779_v12 = vmul.f32 %v4715_v31, %v10117_v36  ;;  %v4573_v49 = vmul.f32 0.5, %v9957_v50  ;;  %v4577_v46 = vmul.f32 0.5, %v10002_v34 }
 0xc0a   : > { %5438 = vmatmul.bf16.gmra.mxu0 %v10872_v27  ;;  %5487 = vmatmul.bf16.gmra.mxu1 %v5138_v24  ;;  %v7315_v15 = vpop.eup %7314  ;;  %v4841_v2 = vadd.f32 %v4777_v16, %v10089_v37  ;;  %v4780_v3 = vmul.f32 %v4716_v18, %v10121_v17  ;;  %v4574_v24 = vmul.f32 0.5, %v9991_v29  ;;  %v4578_v21 = vmul.f32 0.5, %v10018_v41 }
 0xc0b   : > { %5536 = vmatmul.bf16.gmra.mxu2 %v5139_v26  ;;  %5585 = vmatmul.bf16.gmra.mxu3 %v5140_v20  ;;  %v7317_v56 = vpop.eup %7316  ;;  %v4838_v30 = vadd.f32 %v4774_v9, %v10041_v25  ;;  %v4775_v39 = vmul.f32 %v4711_v5, %v10072_v19  ;;  %v4575_v28 = vmul.f32 0.5, %v9999_v13  ;;  %v4579_v50 = vmul.f32 0.5, %v10025_v14 }
 0xc0c   : > { %v7319_v33 = vpop.eup %7318  ;;  %v4842_v34 = vadd.f32 %v4778_v43, %v10111_v1  ;;  %v4776_v22 = vmul.f32 %v4712_v61, %v10079_v11  ;;  %v4576_v63 = vmul.f32 0.5, %v10015_v10  ;;  %v4580_v29 = vmul.f32 0.5, %v10028_v8 }
 0xc0d   : > { %v7321_v35 = vpop.eup %7320  ;;  %v4901_v54 = vmul.f32 0.7978846, %v4837_v0  ;;  %v4843_v41 = vadd.f32 %v4779_v12, %v10117_v36  ;;  %v5025_v32 = vadd.f32 1.0, %v7311_v62  ;;  %v5026_v40 = vadd.f32 1.0, %v7315_v15 }
 0xc0e   : > { %v7323_v45 = vpop.eup %7322  ;;  %v4905_v38 = vmul.f32 0.7978846, %v4841_v2  ;;  %v4844_v13 = vadd.f32 %v4780_v3, %v10121_v17  ;;  %v5027_v57 = vadd.f32 1.0, %v7317_v56  ;;  %v5028_v14 = vadd.f32 1.0, %v7319_v33 }
 0xc0f   : > { %v4902_v6 = vmul.f32 0.7978846, %v4838_v30  ;;  %v4839_v31 = vadd.f32 %v4775_v39, %v10072_v19  ;;  %v5021_v44 = vadd.f32 1.0, %v7309_v58  ;;  %v5022_v48 = vadd.f32 1.0, %v7313_v59 }
 0xc10   : > { %v4906_v5 = vmul.f32 0.7978846, %v4842_v34  ;;  %v4840_v10 = vadd.f32 %v4776_v22, %v10079_v11  ;;  %v5023_v8 = vadd.f32 1.0, %v7321_v35  ;;  %v5024_v18 = vadd.f32 1.0, %v7323_v45 }
 0xc11   : > { %7324 = vtanh.f32 %v4901_v54  ;;  %v4907_v16 = vmul.f32 0.7978846, %v4843_v41  ;;  %v5089_v26 = vmul.f32 %v5025_v32, %v4577_v46  ;;  %v5090_v20 = vmul.f32 %v5026_v40, %v4578_v21 }
 0xc12   : > { %7326 = vtanh.f32 %v4905_v38  ;;  %v4908_v9 = vmul.f32 0.7978846, %v4844_v13  ;;  %v5091_v62 = vmul.f32 %v5027_v57, %v4579_v50  ;;  %v5092_v61 = vmul.f32 %v5028_v14, %v4580_v29 }
 0xc13   : > { %7328 = vtanh.f32 %v4902_v6  ;;  %v4903_v27 = vmul.f32 0.7978846, %v4839_v31  ;;  %v5085_v43 = vmul.f32 %v5021_v44, %v4573_v49  ;;  %v5086_v0 = vmul.f32 %v5022_v48, %v4574_v24 }
 0xc14   : > { %7330 = vtanh.f32 %v4906_v5  ;;  %v4904_v58 = vmul.f32 0.7978846, %v4840_v10  ;;  %v5087_v59 = vmul.f32 %v5023_v8, %v4575_v28  ;;  %v5088_v12 = vmul.f32 %v5024_v18, %v4576_v63 }
 0xc15   : > { %7332 = vtanh.f32 %v4907_v16  ;;  %v5141_v15 = vpack.c.bf16 %v5089_v26, %v5085_v43  ;;  %v5142_v2 = vpack.c.bf16 %v5090_v20, %v5086_v0  ;;  %v4585_v63 = vmul.f32 0.5, %v10089_v37 }
 0xc16   : > { %7334 = vtanh.f32 %v4908_v9  ;;  %v5143_v56 = vpack.c.bf16 %v5091_v62, %v5087_v59  ;;  %v5144_v46 = vpack.c.bf16 %v5092_v61, %v5088_v12  ;;  %v4586_v54 = vmul.f32 0.5, %v10111_v1 }
 0xc17   : > { %v7325_v3 = vpop.eup %7324  ;;  %7336 = vtanh.f32 %v4903_v27  ;;  %v4587_v45 = vmul.f32 0.5, %v10117_v36  ;;  %v4588_v40 = vmul.f32 0.5, %v10121_v17  ;;  %v4581_v13 = vmul.f32 0.5, %v10032_v53 }
 0xc18   : > { %v7327_v21 = vpop.eup %7326  ;;  %7338 = vtanh.f32 %v4904_v58  ;;  %v5029_v29 = vadd.f32 1.0, %v7325_v3  ;;  %v4582_v14 = vmul.f32 0.5, %v10041_v25  ;;  %v4583_v31 = vmul.f32 0.5, %v10072_v19 }
 0xc19   : > { %v7329_v30 = vpop.eup %7328  ;;  %v5033_v50 = vadd.f32 1.0, %v7327_v21  ;;  %v4584_v37 = vmul.f32 0.5, %v10079_v11 }
 0xc1a   : > { %5443 = vmatmul.bf16.gmra.mxu0 %v5141_v15  ;;  %5492 = vmatmul.bf16.gmra.mxu1 %v5142_v2  ;;  %v7331_v49 = vpop.eup %7330  ;;  %v5030_v41 = vadd.f32 1.0, %v7329_v30  ;;  %v5093_v1 = vmul.f32 %v5029_v29, %v4581_v13 }
 0xc1b   : > { %5541 = vmatmul.bf16.gmra.mxu2 %v5143_v56  ;;  %5590 = vmatmul.bf16.gmra.mxu3 %v5144_v46  ;;  %v7333_v24 = vpop.eup %7332  ;;  %v5034_v34 = vadd.f32 1.0, %v7331_v49  ;;  %v5097_v57 = vmul.f32 %v5033_v50, %v4585_v63 }
 0xc1c   : > { %v7335_v39 = vpop.eup %7334  ;;  %v5035_v22 = vadd.f32 1.0, %v7333_v24  ;;  %v5094_v5 = vmul.f32 %v5030_v41, %v4582_v14 }
 0xc1d   : > { %v7337_v33 = vpop.eup %7336  ;;  %v5036_v35 = vadd.f32 1.0, %v7335_v39  ;;  %v5098_v6 = vmul.f32 %v5034_v34, %v4586_v54  ;;  %v5145_v8 = vpack.c.bf16 %v5097_v57, %v5093_v1 }
 0xc1e   : > { %v7339_v28 = vpop.eup %7338  ;;  %v5031_v32 = vadd.f32 1.0, %v7337_v33  ;;  %v5099_v44 = vmul.f32 %v5035_v22, %v4587_v45 }
 0xc1f   : > { %v5032_v38 = vadd.f32 1.0, %v7339_v28  ;;  %v5100_v48 = vmul.f32 %v5036_v35, %v4588_v40  ;;  %v5146_v18 = vpack.c.bf16 %v5098_v6, %v5094_v5 }
 0xc20   : > { %v5095_v10 = vmul.f32 %v5031_v32, %v4583_v31 }
 0xc21   : > { %v5096_v36 = vmul.f32 %v5032_v38, %v4584_v37 }
 0xc22   : > { %v5147_v17 = vpack.c.bf16 %v5099_v44, %v5095_v10 }
 0xc23   : > { %v5148_v16 = vpack.c.bf16 %v5100_v48, %v5096_v36 }
 0xc2a   : > { %5448 = vmatmul.bf16.gmra.mxu0 %v5145_v8  ;;  %5497 = vmatmul.bf16.gmra.mxu1 %v5146_v18 }
 0xc2b   : > { %5546 = vmatmul.bf16.gmra.mxu2 %v5147_v17  ;;  %5595 = vmatmul.bf16.gmra.mxu3 %v5148_v16 }
 0xc37   : > { %v4390_v53 = vpop.f32.mrf.mxu0  ;;  %v4439_v25 = vpop.f32.mrf.mxu1 }
 0xc38   : > { %v4391_v19 = vadd.f32 %v4390_v53, %v9648_v42  ;;  %v4440_v26 = vadd.f32 %v4439_v25, %v9655_v52 }
 0xc3a   : > { %v4653_v11 = vmul.f32 0.044715, %v4391_v19  ;;  %v4654_v20 = vmul.f32 0.044715, %v4440_v26  ;;  %v4589_v57 = vmul.f32 0.5, %v4391_v19  ;;  %v4590_v10 = vmul.f32 0.5, %v4440_v26 }
 0xc3c   : > { %v4717_v9 = vmul.f32 %v4653_v11, %v4391_v19  ;;  %v4718_v62 = vmul.f32 %v4654_v20, %v4440_v26 }
 0xc3e   : > { %v4488_v61 = vpop.f32.mrf.mxu2  ;;  %v4537_v27 = vpop.f32.mrf.mxu3  ;;  %v4781_v43 = vmul.f32 %v4717_v9, %v4391_v19  ;;  %v4782_v0 = vmul.f32 %v4718_v62, %v4440_v26 }
 0xc3f   : > { %v4489_v58 = vadd.f32 %v4488_v61, %v9677_v51  ;;  %v4538_v59 = vadd.f32 %v4537_v27, %v9696_v7  ;;  %v4392_v12 = vpop.f32.mrf.mxu0  ;;  %v4441_v15 = vpop.f32.mrf.mxu1 }
 0xc40   : > { %v4393_v2 = vadd.f32 %v4392_v12, %v9648_v42  ;;  %v4442_v3 = vadd.f32 %v4441_v15, %v9655_v52  ;;  %v4845_v56 = vadd.f32 %v4781_v43, %v4391_v19  ;;  %v4846_v46 = vadd.f32 %v4782_v0, %v4440_v26 }
 0xc41   : > { %v4655_v21 = vmul.f32 0.044715, %v4489_v58  ;;  %v4656_v30 = vmul.f32 0.044715, %v4538_v59  ;;  %v10187_v25 = vmul.f32 0.5, %v4489_v58  ;;  %v10190_v27 = vmul.f32 0.5, %v4538_v59 }
 0xc42   : > { %v4657_v49 = vmul.f32 0.044715, %v4393_v2  ;;  %v4658_v24 = vmul.f32 0.044715, %v4442_v3  ;;  %v4909_v28 = vmul.f32 0.7978846, %v4845_v56 }
 0xc43   : > { %v4719_v39 = vmul.f32 %v4655_v21, %v4489_v58  ;;  %v4720_v33 = vmul.f32 %v4656_v30, %v4538_v59  ;;  %v4910_v50 = vmul.f32 0.7978846, %v4846_v46  ;;  %v4593_v61 = vmul.f32 0.5, %v4393_v2 }
 0xc44   : > { %v4721_v34 = vmul.f32 %v4657_v49, %v4393_v2  ;;  %v4722_v22 = vmul.f32 %v4658_v24, %v4442_v3  ;;  %7340 = vtanh.f32 %v4909_v28  ;;  %v4594_v26 = vmul.f32 0.5, %v4442_v3 }
 0xc45   : > { %v4783_v35 = vmul.f32 %v4719_v39, %v4489_v58  ;;  %7342 = vtanh.f32 %v4910_v50  ;;  %v4784_v45 = vmul.f32 %v4720_v33, %v4538_v59 }
 0xc46   : > { %v4490_v63 = vpop.f32.mrf.mxu2  ;;  %v4539_v29 = vpop.f32.mrf.mxu3  ;;  %v4785_v54 = vmul.f32 %v4721_v34, %v4393_v2  ;;  %v4786_v41 = vmul.f32 %v4722_v22, %v4442_v3 }
 0xc47   : > { %v4491_v32 = vadd.f32 %v4490_v63, %v9677_v51  ;;  %v4540_v40 = vadd.f32 %v4539_v29, %v9696_v7  ;;  %v4395_v38 = vpop.f32.mrf.mxu0  ;;  %v4444_v13 = vpop.f32.mrf.mxu1  ;;  %v4847_v31 = vadd.f32 %v4783_v35, %v4489_v58  ;;  %v4848_v8 = vadd.f32 %v4784_v45, %v4538_v59 }
 0xc48   : > { %v4849_v14 = vadd.f32 %v4785_v54, %v4393_v2  ;;  %v4850_v6 = vadd.f32 %v4786_v41, %v4442_v3  ;;  %v4396_v48 = vadd.f32 %v4395_v38, %v9648_v42  ;;  %v10185_v1 = vadd.f32 %v4444_v13, %v9655_v52 }
 0xc49   : > { %v4659_v44 = vmul.f32 0.044715, %v4491_v32  ;;  %v4660_v37 = vmul.f32 0.044715, %v4540_v40  ;;  %v4911_v9 = vmul.f32 0.7978846, %v4847_v31 }
 0xc4a   : > { %v4913_v5 = vmul.f32 0.7978846, %v4849_v14  ;;  %v4914_v36 = vmul.f32 0.7978846, %v4850_v6  ;;  %v7341_v18 = vpop.eup %7340  ;;  %v4661_v53 = vmul.f32 0.044715, %v4396_v48 }
 0xc4b   : > { %v4723_v17 = vmul.f32 %v4659_v44, %v4491_v32  ;;  %v4724_v16 = vmul.f32 %v4660_v37, %v4540_v40  ;;  %v7343_v19 = vpop.eup %7342  ;;  %v4662_v11 = vmul.f32 0.044715, %v10185_v1  ;;  %v5037_v20 = vadd.f32 1.0, %v7341_v18 }
 0xc4c   : > { %7344 = vtanh.f32 %v4913_v5  ;;  %v4725_v62 = vmul.f32 %v4661_v53, %v4396_v48  ;;  %v4912_v12 = vmul.f32 0.7978846, %v4848_v8  ;;  %v5038_v46 = vadd.f32 1.0, %v7343_v19 }
 0xc4d   : > { %7346 = vtanh.f32 %v4914_v36  ;;  %v4787_v43 = vmul.f32 %v4723_v17, %v4491_v32  ;;  %v4788_v0 = vmul.f32 %v4724_v16, %v4540_v40  ;;  %v10192_v58 = vmul.f32 0.5, %v4491_v32 }
 0xc4e   : > { %v4493_v15 = vpop.f32.mrf.mxu2  ;;  %v4542_v56 = vpop.f32.mrf.mxu3  ;;  %7348 = vtanh.f32 %v4911_v9  ;;  %v4789_v21 = vmul.f32 %v4725_v62, %v4396_v48  ;;  %v4726_v30 = vmul.f32 %v4662_v11, %v10185_v1  ;;  %v5101_v39 = vmul.f32 %v5037_v20, %v4589_v57 }
 0xc4f   : > { %v4397_v49 = vpop.f32.mrf.mxu0  ;;  %v4446_v24 = vpop.f32.mrf.mxu1  ;;  %v4851_v2 = vadd.f32 %v4787_v43, %v4491_v32  ;;  %v10195_v33 = vmul.f32 0.5, %v4540_v40  ;;  %v10198_v59 = vadd.f32 %v4493_v15, %v9677_v51  ;;  %v10201_v3 = vadd.f32 %v4542_v56, %v9696_v7 }
 0xc50   : > { %v4398_v28 = vadd.f32 %v4397_v49, %v9648_v42  ;;  %v4447_v50 = vadd.f32 %v4446_v24, %v9655_v52  ;;  %v4852_v35 = vadd.f32 %v4788_v0, %v4540_v40  ;;  %7350 = vtanh.f32 %v4912_v12 }
 0xc51   : > { %v4915_v22 = vmul.f32 0.7978846, %v4851_v2  ;;  %v4853_v63 = vadd.f32 %v4789_v21, %v4396_v48  ;;  %v5102_v32 = vmul.f32 %v5038_v46, %v4590_v10  ;;  %v10205_v13 = vmul.f32 0.5, %v4396_v48 }
 0xc52   : > { %v7345_v34 = vpop.eup %7344  ;;  %v4665_v54 = vmul.f32 0.044715, %v4398_v28  ;;  %v4666_v41 = vmul.f32 0.044715, %v4447_v50  ;;  %v10208_v57 = vmul.f32 0.5, %v10185_v1  ;;  %v10212_v16 = vmul.f32 0.5, %v4398_v28 }
 0xc53   : > { %v7347_v29 = vpop.eup %7346  ;;  %v5041_v45 = vadd.f32 1.0, %v7345_v34  ;;  %7352 = vtanh.f32 %v4915_v22  ;;  %v4663_v6 = vmul.f32 0.044715, %v10198_v59  ;;  %v4664_v31 = vmul.f32 0.044715, %v10201_v3 }
 0xc54   : > { %v5042_v38 = vadd.f32 1.0, %v7347_v29  ;;  %v7349_v14 = vpop.eup %7348  ;;  %v4729_v40 = vmul.f32 %v4665_v54, %v4398_v28  ;;  %v4730_v37 = vmul.f32 %v4666_v41, %v4447_v50  ;;  %v4916_v36 = vmul.f32 0.7978846, %v4852_v35 }
 0xc55   : > { %v5105_v44 = vmul.f32 %v5041_v45, %v4593_v61  ;;  %v4917_v8 = vmul.f32 0.7978846, %v4853_v63  ;;  %v4790_v53 = vmul.f32 %v4726_v30, %v10185_v1  ;;  %v5039_v61 = vadd.f32 1.0, %v7349_v14 }
 0xc56   : > { %v5106_v5 = vmul.f32 %v5042_v38, %v4594_v26  ;;  %v4495_v18 = vpop.f32.mrf.mxu2  ;;  %v4544_v10 = vpop.f32.mrf.mxu3  ;;  %v4793_v48 = vmul.f32 %v4729_v40, %v4398_v28  ;;  %7354 = vtanh.f32 %v4916_v36  ;;  %v4727_v26 = vmul.f32 %v4663_v6, %v10198_v59 }
 0xc57   : > { %v5149_v17 = vpack.c.bf16 %v5105_v44, %v5101_v39  ;;  %v7351_v19 = vpop.eup %7350  ;;  %v10216_v11 = vadd.f32 %v4495_v18, %v9677_v51  ;;  %v4400_v20 = vpop.f32.mrf.mxu0  ;;  %v10220_v43 = vadd.f32 %v4544_v10, %v9696_v7  ;;  %7356 = vtanh.f32 %v4917_v8 }
 0xc58   : > { %v4449_v9 = vpop.f32.mrf.mxu1  ;;  %v5150_v62 = vpack.c.bf16 %v5106_v5, %v5102_v32  ;;  %v10223_v0 = vadd.f32 %v4400_v20, %v9648_v42  ;;  %v4857_v12 = vadd.f32 %v4793_v48, %v4398_v28  ;;  %v4794_v21 = vmul.f32 %v4730_v37, %v4447_v50 }
 0xc59   : > { %5453 = vmatmul.bf16.gmra.mxu0 %v5149_v17  ;;  %v7353_v15 = vpop.eup %7352  ;;  %v4667_v56 = vmul.f32 0.044715, %v10216_v11  ;;  %v10227_v46 = vadd.f32 %v4449_v9, %v9655_v52  ;;  %v4728_v30 = vmul.f32 %v4664_v31, %v10201_v3  ;;  %v5040_v24 = vadd.f32 1.0, %v7351_v19 }
 0xc5a   : > { %5502 = vmatmul.bf16.gmra.mxu1 %v5150_v62  ;;  %v5043_v49 = vadd.f32 1.0, %v7353_v15  ;;  %v4854_v39 = vadd.f32 %v4790_v53, %v10185_v1  ;;  %v5103_v34 = vmul.f32 %v5039_v61, %v10187_v25  ;;  %v4921_v28 = vmul.f32 0.7978846, %v4857_v12 }
 0xc5b   : > { %v4731_v2 = vmul.f32 %v4667_v56, %v10216_v11  ;;  %v4858_v22 = vadd.f32 %v4794_v21, %v4447_v50  ;;  %v4668_v35 = vmul.f32 0.044715, %v10220_v43  ;;  %v10235_v29 = vmul.f32 0.5, %v4447_v50 }
 0xc5c   : > { %v5107_v63 = vmul.f32 %v5043_v49, %v10192_v58  ;;  %v4918_v54 = vmul.f32 0.7978846, %v4854_v39  ;;  %v7355_v41 = vpop.eup %7354  ;;  %v4669_v45 = vmul.f32 0.044715, %v10223_v0  ;;  %v4670_v32 = vmul.f32 0.044715, %v10227_v46 }
 0xc5d   : > { %7358 = vtanh.f32 %v4921_v28  ;;  %v4922_v1 = vmul.f32 0.7978846, %v4858_v22  ;;  %v5044_v25 = vadd.f32 1.0, %v7355_v41  ;;  %v4791_v31 = vmul.f32 %v4727_v26, %v10198_v59  ;;  %v7357_v40 = vpop.eup %7356 }
 0xc5e   : > { %v4498_v38 = vpop.f32.mrf.mxu2  ;;  %v4547_v14 = vpop.f32.mrf.mxu3  ;;  %v5151_v6 = vpack.c.bf16 %v5107_v63, %v5103_v34  ;;  %7360 = vtanh.f32 %v4918_v54  ;;  %v4795_v5 = vmul.f32 %v4731_v2, %v10216_v11  ;;  %v5104_v18 = vmul.f32 %v5040_v24, %v10190_v27 }
 0xc5f   : > { %v10241_v58 = vadd.f32 %v4498_v38, %v9677_v51  ;;  %v10244_v50 = vadd.f32 %v4547_v14, %v9696_v7  ;;  %v4402_v44 = vpop.f32.mrf.mxu0  ;;  %7362 = vtanh.f32 %v4922_v1  ;;  %v5108_v10 = vmul.f32 %v5044_v25, %v10195_v33 }
 0xc60   : > { %v4451_v37 = vpop.f32.mrf.mxu1  ;;  %v10248_v36 = vadd.f32 %v4402_v44, %v9648_v42  ;;  %5551 = vmatmul.bf16.gmra.mxu2 %v5151_v6  ;;  %v4732_v17 = vmul.f32 %v4668_v35, %v10220_v43  ;;  %v5045_v48 = vadd.f32 1.0, %v7357_v40  ;;  %v4855_v53 = vadd.f32 %v4791_v31, %v10198_v59 }
 0xc61   : > { %v10251_v8 = vadd.f32 %v4451_v37, %v9655_v52  ;;  %v4859_v19 = vadd.f32 %v4795_v5, %v10216_v11  ;;  %v4733_v20 = vmul.f32 %v4669_v45, %v10223_v0  ;;  %v4671_v9 = vmul.f32 0.044715, %v10241_v58 }
 0xc62   : > { %v5152_v62 = vpack.c.bf16 %v5108_v10, %v5104_v18  ;;  %v10261_v61 = vmul.f32 0.5, %v10198_v59  ;;  %v4734_v27 = vmul.f32 %v4670_v32, %v10227_v46  ;;  %v4672_v33 = vmul.f32 0.044715, %v10244_v50 }
 0xc63   : > { %v7359_v26 = vpop.eup %7358  ;;  %v4919_v12 = vmul.f32 0.7978846, %v4855_v53  ;;  %v4923_v15 = vmul.f32 0.7978846, %v4859_v19  ;;  %v4673_v21 = vmul.f32 0.044715, %v10248_v36  ;;  %v5109_v59 = vmul.f32 %v5045_v48, %v10205_v13 }
 0xc64   : > { %v7361_v56 = vpop.eup %7360  ;;  %v4674_v49 = vmul.f32 0.044715, %v10251_v8  ;;  %5600 = vmatmul.bf16.gmra.mxu3 %v5152_v62  ;;  %v5049_v24 = vadd.f32 1.0, %v7359_v26  ;;  %v4603_v39 = vmul.f32 0.5, %v10216_v11  ;;  %v4792_v28 = vmul.f32 %v4728_v30, %v10201_v3 }
 0xc65   : > { %v7363_v2 = vpop.eup %7362  ;;  %v5046_v34 = vadd.f32 1.0, %v7361_v56  ;;  %7364 = vtanh.f32 %v4919_v12  ;;  %v4796_v41 = vmul.f32 %v4732_v17, %v10220_v43  ;;  %v10288_v25 = vmul.f32 %v4671_v9, %v10241_v58 }
 0xc66   : > { %v4500_v22 = vpop.f32.mrf.mxu2  ;;  %v4549_v35 = vpop.f32.mrf.mxu3  ;;  %v5113_v63 = vmul.f32 %v5049_v24, %v10212_v16  ;;  %v5050_v54 = vadd.f32 1.0, %v7363_v2  ;;  %7366 = vtanh.f32 %v4923_v15  ;;  %v4856_v30 = vadd.f32 %v4792_v28, %v10201_v3 }
 0xc67   : > { %v10273_v45 = vadd.f32 %v4500_v22, %v9677_v51  ;;  %v10276_v11 = vadd.f32 %v4549_v35, %v9696_v7  ;;  %v4405_v32 = vpop.f32.mrf.mxu0  ;;  %v5110_v1 = vmul.f32 %v5046_v34, %v10208_v57  ;;  %v4737_v31 = vmul.f32 %v4673_v21, %v10248_v36 }
 0xc68   : > { %v4454_v13 = vpop.f32.mrf.mxu1  ;;  %v10281_v38 = vadd.f32 %v4405_v32, %v9648_v42  ;;  %v5153_v14 = vpack.c.bf16 %v5113_v63, %v5109_v59  ;;  %v5114_v6 = vmul.f32 %v5050_v54, %v10235_v29  ;;  %v4860_v40 = vadd.f32 %v4796_v41, %v10220_v43 }
 0xc69   : > { %v10284_v16 = vadd.f32 %v4454_v13, %v9655_v52  ;;  %v4920_v44 = vmul.f32 0.7978846, %v4856_v30  ;;  %v10293_v57 = vmul.f32 %v4672_v33, %v10244_v50  ;;  %v4675_v37 = vmul.f32 0.044715, %v10273_v45 }
 0xc6a   : > { %v4676_v5 = vmul.f32 0.044715, %v10276_v11  ;;  %5458 = vmatmul.bf16.gmra.mxu0 %v5153_v14  ;;  %v5154_v18 = vpack.c.bf16 %v5114_v6, %v5110_v1  ;;  %v4738_v29 = vmul.f32 %v4674_v49, %v10251_v8  ;;  %v4600_v17 = vmul.f32 0.5, %v10201_v3 }
 0xc6b   : > { %v7365_v10 = vpop.eup %7364  ;;  %v4924_v48 = vmul.f32 0.7978846, %v4860_v40  ;;  %7368 = vtanh.f32 %v4920_v44  ;;  %v4677_v19 = vmul.f32 0.044715, %v10281_v38  ;;  %v4678_v9 = vmul.f32 0.044715, %v10284_v16 }
 0xc6c   : > { %v7367_v53 = vpop.eup %7366  ;;  %5507 = vmatmul.bf16.gmra.mxu1 %v5154_v18  ;;  %v5047_v62 = vadd.f32 1.0, %v7365_v10  ;;  %v4604_v26 = vmul.f32 0.5, %v10220_v43  ;;  %v4797_v12 = vmul.f32 %v4733_v20, %v10223_v0  ;;  %v4801_v15 = vmul.f32 %v4737_v31, %v10248_v36  ;;  %v10349_v18 = vld [vmem:[%s10761_s10] ss:$0 sm:$0xff] }
 0xc6d   : > { %v5051_v33 = vadd.f32 1.0, %v7367_v53  ;;  %7370 = vtanh.f32 %v4924_v48  ;;  %v4739_v56 = vmul.f32 %v4675_v37, %v10273_v45  ;;  %v10306_v3 = vmul.f32 %v4676_v5, %v10276_v11 }
 0xc6e   : > { %v4503_v21 = vpop.f32.mrf.mxu2  ;;  %v4552_v49 = vpop.f32.mrf.mxu3  ;;  %v10309_v24 = vmul.f32 0.5, %v10223_v0  ;;  %v4798_v2 = vmul.f32 %v4734_v27, %v10227_v46  ;;  %v5111_v20 = vmul.f32 %v5047_v62, %v10261_v61  ;;  %v4861_v22 = vadd.f32 %v4797_v12, %v10223_v0 }
 0xc6f   : > { %v10313_v43 = vadd.f32 %v4503_v21, %v9677_v51  ;;  %v4407_v59 = vpop.f32.mrf.mxu0  ;;  %v5115_v28 = vmul.f32 %v5051_v33, %v4603_v39  ;;  %v10318_v35 = vmul.f32 %v4677_v19, %v10281_v38  ;;  %v10321_v63 = vadd.f32 %v4552_v49, %v9696_v7 }
 0xc70   : > { %v4456_v34 = vpop.f32.mrf.mxu1  ;;  %v10324_v54 = vadd.f32 %v4407_v59, %v9648_v42  ;;  %v4865_v27 = vadd.f32 %v4801_v15, %v10248_v36  ;;  %v4925_v61 = vmul.f32 0.7978846, %v4861_v22  ;;  %v4802_v39 = vmul.f32 %v4738_v29, %v10251_v8 }
 0xc71   : > { %v7369_v41 = vpop.eup %7368  ;;  %v10328_v32 = vadd.f32 %v4456_v34, %v9655_v52  ;;  %v5155_v13 = vpack.c.bf16 %v5115_v28, %v5111_v20  ;;  %v10332_v0 = vmul.f32 %v4678_v9, %v10284_v16  ;;  %v4609_v30 = vmul.f32 0.5, %v10248_v36 }
 0xc72   : > { %v5048_v1 = vadd.f32 1.0, %v7369_v41  ;;  %v4862_v14 = vadd.f32 %v4798_v2, %v10227_v46  ;;  %v4679_v6 = vmul.f32 0.044715, %v10313_v43  ;;  %v4929_v31 = vmul.f32 0.7978846, %v4865_v27 }
 0xc73   : > { %v7371_v42 = vpop.eup %7370  ;;  %5556 = vmatmul.bf16.gmra.mxu2 %v5155_v13  ;;  %7372 = vtanh.f32 %v4925_v61  ;;  %v10338_v52 = vmul.f32 0.5, %v10227_v46  ;;  %v4680_v40 = vmul.f32 0.044715, %v10321_v63  ;;  %v4681_v44 = vmul.f32 0.044715, %v10324_v54 }
 0xc74   : > { %v5052_v37 = vadd.f32 1.0, %v7371_v42  ;;  %v10343_v5 = vmul.f32 0.5, %v10251_v8  ;;  %v4682_v36 = vmul.f32 0.044715, %v10328_v32  ;;  %7374 = vtanh.f32 %v4929_v31 }
 0xc75   : > { %v4866_v10 = vadd.f32 %v4802_v39, %v10251_v8  ;;  %v4926_v46 = vmul.f32 0.7978846, %v4862_v14  ;;  %v5112_v29 = vmul.f32 %v5048_v1, %v4600_v17  ;;  %v4799_v9 = vmul.f32 %v10288_v25, %v10241_v58 }
 0xc76   : > { %v5116_v48 = vmul.f32 %v5052_v37, %v4604_v26  ;;  %v4505_v53 = vpop.f32.mrf.mxu2  ;;  %v4554_v19 = vpop.f32.mrf.mxu3  ;;  %v4803_v62 = vmul.f32 %v4739_v56, %v10273_v45  ;;  %v10356_v33 = vmul.f32 %v4679_v6, %v10313_v43  ;;  %v10367_v56 = vmul.f32 %v4680_v40, %v10321_v63 }
 0xc77   : > { %v10359_v12 = vadd.f32 %v4505_v53, %v9677_v51  ;;  %v5434_v15 = vpop.f32.mrf.mxu0  ;;  %v4930_v49 = vmul.f32 0.7978846, %v4866_v10  ;;  %7376 = vtanh.f32 %v4926_v46  ;;  %v10362_v17 = vadd.f32 %v4554_v19, %v9696_v7 }
 0xc78   : > { %v5483_v21 = vpop.f32.mrf.mxu1  ;;  %v5156_v8 = vpack.c.bf16 %v5116_v48, %v5112_v29  ;;  %v4863_v26 = vadd.f32 %v4799_v9, %v10241_v58  ;;  %v4867_v25 = vadd.f32 %v4803_v62, %v10273_v45  ;;  %v4745_v59 = vmul.f32 %v4681_v44, %v10324_v54 }
 0xc79   : > { %v7373_v2 = vpop.eup %7372  ;;  %v5435_v51 = vadd.f32 %v10349_v18, %v5434_v15  ;;  %7378 = vtanh.f32 %v4930_v49  ;;  %v4746_v34 = vmul.f32 %v4682_v36, %v10328_v32  ;;  %v4683_v27 = vmul.f32 0.044715, %v10359_v12 }
 0xc7a   : > { %5605 = vmatmul.bf16.gmra.mxu3 %v5156_v8  ;;  %v5053_v20 = vadd.f32 1.0, %v7373_v2  ;;  %v4927_v28 = vmul.f32 0.7978846, %v4863_v26  ;;  %v4931_v7 = vmul.f32 0.7978846, %v4867_v25  ;;  %v7375_v22 = vpop.eup %7374  ;;  %v4607_v41 = vmul.f32 0.5, %v10241_v58 }
 0xc7b   : > { %v4611_v13 = vmul.f32 0.5, %v10273_v45  ;;  %v4800_v61 = vmul.f32 %v10293_v57, %v10244_v50  ;;  %v4684_v39 = vmul.f32 0.044715, %v10362_v17  ;;  %v5057_v1 = vadd.f32 1.0, %v7375_v22 }
 0xc7c   : > { %7380 = vtanh.f32 %v4927_v28  ;;  %v4804_v14 = vmul.f32 %v10306_v3, %v10276_v11  ;;  %v5484_v6 = vadd.f32 %v5483_v21, %v5435_v51  ;;  %v5117_v31 = vmul.f32 %v5053_v20, %v10309_v24 }
 0xc7d   : > { %v7377_v42 = vpop.eup %7376  ;;  %7382 = vtanh.f32 %v4931_v7  ;;  %v4864_v40 = vadd.f32 %v4800_v61, %v10244_v50  ;;  %v5121_v58 = vmul.f32 %v5057_v1, %v4609_v30  ;;  %v4805_v36 = vmul.f32 %v10318_v35, %v10281_v38 }
 0xc7e   : > { %v5054_v44 = vadd.f32 1.0, %v7377_v42  ;;  %v5532_v45 = vpop.f32.mrf.mxu2  ;;  %v5581_v37 = vpop.f32.mrf.mxu3  ;;  %v4868_v57 = vadd.f32 %v4804_v14, %v10276_v11  ;;  %v10386_v48 = vmul.f32 0.5, %v10244_v50  ;;  %v4809_v53 = vmul.f32 %v4745_v59, %v10324_v54 }
 0xc7f   : > { %v7379_v10 = vpop.eup %7378  ;;  %v5533_v46 = vadd.f32 %v5532_v45, %v5484_v6  ;;  %v5436_v29 = vpop.f32.mrf.mxu0  ;;  %v4928_v24 = vmul.f32 0.7978846, %v4864_v40  ;;  %v4747_v30 = vmul.f32 %v4683_v27, %v10359_v12  ;;  %v5157_v19 = vpack.c.bf16 %v5121_v58, %v5117_v31 }
 0xc80   : > { %v5485_v3 = vpop.f32.mrf.mxu1  ;;  %v5058_v9 = vadd.f32 1.0, %v7379_v10  ;;  %v5437_v62 = vadd.f32 %v10349_v18, %v5436_v29  ;;  %v4932_v21 = vmul.f32 0.7978846, %v4868_v57  ;;  %v4869_v35 = vadd.f32 %v4805_v36, %v10281_v38 }
 0xc81   : > { %v5582_v15 = vadd.f32 %v5581_v37, %v5533_v46  ;;  %7384 = vtanh.f32 %v4928_v24  ;;  %v4748_v8 = vmul.f32 %v4684_v39, %v10362_v17  ;;  %5463 = vmatmul.bf16.gmra.mxu0 %v5157_v19  ;;  %v5118_v50 = vmul.f32 %v5054_v44, %v10338_v52 }
 0xc82   : > { %v7381_v49 = vpop.eup %7380  ;;  %v5122_v26 = vmul.f32 %v5058_v9, %v10343_v5  ;;  %v4873_v25 = vadd.f32 %v4809_v53, %v10324_v54  ;;  %7386 = vtanh.f32 %v4932_v21  ;;  %v4933_v20 = vmul.f32 0.7978846, %v4869_v35 }
 0xc83   : > { %v7383_v2 = vpop.eup %7382  ;;  %v10397_v59 = vadd.f32 %v5582_v15, %v9546_v60  ;;  %v5055_v51 = vadd.f32 1.0, %v7381_v49  ;;  %v4806_v27 = vmul.f32 %v10332_v0, %v10284_v16  ;;  %v5486_v61 = vadd.f32 %v5485_v3, %v5437_v62 }
 0xc84   : > { %v5158_v28 = vpack.c.bf16 %v5122_v26, %v5118_v50  ;;  %v5059_v7 = vadd.f32 1.0, %v7383_v2  ;;  %v4937_v22 = vmul.f32 0.7978846, %v4873_v25  ;;  %v4612_v52 = vmul.f32 0.5, %v10276_v11 }
 0xc85   : > { %5639 = vadd.xlane.f32.xlu2 %v10397_v59  ;;  %7388 = vtanh.f32 %v4933_v20  ;;  %v4810_v5 = vmul.f32 %v4746_v34, %v10328_v32  ;;  %v5119_v60 = vmul.f32 %v5055_v51, %v4607_v41  ;;  %v4870_v42 = vadd.f32 %v4806_v27, %v10284_v16 }
 0xc86   : > { %5512 = vmatmul.bf16.gmra.mxu1 %v5158_v28  ;;  %v5123_v39 = vmul.f32 %v5059_v7, %v4611_v13  ;;  %v5534_v1 = vpop.f32.mrf.mxu2  ;;  %v5583_v14 = vpop.f32.mrf.mxu3  ;;  %7390 = vtanh.f32 %v4937_v22  ;;  %v4807_v11 = vmul.f32 %v10356_v33, %v10313_v43  ;;  %v4811_v44 = vmul.f32 %v4747_v30, %v10359_v12 }
 0xc87   : > { %v7385_v6 = vpop.eup %7384  ;;  %v5535_v31 = vadd.f32 %v5534_v1, %v5486_v61  ;;  %v5439_v40 = vpop.f32.mrf.mxu0  ;;  %v4874_v58 = vadd.f32 %v4810_v5, %v10328_v32  ;;  %v4934_v13 = vmul.f32 0.7978846, %v4870_v42  ;;  %v4613_v3 = vmul.f32 0.5, %v10281_v38 }
 0xc88   : > { %v5488_v0 = vpop.f32.mrf.mxu1  ;;  %v5159_v34 = vpack.c.bf16 %v5123_v39, %v5119_v60  ;;  %v5056_v45 = vadd.f32 1.0, %v7385_v6  ;;  %v5440_v41 = vadd.f32 %v10349_v18, %v5439_v40  ;;  %v7387_v37 = vpop.eup %7386  ;;  %v4871_v10 = vadd.f32 %v4807_v11, %v10313_v43 }
 0xc89   : > { %v5584_v57 = vadd.f32 %v5583_v14, %v5535_v31  ;;  %v4938_v36 = vmul.f32 0.7978846, %v4874_v58  ;;  %v4875_v46 = vadd.f32 %v4811_v44, %v10359_v12  ;;  %v5060_v29 = vadd.f32 1.0, %v7387_v37 }
 0xc8a   : > { %5561 = vmatmul.bf16.gmra.mxu2 %v5159_v34  ;;  %v4617_v33 = vmul.f32 0.5, %v10324_v54  ;;  %7392 = vtanh.f32 %v4934_v13  ;;  %v4935_v30 = vmul.f32 0.7978846, %v4871_v10  ;;  %v5120_v62 = vmul.f32 %v5056_v45, %v10386_v48 }
 0xc8b   : > { %v7389_v24 = vpop.eup %7388  ;;  %v10415_v53 = vadd.f32 %v5584_v57, %v9549_v47  ;;  %7394 = vtanh.f32 %v4938_v36  ;;  %v4939_v19 = vmul.f32 0.7978846, %v4875_v46  ;;  %v5124_v15 = vmul.f32 %v5060_v29, %v4612_v52 }
 0xc8c   : > { %v7391_v9 = vpop.eup %7390  ;;  %v5489_v21 = vadd.f32 %v5488_v0, %v5440_v41  ;;  %v5061_v35 = vadd.f32 1.0, %v7389_v24  ;;  %7396 = vtanh.f32 %v4935_v30  ;;  %v4808_v38 = vmul.f32 %v10367_v56, %v10321_v63 }
 0xc8d   : > { %v5065_v49 = vadd.f32 1.0, %v7391_v9  ;;  %5641 = vadd.xlane.f32.xlu0 %v10415_v53  ;;  %v4812_v54 = vmul.f32 %v4748_v8, %v10362_v17  ;;  %v5160_v47 = vpack.c.bf16 %v5124_v15, %v5120_v62  ;;  %7398 = vtanh.f32 %v4939_v19 }
 0xc8e   : > { %v5125_v50 = vmul.f32 %v5061_v35, %v4613_v3  ;;  %v5537_v26 = vpop.f32.mrf.mxu2  ;;  %v5586_v25 = vpop.f32.mrf.mxu3  ;;  %v4872_v28 = vadd.f32 %v4808_v38, %v10321_v63  ;;  %v4614_v60 = vmul.f32 0.5, %v10284_v16  ;;  %v4618_v39 = vmul.f32 0.5, %v10328_v32 }
 0xc8f   : > { %v5129_v2 = vmul.f32 %v5065_v49, %v4617_v33  ;;  %v5538_v51 = vadd.f32 %v5537_v26, %v5489_v21  ;;  %v5441_v48 = vpop.f32.mrf.mxu0  ;;  %v4876_v7 = vadd.f32 %v4812_v54, %v10362_v17  ;;  %5610 = vmatmul.bf16.gmra.mxu3 %v5160_v47  ;;  %v4615_v44 = vmul.f32 0.5, %v10313_v43 }
 0xc90   : > { %v5490_v20 = vpop.f32.mrf.mxu1  ;;  %v7393_v22 = vpop.eup %7392  ;;  %v5442_v27 = vadd.f32 %v10349_v18, %v5441_v48  ;;  %v4936_v5 = vmul.f32 0.7978846, %v4872_v28  ;;  %v4619_v16 = vmul.f32 0.5, %v10359_v12  ;;  %v4616_v12 = vmul.f32 0.5, %v10321_v63 }
 0xc91   : > { %v7395_v56 = vpop.eup %7394  ;;  %v5161_v61 = vpack.c.bf16 %v5129_v2, %v5125_v50  ;;  %v5062_v8 = vadd.f32 1.0, %v7393_v22  ;;  %v5587_v52 = vadd.f32 %v5586_v25, %v5538_v51  ;;  %v4940_v14 = vmul.f32 0.7978846, %v4876_v7  ;;  %v10873_v7 = vld [vmem:[#allocation23_spill] sm:$0xff] }
 0xc92   : > { %v5066_v1 = vadd.f32 1.0, %v7395_v56  ;;  %v7397_v42 = vpop.eup %7396  ;;  %7400 = vtanh.f32 %v4936_v5  ;;  %v5491_v11 = vadd.f32 %v5490_v20, %v5442_v27  ;;  %v4620_v24 = vmul.f32 0.5, %v10362_v17 }
 0xc93   : > { %5468 = vmatmul.bf16.gmra.mxu0 %v5161_v61  ;;  %v10428_v6 = vadd.f32 %v5587_v52, %v9588_v23  ;;  %v7399_v31 = vpop.eup %7398  ;;  %v5126_v40 = vmul.f32 %v5062_v8, %v4614_v60  ;;  %v5063_v58 = vadd.f32 1.0, %v7397_v42  ;;  %7402 = vtanh.f32 %v4940_v14  ;;  %v10874_v60 = vld [vmem:[#allocation25_spill] sm:$0xff] }
 0xc94   : > { %v5130_v0 = vmul.f32 %v5066_v1, %v4618_v39  ;;  %v5067_v34 = vadd.f32 1.0, %v7399_v31 }
 0xc95   : > { %5643 = vadd.xlane.f32.xlu1 %v10428_v6  ;;  %v5127_v13 = vmul.f32 %v5063_v58, %v4615_v44  ;;  %v10875_v58 = vld [vmem:[#allocation27_spill] sm:$0xff] }
 0xc96   : > { %v5162_v32 = vpack.c.bf16 %v5130_v0, %v5126_v40  ;;  %v5539_v45 = vpop.f32.mrf.mxu2  ;;  %v5588_v41 = vpop.f32.mrf.mxu3  ;;  %v5131_v23 = vmul.f32 %v5067_v34, %v4619_v16 }
 0xc97   : > { %v5540_v37 = vadd.f32 %v5539_v45, %v5491_v11  ;;  %v5444_v57 = vpop.f32.mrf.mxu0 }
 0xc98   : > { %v5493_v36 = vpop.f32.mrf.mxu1  ;;  %5517 = vmatmul.bf16.gmra.mxu1 %v5162_v32  ;;  %v7401_v10 = vpop.eup %7400  ;;  %v5163_v46 = vpack.c.bf16 %v5131_v23, %v5127_v13  ;;  %v5445_v3 = vadd.f32 %v10349_v18, %v5444_v57 }
 0xc99   : > { %v5589_v29 = vadd.f32 %v5588_v41, %v5540_v37  ;;  %v7403_v43 = vpop.eup %7402  ;;  %v5064_v33 = vadd.f32 1.0, %v7401_v10 }
 0xc9a   : > { %5566 = vmatmul.bf16.gmra.mxu2 %v5163_v46  ;;  %v5068_v30 = vadd.f32 1.0, %v7403_v43  ;;  %v5494_v15 = vadd.f32 %v5493_v36, %v5445_v3  ;;  %v10876_v46 = vld [vmem:[#allocation26_spill] sm:$0xff] }
 0xc9b   : > { %v10437_v19 = vadd.f32 %v5589_v29, %v9591_v4  ;;  %v5128_v9 = vmul.f32 %v5064_v33, %v4616_v12 }
 0xc9c   : > { %v5132_v62 = vmul.f32 %v5068_v30, %v4620_v24  ;;  %v10877_v30 = vld [vmem:[#allocation31_spill] sm:$0xff] }
 0xc9d   : > { %5645 = vadd.xlane.f32.xlu2 %v10437_v19 }
 0xc9e   : > { %v5542_v21 = vpop.f32.mrf.mxu2  ;;  %v5591_v35 = vpop.f32.mrf.mxu3  ;;  %v5164_v49 = vpack.c.bf16 %v5132_v62, %v5128_v9 }
 0xc9f   : > { %v5543_v38 = vadd.f32 %v5542_v21, %v5494_v15  ;;  %v5446_v54 = vpop.f32.mrf.mxu0 }
 0xca0   : > { %v5495_v47 = vpop.f32.mrf.mxu1  ;;  %5615 = vmatmul.bf16.gmra.mxu3 %v5164_v49  ;;  %v5447_v63 = vadd.f32 %v10349_v18, %v5446_v54 }
 0xca1   : > { %v5592_v50 = vadd.f32 %v5591_v35, %v5543_v38 }
 0xca2   : > { %v5496_v4 = vadd.f32 %v5495_v47, %v5447_v63 }
 0xca3   : > { %v10442_v17 = vadd.f32 %v5592_v50, %v9613_v55 }
 0xca5   : > { %5647 = vadd.xlane.f32.xlu0 %v10442_v17 }
 0xca6   : > { %v5544_v26 = vpop.f32.mrf.mxu2  ;;  %v5593_v25 = vpop.f32.mrf.mxu3 }
 0xca7   : > { %v5545_v2 = vadd.f32 %v5544_v26, %v5496_v4  ;;  %v5449_v51 = vpop.f32.mrf.mxu0 }
 0xca8   : > { %v5450_v20 = vadd.f32 %v10349_v18, %v5449_v51  ;;  %v5498_v28 = vpop.f32.mrf.mxu1 }
 0xca9   : > { %v5594_v48 = vadd.f32 %v5593_v25, %v5545_v2  ;;  %v10878_v25 = vld [vmem:[#allocation28_spill] sm:$0xff] }
 0xcaa   : > { %v5499_v27 = vadd.f32 %v5498_v28, %v5450_v20 }
 0xcab   : > { %v10447_v22 = vadd.f32 %v5594_v48, %v10873_v7 }
 0xcad   : > { %5649 = vadd.xlane.f32.xlu1 %v10447_v22 }
 0xcae   : > { %v5547_v56 = vpop.f32.mrf.mxu2  ;;  %v5596_v55 = vpop.f32.mrf.mxu3 }
 0xcaf   : > { %v5548_v61 = vadd.f32 %v5547_v56, %v5499_v27  ;;  %v5451_v8 = vpop.f32.mrf.mxu0  ;;  %v10879_v27 = vld [vmem:[#allocation21_spill] sm:$0xff] }
 0xcb0   : > { %v5452_v5 = vadd.f32 %v10349_v18, %v5451_v8  ;;  %v5500_v1 = vpop.f32.mrf.mxu1 }
 0xcb1   : > { %v5597_v52 = vadd.f32 %v5596_v55, %v5548_v61 }
 0xcb2   : > { %v5501_v14 = vadd.f32 %v5500_v1, %v5452_v5 }
 0xcb3   : > { %v10452_v39 = vadd.f32 %v5597_v52, %v10874_v60 }
 0xcb5   : > { %5651 = vadd.xlane.f32.xlu2 %v10452_v39 }
 0xcb6   : > { %v5549_v42 = vpop.f32.mrf.mxu2  ;;  %v5598_v40 = vpop.f32.mrf.mxu3 }
 0xcb7   : > { %v5550_v31 = vadd.f32 %v5549_v42, %v5501_v14 }
 0xcb9   : > { %v5599_v0 = vadd.f32 %v5598_v40, %v5550_v31 }
 0xcbb   : > { %v10456_v11 = vadd.f32 %v5599_v0, %v10875_v58  ;;  %v10880_v0 = vld [vmem:[#allocation24_spill] sm:$0xff] }
 0xcbd   : > { %5653 = vadd.xlane.f32.xlu0 %v10456_v11 }
 0xcd6   : > { %v5454_v44 = vpop.f32.mrf.mxu0 }
 0xcd7   : > { %v5455_v16 = vadd.f32 %v10349_v18, %v5454_v44  ;;  %v5503_v34 = vpop.f32.mrf.mxu1 }
 0xcd9   : > { %v5504_v32 = vadd.f32 %v5503_v34, %v5455_v16 }
 0xcde   : > { %v5456_v45 = vpop.f32.mrf.mxu0 }
 0xcdf   : > { %v5457_v23 = vadd.f32 %v10349_v18, %v5456_v45  ;;  %v5505_v36 = vpop.f32.mrf.mxu1 }
 0xce1   : > { %v5506_v10 = vadd.f32 %v5505_v36, %v5457_v23  ;;  %v10881_v23 = vld [vmem:[#allocation22_spill] sm:$0xff] }
 0xce3   : > { %v5552_v41 = vpop.f32.mrf.mxu2 }
 0xce4   : > { %v5553_v13 = vadd.f32 %v5552_v41, %v5504_v32 }
 0xce7   : > { %v5601_v37 = vpop.f32.mrf.mxu3  ;;  %v5459_v33 = vpop.f32.mrf.mxu0 }
 0xce8   : > { %v5602_v57 = vadd.f32 %v5601_v37, %v5553_v13  ;;  %v5460_v62 = vadd.f32 %v10349_v18, %v5459_v33 }
 0xce9   : > { %v5508_v15 = vpop.f32.mrf.mxu1 }
 0xcea   : > { %v10462_v29 = vadd.f32 %v5602_v57, %v10876_v46  ;;  %v5509_v35 = vadd.f32 %v5508_v15, %v5460_v62  ;;  %v10882_v57 = vld [vmem:[#allocation29_spill] sm:$0xff] }
 0xceb   : > { %v5554_v3 = vpop.f32.mrf.mxu2 }
 0xcec   : > { %5655 = vadd.xlane.f32.xlu1 %v10462_v29  ;;  %v5555_v43 = vadd.f32 %v5554_v3, %v5506_v10 }
 0xcef   : > { %v5603_v12 = vpop.f32.mrf.mxu3  ;;  %v5461_v49 = vpop.f32.mrf.mxu0 }
 0xcf0   : > { %v5604_v24 = vadd.f32 %v5603_v12, %v5555_v43  ;;  %v5462_v54 = vadd.f32 %v10349_v18, %v5461_v49 }
 0xcf1   : > { %v5510_v50 = vpop.f32.mrf.mxu1 }
 0xcf2   : > { %v10466_v9 = vadd.f32 %v5604_v24, %v10877_v30  ;;  %v5511_v26 = vadd.f32 %v5510_v50, %v5462_v54  ;;  %v10883_v50 = vld [vmem:[#allocation30_spill] sm:$0xff] }
 0xcf4   : > { %5657 = vadd.xlane.f32.xlu2 %v10466_v9 }
 0xcf6   : > { %v5557_v21 = vpop.f32.mrf.mxu2 }
 0xcf7   : > { %v5558_v38 = vadd.f32 %v5557_v21, %v5509_v35 }
 0xcf8   : > { %v5640_v34 = vpop.xlane.xlu2 %5639 }
 0xcf9   : > { %v5671_v37 = vmul.f32 %v5640_v34, %v10881_v23 }
 0xcfb   : > { %v10492_v12 = vsub.f32 %v10397_v59, %v5671_v37 }
 0xcfd   : > { %v5606_v47 = vpop.f32.mrf.mxu3  ;;  %v5703_v49 = vmul.f32 %v10492_v12, %v10492_v12 }
 0xcfe   : > { %v5607_v63 = vadd.f32 %v5606_v47, %v5558_v38  ;;  %v5559_v4 = vpop.f32.mrf.mxu2  ;;  %v5464_v51 = vpop.f32.mrf.mxu0 }
 0xcff   : > { %v5560_v48 = vadd.f32 %v5559_v4, %v5511_v26  ;;  %v5465_v55 = vadd.f32 %v10349_v18, %v5464_v51 }
 0xd00   : > { %v10472_v2 = vadd.f32 %v5607_v63, %v10878_v25  ;;  %v5642_v24 = vpop.xlane.xlu0 %5641 }
 0xd01   : > { %v5672_v54 = vmul.f32 %v5642_v24, %v10881_v23 }
 0xd02   : > { %5659 = vadd.xlane.f32.xlu0 %v10472_v2 }
 0xd03   : > { %v5513_v7 = vpop.f32.mrf.mxu1  ;;  %v10507_v25 = vsub.f32 %v10415_v53, %v5672_v54 }
 0xd04   : > { %v5514_v52 = vadd.f32 %v5513_v7, %v5465_v55 }
 0xd05   : > { %v5608_v20 = vpop.f32.mrf.mxu3 }
 0xd06   : > { %v5609_v28 = vadd.f32 %v5608_v20, %v5560_v48  ;;  %v5466_v61 = vpop.f32.mrf.mxu0 }
 0xd07   : > { %v5467_v60 = vadd.f32 %v10349_v18, %v5466_v61  ;;  %v10884_v61 = vld [vmem:[#allocation32_spill] sm:$0xff] }
 0xd08   : > { %v10476_v56 = vadd.f32 %v5609_v28, %v10879_v27  ;;  %v5644_v51 = vpop.xlane.xlu1 %5643 }
 0xd09   : > { %v5673_v27 = vmul.f32 %v5644_v51, %v10881_v23 }
 0xd0a   : > { %5661 = vadd.xlane.f32.xlu1 %v10476_v56 }
 0xd0b   : > { %v5515_v1 = vpop.f32.mrf.mxu1 }
 0xd0c   : > { %v5516_v40 = vadd.f32 %v5515_v1, %v5467_v60 }
 0xd0d   : > { %v5562_v8 = vpop.f32.mrf.mxu2 }
 0xd0e   : > { %v5563_v5 = vadd.f32 %v5562_v8, %v5514_v52 }
 0xd10   : > { %v5469_v44 = vpop.f32.mrf.mxu0  ;;  %v5646_v43 = vpop.xlane.xlu2 %5645 }
 0xd11   : > { %v5470_v32 = vadd.f32 %v10349_v18, %v5469_v44  ;;  %v5674_v35 = vmul.f32 %v5646_v43, %v10881_v23 }
 0xd12   : > { %v5611_v14 = vpop.f32.mrf.mxu3 }
 0xd13   : > { %v5612_v42 = vadd.f32 %v5611_v14, %v5563_v5  ;;  %v10504_v4 = vsub.f32 %v10437_v19, %v5674_v35  ;;  %v5704_v19 = vmul.f32 %v10507_v25, %v10507_v25  ;;  %v10524_v5 = vsub.f32 %v10428_v6, %v5673_v27 }
 0xd15   : > { %v5564_v31 = vpop.f32.mrf.mxu2  ;;  %v10482_v58 = vadd.f32 %v5612_v42, %v10880_v0  ;;  %v5518_v41 = vpop.f32.mrf.mxu1  ;;  %v5706_v7 = vmul.f32 %v10504_v4, %v10504_v4 }
 0xd16   : > { %v5565_v16 = vadd.f32 %v5564_v31, %v5516_v40  ;;  %v5519_v46 = vadd.f32 %v5518_v41, %v5470_v32 }
 0xd17   : > { %5663 = vadd.xlane.f32.xlu2 %v10482_v58 }
 0xd18   : > { %v5471_v3 = vpop.f32.mrf.mxu0  ;;  %v5648_v26 = vpop.xlane.xlu0 %5647 }
 0xd19   : > { %v5472_v30 = vadd.f32 %v10349_v18, %v5471_v3  ;;  %v5675_v55 = vmul.f32 %v5648_v26, %v10881_v23 }
 0xd1a   : > { %v5613_v45 = vpop.f32.mrf.mxu3 }
 0xd1b   : > { %v5614_v13 = vadd.f32 %v5613_v45, %v5565_v16  ;;  %v10527_v60 = vsub.f32 %v10442_v17, %v5675_v55 }
 0xd1d   : > { %v10488_v36 = vadd.f32 %v5614_v13, %v10882_v57  ;;  %v5567_v10 = vpop.f32.mrf.mxu2  ;;  %v5520_v21 = vpop.f32.mrf.mxu1  ;;  %v5707_v40 = vmul.f32 %v10527_v60, %v10527_v60 }
 0xd1e   : > { %v5568_v33 = vadd.f32 %v5567_v10, %v5519_v46  ;;  %v5521_v47 = vadd.f32 %v5520_v21, %v5472_v30 }
 0xd1f   : > { %5665 = vadd.xlane.f32.xlu0 %v10488_v36 }
 0xd20   : > { %v5650_v1 = vpop.xlane.xlu1 %5649 }
 0xd21   : > { %v5676_v31 = vmul.f32 %v5650_v1, %v10881_v23 }
 0xd23   : > { %v5616_v62 = vpop.f32.mrf.mxu3  ;;  %v10541_v17 = vsub.f32 %v10447_v22, %v5676_v31 }
 0xd24   : > { %v5617_v15 = vadd.f32 %v5616_v62, %v5568_v33 }
 0xd25   : > { %v5569_v38 = vpop.f32.mrf.mxu2  ;;  %v5708_v44 = vmul.f32 %v10541_v17, %v10541_v17 }
 0xd26   : > { %v10500_v63 = vadd.f32 %v5617_v15, %v10883_v50  ;;  %v5570_v59 = vadd.f32 %v5569_v38, %v5521_v47 }
 0xd27   : > { %5719 = vadd.xlane.f32.xlu0 %v5703_v49 }
 0xd28   : > { %5667 = vadd.xlane.f32.xlu1 %v10500_v63  ;;  %v5652_v18 = vpop.xlane.xlu2 %5651 }
 0xd29   : > { %v5677_v20 = vmul.f32 %v5652_v18, %v10881_v23 }
 0xd2b   : > { %v5618_v48 = vpop.f32.mrf.mxu3  ;;  %v10520_v53 = vsub.f32 %v10452_v39, %v5677_v20  ;;  %v5705_v39 = vmul.f32 %v10524_v5, %v10524_v5 }
 0xd2c   : > { %v5619_v28 = vadd.f32 %v5618_v48, %v5570_v59 }
 0xd2d   : > { %v5709_v14 = vmul.f32 %v10520_v53, %v10520_v53 }
 0xd2e   : > { %v10515_v8 = vadd.f32 %v5619_v28, %v10884_v61 }
 0xd2f   : > { %5725 = vadd.xlane.f32.xlu0 %v5706_v7 }
 0xd30   : > { %5669 = vadd.xlane.f32.xlu2 %v10515_v8  ;;  %5721 = vadd.xlane.f32.xlu1 %v5704_v19  ;;  %v5654_v52 = vpop.xlane.xlu0 %5653 }
 0xd31   : > { %v5678_v42 = vmul.f32 %v5654_v52, %v10881_v23 }
 0xd33   : > { %v10538_v6 = vsub.f32 %v10456_v11, %v5678_v42 }
 0xd35   : > { %v5710_v0 = vmul.f32 %v10538_v6, %v10538_v6 }
 0xd37   : > { %5731 = vadd.xlane.f32.xlu0 %v5709_v14 }
 0xd38   : > { %5723 = vadd.xlane.f32.xlu2 %v5705_v39  ;;  %5727 = vadd.xlane.f32.xlu1 %v5707_v40 }
 0xd40   : > { %5729 = vadd.xlane.f32.xlu2 %v5708_v44  ;;  %5733 = vadd.xlane.f32.xlu1 %v5710_v0 }
 0xd5f   : > { %v5656_v16 = vpop.xlane.xlu1 %5655 }
 0xd60   : > { %v5679_v34 = vmul.f32 %v5656_v16, %v10881_v23 }
 0xd62   : > { %v10549_v32 = vsub.f32 %v10462_v29, %v5679_v34 }
 0xd64   : > { %v5711_v11 = vmul.f32 %v10549_v32, %v10549_v32 }
 0xd66   : > { %5735 = vadd.xlane.f32.xlu2 %v5711_v11 }
 0xd67   : > { %v5658_v22 = vpop.xlane.xlu2 %5657 }
 0xd68   : > { %v5680_v45 = vmul.f32 %v5658_v22, %v10881_v23 }
 0xd6a   : > { %v10555_v41 = vsub.f32 %v10466_v9, %v5680_v45 }
 0xd6c   : > { %v5712_v13 = vmul.f32 %v10555_v41, %v10555_v41 }
 0xd6e   : > { %5737 = vadd.xlane.f32.xlu0 %v5712_v13 }
 0xd75   : > { %v5660_v37 = vpop.xlane.xlu0 %5659 }
 0xd76   : > { %v5681_v57 = vmul.f32 %v5660_v37, %v10881_v23 }
 0xd78   : > { %v10561_v29 = vsub.f32 %v10472_v2, %v5681_v57 }
 0xd7a   : > { %v5713_v10 = vmul.f32 %v10561_v29, %v10561_v29 }
 0xd7c   : > { %5739 = vadd.xlane.f32.xlu1 %v5713_v10 }
 0xd7d   : > { %v5662_v46 = vpop.xlane.xlu1 %5661 }
 0xd7e   : > { %v5682_v3 = vmul.f32 %v5662_v46, %v10881_v23 }
 0xd80   : > { %v10567_v9 = vsub.f32 %v10476_v56, %v5682_v3 }
 0xd82   : > { %v5714_v43 = vmul.f32 %v10567_v9, %v10567_v9 }
 0xd84   : > { %5741 = vadd.xlane.f32.xlu2 %v5714_v43 }
 0xd8a   : > { %v5664_v33 = vpop.xlane.xlu2 %5663 }
 0xd8b   : > { %v5683_v24 = vmul.f32 %v5664_v33, %v10881_v23 }
 0xd8d   : > { %v10573_v2 = vsub.f32 %v10482_v58, %v5683_v24 }
 0xd8f   : > { %v5715_v30 = vmul.f32 %v10573_v2, %v10573_v2 }
 0xd91   : > { %5743 = vadd.xlane.f32.xlu0 %v5715_v30 }
 0xd92   : > { %v5666_v62 = vpop.xlane.xlu0 %5665 }
 0xd93   : > { %v5684_v15 = vmul.f32 %v5666_v62, %v10881_v23 }
 0xd95   : > { %v10579_v56 = vsub.f32 %v10488_v36, %v5684_v15  ;;  %v10614_v15 = vld [vmem:[%s10762_s11] ss:$0 sm:$0xff] }
 0xd97   : > { %v5716_v21 = vmul.f32 %v10579_v56, %v10579_v56 }
 0xd99   : > { %5745 = vadd.xlane.f32.xlu1 %v5716_v21 }
 0xd9a   : > { %v5720_v35 = vpop.xlane.xlu0 %5719 }
 0xd9b   : > { %v5751_v49 = vmul.f32 %v5720_v35, %v10881_v23  ;;  %v5668_v38 = vpop.xlane.xlu1 %5667 }
 0xd9c   : > { %v5685_v58 = vmul.f32 %v5668_v38, %v10881_v23 }
 0xd9d   : > { %v5767_v54 = vadd.f32 1e-06, %v5751_v49 }
 0xd9e   : > { %v10586_v47 = vsub.f32 %v10500_v63, %v5685_v58 }
 0xd9f   : > { %7404 = vrsqrt.f32 %v5767_v54  ;;  %vm5789_vm7 = vweird.f32 %v5767_v54 }
 0xda0   : > { %v5717_v50 = vmul.f32 %v10586_v47, %v10586_v47 }
 0xda2   : > { %5747 = vadd.xlane.f32.xlu2 %v5717_v50  ;;  %v5726_v36 = vpop.xlane.xlu0 %5725 }
 0xda3   : > { %v5754_v59 = vmul.f32 %v5726_v36, %v10881_v23  ;;  %v5670_v18 = vpop.xlane.xlu2 %5669  ;;  %v5722_v26 = vpop.xlane.xlu1 %5721 }
 0xda4   : > { %v5686_v51 = vmul.f32 %v5670_v18, %v10881_v23  ;;  %v5752_v48 = vmul.f32 %v5722_v26, %v10881_v23 }
 0xda5   : > { %v7405_v20 = vpop.eup %7404  ;;  %v5770_v28 = vadd.f32 1e-06, %v5754_v59 }
 0xda6   : > { %v5784_v7 = vmul.f32 %v7405_v20, %v5767_v54  ;;  %v10594_v63 = vsub.f32 %v10515_v8, %v5686_v51  ;;  %v5768_v27 = vadd.f32 1e-06, %v5752_v48  ;;  %vm5790_vm6 = vweird.f32 %v7405_v20 }
 0xda7   : > { %7406 = vrsqrt.f32 %v5770_v28  ;;  %vm5791_vm8 = vmor %vm5789_vm7, %vm5790_vm6  ;;  %vm5819_vm12 = vweird.f32 %v5770_v28 }
 0xda8   : > { %v5785_v55 = vmul.f32 %v7405_v20, %v5784_v7  ;;  %7408 = vrsqrt.f32 %v5768_v27  ;;  %v5718_v61 = vmul.f32 %v10594_v63, %v10594_v63  ;;  %vm5799_vm11 = vweird.f32 %v5768_v27  ;;  %v10633_v7 = vld [vmem:[%s10763_s12] ss:$0 sm:$0xff] }
 0xdaa   : > { %v5786_v19 = vmul.f32 0.5, %v5785_v55  ;;  %5749 = vadd.xlane.f32.xlu0 %v5718_v61  ;;  %v5732_v52 = vpop.xlane.xlu0 %5731 }
 0xdab   : > { %v5724_v1 = vpop.xlane.xlu2 %5723  ;;  %v5728_v14 = vpop.xlane.xlu1 %5727  ;;  %v5757_v42 = vmul.f32 %v5732_v52, %v10881_v23 }
 0xdac   : > { %v5787_v31 = vsub.f32 1.5, %v5786_v19  ;;  %v5753_v39 = vmul.f32 %v5724_v1, %v10881_v23  ;;  %v5755_v8 = vmul.f32 %v5728_v14, %v10881_v23 }
 0xdad   : > { %v7407_v40 = vpop.eup %7406  ;;  %v10601_v0 = vadd.f32 1e-06, %v5757_v42 }
 0xdae   : > { %v7409_v44 = vpop.eup %7408  ;;  %v5788_v16 = vmul.f32 %v7405_v20, %v5787_v31  ;;  %v5814_v34 = vmul.f32 %v7407_v40, %v5770_v28  ;;  %v5769_v11 = vadd.f32 1e-06, %v5753_v39  ;;  %v10603_v45 = vadd.f32 1e-06, %v5755_v8 }
 0xdaf   : > { %v5794_v22 = vmul.f32 %v7409_v44, %v5768_v27  ;;  %7410 = vrsqrt.f32 %v10601_v0  ;;  %vm5800_vm9 = vweird.f32 %v7409_v44  ;;  %vm5820_vm10 = vweird.f32 %v7407_v40 }
 0xdb0   : > { %v5815_v13 = vmul.f32 %v7407_v40, %v5814_v34  ;;  %7412 = vrsqrt.f32 %v5769_v11  ;;  %v5792_v57 = vsel %vm5791_vm8, %v7405_v20, %v5788_v16  ;;  %vm5801_vm13 = vmor %vm5799_vm11, %vm5800_vm9  ;;  %vm5809_vm0 = vweird.f32 %v5769_v11 }
 0xdb1   : > { %v5795_v37 = vmul.f32 %v7409_v44, %v5794_v22  ;;  %7414 = vrsqrt.f32 %v10603_v45  ;;  %v5943_v21 = vmul.f32 %v5792_v57, %v10492_v12  ;;  %vm5821_vm14 = vmor %vm5819_vm12, %vm5820_vm10  ;;  %vm5829_vm4 = vweird.f32 %v10603_v45 }
 0xdb2   : > { %v5816_v10 = vmul.f32 0.5, %v5815_v13  ;;  %vm5849_vm6 = vweird.f32 %v10601_v0 }
 0xdb3   : > { %v5796_v46 = vmul.f32 0.5, %v5795_v37  ;;  %v5730_v3 = vpop.xlane.xlu2 %5729  ;;  %v5734_v43 = vpop.xlane.xlu1 %5733  ;;  %v5962_v51 = vmul.f32 %v10614_v15, %v5943_v21 }
 0xdb4   : > { %v5817_v33 = vsub.f32 1.5, %v5816_v10  ;;  %v5756_v24 = vmul.f32 %v5730_v3, %v10881_v23  ;;  %v5758_v30 = vmul.f32 %v5734_v43, %v10881_v23 }
 0xdb5   : > { %v10609_v62 = vpop.eup %7410  ;;  %v5797_v35 = vsub.f32 1.5, %v5796_v46  ;;  %v5981_v39 = vadd.f32 %v10633_v7, %v5962_v51 }
 0xdb6   : > { %v7413_v49 = vpop.eup %7412  ;;  %v5818_v38 = vmul.f32 %v7407_v40, %v5817_v33  ;;  %v5844_v58 = vmul.f32 %v10609_v62, %v10601_v0  ;;  %v10619_v54 = vadd.f32 1e-06, %v5756_v24  ;;  %v10623_v18 = vadd.f32 1e-06, %v5758_v30 }
 0xdb7   : > { %v10621_v50 = vpop.eup %7414  ;;  %v5798_v36 = vmul.f32 %v7409_v44, %v5797_v35  ;;  %v5804_v59 = vmul.f32 %v7413_v49, %v5769_v11  ;;  %vm5810_vm15 = vweird.f32 %v7413_v49  ;;  %vm5850_vm3 = vweird.f32 %v10609_v62 }
 0xdb8   : > { %v5824_v12 = vmul.f32 %v10621_v50, %v10603_v45  ;;  %v5845_v26 = vmul.f32 %v10609_v62, %v5844_v58  ;;  %7416 = vrsqrt.f32 %v10619_v54  ;;  %v5822_v27 = vsel %vm5821_vm14, %v7407_v40, %v5818_v38  ;;  %vm5811_vm1 = vmor %vm5809_vm0, %vm5810_vm15 }
 0xdb9   : > { %v5802_v48 = vsel %vm5801_vm13, %v7409_v44, %v5798_v36  ;;  %v5805_v20 = vmul.f32 %v7413_v49, %v5804_v59  ;;  %7418 = vrsqrt.f32 %v10623_v18  ;;  %v5946_v14 = vmul.f32 %v5822_v27, %v10504_v4  ;;  %vm5851_vm7 = vmor %vm5849_vm6, %vm5850_vm3 }
 0xdba   : > { %v5944_v28 = vmul.f32 %v5802_v48, %v10507_v25  ;;  %v5825_v55 = vmul.f32 %v10621_v50, %v5824_v12  ;;  %v5846_v61 = vmul.f32 0.5, %v5845_v26  ;;  %vm5830_vm2 = vweird.f32 %v10621_v50 }
 0xdbb   : > { %v5806_v19 = vmul.f32 0.5, %v5805_v20  ;;  %v5965_v13 = vmul.f32 %v10614_v15, %v5946_v14  ;;  %vm5831_vm5 = vmor %vm5829_vm4, %vm5830_vm2  ;;  %vm5839_vm9 = vweird.f32 %v10619_v54  ;;  %vm5859_vm12 = vweird.f32 %v10623_v18 }
 0xdbc   : > { %v5963_v52 = vmul.f32 %v10614_v15, %v5944_v28  ;;  %v5826_v1 = vmul.f32 0.5, %v5825_v55  ;;  %v5847_v31 = vsub.f32 1.5, %v5846_v61 }
 0xdbd   : > { %v5807_v42 = vsub.f32 1.5, %v5806_v19  ;;  %v5984_v30 = vadd.f32 %v10633_v7, %v5965_v13 }
 0xdbe   : > { %v5982_v8 = vadd.f32 %v10633_v7, %v5963_v52  ;;  %v5827_v25 = vsub.f32 1.5, %v5826_v1  ;;  %v7417_v40 = vpop.eup %7416  ;;  %v5848_v57 = vmul.f32 %v10609_v62, %v5847_v31 }
 0xdbf   : > { %v5808_v44 = vmul.f32 %v7413_v49, %v5807_v42  ;;  %v5834_v4 = vmul.f32 %v7417_v40, %v10619_v54  ;;  %v7419_v22 = vpop.eup %7418  ;;  %vm5840_vm8 = vweird.f32 %v7417_v40 }
 0xdc0   : > { %v6827_v16 = vpack.c.bf16 %v5982_v8, %v5981_v39  ;;  %v5828_v34 = vmul.f32 %v10621_v50, %v5827_v25  ;;  %v5854_v46 = vmul.f32 %v7419_v22, %v10623_v18  ;;  %vm5860_vm10 = vweird.f32 %v7419_v22  ;;  %vm5841_vm11 = vmor %vm5839_vm9, %vm5840_vm8 }
 0xdc1   : > { %v5812_v37 = vsel %vm5811_vm1, %v7413_v49, %v5808_v44  ;;  %v5835_v10 = vmul.f32 %v7417_v40, %v5834_v4  ;;  %vm5861_vm13 = vmor %vm5859_vm12, %vm5860_vm10 }
 0xdc2   : > { %6828 = vst [vmem:[%s10650_s17] sm:$0xff] %v6827_v16   ;;  %v5945_v11 = vmul.f32 %v5812_v37, %v10524_v5  ;;  %v5832_v43 = vsel %vm5831_vm5, %v10621_v50, %v5828_v34  ;;  %v5855_v24 = vmul.f32 %v7419_v22, %v5854_v46  ;;  %v5852_v5 = vsel %vm5851_vm7, %v10609_v62, %v5848_v57 }
 0xdc3   : > { %v5836_v33 = vmul.f32 0.5, %v5835_v10  ;;  %v5947_v49 = vmul.f32 %v5832_v43, %v10527_v60  ;;  %v5949_v50 = vmul.f32 %v5852_v5, %v10520_v53 }
 0xdc4   : > { %v5964_v3 = vmul.f32 %v10614_v15, %v5945_v11  ;;  %v5856_v35 = vmul.f32 0.5, %v5855_v24 }
 0xdc5   : > { %v5837_v21 = vsub.f32 1.5, %v5836_v33  ;;  %v5966_v59 = vmul.f32 %v10614_v15, %v5947_v49  ;;  %v5968_v12 = vmul.f32 %v10614_v15, %v5949_v50 }
 0xdc6   : > { %v5983_v45 = vadd.f32 %v10633_v7, %v5964_v3  ;;  %v5857_v58 = vsub.f32 1.5, %v5856_v35 }
 0xdc7   : > { %v5838_v38 = vmul.f32 %v7417_v40, %v5837_v21  ;;  %v5985_v51 = vadd.f32 %v10633_v7, %v5966_v59  ;;  %v5987_v18 = vadd.f32 %v10633_v7, %v5968_v12 }
 0xdc8   : > { %v6832_v0 = vpack.c.bf16 %v5984_v30, %v5983_v45  ;;  %v5858_v62 = vmul.f32 %v7419_v22, %v5857_v58 }
 0xdc9   : > { %v5842_v36 = vsel %vm5841_vm11, %v7417_v40, %v5838_v38 }
 0xdca   : > { %6865 = vst [vmem:[%s10650_s17 + $0x8] sm:$0xff] %v6832_v0   ;;  %v5948_v60 = vmul.f32 %v5842_v36, %v10541_v17  ;;  %v5862_v54 = vsel %vm5861_vm13, %v7419_v22, %v5858_v62 }
 0xdcb   : > { %v5950_v53 = vmul.f32 %v5862_v54, %v10538_v6 }
 0xdcc   : > { %v5967_v26 = vmul.f32 %v10614_v15, %v5948_v60 }
 0xdcd   : > { %v5969_v20 = vmul.f32 %v10614_v15, %v5950_v53 }
 0xdce   : > { %v5986_v48 = vadd.f32 %v10633_v7, %v5967_v26 }
 0xdcf   : > { %v5988_v28 = vadd.f32 %v10633_v7, %v5969_v20 }
 0xdd0   : > { %v6837_v27 = vpack.c.bf16 %v5986_v48, %v5985_v51 }
 0xdd1   : > { %v6842_v17 = vpack.c.bf16 %v5988_v28, %v5987_v18 }
 0xdd2   : > { %6866 = vst [vmem:[%s10650_s17 + $0x10] sm:$0xff] %v6837_v27  }
 0xdd3   : > { %6867 = vst [vmem:[%s10650_s17 + $0x18] sm:$0xff] %v6842_v17  }
 0xdd9   : > { %v5736_v55 = vpop.xlane.xlu2 %5735 }
 0xdda   : > { %v5759_v61 = vmul.f32 %v5736_v55, %v10881_v23 }
 0xddc   : > { %v5775_v19 = vadd.f32 1e-06, %v5759_v61 }
 0xdde   : > { %7420 = vrsqrt.f32 %v5775_v19  ;;  %vm5869_vm15 = vweird.f32 %v5775_v19 }
 0xde1   : > { %v5738_v6 = vpop.xlane.xlu0 %5737 }
 0xde2   : > { %v5760_v52 = vmul.f32 %v5738_v6, %v10881_v23 }
 0xde4   : > { %v7421_v1 = vpop.eup %7420  ;;  %v5776_v14 = vadd.f32 1e-06, %v5760_v52 }
 0xde5   : > { %v5864_v42 = vmul.f32 %v7421_v1, %v5775_v19  ;;  %vm5870_vm14 = vweird.f32 %v7421_v1 }
 0xde6   : > { %7422 = vrsqrt.f32 %v5776_v14  ;;  %vm5871_vm0 = vmor %vm5869_vm15, %vm5870_vm14  ;;  %vm5879_vm2 = vweird.f32 %v5776_v14 }
 0xde7   : > { %v5865_v31 = vmul.f32 %v7421_v1, %v5864_v42 }
 0xde9   : > { %v5866_v39 = vmul.f32 0.5, %v5865_v31 }
 0xdeb   : > { %v5867_v8 = vsub.f32 1.5, %v5866_v39 }
 0xdec   : > { %v7423_v25 = vpop.eup %7422 }
 0xded   : > { %v5868_v40 = vmul.f32 %v7421_v1, %v5867_v8  ;;  %v5874_v44 = vmul.f32 %v7423_v25, %v5776_v14  ;;  %vm5880_vm1 = vweird.f32 %v7423_v25 }
 0xdee   : > { %vm5881_vm3 = vmor %vm5879_vm2, %vm5880_vm1 }
 0xdef   : > { %v5875_v16 = vmul.f32 %v7423_v25, %v5874_v44  ;;  %v5740_v34 = vpop.xlane.xlu1 %5739  ;;  %v5872_v22 = vsel %vm5871_vm0, %v7421_v1, %v5868_v40 }
 0xdf0   : > { %v5761_v4 = vmul.f32 %v5740_v34, %v10881_v23  ;;  %v5951_v11 = vmul.f32 %v5872_v22, %v10549_v32 }
 0xdf1   : > { %v5876_v13 = vmul.f32 0.5, %v5875_v16 }
 0xdf2   : > { %v5777_v37 = vadd.f32 1e-06, %v5761_v4  ;;  %v5970_v43 = vmul.f32 %v10614_v15, %v5951_v11 }
 0xdf3   : > { %v5877_v57 = vsub.f32 1.5, %v5876_v13 }
 0xdf4   : > { %7424 = vrsqrt.f32 %v5777_v37  ;;  %v5989_v32 = vadd.f32 %v10633_v7, %v5970_v43  ;;  %vm5889_vm5 = vweird.f32 %v5777_v37 }
 0xdf5   : > { %v5878_v10 = vmul.f32 %v7423_v25, %v5877_v57 }
 0xdf7   : > { %v5882_v46 = vsel %vm5881_vm3, %v7423_v25, %v5878_v10  ;;  %v5742_v3 = vpop.xlane.xlu2 %5741 }
 0xdf8   : > { %v5952_v33 = vmul.f32 %v5882_v46, %v10555_v41  ;;  %v5762_v24 = vmul.f32 %v5742_v3, %v10881_v23 }
 0xdfa   : > { %v7425_v30 = vpop.eup %7424  ;;  %v5971_v5 = vmul.f32 %v10614_v15, %v5952_v33  ;;  %v5778_v45 = vadd.f32 1e-06, %v5762_v24 }
 0xdfb   : > { %v5884_v21 = vmul.f32 %v7425_v30, %v5777_v37  ;;  %vm5890_vm4 = vweird.f32 %v7425_v30 }
 0xdfc   : > { %v5990_v35 = vadd.f32 %v10633_v7, %v5971_v5  ;;  %7426 = vrsqrt.f32 %v5778_v45  ;;  %vm5891_vm6 = vmor %vm5889_vm5, %vm5890_vm4  ;;  %vm5899_vm8 = vweird.f32 %v5778_v45 }
 0xdfd   : > { %v5885_v49 = vmul.f32 %v7425_v30, %v5884_v21 }
 0xdfe   : > { %v6847_v0 = vpack.c.bf16 %v5990_v35, %v5989_v32 }
 0xdff   : > { %v5886_v38 = vmul.f32 0.5, %v5885_v49 }
 0xe00   : > { %6868 = vst [vmem:[%s10650_s17 + $0x20] sm:$0xff] %v6847_v0  }
 0xe01   : > { %v5887_v58 = vsub.f32 1.5, %v5886_v38 }
 0xe02   : > { %v7427_v50 = vpop.eup %7426 }
 0xe03   : > { %v5888_v36 = vmul.f32 %v7425_v30, %v5887_v58  ;;  %v5894_v41 = vmul.f32 %v7427_v50, %v5778_v45  ;;  %vm5900_vm7 = vweird.f32 %v7427_v50 }
 0xe04   : > { %v5744_v59 = vpop.xlane.xlu0 %5743  ;;  %vm5901_vm9 = vmor %vm5899_vm8, %vm5900_vm7 }
 0xe05   : > { %v5895_v62 = vmul.f32 %v7427_v50, %v5894_v41  ;;  %v5763_v60 = vmul.f32 %v5744_v59, %v10881_v23  ;;  %v5892_v54 = vsel %vm5891_vm6, %v7425_v30, %v5888_v36 }
 0xe06   : > { %v5953_v51 = vmul.f32 %v5892_v54, %v10561_v29 }
 0xe07   : > { %v5896_v12 = vmul.f32 0.5, %v5895_v62  ;;  %v5779_v26 = vadd.f32 1e-06, %v5763_v60 }
 0xe08   : > { %v5972_v27 = vmul.f32 %v10614_v15, %v5953_v51 }
 0xe09   : > { %v5897_v53 = vsub.f32 1.5, %v5896_v12  ;;  %7428 = vrsqrt.f32 %v5779_v26  ;;  %vm5909_vm11 = vweird.f32 %v5779_v26 }
 0xe0a   : > { %v5991_v29 = vadd.f32 %v10633_v7, %v5972_v27 }
 0xe0b   : > { %v5898_v48 = vmul.f32 %v7427_v50, %v5897_v53 }
 0xe0c   : > { %v5746_v18 = vpop.xlane.xlu1 %5745 }
 0xe0d   : > { %v5902_v20 = vsel %vm5901_vm9, %v7427_v50, %v5898_v48  ;;  %v5764_v17 = vmul.f32 %v5746_v18, %v10881_v23 }
 0xe0e   : > { %v5954_v28 = vmul.f32 %v5902_v20, %v10567_v9 }
 0xe0f   : > { %v7429_v55 = vpop.eup %7428  ;;  %v5780_v19 = vadd.f32 1e-06, %v5764_v17 }
 0xe10   : > { %v5973_v61 = vmul.f32 %v10614_v15, %v5954_v28  ;;  %v5904_v6 = vmul.f32 %v7429_v55, %v5779_v26  ;;  %vm5910_vm10 = vweird.f32 %v7429_v55 }
 0xe11   : > { %7430 = vrsqrt.f32 %v5780_v19  ;;  %vm5911_vm12 = vmor %vm5909_vm11, %vm5910_vm10  ;;  %vm5919_vm14 = vweird.f32 %v5780_v19 }
 0xe12   : > { %v5992_v52 = vadd.f32 %v10633_v7, %v5973_v61  ;;  %v5905_v1 = vmul.f32 %v7429_v55, %v5904_v6 }
 0xe14   : > { %v6852_v14 = vpack.c.bf16 %v5992_v52, %v5991_v29  ;;  %v5906_v42 = vmul.f32 0.5, %v5905_v1 }
 0xe15   : > { %v5748_v31 = vpop.xlane.xlu2 %5747 }
 0xe16   : > { %6869 = vst [vmem:[%s10650_s17 + $0x28] sm:$0xff] %v6852_v14   ;;  %v5907_v39 = vsub.f32 1.5, %v5906_v42  ;;  %v5765_v9 = vmul.f32 %v5748_v31, %v10881_v23 }
 0xe17   : > { %v7431_v8 = vpop.eup %7430 }
 0xe18   : > { %v5908_v25 = vmul.f32 %v7429_v55, %v5907_v39  ;;  %v5914_v40 = vmul.f32 %v7431_v8, %v5780_v19  ;;  %v5781_v44 = vadd.f32 1e-06, %v5765_v9  ;;  %vm5920_vm13 = vweird.f32 %v7431_v8 }
 0xe19   : > { %vm5921_vm15 = vmor %vm5919_vm14, %vm5920_vm13 }
 0xe1a   : > { %v5915_v16 = vmul.f32 %v7431_v8, %v5914_v40  ;;  %7432 = vrsqrt.f32 %v5781_v44  ;;  %v5912_v34 = vsel %vm5911_vm12, %v7429_v55, %v5908_v25  ;;  %vm5929_vm1 = vweird.f32 %v5781_v44 }
 0xe1b   : > { %v5955_v57 = vmul.f32 %v5912_v34, %v10573_v2 }
 0xe1c   : > { %v5916_v4 = vmul.f32 0.5, %v5915_v16 }
 0xe1d   : > { %v5750_v22 = vpop.xlane.xlu0 %5749  ;;  %v5974_v33 = vmul.f32 %v10614_v15, %v5955_v57 }
 0xe1e   : > { %v5917_v13 = vsub.f32 1.5, %v5916_v4  ;;  %v5766_v37 = vmul.f32 %v5750_v22, %v10881_v23 }
 0xe1f   : > { %v5993_v23 = vadd.f32 %v10633_v7, %v5974_v33 }
 0xe20   : > { %v7433_v11 = vpop.eup %7432  ;;  %v5918_v10 = vmul.f32 %v7431_v8, %v5917_v13  ;;  %v5782_v46 = vadd.f32 1e-06, %v5766_v37 }
 0xe21   : > { %v5924_v3 = vmul.f32 %v7433_v11, %v5781_v44  ;;  %vm5930_vm0 = vweird.f32 %v7433_v11 }
 0xe22   : > { %v5922_v43 = vsel %vm5921_vm15, %v7431_v8, %v5918_v10  ;;  %7434 = vrsqrt.f32 %v5782_v46  ;;  %vm5931_vm2 = vmor %vm5929_vm1, %vm5930_vm0  ;;  %vm5939_vm4 = vweird.f32 %v5782_v46 }
 0xe23   : > { %v5956_v24 = vmul.f32 %v5922_v43, %v10579_v56  ;;  %v5925_v30 = vmul.f32 %v7433_v11, %v5924_v3 }
 0xe25   : > { %v5975_v5 = vmul.f32 %v10614_v15, %v5956_v24  ;;  %v5926_v45 = vmul.f32 0.5, %v5925_v30 }
 0xe27   : > { %v5994_v2 = vadd.f32 %v10633_v7, %v5975_v5  ;;  %v5927_v21 = vsub.f32 1.5, %v5926_v45 }
 0xe28   : > { %v7435_v32 = vpop.eup %7434 }
 0xe29   : > { %v6857_v35 = vpack.c.bf16 %v5994_v2, %v5993_v23  ;;  %v5928_v49 = vmul.f32 %v7433_v11, %v5927_v21  ;;  %v5934_v0 = vmul.f32 %v7435_v32, %v5782_v46  ;;  %vm5940_vm3 = vweird.f32 %v7435_v32 }
 0xe2a   : > { %vm5941_vm5 = vmor %vm5939_vm4, %vm5940_vm3 }
 0xe2b   : > { %6870 = vst [vmem:[%s10650_s17 + $0x30] sm:$0xff] %v6857_v35   ;;  %v5935_v38 = vmul.f32 %v7435_v32, %v5934_v0  ;;  %v5932_v56 = vsel %vm5931_vm2, %v7433_v11, %v5928_v49 }
 0xe2c   : > { %v5957_v36 = vmul.f32 %v5932_v56, %v10586_v47 }
 0xe2d   : > { %v5936_v58 = vmul.f32 0.5, %v5935_v38 }
 0xe2e   : > { %v5976_v59 = vmul.f32 %v10614_v15, %v5957_v36 }
 0xe2f   : > { %v5937_v50 = vsub.f32 1.5, %v5936_v58 }
 0xe30   : > { %v5995_v47 = vadd.f32 %v10633_v7, %v5976_v59 }
 0xe31   : > { %v5938_v41 = vmul.f32 %v7435_v32, %v5937_v50 }
 0xe33   : > { %v5942_v62 = vsel %vm5941_vm5, %v7435_v32, %v5938_v41 }
 0xe34   : > { %v5958_v60 = vmul.f32 %v5942_v62, %v10594_v63 }
 0xe36   : > { %v5977_v54 = vmul.f32 %v10614_v15, %v5958_v60 }
 0xe38   : > { %v5996_v12 = vadd.f32 %v10633_v7, %v5977_v54 }
 0xe3a   : > { %v6862_v26 = vpack.c.bf16 %v5996_v12, %v5995_v47 }
 0xe3c   : > { %6871 = vst [vmem:[%s10650_s17 + $0x38] sm:$0xff] %v6862_v26  }
 0xe3d   : > { %7645 = shalt.err (!%p7642_p9)
}
 0xe3e   : > { %s7713_s2 = smov 4  }
 0xe3f   : > { %6894 = dma.vmem_to_hbm [thread:$0]  (%p7879_p13), %s6043_s16, 1024, %s6045_s22, %s6030_s15, %s7710_s13, %s7710_s13, %s7713_s2  }
 0xe40 PF: > { %s6059_s17 = sand.u32 1, %s7684_s25   ;;  %p10886_p10 = scmp.ge.s32.totalorder %s7696_s28, 2 }
 0xe41   : > { %s6060_s18 = scalar_lea.sflag [#allocation5], %s6059_s17 }
 0xe42   : > { %p6917_p11 = pnand %p10886_p10, %p7884_p4 }
 0xe44   : > { %p6918_p0 = pneg %p6917_p11 }
 0xe46   : > { %7679 = dma.done.wait (%p6918_p0), %s6060_s18, 1024  }
 0xe47   : > { %7681 = vsyncadd (%p6918_p0), %s6060_s18, 4294966272  ;;  %s10887_s7 = sld [smem:[#allocation20_spill]]  ;;  %p29_p2 = scmp.ge.s32.totalorder %s7859_s24, 4  }
 0xe48   : > { %s10888_s25 = smov %s7688_s26  ;;  %s10889_s26 = smov %s7692_s27 }
 0xe49   : > { %s10891_s28 = smov %s7859_s24  ;;  %31 = sbr.rel (!%p29_p2) target bundleno = 15 (0xf), region = 137 }
 0xe4d   : > { %s10890_s27 = smov %s10887_s7 }
 0xe4e   :  { %6066 = vsyncpa [#allocation4], 1 }
 0xe4f   :  { %6068 = vsyncpa [#allocation4 + $0x1], 1 }
 0xe50   :  { %6069 = vsyncpa [#allocation7], 1 }
 0xe51   :  { %6070 = vsyncpa [#allocation10], 1 }
 0xe52   :  { %6071 = vsyncpa [#allocation13], 1 }
 0xe53   :  { %6072 = vsyncpa [#allocation5], 1 }
 0xe54   :  { %6074 = vsyncpa [#allocation5 + $0x1], 1 }

</bundles_post_ra>
